<compile_context>
chip_gen: v5e
topology: v5e:2x2
jax: 0.10.0
libtpu: 0.0.40
codegen_flags: <defaults>
</compile_context>

<pallas_src>
import functools

import jax
import jax.numpy as jnp
from jax.experimental import pallas as pl
from jax.experimental.pallas import tpu as pltpu

_EPS = 0.8
_SLOPE = 0.2


def _leaky_relu(x, slope=_SLOPE):
    return jnp.where(x > 0, x, slope * x)


def _dot_bf16(x_f32, w_ref):
    """MXU-native bf16 x bf16 -> f32 matmul (weights already stored bf16 in VMEM)."""
    return jnp.dot(x_f32.astype(jnp.bfloat16), w_ref[...],
                   preferred_element_type=jnp.float32)


@functools.lru_cache(maxsize=1)
def _vmem_limit_bytes():
    try:
        kind = jax.devices()[0].device_kind.lower()
    except Exception:
        kind = ""
    if "v7" in kind or "tpu7" in kind:
        return 32 * 1024 * 1024          # v7x: 64 MiB physical VMEM per TC
    return 64 * 1024 * 1024              # v5e / v6e: 128 MiB physical VMEM


# ----------------------------- kernels ------------------------------------------


def fused_generator_kernel(z_ref, w1_ref, w2_ref, w3_ref, w4_ref, w5_ref,
                           b12_ref, b3_ref, b4_ref, b5_ref,
                           gb2_ref, gb3_ref, gb4_ref, o_ref, *, eps, slope):
    """Whole generator in one kernel (valid when the full batch is one tile)."""
    inv_n = 1.0 / z_ref.shape[0]

    def bn(x, gb_ref):
        mean = jnp.sum(x, axis=0, keepdims=True) * inv_n
        var = jnp.sum(x * x, axis=0, keepdims=True) * inv_n - mean * mean
        return (x - mean) * jax.lax.rsqrt(var + eps) * gb_ref[0:1, :] + gb_ref[1:2, :]

    h = _leaky_relu(_dot_bf16(z_ref[...], w1_ref) + b12_ref[:, 0:128], slope)
    h = _leaky_relu(bn(_dot_bf16(h, w2_ref) + b12_ref[:, 128:384], gb2_ref), slope)
    h = _leaky_relu(bn(_dot_bf16(h, w3_ref) + b3_ref[...], gb3_ref), slope)
    h = _leaky_relu(bn(_dot_bf16(h, w4_ref) + b4_ref[...], gb4_ref), slope)
    o_ref[...] = jnp.tanh(_dot_bf16(h, w5_ref) + b5_ref[...])


def stage1_kernel(z_ref, w1_ref, w2_ref, b12_ref, h_ref, s_ref, q_ref):
    """z -> Linear(latent,128) -> LeakyReLU -> Linear(128,256) (pre-BN) + batch stats."""
    @pl.when(pl.program_id(0) == 0)
    def _():
        s_ref[...] = jnp.zeros_like(s_ref)
        q_ref[...] = jnp.zeros_like(q_ref)

    b1 = b12_ref[:, 0:128]
    b2 = b12_ref[:, 128:384]
    h1 = _leaky_relu(_dot_bf16(z_ref[...], w1_ref) + b1)
    h2 = _dot_bf16(h1, w2_ref) + b2
    s_ref[...] += jnp.sum(h2, axis=0, keepdims=True)          # f32 stats, pre-downcast
    q_ref[...] += jnp.sum(h2 * h2, axis=0, keepdims=True)
    h_ref[...] = h2.astype(h_ref.dtype)                        # bf16 inter-stage store


def bn_act_linear_kernel(s_in_ref, q_in_ref, gb_ref, h_ref, w_ref, b_ref,
                         o_ref, s_ref, q_ref, *, batch, eps, slope):
    """BatchNorm(full-batch stats) -> LeakyReLU -> Linear (next pre-BN) + batch stats."""
    @pl.when(pl.program_id(0) == 0)
    def _():
        s_ref[...] = jnp.zeros_like(s_ref)
        q_ref[...] = jnp.zeros_like(q_ref)

    inv_n = 1.0 / batch
    mean = s_in_ref[...] * inv_n
    var = q_in_ref[...] * inv_n - mean * mean                  # biased variance (train mode)
    inv_std = jax.lax.rsqrt(var + eps)
    x = (h_ref[...].astype(jnp.float32) - mean) * inv_std * gb_ref[0:1, :] + gb_ref[1:2, :]
    x = jnp.where(x > 0, x, slope * x)
    y = _dot_bf16(x, w_ref) + b_ref[...]
    s_ref[...] += jnp.sum(y, axis=0, keepdims=True)
    q_ref[...] += jnp.sum(y * y, axis=0, keepdims=True)
    o_ref[...] = y.astype(o_ref.dtype)


def bn_act_linear_tanh_kernel(s_in_ref, q_in_ref, gb_ref, h_ref, w_ref, b_ref,
                              o_ref, *, batch, eps, slope):
    """Final BatchNorm -> LeakyReLU -> Linear(out_dim tile) -> tanh."""
    inv_n = 1.0 / batch
    mean = s_in_ref[...] * inv_n
    var = q_in_ref[...] * inv_n - mean * mean
    inv_std = jax.lax.rsqrt(var + eps)
    x = (h_ref[...].astype(jnp.float32) - mean) * inv_std * gb_ref[0:1, :] + gb_ref[1:2, :]
    x = jnp.where(x > 0, x, slope * x)
    o_ref[...] = jnp.tanh(_dot_bf16(x, w_ref) + b_ref[...])


# ----------------------------- wrapper ------------------------------------------


def _const_spec(shape):
    # whole-array block, same block every grid step -> stays VMEM-resident (no re-DMA)
    return pl.BlockSpec(shape, lambda *_: (0,) * len(shape))


def _pick_out_tile(out_dim, max_tile=4096):
    """Tile for the final output feature dim (keeps w5 block under VMEM on v7x)."""
    if out_dim <= max_tile:
        return out_dim
    for t in range(max_tile - (max_tile % 128), 127, -128):
        if out_dim % t == 0:
            return t
    return out_dim


@functools.partial(jax.jit, static_argnames=("input_shape", "batch_tile"))
def generator_forward(z, params, input_shape, batch_tile=256):
    B, latent = z.shape
    out_dim = 1
    for d in input_shape:
        out_dim *= int(d)

    bt = min(int(batch_tile), B)
    if B % bt != 0 or (bt != B and bt % 8 != 0):
        bt = B                              # fall back to a single batch tile
    nt = B // bt
    vmem = _vmem_limit_bytes()

    # ---- nt == 1: whole network as ONE fused kernel (no HBM round trips) ---------
    if nt == 1:
        img_flat = pl.pallas_call(
            functools.partial(fused_generator_kernel, eps=_EPS, slope=_SLOPE),
            out_shape=jax.ShapeDtypeStruct((B, out_dim), jnp.float32),
            compiler_params=pltpu.CompilerParams(vmem_limit_bytes=vmem),
        )(z, params["w1"], params["w2"], params["w3"], params["w4"], params["w5"],
          params["b12"], params["b3"], params["b4"], params["b5"],
          params["gb2"], params["gb3"], params["gb4"])
        return img_flat.reshape((B,) + tuple(input_shape))

    # ---- nt > 1: split at BN boundaries; accumulate full-batch stats on the fly --
    def tile_spec(n_feat):
        return pl.BlockSpec((bt, n_feat), lambda t: (t, 0))

    mosaic_seq = pltpu.CompilerParams(dimension_semantics=("arbitrary",),
                                      vmem_limit_bytes=vmem)

    # stage 1: z -> L1 -> LeakyReLU -> L2 (pre-BN, bf16) + full-batch f32 stats
    h_pre, s, q = pl.pallas_call(
        stage1_kernel,
        out_shape=(jax.ShapeDtypeStruct((B, 256), jnp.bfloat16),
                   jax.ShapeDtypeStruct((1, 256), jnp.float32),
                   jax.ShapeDtypeStruct((1, 256), jnp.float32)),
        grid=(nt,),
        in_specs=[tile_spec(latent),
                  _const_spec((latent, 128)),
                  _const_spec((128, 256)),
                  _const_spec((1, 384))],
        out_specs=(tile_spec(256), _const_spec((1, 256)), _const_spec((1, 256))),
        compiler_params=mosaic_seq,
    )(z, params["w1"], params["w2"], params["b12"])

    # stages 2-3: BN -> LeakyReLU -> Linear (+ stats of the new pre-BN activations)
    for n_in, n_out, gb_k, w_k, b_k in ((256, 512, "gb2", "w3", "b3"),
                                        (512, 1024, "gb3", "w4", "b4")):
        kern = functools.partial(bn_act_linear_kernel, batch=B, eps=_EPS, slope=_SLOPE)
        h_pre, s, q = pl.pallas_call(
            kern,
            out_shape=(jax.ShapeDtypeStruct((B, n_out), jnp.bfloat16),
                       jax.ShapeDtypeStruct((1, n_out), jnp.float32),
                       jax.ShapeDtypeStruct((1, n_out), jnp.float32)),
            grid=(nt,),
            in_specs=[_const_spec((1, n_in)), _const_spec((1, n_in)),
                      _const_spec((2, n_in)),
                      tile_spec(n_in),
                      _const_spec((n_in, n_out)), _const_spec((1, n_out))],
            out_specs=(tile_spec(n_out),
                       _const_spec((1, n_out)), _const_spec((1, n_out))),
            compiler_params=mosaic_seq,
        )(s, q, params[gb_k], h_pre, params[w_k], params[b_k])

    # stage 4: BN -> LeakyReLU -> Linear -> tanh, tiled over batch AND out_dim.
    # Grid order (out_tile, batch_tile): the (1024, ot) weight block stays resident
    # across the inner batch loop; no cross-tile state -> both axes "parallel".
    ot = _pick_out_tile(out_dim)
    njt = out_dim // ot
    kern = functools.partial(bn_act_linear_tanh_kernel, batch=B, eps=_EPS, slope=_SLOPE)
    img_flat = pl.pallas_call(
        kern,
        out_shape=jax.ShapeDtypeStruct((B, out_dim), jnp.float32),
        grid=(njt, nt),
        in_specs=[_const_spec((1, 1024)), _const_spec((1, 1024)),
                  _const_spec((2, 1024)),
                  pl.BlockSpec((bt, 1024), lambda j, t: (t, 0)),
                  pl.BlockSpec((1024, ot), lambda j, t: (0, j)),
                  pl.BlockSpec((1, ot), lambda j, t: (0, j))],
        out_specs=pl.BlockSpec((bt, ot), lambda j, t: (t, j)),
        compiler_params=pltpu.CompilerParams(
            dimension_semantics=("parallel", "parallel"), vmem_limit_bytes=vmem),
    )(s, q, params["gb4"], h_pre, params["w5"], params["b5"])

    # glue: view(B, *input_shape)
    return img_flat.reshape((B,) + tuple(input_shape))


# ----------------------------- params & reference --------------------------------


def init_generator_params(key, latent_dim, out_dim):
    """Deterministic synthetic parameters. Linear weights stored (in, out) as bf16."""
    dims = [latent_dim, 128, 256, 512, 1024, out_dim]
    n_lin = len(dims) - 1
    keys = jax.random.split(key, 2 * n_lin + 2 * 3)
    params = {}
    for i in range(n_lin):
        fan_in, fan_out = dims[i], dims[i + 1]
        scale = 1.0 / jnp.sqrt(jnp.float32(fan_in))
        w = jax.random.uniform(keys[2 * i], (fan_in, fan_out), jnp.float32, -1.0, 1.0) * scale
        params[f"w{i+1}"] = w.astype(jnp.bfloat16)     # bf16 storage: native MXU operand
        params[f"b{i+1}"] = (
            jax.random.uniform(keys[2 * i + 1], (1, fan_out), jnp.float32, -1.0, 1.0) * scale)
    # BatchNorm affine params for layers 2..4 (perturbed to exercise the math)
    for j, (i, n) in enumerate(zip((2, 3, 4), (256, 512, 1024))):
        kg = keys[2 * n_lin + 2 * j]
        kb = keys[2 * n_lin + 2 * j + 1]
        params[f"g{i}"] = 1.0 + 0.1 * jax.random.uniform(kg, (1, n), jnp.float32, -1.0, 1.0)
        params[f"be{i}"] = 0.1 * jax.random.uniform(kb, (1, n), jnp.float32, -1.0, 1.0)
    # packed small operands -> fewer per-call DMA descriptors
    params["b12"] = jnp.concatenate([params["b1"], params["b2"]], axis=1)                # (1,384)
    for i in (2, 3, 4):
        params[f"gb{i}"] = jnp.concatenate([params[f"g{i}"], params[f"be{i}"]], axis=0)  # (2,N)
    return params


def reference_forward(z, params, input_shape, bf16_hidden=False):
    """Pure-JAX reference mirroring the kernel numerics (bf16 weights, bf16 MXU
    inputs, f32 accumulation / BatchNorm).  bf16_hidden=True additionally mirrors
    the nt>1 path's bf16 storage of inter-stage pre-BN activations (statistics are
    still taken from the f32 values, exactly as the kernels do)."""
    def dot(x, wk):
        return jnp.dot(x.astype(jnp.bfloat16), params[wk],
                       preferred_element_type=jnp.float32)

    def round_h(y):
        return y.astype(jnp.bfloat16).astype(jnp.float32) if bf16_hidden else y

    def bn(y, gk, bk):
        mu = jnp.mean(y, axis=0, keepdims=True)
        var = jnp.mean((y - mu) ** 2, axis=0, keepdims=True)   # stats from f32 pre-round y
        y = round_h(y)
        return (y - mu) * jax.lax.rsqrt(var + _EPS) * params[gk] + params[bk]

    h = _leaky_relu(dot(z, "w1") + params["b1"])
    h = _leaky_relu(bn(dot(h, "w2") + params["b2"], "g2", "be2"))
    h = _leaky_relu(bn(dot(h, "w3") + params["b3"], "g3", "be3"))
    h = _leaky_relu(bn(dot(h, "w4") + params["b4"], "g4", "be4"))
    out = jnp.tanh(dot(h, "w5") + params["b5"])
    return out.reshape((z.shape[0],) + tuple(input_shape))


if __name__ == "__main__":
    B = 128
    latent_dim = 32
    input_shape = (1, 16, 16)            # (C, H, W); output img is (B, 1, 16, 16)
    out_dim = 1 * 16 * 16

    root = jax.random.PRNGKey(0)
    k_z, k_p = jax.random.split(root)
    z = jax.random.normal(k_z, (B, latent_dim), jnp.float32)
    params = init_generator_params(k_p, latent_dim, out_dim)

    # (1) default batch_tile -> nt == 1 -> the whole network runs as ONE fused kernel.
    img = jax.block_until_ready(generator_forward(z, params, input_shape))
    ref = reference_forward(z, params, input_shape, bf16_hidden=False)
    assert img.shape == (B,) + input_shape, img.shape
    assert jnp.allclose(img, ref, atol=3e-3, rtol=3e-3), "fused path mismatch vs reference"

    # (2) batch_tile=64 -> 2 batch tiles: exercises the split-at-BN path with resident
    #     weights, f32 full-batch stat accumulation and bf16 inter-stage activations.
    img_t = jax.block_until_ready(generator_forward(z, params, input_shape, batch_tile=64))
    ref_t = reference_forward(z, params, input_shape, bf16_hidden=True)
    assert img_t.shape == (B,) + input_shape, img_t.shape
    assert jnp.allclose(img_t, ref_t, atol=3e-3, rtol=3e-3), "tiled path mismatch vs reference"

    print("KERNEL_OK")
</pallas_src>

<mosaic_0001>
module attributes {stable_mosaic.version = 11 : i64} {
  func.func @fused_generator_kernel(%arg0: memref<128x32xf32, #tpu.memory_space<vmem>>, %arg1: memref<32x128xbf16, #tpu.memory_space<vmem>>, %arg2: memref<128x256xbf16, #tpu.memory_space<vmem>>, %arg3: memref<256x512xbf16, #tpu.memory_space<vmem>>, %arg4: memref<512x1024xbf16, #tpu.memory_space<vmem>>, %arg5: memref<1024x256xbf16, #tpu.memory_space<vmem>>, %arg6: memref<1x384xf32, #tpu.memory_space<vmem>>, %arg7: memref<1x512xf32, #tpu.memory_space<vmem>>, %arg8: memref<1x1024xf32, #tpu.memory_space<vmem>>, %arg9: memref<1x256xf32, #tpu.memory_space<vmem>>, %arg10: memref<2x256xf32, #tpu.memory_space<vmem>>, %arg11: memref<2x512xf32, #tpu.memory_space<vmem>>, %arg12: memref<2x1024xf32, #tpu.memory_space<vmem>>, %arg13: memref<128x256xf32, #tpu.memory_space<vmem>>) attributes {dimension_semantics = [], scalar_prefetch = 0 : i64, scratch_operands = 0 : i64, tpu.core_type = #tpu.core_type<tc>} {
    %c0 = arith.constant 0 : index
    %c0_0 = arith.constant 0 : index
    %0 = vector.load %arg0[%c0, %c0_0] : memref<128x32xf32, #tpu.memory_space<vmem>>, vector<128x32xf32>
    %1 = arith.truncf %0 : vector<128x32xf32> to vector<128x32xbf16>
    %c0_1 = arith.constant 0 : index
    %c0_2 = arith.constant 0 : index
    %2 = vector.load %arg1[%c0_1, %c0_2] : memref<32x128xbf16, #tpu.memory_space<vmem>>, vector<32x128xbf16>
    %cst = arith.constant dense<0.000000e+00> : vector<128x128xf32>
    %3 = tpu.matmul %1, %2, %cst {dimension_numbers = #tpu.dot_dimension_numbers<[1], [0], [0], [1], [0, 0, 1, 1], [], []>} : vector<128x32xbf16>, vector<32x128xbf16>, vector<128x128xf32> -> vector<128x128xf32>
    %c0_3 = arith.constant 0 : index
    %c0_4 = arith.constant 0 : index
    %4 = vector.load %arg6[%c0_3, %c0_4] : memref<1x384xf32, #tpu.memory_space<vmem>>, vector<1x128xf32>
    %5 = vector.broadcast %4 : vector<1x128xf32> to vector<128x128xf32>
    %6 = arith.addf %3, %5 : vector<128x128xf32>
    %cst_5 = arith.constant 0.000000e+00 : f32
    %7 = vector.broadcast %cst_5 : f32 to vector<128x128xf32>
    %8 = arith.cmpf ogt, %6, %7 : vector<128x128xf32>
    %cst_6 = arith.constant 2.000000e-01 : f32
    %9 = vector.broadcast %cst_6 : f32 to vector<128x128xf32>
    %10 = arith.mulf %9, %6 : vector<128x128xf32>
    %11 = arith.select %8, %6, %10 : vector<128x128xi1>, vector<128x128xf32>
    %12 = arith.truncf %11 : vector<128x128xf32> to vector<128x128xbf16>
    %c0_7 = arith.constant 0 : index
    %c0_8 = arith.constant 0 : index
    %13 = vector.load %arg2[%c0_7, %c0_8] : memref<128x256xbf16, #tpu.memory_space<vmem>>, vector<128x256xbf16>
    %cst_9 = arith.constant dense<0.000000e+00> : vector<128x256xf32>
    %14 = tpu.matmul %12, %13, %cst_9 {dimension_numbers = #tpu.dot_dimension_numbers<[1], [0], [0], [1], [0, 0, 1, 1], [], []>} : vector<128x128xbf16>, vector<128x256xbf16>, vector<128x256xf32> -> vector<128x256xf32>
    %c0_10 = arith.constant 0 : index
    %c128 = arith.constant 128 : index
    %15 = vector.load %arg6[%c0_10, %c128] : memref<1x384xf32, #tpu.memory_space<vmem>>, vector<1x256xf32>
    %16 = vector.broadcast %15 : vector<1x256xf32> to vector<128x256xf32>
    %17 = arith.addf %14, %16 : vector<128x256xf32>
    %cst_11 = arith.constant dense<0.000000e+00> : vector<256xf32>
    %18 = vector.multi_reduction <add>, %17, %cst_11 [0] : vector<128x256xf32> to vector<256xf32>
    %19 = vector.shape_cast %18 : vector<256xf32> to vector<1x256xf32>
    %cst_12 = arith.constant 7.812500e-03 : f32
    %20 = vector.broadcast %cst_12 : f32 to vector<1x256xf32>
    %21 = arith.mulf %19, %20 : vector<1x256xf32>
    %22 = arith.mulf %17, %17 : vector<128x256xf32>
    %cst_13 = arith.constant dense<0.000000e+00> : vector<256xf32>
    %23 = vector.multi_reduction <add>, %22, %cst_13 [0] : vector<128x256xf32> to vector<256xf32>
    %24 = vector.shape_cast %23 : vector<256xf32> to vector<1x256xf32>
    %cst_14 = arith.constant 7.812500e-03 : f32
    %25 = vector.broadcast %cst_14 : f32 to vector<1x256xf32>
    %26 = arith.mulf %24, %25 : vector<1x256xf32>
    %27 = arith.mulf %21, %21 : vector<1x256xf32>
    %28 = arith.subf %26, %27 : vector<1x256xf32>
    %29 = vector.broadcast %21 : vector<1x256xf32> to vector<128x256xf32>
    %30 = arith.subf %17, %29 : vector<128x256xf32>
    %cst_15 = arith.constant 8.000000e-01 : f32
    %31 = vector.broadcast %cst_15 : f32 to vector<1x256xf32>
    %32 = arith.addf %28, %31 : vector<1x256xf32>
    %33 = math.rsqrt %32 : vector<1x256xf32>
    %34 = vector.broadcast %33 : vector<1x256xf32> to vector<128x256xf32>
    %35 = arith.mulf %30, %34 : vector<128x256xf32>
    %c0_16 = arith.constant 0 : index
    %c0_17 = arith.constant 0 : index
    %36 = vector.load %arg10[%c0_16, %c0_17] : memref<2x256xf32, #tpu.memory_space<vmem>>, vector<1x256xf32>
    %37 = vector.broadcast %36 : vector<1x256xf32> to vector<128x256xf32>
    %38 = arith.mulf %35, %37 : vector<128x256xf32>
    %c1 = arith.constant 1 : index
    %c0_18 = arith.constant 0 : index
    %39 = vector.load %arg10[%c1, %c0_18] : memref<2x256xf32, #tpu.memory_space<vmem>>, vector<1x256xf32>
    %40 = vector.broadcast %39 : vector<1x256xf32> to vector<128x256xf32>
    %41 = arith.addf %38, %40 : vector<128x256xf32>
    %cst_19 = arith.constant 0.000000e+00 : f32
    %42 = vector.broadcast %cst_19 : f32 to vector<128x256xf32>
    %43 = arith.cmpf ogt, %41, %42 : vector<128x256xf32>
    %cst_20 = arith.constant 2.000000e-01 : f32
    %44 = vector.broadcast %cst_20 : f32 to vector<128x256xf32>
    %45 = arith.mulf %44, %41 : vector<128x256xf32>
    %46 = arith.select %43, %41, %45 : vector<128x256xi1>, vector<128x256xf32>
    %47 = arith.truncf %46 : vector<128x256xf32> to vector<128x256xbf16>
    %c0_21 = arith.constant 0 : index
    %c0_22 = arith.constant 0 : index
    %48 = vector.load %arg3[%c0_21, %c0_22] : memref<256x512xbf16, #tpu.memory_space<vmem>>, vector<256x512xbf16>
    %cst_23 = arith.constant dense<0.000000e+00> : vector<128x512xf32>
    %49 = tpu.matmul %47, %48, %cst_23 {dimension_numbers = #tpu.dot_dimension_numbers<[1], [0], [0], [1], [0, 0, 1, 1], [], []>} : vector<128x256xbf16>, vector<256x512xbf16>, vector<128x512xf32> -> vector<128x512xf32>
    %c0_24 = arith.constant 0 : index
    %c0_25 = arith.constant 0 : index
    %50 = vector.load %arg7[%c0_24, %c0_25] : memref<1x512xf32, #tpu.memory_space<vmem>>, vector<1x512xf32>
    %51 = vector.broadcast %50 : vector<1x512xf32> to vector<128x512xf32>
    %52 = arith.addf %49, %51 : vector<128x512xf32>
    %cst_26 = arith.constant dense<0.000000e+00> : vector<512xf32>
    %53 = vector.multi_reduction <add>, %52, %cst_26 [0] : vector<128x512xf32> to vector<512xf32>
    %54 = vector.shape_cast %53 : vector<512xf32> to vector<1x512xf32>
    %cst_27 = arith.constant 7.812500e-03 : f32
    %55 = vector.broadcast %cst_27 : f32 to vector<1x512xf32>
    %56 = arith.mulf %54, %55 : vector<1x512xf32>
    %57 = arith.mulf %52, %52 : vector<128x512xf32>
    %cst_28 = arith.constant dense<0.000000e+00> : vector<512xf32>
    %58 = vector.multi_reduction <add>, %57, %cst_28 [0] : vector<128x512xf32> to vector<512xf32>
    %59 = vector.shape_cast %58 : vector<512xf32> to vector<1x512xf32>
    %cst_29 = arith.constant 7.812500e-03 : f32
    %60 = vector.broadcast %cst_29 : f32 to vector<1x512xf32>
    %61 = arith.mulf %59, %60 : vector<1x512xf32>
    %62 = arith.mulf %56, %56 : vector<1x512xf32>
    %63 = arith.subf %61, %62 : vector<1x512xf32>
    %64 = vector.broadcast %56 : vector<1x512xf32> to vector<128x512xf32>
    %65 = arith.subf %52, %64 : vector<128x512xf32>
    %cst_30 = arith.constant 8.000000e-01 : f32
    %66 = vector.broadcast %cst_30 : f32 to vector<1x512xf32>
    %67 = arith.addf %63, %66 : vector<1x512xf32>
    %68 = math.rsqrt %67 : vector<1x512xf32>
    %69 = vector.broadcast %68 : vector<1x512xf32> to vector<128x512xf32>
    %70 = arith.mulf %65, %69 : vector<128x512xf32>
    %c0_31 = arith.constant 0 : index
    %c0_32 = arith.constant 0 : index
    %71 = vector.load %arg11[%c0_31, %c0_32] : memref<2x512xf32, #tpu.memory_space<vmem>>, vector<1x512xf32>
    %72 = vector.broadcast %71 : vector<1x512xf32> to vector<128x512xf32>
    %73 = arith.mulf %70, %72 : vector<128x512xf32>
    %c1_33 = arith.constant 1 : index
    %c0_34 = arith.constant 0 : index
    %74 = vector.load %arg11[%c1_33, %c0_34] : memref<2x512xf32, #tpu.memory_space<vmem>>, vector<1x512xf32>
    %75 = vector.broadcast %74 : vector<1x512xf32> to vector<128x512xf32>
    %76 = arith.addf %73, %75 : vector<128x512xf32>
    %cst_35 = arith.constant 0.000000e+00 : f32
    %77 = vector.broadcast %cst_35 : f32 to vector<128x512xf32>
    %78 = arith.cmpf ogt, %76, %77 : vector<128x512xf32>
    %cst_36 = arith.constant 2.000000e-01 : f32
    %79 = vector.broadcast %cst_36 : f32 to vector<128x512xf32>
    %80 = arith.mulf %79, %76 : vector<128x512xf32>
    %81 = arith.select %78, %76, %80 : vector<128x512xi1>, vector<128x512xf32>
    %82 = arith.truncf %81 : vector<128x512xf32> to vector<128x512xbf16>
    %c0_37 = arith.constant 0 : index
    %c0_38 = arith.constant 0 : index
    %83 = vector.load %arg4[%c0_37, %c0_38] : memref<512x1024xbf16, #tpu.memory_space<vmem>>, vector<512x1024xbf16>
    %cst_39 = arith.constant dense<0.000000e+00> : vector<128x1024xf32>
    %84 = tpu.matmul %82, %83, %cst_39 {dimension_numbers = #tpu.dot_dimension_numbers<[1], [0], [0], [1], [0, 0, 1, 1], [], []>} : vector<128x512xbf16>, vector<512x1024xbf16>, vector<128x1024xf32> -> vector<128x1024xf32>
    %c0_40 = arith.constant 0 : index
    %c0_41 = arith.constant 0 : index
    %85 = vector.load %arg8[%c0_40, %c0_41] : memref<1x1024xf32, #tpu.memory_space<vmem>>, vector<1x1024xf32>
    %86 = vector.broadcast %85 : vector<1x1024xf32> to vector<128x1024xf32>
    %87 = arith.addf %84, %86 : vector<128x1024xf32>
    %cst_42 = arith.constant dense<0.000000e+00> : vector<1024xf32>
    %88 = vector.multi_reduction <add>, %87, %cst_42 [0] : vector<128x1024xf32> to vector<1024xf32>
    %89 = vector.shape_cast %88 : vector<1024xf32> to vector<1x1024xf32>
    %cst_43 = arith.constant 7.812500e-03 : f32
    %90 = vector.broadcast %cst_43 : f32 to vector<1x1024xf32>
    %91 = arith.mulf %89, %90 : vector<1x1024xf32>
    %92 = arith.mulf %87, %87 : vector<128x1024xf32>
    %cst_44 = arith.constant dense<0.000000e+00> : vector<1024xf32>
    %93 = vector.multi_reduction <add>, %92, %cst_44 [0] : vector<128x1024xf32> to vector<1024xf32>
    %94 = vector.shape_cast %93 : vector<1024xf32> to vector<1x1024xf32>
    %cst_45 = arith.constant 7.812500e-03 : f32
    %95 = vector.broadcast %cst_45 : f32 to vector<1x1024xf32>
    %96 = arith.mulf %94, %95 : vector<1x1024xf32>
    %97 = arith.mulf %91, %91 : vector<1x1024xf32>
    %98 = arith.subf %96, %97 : vector<1x1024xf32>
    %99 = vector.broadcast %91 : vector<1x1024xf32> to vector<128x1024xf32>
    %100 = arith.subf %87, %99 : vector<128x1024xf32>
    %cst_46 = arith.constant 8.000000e-01 : f32
    %101 = vector.broadcast %cst_46 : f32 to vector<1x1024xf32>
    %102 = arith.addf %98, %101 : vector<1x1024xf32>
    %103 = math.rsqrt %102 : vector<1x1024xf32>
    %104 = vector.broadcast %103 : vector<1x1024xf32> to vector<128x1024xf32>
    %105 = arith.mulf %100, %104 : vector<128x1024xf32>
    %c0_47 = arith.constant 0 : index
    %c0_48 = arith.constant 0 : index
    %106 = vector.load %arg12[%c0_47, %c0_48] : memref<2x1024xf32, #tpu.memory_space<vmem>>, vector<1x1024xf32>
    %107 = vector.broadcast %106 : vector<1x1024xf32> to vector<128x1024xf32>
    %108 = arith.mulf %105, %107 : vector<128x1024xf32>
    %c1_49 = arith.constant 1 : index
    %c0_50 = arith.constant 0 : index
    %109 = vector.load %arg12[%c1_49, %c0_50] : memref<2x1024xf32, #tpu.memory_space<vmem>>, vector<1x1024xf32>
    %110 = vector.broadcast %109 : vector<1x1024xf32> to vector<128x1024xf32>
    %111 = arith.addf %108, %110 : vector<128x1024xf32>
    %cst_51 = arith.constant 0.000000e+00 : f32
    %112 = vector.broadcast %cst_51 : f32 to vector<128x1024xf32>
    %113 = arith.cmpf ogt, %111, %112 : vector<128x1024xf32>
    %cst_52 = arith.constant 2.000000e-01 : f32
    %114 = vector.broadcast %cst_52 : f32 to vector<128x1024xf32>
    %115 = arith.mulf %114, %111 : vector<128x1024xf32>
    %116 = arith.select %113, %111, %115 : vector<128x1024xi1>, vector<128x1024xf32>
    %117 = arith.truncf %116 : vector<128x1024xf32> to vector<128x1024xbf16>
    %c0_53 = arith.constant 0 : index
    %c0_54 = arith.constant 0 : index
    %118 = vector.load %arg5[%c0_53, %c0_54] : memref<1024x256xbf16, #tpu.memory_space<vmem>>, vector<1024x256xbf16>
    %cst_55 = arith.constant dense<0.000000e+00> : vector<128x256xf32>
    %119 = tpu.matmul %117, %118, %cst_55 {dimension_numbers = #tpu.dot_dimension_numbers<[1], [0], [0], [1], [0, 0, 1, 1], [], []>} : vector<128x1024xbf16>, vector<1024x256xbf16>, vector<128x256xf32> -> vector<128x256xf32>
    %c0_56 = arith.constant 0 : index
    %c0_57 = arith.constant 0 : index
    %120 = vector.load %arg9[%c0_56, %c0_57] : memref<1x256xf32, #tpu.memory_space<vmem>>, vector<1x256xf32>
    %121 = vector.broadcast %120 : vector<1x256xf32> to vector<128x256xf32>
    %122 = arith.addf %119, %121 : vector<128x256xf32>
    %123 = math.tanh %122 : vector<128x256xf32>
    %c0_58 = arith.constant 0 : index
    %c0_59 = arith.constant 0 : index
    %124 = vector.load %arg13[%c0_58, %c0_59] : memref<128x256xf32, #tpu.memory_space<vmem>>, vector<128x256xf32>
    tpu.vector_store %arg13[%c0_58, %c0_59], %123 {strides = array<i32>} : memref<128x256xf32, #tpu.memory_space<vmem>>, vector<128x256xf32>,
    return
  }
}

</mosaic_0001>

<bundles_post_ra>
// kernel: generator_forward.1
= control target key start
LH: loop header
LB: loop body
LE: loop exit
PB: predicated region body
PF: predicated region fallthrough
CT: control target
= control target key end

     0   :  { %18 = vsyncpa [#allocation3], 0  ;;  %s17024_s0 = inlined_call_operand.vmem [shape: f32[128,32], index: 0, kind: input, shape index: {}]   ;;  %s17025_s1 = inlined_call_operand.vmem [shape: bf16[32,128], index: 1, kind: input, shape index: {}]   ;;  %s17026_s2 = inlined_call_operand.vmem [shape: bf16[128,256], index: 2, kind: input, shape index: {}]   ;;  %s17027_s3 = inlined_call_operand.hbm [shape: bf16[256,512], index: 3, kind: input, shape index: {}]   ;;  %s17028_s4 = inlined_call_operand.hbm [shape: bf16[512,1024], index: 4, kind: input, shape index: {}]   ;;  %s17029_s5 = inlined_call_operand.hbm [shape: bf16[1024,256], index: 5, kind: input, shape index: {}]   ;;  %s17030_s6 = inlined_call_operand.hbm [shape: f32[1,384], index: 6, kind: input, shape index: {}]   ;;  %s17031_s7 = inlined_call_operand.hbm [shape: f32[1,512], index: 7, kind: input, shape index: {}]   ;;  %s17032_s8 = inlined_call_operand.vmem [shape: f32[1,1024], index: 8, kind: input, shape index: {}]   ;;  %s17033_s9 = inlined_call_operand.hbm [shape: f32[1,256], index: 9, kind: input, shape index: {}]   ;;  %s17034_s10 = inlined_call_operand.hbm [shape: f32[2,256], index: 10, kind: input, shape index: {}]   ;;  %s17035_s11 = inlined_call_operand.hbm [shape: f32[2,512], index: 11, kind: input, shape index: {}]   ;;  %s17036_s12 = inlined_call_operand.vmem [shape: f32[2,1024], index: 12, kind: input, shape index: {}]   ;;  %s17037_s13 = inlined_call_operand.vmem [shape: f32[128,256], index: 13, kind: output, shape index: {}]  }
   0x1   :  { %19 = vsyncpa [#allocation5], 0 }
   0x2   :  { %20 = vsyncpa [#allocation8], 0 }
   0x3   :  { %21 = vsyncpa [#allocation11], 0  ;;  %s46_s27 = sshll.u32 %s17028_s4, 4  ;;  %s47_s27 = int_to_ptr.hbm [resolvable:$true] %s46_s27 }
   0x4   :  { %22 = vsyncpa [#allocation14], 0  ;;  %s11522_s28 = smov [#allocation4]   ;;  %s73_s15 = sshll.u32 %s17030_s6, 4  ;;  %s74_s15 = int_to_ptr.hbm [resolvable:$true] %s73_s15 }
   0x5   :  { %s48_s29 = sshll.u32 %s11522_s28, 4  ;;  %s11523_s16 = smov 512   ;;  %s49_s29 = int_to_ptr.vmem [resolvable:$true] %s48_s29 }
   0x6   :  { %s11524_s17 = smov 32   ;;  %s11525_s18 = smov [#allocation7]  }
   0x7   :  { %54 = dma.hbm_to_vmem [thread:$0]  %s47_s27, 32768, %s49_s29, [#allocation5], %s11523_s16, %s11523_s16, %s11524_s17  }
   0x8   :  { %s75_s19 = sshll.u32 %s11525_s18, 4  ;;  %s97_s22 = sshll.u32 %s17033_s9, 4  ;;  %s76_s19 = int_to_ptr.vmem [resolvable:$true] %s75_s19  ;;  %s98_s22 = int_to_ptr.hbm [resolvable:$true] %s97_s22 }
   0x9   :  { %78 = dma.hbm_to_vmem [thread:$0]  %s74_s15, 48, %s76_s19, [#allocation8]  }
   0xa   :  { %s33_s24 = sshll.u32 %s17027_s3, 4  ;;  %s11526_s25 = smov [#allocation10]   ;;  %s34_s24 = int_to_ptr.hbm [resolvable:$true] %s33_s24 }
   0xb   :  { %s99_s26 = sshll.u32 %s11526_s25, 4  ;;  %s11527_s6 = smov [#allocation2]   ;;  %s100_s26 = int_to_ptr.vmem [resolvable:$true] %s99_s26 }
   0xc   :  { %102 = dma.hbm_to_vmem [thread:$0]  %s98_s22, 32, %s100_s26, [#allocation11]  }
   0xd   :  { %s35_s27 = sshll.u32 %s11527_s6, 4  ;;  %s11528_s28 = smov 256   ;;  %s36_s27 = int_to_ptr.vmem [resolvable:$true] %s35_s27 }
   0xe   :  { %s11529_s29 = smov 16   ;;  %s59_s14 = sshll.u32 %s17029_s5, 4  ;;  %s60_s14 = int_to_ptr.hbm [resolvable:$true] %s59_s14 }
   0xf   :  { %41 = dma.hbm_to_vmem [thread:$0]  %s34_s24, 8192, %s36_s27, [#allocation3], %s11528_s28, %s11528_s28, %s11529_s29  }
  0x10   :  { %s11530_s15 = smov [#allocation6]   ;;  %s84_s18 = sshll.u32 %s17031_s7, 4  ;;  %s85_s18 = int_to_ptr.hbm [resolvable:$true] %s84_s18 }
  0x11   :  { %s61_s16 = sshll.u32 %s11530_s15, 4  ;;  %s11531_s19 = smov 128   ;;  %s62_s16 = int_to_ptr.vmem [resolvable:$true] %s61_s16 }
  0x12   :  { %s11532_s20 = smov 8   ;;  %s11533_s21 = smov [#allocation9]  }
  0x13   :  { %67 = dma.hbm_to_vmem [thread:$0]  %s60_s14, 16384, %s62_s16, [#allocation5], %s11531_s19, %s11531_s19, %s11532_s20  }
  0x14   :  { %s86_s22 = sshll.u32 %s11533_s21, 4  ;;  %s108_s24 = sshll.u32 %s17034_s10, 4  ;;  %s87_s22 = int_to_ptr.vmem [resolvable:$true] %s86_s22  ;;  %s109_s24 = int_to_ptr.hbm [resolvable:$true] %s108_s24 }
  0x15   :  { %89 = dma.hbm_to_vmem [thread:$0]  %s85_s18, 64, %s87_s22, [#allocation8]  }
  0x16   :  { %s119_s26 = sshll.u32 %s17035_s11, 4  ;;  %s11534_s6 = smov [#allocation12]   ;;  %s120_s26 = int_to_ptr.hbm [resolvable:$true] %s119_s26 }
  0x17   :  { %s110_s27 = sshll.u32 %s11534_s6, 4  ;;  %s11535_s7 = smov [#allocation13]   ;;  %s111_s27 = int_to_ptr.vmem [resolvable:$true] %s110_s27 }
  0x18   :  { %113 = dma.hbm_to_vmem [thread:$0]  %s109_s24, 64, %s111_s27, [#allocation11]  }
  0x19   :  { %s121_s28 = sshll.u32 %s11535_s7, 4  ;;  %s122_s28 = int_to_ptr.vmem [resolvable:$true] %s121_s28 }
  0x1a   :  { %124 = dma.hbm_to_vmem [thread:$0]  %s120_s26, 128, %s122_s28, [#allocation14]  }
  0x1b   :  { %11512 = dma.done.wait [#allocation3], 8192  }
  0x1c   :  { %11513 = vsyncadd [#allocation3], 4294959104 }
  0x1d   :  { %11514 = dma.done.wait [#allocation5], 49152  }
  0x1e   :  { %11515 = vsyncadd [#allocation5], 4294918144 }
  0x1f   :  { %11516 = dma.done.wait [#allocation8], 112  }
  0x20   :  { %11517 = vsyncadd [#allocation8], 4294967184 }
  0x21   :  { %11518 = dma.done.wait [#allocation11], 96  }
  0x22   :  { %11519 = vsyncadd [#allocation11], 4294967200 }
  0x23   :  { %11520 = dma.done.wait [#allocation14], 128  }
  0x24   :  { %11521 = vsyncadd [#allocation14], 4294967168  ;;  %v10720_v0 = vld [vmem:[%s17025_s1 + $0x8] sm:$0xff]  ;;  %v10719_v1 = vld [vmem:[%s17025_s1] sm:$0xff]  ;;  %vm204_vm0 = vcmask 261120  }
  0x25   :  { %235 = vmatpush.bf16.msra.mxu0 %v10720_v0  ;;  %v160_v2 = vld [vmem:[%s17024_s0] sm:$0xff]  ;;  %v161_v3 = vld [vmem:[%s17024_s0 + $0x8] sm:$0xff]  ;;  %v162_v5 = vld [vmem:[%s17024_s0 + $0x10] sm:$0xff] }
  0x26   :  { %v176_v4 = vpack.c.bf16 %v161_v3, %v160_v2  ;;  %v163_v6 = vld [vmem:[%s17024_s0 + $0x18] sm:$0xff]  ;;  %v164_v8 = vld [vmem:[%s17024_s0 + $0x20] sm:$0xff]  ;;  %v165_v9 = vld [vmem:[%s17024_s0 + $0x28] sm:$0xff] }
  0x27   :  { %v177_v7 = vpack.c.bf16 %v163_v6, %v162_v5  ;;  %v178_v10 = vpack.c.bf16 %v165_v9, %v164_v8  ;;  %v166_v11 = vld [vmem:[%s17024_s0 + $0x30] sm:$0xff]  ;;  %v167_v12 = vld [vmem:[%s17024_s0 + $0x38] sm:$0xff]  ;;  %v168_v14 = vld [vmem:[%s17024_s0 + $0x40] sm:$0xff] }
  0x28   :  { %v179_v13 = vpack.c.bf16 %v167_v12, %v166_v11  ;;  %v169_v15 = vld [vmem:[%s17024_s0 + $0x48] sm:$0xff]  ;;  %v8920_v17 = vld [vmem:[%s17026_s2 + $0x70] sm:$0xf]  ;;  %v10736_v18 = vld [vmem:[%s17026_s2 + $0x74] sm:$0xf0] }
  0x29   :  { %236 = vmatpush.bf16.msra.mxu0 %v10719_v1  ;;  %v180_v16 = vpack.c.bf16 %v169_v15, %v168_v14  ;;  %v8921_v19 = vor.u32 %v10736_v18, %v8920_v17  ;;  %v170_v20 = vld [vmem:[%s17024_s0 + $0x50] sm:$0xff]  ;;  %v171_v21 = vld [vmem:[%s17024_s0 + $0x58] sm:$0xff]  ;;  %v8912_v23 = vld [vmem:[%s17026_s2 + $0x60] sm:$0xf] }
  0x2a   :  { %v181_v22 = vpack.c.bf16 %v171_v21, %v170_v20  ;;  %v10734_v24 = vld [vmem:[%s17026_s2 + $0x64] sm:$0xf0]  ;;  %v8904_v26 = vld [vmem:[%s17026_s2 + $0x50] sm:$0xf]  ;;  %v10732_v27 = vld [vmem:[%s17026_s2 + $0x54] sm:$0xf0] }
  0x2b   :  { %436 = vmatpush.bf16.msra.mxu1 %v8921_v19  ;;  %11185 = vmatpush.bf16.msra.mxu3 %v8921_v19  ;;  %v8913_v25 = vor.u32 %v10734_v24, %v8912_v23  ;;  %v8905_v28 = vor.u32 %v10732_v27, %v8904_v26  ;;  %v8896_v29 = vld [vmem:[%s17026_s2 + $0x40] sm:$0xf]  ;;  %v10730_v30 = vld [vmem:[%s17026_s2 + $0x44] sm:$0xf0]  ;;  %v8888_v34 = vld [vmem:[%s17026_s2 + $0x30] sm:$0xf] }
  0x2c   :  { %8854 = vmatmul.msk.bf16.vlgmr.msra.gmra.mxu0 %vm204_vm0, %v176_v4  ;;  %v8897_v31 = vor.u32 %v10730_v30, %v8896_v29  ;;  %v172_v32 = vld [vmem:[%s17024_s0 + $0x60] sm:$0xff]  ;;  %v173_v33 = vld [vmem:[%s17024_s0 + $0x68] sm:$0xff]  ;;  %v10728_v35 = vld [vmem:[%s17026_s2 + $0x34] sm:$0xf0] }
  0x2d   :  { %v182_v36 = vpack.c.bf16 %v173_v33, %v172_v32  ;;  %v8889_v37 = vor.u32 %v10728_v35, %v8888_v34  ;;  %v8880_v38 = vld [vmem:[%s17026_s2 + $0x20] sm:$0xf]  ;;  %v10726_v39 = vld [vmem:[%s17026_s2 + $0x24] sm:$0xf0]  ;;  %v8872_v41 = vld [vmem:[%s17026_s2 + $0x10] sm:$0xf] }
  0x2e   :  { %v8881_v40 = vor.u32 %v10726_v39, %v8880_v38  ;;  %v10724_v42 = vld [vmem:[%s17026_s2 + $0x14] sm:$0xf0]  ;;  %v8864_v44 = vld [vmem:[%s17026_s2] sm:$0xf]  ;;  %v10722_v45 = vld [vmem:[%s17026_s2 + $0x4] sm:$0xf0] }
  0x2f   :  { %437 = vmatpush.bf16.msra.mxu1 %v8913_v25  ;;  %11186 = vmatpush.bf16.msra.mxu3 %v8913_v25  ;;  %v8873_v43 = vor.u32 %v10724_v42, %v8872_v41  ;;  %v8865_v46 = vor.u32 %v10722_v45, %v8864_v44  ;;  %v174_v47 = vld [vmem:[%s17024_s0 + $0x70] sm:$0xff]  ;;  %v175_v48 = vld [vmem:[%s17024_s0 + $0x78] sm:$0xff]  ;;  %v10733_v53 = vld [vmem:[%s17026_s2 + $0x64] sm:$0xf] }
  0x30   :  { %v10735_v49 = vld [vmem:[%s17026_s2 + $0x74] sm:$0xf]  ;;  %v8922_v50 = vld [vmem:[%s17026_s2 + $0x78] sm:$0xf0]  ;;  %v183_v51 = vpack.c.bf16 %v175_v48, %v174_v47  ;;  %v8914_v54 = vld [vmem:[%s17026_s2 + $0x68] sm:$0xf0] }
  0x31   :  { %v8925_v52 = vor.u32 %v10735_v49, %v8922_v50  ;;  %v8917_v55 = vor.u32 %v10733_v53, %v8914_v54  ;;  %v10731_v56 = vld [vmem:[%s17026_s2 + $0x54] sm:$0xf]  ;;  %v8906_v57 = vld [vmem:[%s17026_s2 + $0x58] sm:$0xf0]  ;;  %v10729_v59 = vld [vmem:[%s17026_s2 + $0x44] sm:$0xf] }
  0x32   :  { %v8909_v58 = vor.u32 %v10731_v56, %v8906_v57  ;;  %v8898_v60 = vld [vmem:[%s17026_s2 + $0x48] sm:$0xf0]  ;;  %v10727_v62 = vld [vmem:[%s17026_s2 + $0x34] sm:$0xf]  ;;  %v8890_v63 = vld [vmem:[%s17026_s2 + $0x38] sm:$0xf0] }
  0x33   :  { %438 = vmatpush.bf16.msra.mxu1 %v8905_v28  ;;  %11187 = vmatpush.bf16.msra.mxu3 %v8905_v28  ;;  %v8901_v61 = vor.u32 %v10729_v59, %v8898_v60  ;;  %v8893_v0 = vor.u32 %v10727_v62, %v8890_v63  ;;  %v11770_v2 = vld [vmem:[#allocation7] ss:$0 sm:$0xff]  ;;  %v10725_v3 = vld [vmem:[%s17026_s2 + $0x24] sm:$0xf]  ;;  %v8882_v4 = vld [vmem:[%s17026_s2 + $0x28] sm:$0xf0] }
  0x34   :  { %11193 = vmatpush.bf16.msra.mxu2 %v8925_v52  ;;  %v8885_v5 = vor.u32 %v10725_v3, %v8882_v4  ;;  %v8874_v8 = vld [vmem:[%s17026_s2 + $0x18] sm:$0xf0]  ;;  %v8866_v14 = vld [vmem:[%s17026_s2 + $0x8] sm:$0xf0] }
  0x37   :  { %439 = vmatpush.bf16.msra.mxu1 %v8897_v31  ;;  %11188 = vmatpush.bf16.msra.mxu3 %v8897_v31 }
  0x38   :  { %11194 = vmatpush.bf16.msra.mxu2 %v8917_v55 }
  0x3b   :  { %440 = vmatpush.bf16.msra.mxu1 %v8889_v37  ;;  %11189 = vmatpush.bf16.msra.mxu3 %v8889_v37 }
  0x3c   :  { %8855 = vmatmul.msk.bf16.gmra.mxu0 %vm204_vm0, %v177_v7  ;;  %11195 = vmatpush.bf16.msra.mxu2 %v8909_v58  ;;  %v10723_v7 = vld [vmem:[%s17026_s2 + $0x14] sm:$0xf] }
  0x3d   :  { %v8877_v9 = vor.u32 %v10723_v7, %v8874_v8 }
  0x3f   :  { %441 = vmatpush.bf16.msra.mxu1 %v8881_v40  ;;  %11190 = vmatpush.bf16.msra.mxu3 %v8881_v40 }
  0x40   :  { %11196 = vmatpush.bf16.msra.mxu2 %v8901_v61 }
  0x43   :  { %442 = vmatpush.bf16.msra.mxu1 %v8873_v43  ;;  %11191 = vmatpush.bf16.msra.mxu3 %v8873_v43 }
  0x44   :  { %11197 = vmatpush.bf16.msra.mxu2 %v8893_v0 }
  0x47   :  { %443 = vmatpush.bf16.msra.mxu1 %v8865_v46  ;;  %11192 = vmatpush.bf16.msra.mxu3 %v8865_v46 }
  0x48   :  { %11198 = vmatpush.bf16.msra.mxu2 %v8885_v5 }
  0x4b   :  { %485 = vmatpush.bf16.msrb.mxu1 %v8925_v52 }
  0x4c   :  { %8856 = vmatmul.msk.bf16.gmra.mxu0 %vm204_vm0, %v178_v10  ;;  %11199 = vmatpush.bf16.msra.mxu2 %v8877_v9 }
  0x4f   :  { %486 = vmatpush.bf16.msrb.mxu1 %v8917_v55 }
  0x53   :  { %487 = vmatpush.bf16.msrb.mxu1 %v8909_v58 }
  0x57   :  { %488 = vmatpush.bf16.msrb.mxu1 %v8901_v61 }
  0x5b   :  { %489 = vmatpush.bf16.msrb.mxu1 %v8893_v0 }
  0x5c   :  { %8857 = vmatmul.msk.bf16.gmra.mxu0 %vm204_vm0, %v179_v13  ;;  %v10721_v13 = vld [vmem:[%s17026_s2 + $0x4] sm:$0xf] }
  0x5f   :  { %490 = vmatpush.bf16.msrb.mxu1 %v8885_v5 }
  0x63   :  { %491 = vmatpush.bf16.msrb.mxu1 %v8877_v9 }
  0x6c   :  { %8858 = vmatmul.msk.bf16.gmra.mxu0 %vm204_vm0, %v180_v16  ;;  %v8869_v16 = vor.u32 %v10721_v13, %v8866_v14 }
  0x6e   :  { %492 = vmatpush.bf16.msrb.mxu1 %v8869_v16  ;;  %11200 = vmatpush.bf16.msra.mxu2 %v8869_v16 }
  0x7c   :  { %8859 = vmatmul.msk.bf16.gmra.mxu0 %vm204_vm0, %v181_v22 }
  0x8c   :  { %8860 = vmatmul.msk.bf16.gmra.mxu0 %vm204_vm0, %v182_v36 }
  0x9c   :  { %8861 = vmatmul.msk.bf16.gmra.mxu0 %vm204_vm0, %v183_v51 }
  0xa9   :  { %v238_v1 = vpop.f32.mrf.mxu0 }
  0xaa   :  { %v239_v6 = vadd.f32 %v11770_v2, %v238_v1 }
  0xac   :  { %v294_v11 = vmul.f32 0.2, %v239_v6  ;;  %vm278_vm1 = vcmp.gt.f32.partialorder %v239_v6, 0.0 }
  0xae   :  { %v310_v17 = vsel %vm278_vm1, %v239_v6, %v294_v11 }
  0xb1   :  { %v240_v10 = vpop.f32.mrf.mxu0 }
  0xb2   :  { %v241_v12 = vadd.f32 %v11770_v2, %v240_v10 }
  0xb4   :  { %v295_v15 = vmul.f32 0.2, %v241_v12  ;;  %vm279_vm2 = vcmp.gt.f32.partialorder %v241_v12, 0.0 }
  0xb6   :  { %v311_v18 = vsel %vm279_vm2, %v241_v12, %v295_v15 }
  0xb7   :  { %v326_v19 = vpack.c.bf16 %v311_v18, %v310_v17 }
  0xb9   :  { %v243_v20 = vpop.f32.mrf.mxu0  ;;  %444 = vmatmul.bf16.vlgmr.msra.gmra.mxu1 %v326_v19 }
  0xba   :  { %v244_v21 = vadd.f32 %v11770_v2, %v243_v20 }
  0xbc   :  { %v296_v23 = vmul.f32 0.2, %v244_v21  ;;  %vm280_vm3 = vcmp.gt.f32.partialorder %v244_v21, 0.0 }
  0xbe   :  { %v312_v26 = vsel %vm280_vm3, %v244_v21, %v296_v23  ;;  %v10799_v23 = vld [vmem:[#allocation2 + $0x1ec] sm:$0xf0] }
  0xc1   :  { %v245_v22 = vpop.f32.mrf.mxu0 }
  0xc2   :  { %v246_v24 = vadd.f32 %v11770_v2, %v245_v22  ;;  %v9168_v22 = vld [vmem:[#allocation2 + $0x1e0] sm:$0xf] }
  0xc4   :  { %v297_v25 = vmul.f32 0.2, %v246_v24  ;;  %vm281_vm4 = vcmp.gt.f32.partialorder %v246_v24, 0.0 }
  0xc6   :  { %v313_v27 = vsel %vm281_vm4, %v246_v24, %v297_v25 }
  0xc7   :  { %v327_v28 = vpack.c.bf16 %v313_v27, %v312_v26  ;;  %v9169_v26 = vor.u32 %v10799_v23, %v9168_v22 }
  0xc9   :  { %v248_v29 = vpop.f32.mrf.mxu0  ;;  %449 = vmatmul.bf16.gmra.mxu1 %v327_v28  ;;  %1376 = vmatpush.bf16.msrb.mxu0 %v9169_v26  ;;  %v10755_v26 = vld [vmem:[#allocation2 + $0x8c] sm:$0xf0] }
  0xca   :  { %v249_v30 = vadd.f32 %v11770_v2, %v248_v29 }
  0xcc   :  { %v298_v32 = vmul.f32 0.2, %v249_v30  ;;  %vm282_vm5 = vcmp.gt.f32.partialorder %v249_v30, 0.0 }
  0xce   :  { %v314_v35 = vsel %vm282_vm5, %v249_v30, %v298_v32  ;;  %v9152_v30 = vld [vmem:[#allocation2 + $0x1c0] sm:$0xf]  ;;  %v10797_v32 = vld [vmem:[#allocation2 + $0x1e4] sm:$0xf] }
  0xd1   :  { %v250_v31 = vpop.f32.mrf.mxu0 }
  0xd2   :  { %v251_v33 = vadd.f32 %v11770_v2, %v250_v31  ;;  %v10795_v31 = vld [vmem:[#allocation2 + $0x1cc] sm:$0xf0] }
  0xd4   :  { %v299_v34 = vmul.f32 0.2, %v251_v33  ;;  %vm283_vm6 = vcmp.gt.f32.partialorder %v251_v33, 0.0 }
  0xd6   :  { %v315_v36 = vsel %vm283_vm6, %v251_v33, %v299_v34  ;;  %v9153_v33 = vor.u32 %v10795_v31, %v9152_v30  ;;  %v9170_v34 = vld [vmem:[#allocation2 + $0x1f0] sm:$0xf0] }
  0xd7   :  { %v328_v37 = vpack.c.bf16 %v315_v36, %v314_v35  ;;  %v9173_v36 = vor.u32 %v10797_v32, %v9170_v34 }
  0xd8   :  { %1377 = vmatpush.bf16.msrb.mxu0 %v9153_v33 }
  0xd9   :  { %v253_v38 = vpop.f32.mrf.mxu0  ;;  %454 = vmatmul.bf16.vlgmr.msra.gmra.mxu3 %v328_v37  ;;  %493 = vmatmul.bf16.vlgmr.msrb.gmra.mxu1 %v326_v19 }
  0xda   :  { %503 = vmatmul.bf16.vlgmr.msra.gmra.mxu2 %v328_v37  ;;  %v254_v39 = vadd.f32 %v11770_v2, %v253_v38 }
  0xdb   :  { %1474 = vmatpush.bf16.msrb.mxu2 %v9173_v36 }
  0xdc   :  { %v300_v41 = vmul.f32 0.2, %v254_v39  ;;  %vm284_vm7 = vcmp.gt.f32.partialorder %v254_v39, 0.0 }
  0xde   :  { %v316_v44 = vsel %vm284_vm7, %v254_v39, %v300_v41  ;;  %v9040_v39 = vld [vmem:[#allocation2 + $0xe0] sm:$0xf] }
  0xe1   :  { %v255_v40 = vpop.f32.mrf.mxu0 }
  0xe2   :  { %v256_v42 = vadd.f32 %v11770_v2, %v255_v40  ;;  %v10767_v40 = vld [vmem:[#allocation2 + $0xec] sm:$0xf0] }
  0xe3   :  { %v9041_v41 = vor.u32 %v10767_v40, %v9040_v39 }
  0xe4   :  { %v301_v43 = vmul.f32 0.2, %v256_v42  ;;  %vm285_vm8 = vcmp.gt.f32.partialorder %v256_v42, 0.0 }
  0xe5   :  { %1327 = vmatpush.bf16.msrb.mxu3 %v9041_v41 }
  0xe6   :  { %v317_v45 = vsel %vm285_vm8, %v256_v42, %v301_v43 }
  0xe7   :  { %v329_v46 = vpack.c.bf16 %v317_v45, %v316_v44  ;;  %v9136_v45 = vld [vmem:[#allocation2 + $0x1a0] sm:$0xf] }
  0xe9   :  { %v258_v47 = vpop.f32.mrf.mxu0  ;;  %459 = vmatmul.bf16.gmra.mxu3 %v329_v46  ;;  %498 = vmatmul.bf16.gmra.mxu1 %v327_v28 }
  0xea   :  { %508 = vmatmul.bf16.gmra.mxu2 %v329_v46  ;;  %v259_v48 = vadd.f32 %v11770_v2, %v258_v47  ;;  %v10791_v46 = vld [vmem:[#allocation2 + $0x1ac] sm:$0xf0]  ;;  %v10793_v47 = vld [vmem:[#allocation2 + $0x1c4] sm:$0xf] }
  0xec   :  { %v302_v50 = vmul.f32 0.2, %v259_v48  ;;  %vm286_vm9 = vcmp.gt.f32.partialorder %v259_v48, 0.0 }
  0xee   :  { %v318_v53 = vsel %vm286_vm9, %v259_v48, %v302_v50  ;;  %v9137_v48 = vor.u32 %v10791_v46, %v9136_v45  ;;  %v9024_v50 = vld [vmem:[#allocation2 + $0xc0] sm:$0xf] }
  0xf0   :  { %1378 = vmatpush.bf16.msrb.mxu0 %v9137_v48 }
  0xf1   :  { %v260_v49 = vpop.f32.mrf.mxu0 }
  0xf2   :  { %v261_v51 = vadd.f32 %v11770_v2, %v260_v49  ;;  %v9154_v49 = vld [vmem:[#allocation2 + $0x1d0] sm:$0xf0] }
  0xf4   :  { %v303_v52 = vmul.f32 0.2, %v261_v51  ;;  %vm287_vm10 = vcmp.gt.f32.partialorder %v261_v51, 0.0 }
  0xf6   :  { %v319_v54 = vsel %vm287_vm10, %v261_v51, %v303_v52  ;;  %v10763_v51 = vld [vmem:[#allocation2 + $0xcc] sm:$0xf0] }
  0xf7   :  { %v330_v55 = vpack.c.bf16 %v319_v54, %v318_v53  ;;  %v9157_v53 = vor.u32 %v10793_v47, %v9154_v49  ;;  %v9025_v54 = vor.u32 %v10763_v51, %v9024_v50 }
  0xf9   :  { %v263_v56 = vpop.f32.mrf.mxu0  ;;  %464 = vmatmul.bf16.gmra.mxu3 %v330_v55  ;;  %1475 = vmatpush.bf16.msrb.mxu2 %v9157_v53 }
  0xfa   :  { %513 = vmatmul.bf16.gmra.mxu2 %v330_v55  ;;  %v264_v57 = vadd.f32 %v11770_v2, %v263_v56  ;;  %1328 = vmatpush.bf16.msrb.mxu3 %v9025_v54  ;;  %v10789_v56 = vld [vmem:[#allocation2 + $0x1a4] sm:$0xf] }
  0xfc   :  { %v304_v59 = vmul.f32 0.2, %v264_v57  ;;  %vm288_vm11 = vcmp.gt.f32.partialorder %v264_v57, 0.0 }
  0xfe   :  { %v320_v62 = vsel %vm288_vm11, %v264_v57, %v304_v59  ;;  %v9138_v57 = vld [vmem:[#allocation2 + $0x1b0] sm:$0xf0] }
 0x101   :  { %v265_v58 = vpop.f32.mrf.mxu0 }
 0x102   :  { %v266_v60 = vadd.f32 %v11770_v2, %v265_v58  ;;  %v9141_v58 = vor.u32 %v10789_v56, %v9138_v57 }
 0x104   :  { %v305_v61 = vmul.f32 0.2, %v266_v60  ;;  %vm289_vm12 = vcmp.gt.f32.partialorder %v266_v60, 0.0  ;;  %1476 = vmatpush.bf16.msrb.mxu2 %v9141_v58 }
 0x106   :  { %v321_v63 = vsel %vm289_vm12, %v266_v60, %v305_v61 }
 0x107   :  { %v331_v0 = vpack.c.bf16 %v321_v63, %v320_v62  ;;  %v350_v62 = vld [vmem:[#allocation7 + $0x1] sm:$0x3] }
 0x108   :  { %v9008_v63 = vld [vmem:[#allocation2 + $0xa0] sm:$0xf] }
 0x109   :  { %v268_v1 = vpop.f32.mrf.mxu0  ;;  %469 = vmatmul.bf16.gmra.mxu3 %v331_v0 }
 0x10a   :  { %518 = vmatmul.bf16.gmra.mxu2 %v331_v0  ;;  %v269_v3 = vadd.f32 %v11770_v2, %v268_v1  ;;  %v10759_v0 = vld [vmem:[#allocation2 + $0xac] sm:$0xf0]  ;;  %v9120_v1 = vld [vmem:[#allocation2 + $0x180] sm:$0xf] }
 0x10c   :  { %v306_v5 = vmul.f32 0.2, %v269_v3  ;;  %vm290_vm13 = vcmp.gt.f32.partialorder %v269_v3, 0.0 }
 0x10e   :  { %v322_v8 = vsel %vm290_vm13, %v269_v3, %v306_v5  ;;  %v11838_v3 = vperm.slane %v350_v62, 1  ;;  %v10787_v5 = vld [vmem:[#allocation2 + $0x18c] sm:$0xf0] }
 0x111   :  { %v270_v4 = vpop.f32.mrf.mxu0 }
 0x112   :  { %v271_v6 = vadd.f32 %v11770_v2, %v270_v4  ;;  %v9009_v4 = vor.u32 %v10759_v0, %v9008_v63 }
 0x114   :  { %v307_v7 = vmul.f32 0.2, %v271_v6  ;;  %vm291_vm14 = vcmp.gt.f32.partialorder %v271_v6, 0.0  ;;  %1329 = vmatpush.bf16.msrb.mxu3 %v9009_v4 }
 0x116   :  { %v323_v9 = vsel %vm291_vm14, %v271_v6, %v307_v7  ;;  %v9121_v7 = vor.u32 %v10787_v5, %v9120_v1 }
 0x117   :  { %v332_v10 = vpack.c.bf16 %v323_v9, %v322_v8 }
 0x118   :  { %1379 = vmatpush.bf16.msrb.mxu0 %v9121_v7 }
 0x119   :  { %v273_v11 = vpop.f32.mrf.mxu0  ;;  %474 = vmatmul.bf16.gmra.mxu3 %v332_v10 }
 0x11a   :  { %523 = vmatmul.bf16.gmra.mxu2 %v332_v10  ;;  %v274_v12 = vadd.f32 %v11770_v2, %v273_v11 }
 0x11c   :  { %v308_v14 = vmul.f32 0.2, %v274_v12  ;;  %vm292_vm15 = vcmp.gt.f32.partialorder %v274_v12, 0.0 }
 0x11e   :  { %v324_v17 = vsel %vm292_vm15, %v274_v12, %v308_v14 }
 0x121   :  { %v275_v13 = vpop.f32.mrf.mxu0 }
 0x122   :  { %v276_v15 = vadd.f32 %v11770_v2, %v275_v13  ;;  %v11853_v13 = vperm.slane %v350_v62, 0 }
 0x124   :  { %v309_v16 = vmul.f32 0.2, %v276_v15  ;;  %vm293_vm0 = vcmp.gt.f32.partialorder %v276_v15, 0.0 }
 0x126   :  { %v325_v18 = vsel %vm293_vm0, %v276_v15, %v309_v16  ;;  %v10785_v16 = vld [vmem:[#allocation2 + $0x184] sm:$0xf] }
 0x127   :  { %v333_v19 = vpack.c.bf16 %v325_v18, %v324_v17  ;;  %v9122_v17 = vld [vmem:[#allocation2 + $0x190] sm:$0xf0]  ;;  %v8992_v18 = vld [vmem:[#allocation2 + $0x80] sm:$0xf] }
 0x128   :  { %v9125_v23 = vor.u32 %v10785_v16, %v9122_v17  ;;  %v8993_v33 = vor.u32 %v10755_v26, %v8992_v18 }
 0x129   :  { %479 = vmatmul.bf16.gmra.mxu3 %v333_v19 }
 0x12a   :  { %528 = vmatmul.bf16.gmra.mxu2 %v333_v19  ;;  %1330 = vmatpush.bf16.msrb.mxu3 %v8993_v33 }
 0x12b   :  { %1477 = vmatpush.bf16.msrb.mxu2 %v9125_v23 }
 0x136   :  { %v11806_v20 = vpop.f32.mrf.mxu1 }
 0x137   :  { %v11878_v39 = vadd.f32 %v11806_v20, %v11853_v13 }
 0x13e   :  { %v11808_v21 = vpop.f32.mrf.mxu1 }
 0x13f   :  { %v11866_v30 = vadd.f32 %v11808_v21, %v11853_v13 }
 0x141   :  { %v580_v45 = vmul.f32 %v11866_v30, %v11866_v30  ;;  %v534_v49 = vadd.f32 %v11866_v30, %v11878_v39 }
 0x146   :  { %v11810_v24 = vpop.f32.mrf.mxu1 }
 0x147   :  { %v11882_v21 = vadd.f32 %v11810_v24, %v11853_v13  ;;  %v578_v24 = vmul.f32 %v11878_v39, %v11878_v39 }
 0x149   :  { %v582_v48 = vmul.f32 %v11882_v21, %v11882_v21  ;;  %v610_v51 = vadd.f32 %v580_v45, %v578_v24  ;;  %v535_v57 = vadd.f32 %v534_v49, %v11882_v21 }
 0x14b   :  { %v611_v62 = vadd.f32 %v610_v51, %v582_v48 }
 0x14e   :  { %v11820_v29 = vpop.f32.mrf.mxu1 }
 0x14f   :  { %v11893_v46 = vadd.f32 %v11820_v29, %v11853_v13 }
 0x151   :  { %v584_v53 = vmul.f32 %v11893_v46, %v11893_v46  ;;  %v536_v0 = vadd.f32 %v535_v57, %v11893_v46  ;;  %v9042_v57 = vld [vmem:[#allocation2 + $0xf0] sm:$0xf0] }
 0x153   :  { %v612_v4 = vadd.f32 %v611_v62, %v584_v53 }
 0x156   :  { %v494_v38 = vpop.f32.mrf.mxu1 }
 0x157   :  { %v11848_v11 = vadd.f32 %v494_v38, %v11838_v3 }
 0x159   :  { %v579_v19 = vmul.f32 %v11848_v11, %v11848_v11 }
 0x15c   :  { %v11812_v25 = vpop.f32.mrf.mxu3 }
 0x15d   :  { %v11814_v2 = vpop.f32.mrf.mxu2 }
 0x15e   :  { %v496_v44 = vpop.f32.mrf.mxu1  ;;  %v11887_v41 = vadd.f32 %v11814_v2, %v11838_v3  ;;  %v11902_v2 = vadd.f32 %v11812_v25, %v11853_v13 }
 0x15f   :  { %v11843_v8 = vadd.f32 %v496_v44, %v11838_v3 }
 0x160   :  { %v587_v29 = vmul.f32 %v11887_v41, %v11887_v41 }
 0x161   :  { %v581_v14 = vmul.f32 %v11843_v8, %v11843_v8  ;;  %v555_v31 = vadd.f32 %v11843_v8, %v11848_v11 }
 0x163   :  { %v631_v34 = vadd.f32 %v581_v14, %v579_v19 }
 0x164   :  { %v11816_v27 = vpop.f32.mrf.mxu3 }
 0x165   :  { %v11818_v28 = vpop.f32.mrf.mxu2  ;;  %v11916_v54 = vadd.f32 %v11816_v27, %v11853_v13 }
 0x166   :  { %v499_v59 = vpop.f32.mrf.mxu1  ;;  %v11910_v50 = vadd.f32 %v11818_v28, %v11838_v3  ;;  %v586_v28 = vmul.f32 %v11902_v2, %v11902_v2 }
 0x167   :  { %v11851_v12 = vadd.f32 %v499_v59, %v11838_v3  ;;  %v588_v5 = vmul.f32 %v11916_v54, %v11916_v54 }
 0x168   :  { %v589_v27 = vmul.f32 %v11910_v50, %v11910_v50  ;;  %v613_v16 = vadd.f32 %v612_v4, %v586_v28 }
 0x169   :  { %v583_v22 = vmul.f32 %v11851_v12, %v11851_v12  ;;  %v556_v40 = vadd.f32 %v555_v31, %v11851_v12 }
 0x16a   :  { %v614_v23 = vadd.f32 %v613_v16, %v588_v5 }
 0x16b   :  { %v632_v44 = vadd.f32 %v631_v34, %v583_v22 }
 0x16c   :  { %v11822_v35 = vpop.f32.mrf.mxu3 }
 0x16d   :  { %v11824_v37 = vpop.f32.mrf.mxu2  ;;  %v11924_v63 = vadd.f32 %v11822_v35, %v11853_v13 }
 0x16e   :  { %v501_v10 = vpop.f32.mrf.mxu1  ;;  %v11931_v1 = vadd.f32 %v11824_v37, %v11838_v3 }
 0x16f   :  { %v11858_v15 = vadd.f32 %v501_v10, %v11838_v3  ;;  %v537_v10 = vadd.f32 %v536_v0, %v11902_v2  ;;  %v590_v17 = vmul.f32 %v11924_v63, %v11924_v63 }
 0x170   :  { %v591_v19 = vmul.f32 %v11931_v1, %v11931_v1 }
 0x171   :  { %v585_v36 = vmul.f32 %v11858_v15, %v11858_v15  ;;  %v557_v20 = vadd.f32 %v556_v40, %v11858_v15  ;;  %v538_v18 = vadd.f32 %v537_v10, %v11916_v54  ;;  %v615_v40 = vadd.f32 %v614_v23, %v590_v17  ;;  %v10761_v23 = vld [vmem:[#allocation2 + $0xc4] sm:$0xf] }
 0x173   :  { %v633_v47 = vadd.f32 %v632_v44, %v585_v36  ;;  %v558_v25 = vadd.f32 %v557_v20, %v11887_v41  ;;  %v539_v34 = vadd.f32 %v538_v18, %v11924_v63 }
 0x174   :  { %v11826_v42 = vpop.f32.mrf.mxu3 }
 0x175   :  { %v11828_v43 = vpop.f32.mrf.mxu2  ;;  %v634_v58 = vadd.f32 %v633_v47, %v587_v29  ;;  %v11937_v7 = vadd.f32 %v11826_v42, %v11853_v13  ;;  %v559_v35 = vadd.f32 %v558_v25, %v11910_v50  ;;  %v10765_v25 = vld [vmem:[#allocation2 + $0xe4] sm:$0xf] }
 0x176   :  { %v11952_v42 = vadd.f32 %v11828_v43, %v11838_v3 }
 0x177   :  { %v635_v14 = vadd.f32 %v634_v58, %v589_v27  ;;  %v592_v26 = vmul.f32 %v11937_v7, %v11937_v7  ;;  %v540_v45 = vadd.f32 %v539_v34, %v11937_v7 }
 0x178   :  { %v593_v20 = vmul.f32 %v11952_v42, %v11952_v42 }
 0x179   :  { %v636_v36 = vadd.f32 %v635_v14, %v591_v19  ;;  %v616_v24 = vadd.f32 %v615_v40, %v592_v26  ;;  %v9026_v26 = vld [vmem:[#allocation2 + $0xd0] sm:$0xf0] }
 0x17b   :  { %v637_v29 = vadd.f32 %v636_v36, %v593_v20  ;;  %v9029_v36 = vor.u32 %v10761_v23, %v9026_v26  ;;  %v8994_v23 = vld [vmem:[#allocation2 + $0x90] sm:$0xf0] }
 0x17c   :  { %v11830_v52 = vpop.f32.mrf.mxu3 }
 0x17d   :  { %v11832_v55 = vpop.f32.mrf.mxu2  ;;  %v11945_v37 = vadd.f32 %v11830_v52, %v11853_v13  ;;  %v560_v52 = vadd.f32 %v559_v35, %v11931_v1 }
 0x17e   :  { %v11956_v22 = vadd.f32 %v11832_v55, %v11838_v3 }
 0x17f   :  { %v594_v44 = vmul.f32 %v11945_v37, %v11945_v37  ;;  %v541_v51 = vadd.f32 %v540_v45, %v11945_v37 }
 0x181   :  { %v617_v58 = vadd.f32 %v616_v24, %v594_v44 }
 0x184   :  { %v11834_v60 = vpop.f32.mrf.mxu3 }
 0x185   :  { %v11836_v61 = vpop.f32.mrf.mxu2  ;;  %v11963_v31 = vadd.f32 %v11834_v60, %v11853_v13  ;;  %v595_v60 = vmul.f32 %v11956_v22, %v11956_v22 }
 0x186   :  { %v11968_v43 = vadd.f32 %v11836_v61, %v11838_v3  ;;  %v561_v61 = vadd.f32 %v560_v52, %v11952_v42 }
 0x187   :  { %v596_v48 = vmul.f32 %v11963_v31, %v11963_v31  ;;  %v638_v0 = vadd.f32 %v637_v29, %v595_v60  ;;  %v542_v27 = vadd.f32 %v541_v51, %v11963_v31  ;;  %v10757_v51 = vld [vmem:[#allocation2 + $0xa4] sm:$0xf] }
 0x188   :  { %v597_v53 = vmul.f32 %v11968_v43, %v11968_v43  ;;  %v562_v62 = vadd.f32 %v561_v61, %v11956_v22 }
 0x18a   :  { %v563_v35 = vadd.f32 %v562_v62, %v11968_v43  ;;  %v639_v16 = vadd.f32 %v638_v0, %v597_v53  ;;  %v9010_v53 = vld [vmem:[#allocation2 + $0xb0] sm:$0xf0] }
 0x18b   :  { %v9013_v62 = vor.u32 %v10757_v51, %v9010_v53 }
 0x18c   :  { %v11840_v6 = vpop.f32.mrf.mxu3 }
 0x18d   :  { %v11845_v9 = vpop.f32.mrf.mxu2  ;;  %v11979_v47 = vadd.f32 %v11840_v6, %v11853_v13 }
 0x18e   :  { %v11986_v49 = vadd.f32 %v11845_v9, %v11838_v3  ;;  %v9045_v9 = vor.u32 %v10765_v25, %v9042_v57 }
 0x18f   :  { %v598_v4 = vmul.f32 %v11979_v47, %v11979_v47  ;;  %v543_v17 = vadd.f32 %v542_v27, %v11979_v47 }
 0x190   :  { %v599_v10 = vmul.f32 %v11986_v49, %v11986_v49  ;;  %1425 = vmatpush.bf16.msra.mxu1 %v9045_v9  ;;  %v564_v52 = vadd.f32 %v563_v35, %v11986_v49 }
 0x192   :  { %v640_v20 = vadd.f32 %v639_v16, %v599_v10 }
 0x194   :  { %v11870_v32 = vpop.f32.mrf.mxu3  ;;  %1426 = vmatpush.bf16.msra.mxu1 %v9029_v36 }
 0x195   :  { %v11874_v38 = vpop.f32.mrf.mxu2  ;;  %v11993_v6 = vadd.f32 %v11870_v32, %v11853_v13  ;;  %v618_v32 = vadd.f32 %v617_v58, %v596_v48 }
 0x196   :  { %v11998_v28 = vadd.f32 %v11874_v38, %v11838_v3 }
 0x197   :  { %v600_v18 = vmul.f32 %v11993_v6, %v11993_v6  ;;  %v619_v40 = vadd.f32 %v618_v32, %v598_v4  ;;  %v544_v44 = vadd.f32 %v543_v17, %v11993_v6 }
 0x198   :  { %v565_v60 = vadd.f32 %v564_v52, %v11998_v28  ;;  %1427 = vmatpush.bf16.msra.mxu1 %v9013_v62 }
 0x19c   :  { %v475_v56 = vpop.f32.mrf.mxu3 }
 0x19d   :  { %v524_v59 = vpop.f32.mrf.mxu2  ;;  %v12004_v5 = vadd.f32 %v475_v56, %v11853_v13 }
 0x19e   :  { %v12010_v14 = vadd.f32 %v524_v59, %v11838_v3  ;;  %v601_v59 = vmul.f32 %v11998_v28, %v11998_v28 }
 0x19f   :  { %v602_v45 = vmul.f32 %v12004_v5, %v12004_v5  ;;  %v545_v48 = vadd.f32 %v544_v44, %v12004_v5 }
 0x1a0   :  { %v603_v24 = vmul.f32 %v12010_v14, %v12010_v14  ;;  %v641_v25 = vadd.f32 %v640_v20, %v601_v59  ;;  %v566_v57 = vadd.f32 %v565_v60, %v12010_v14 }
 0x1a2   :  { %v642_v4 = vadd.f32 %v641_v25, %v603_v24  ;;  %v10781_v25 = vld [vmem:[#allocation2 + $0x164] sm:$0xf] }
 0x1a4   :  { %v477_v33 = vpop.f32.mrf.mxu3 }
 0x1a5   :  { %v526_v55 = vpop.f32.mrf.mxu2  ;;  %v12016_v56 = vadd.f32 %v477_v33, %v11853_v13 }
 0x1a6   :  { %v12022_v34 = vadd.f32 %v526_v55, %v11838_v3  ;;  %v620_v55 = vadd.f32 %v619_v40, %v600_v18 }
 0x1a7   :  { %v604_v29 = vmul.f32 %v12016_v56, %v12016_v56  ;;  %v546_v0 = vadd.f32 %v545_v48, %v12016_v56  ;;  %v9104_v48 = vld [vmem:[#allocation2 + $0x160] sm:$0xf] }
 0x1a8   :  { %v605_v58 = vmul.f32 %v12022_v34, %v12022_v34  ;;  %v621_v9 = vadd.f32 %v620_v55, %v602_v45  ;;  %v567_v32 = vadd.f32 %v566_v57, %v12022_v34  ;;  %v9106_v57 = vld [vmem:[#allocation2 + $0x170] sm:$0xf0] }
 0x1aa   :  { %v643_v26 = vadd.f32 %v642_v4, %v605_v58 }
 0x1ac   :  { %v480_v38 = vpop.f32.mrf.mxu3 }
 0x1ad   :  { %v529_v19 = vpop.f32.mrf.mxu2  ;;  %v12028_v33 = vadd.f32 %v480_v38, %v11853_v13  ;;  %v622_v38 = vadd.f32 %v621_v9, %v604_v29  ;;  %v10783_v29 = vld [vmem:[#allocation2 + $0x16c] sm:$0xf0]  ;;  %v9109_v9 = vor.u32 %v10781_v25, %v9106_v57  ;;  %v10773_v57 = vld [vmem:[#allocation2 + $0x124] sm:$0xf] }
 0x1ae   :  { %v12034_v61 = vadd.f32 %v529_v19, %v11838_v3  ;;  %v10753_v19 = vld [vmem:[#allocation2 + $0x84] sm:$0xf]  ;;  %v9105_v53 = vor.u32 %v10783_v29, %v9104_v48 }
 0x1af   :  { %v606_v27 = vmul.f32 %v12028_v33, %v12028_v33  ;;  %v547_v16 = vadd.f32 %v546_v0, %v12028_v33  ;;  %v8997_v36 = vor.u32 %v10753_v19, %v8994_v23  ;;  %v8976_v0 = vld [vmem:[#allocation2 + $0x60] sm:$0xf]  ;;  %1478 = vmatpush.bf16.msrb.mxu2 %v9109_v9  ;;  %v10779_v23 = vld [vmem:[#allocation2 + $0x14c] sm:$0xf0]  ;;  %v9074_v9 = vld [vmem:[#allocation2 + $0x130] sm:$0xf0] }
 0x1b0   :  { %v607_v35 = vmul.f32 %v12034_v61, %v12034_v61  ;;  %v568_v52 = vadd.f32 %v567_v32, %v12034_v61  ;;  %1380 = vmatpush.bf16.msrb.mxu0 %v9105_v53  ;;  %v9088_v19 = vld [vmem:[#allocation2 + $0x140] sm:$0xf] }
 0x1b1   :  { %v623_v40 = vadd.f32 %v622_v38, %v606_v27  ;;  %1428 = vmatpush.bf16.msra.mxu1 %v8997_v36  ;;  %v10751_v27 = vld [vmem:[#allocation2 + $0x6c] sm:$0xf0]  ;;  %v8978_v38 = vld [vmem:[#allocation2 + $0x70] sm:$0xf0] }
 0x1b2   :  { %v644_v20 = vadd.f32 %v643_v26, %v607_v35  ;;  %v8977_v35 = vor.u32 %v10751_v27, %v8976_v0 }
 0x1b4   :  { %v482_v10 = vpop.f32.mrf.mxu3  ;;  %1331 = vmatpush.bf16.msrb.mxu3 %v8977_v35  ;;  %v10743_v35 = vld [vmem:[#allocation2 + $0x2c] sm:$0xf0] }
 0x1b5   :  { %v12050_v17 = vadd.f32 %v482_v10, %v11853_v13  ;;  %v531_v18 = vpop.f32.mrf.mxu2  ;;  %v10749_v10 = vld [vmem:[#allocation2 + $0x64] sm:$0xf] }
 0x1b6   :  { %v12054_v59 = vadd.f32 %v531_v18, %v11838_v3  ;;  %v8981_v26 = vor.u32 %v10749_v10, %v8978_v38 }
 0x1b7   :  { %v548_v44 = vadd.f32 %v547_v16, %v12050_v17  ;;  %v608_v45 = vmul.f32 %v12050_v17, %v12050_v17 }
 0x1b8   :  { %v569_v13 = vadd.f32 %v568_v52, %v12054_v59  ;;  %v609_v60 = vmul.f32 %v12054_v59, %v12054_v59  ;;  %1429 = vmatpush.bf16.msra.mxu1 %v8981_v26 }
 0x1b9   :  { %v549_v24 = vrot.slane %v548_v44, 4  ;;  %v624_v55 = vadd.f32 %v623_v40, %v608_v45  ;;  %v9089_v40 = vor.u32 %v10779_v23, %v9088_v19  ;;  %v9090_v45 = vld [vmem:[#allocation2 + $0x150] sm:$0xf0]  ;;  %v10775_v19 = vld [vmem:[#allocation2 + $0x12c] sm:$0xf0] }
 0x1ba   :  { %v570_v3 = vrot.slane %v569_v13, 4  ;;  %v645_v51 = vadd.f32 %v644_v20, %v609_v60 }
 0x1bb   :  { %v550_v58 = vadd.f32 %v549_v24, %v548_v44  ;;  %v625_v62 = vrot.slane %v624_v55, 4  ;;  %v10777_v44 = vld [vmem:[#allocation2 + $0x144] sm:$0xf]  ;;  %v8960_v24 = vld [vmem:[#allocation2 + $0x40] sm:$0xf]  ;;  %1381 = vmatpush.bf16.msrb.mxu0 %v9089_v40 }
 0x1bc   :  { %v571_v4 = vadd.f32 %v570_v3, %v569_v13  ;;  %v646_v32 = vrot.slane %v645_v51, 4  ;;  %v9093_v13 = vor.u32 %v10777_v44, %v9090_v45  ;;  %v10747_v3 = vld [vmem:[#allocation2 + $0x4c] sm:$0xf0]  ;;  %v9058_v40 = vld [vmem:[#allocation2 + $0x110] sm:$0xf0] }
 0x1bd   :  { %v551_v16 = vrot.slane %v550_v58, 2  ;;  %v626_v18 = vadd.f32 %v625_v62, %v624_v55  ;;  %v8961_v25 = vor.u32 %v10747_v3, %v8960_v24  ;;  %v8928_v3 = vld [vmem:[#allocation2] sm:$0xf] }
 0x1be   :  { %v572_v52 = vrot.slane %v571_v4, 2  ;;  %v647_v36 = vadd.f32 %v646_v32, %v645_v51  ;;  %1479 = vmatpush.bf16.msrb.mxu2 %v9093_v13  ;;  %v8944_v32 = vld [vmem:[#allocation2 + $0x20] sm:$0xf] }
 0x1bf   :  { %v552_v20 = vadd.f32 %v551_v16, %v550_v58  ;;  %v627_v60 = vrot.slane %v626_v18, 2  ;;  %1332 = vmatpush.bf16.msrb.mxu3 %v8961_v25  ;;  %v9077_v58 = vor.u32 %v10773_v57, %v9074_v9  ;;  %v9072_v16 = vld [vmem:[#allocation2 + $0x120] sm:$0xf]  ;;  %v8946_v9 = vld [vmem:[#allocation2 + $0x30] sm:$0xf0] }
 0x1c0   :  { %v573_v48 = vadd.f32 %v572_v52, %v571_v4  ;;  %v648_v29 = vrot.slane %v647_v36, 2  ;;  %v8945_v4 = vor.u32 %v10743_v35, %v8944_v32  ;;  %v9073_v26 = vor.u32 %v10775_v19, %v9072_v16  ;;  %v10769_v52 = vld [vmem:[#allocation2 + $0x104] sm:$0xf]  ;;  %v10771_v32 = vld [vmem:[#allocation2 + $0x10c] sm:$0xf0] }
 0x1c1   :  { %v553_v55 = vrot.slane %v552_v20, 1  ;;  %v628_v53 = vadd.f32 %v627_v60, %v626_v18  ;;  %v9061_v45 = vor.u32 %v10769_v52, %v9058_v40  ;;  %v8962_v60 = vld [vmem:[#allocation2 + $0x50] sm:$0xf0]  ;;  %v10798_v19 = vld [vmem:[#allocation2 + $0x1ec] sm:$0xf] }
 0x1c2   :  { %v574_v62 = vrot.slane %v573_v48, 1  ;;  %v649_v51 = vadd.f32 %v648_v29, %v647_v36  ;;  %1480 = vmatpush.bf16.msrb.mxu2 %v9077_v58  ;;  %1382 = vmatpush.bf16.msrb.mxu0 %v9073_v26  ;;  %v9056_v58 = vld [vmem:[#allocation2 + $0x100] sm:$0xf]  ;;  %v9048_v40 = vld [vmem:[#allocation2 + $0xe8] sm:$0xf] }
 0x1c3   :  { %v554_v0 = vadd.f32 %v553_v55, %v552_v20  ;;  %v629_v27 = vrot.slane %v628_v53, 1  ;;  %v10745_v20 = vld [vmem:[#allocation2 + $0x44] sm:$0xf]  ;;  %1333 = vmatpush.bf16.msrb.mxu3 %v8945_v4  ;;  %v10739_v55 = vld [vmem:[#allocation2 + $0xc] sm:$0xf0] }
 0x1c4   :  { %v575_v10 = vadd.f32 %v574_v62, %v573_v48  ;;  %v650_v38 = vrot.slane %v649_v51, 1  ;;  %v8965_v29 = vor.u32 %v10745_v20, %v8962_v60  ;;  %v8929_v62 = vor.u32 %v10739_v55, %v8928_v3  ;;  %v8930_v4 = vld [vmem:[#allocation2 + $0x10] sm:$0xf0]  ;;  %v10766_v60 = vld [vmem:[#allocation2 + $0xec] sm:$0xf] }
 0x1c5   :  { %v12062_v23 = vmul.f32 0.0078125, %v554_v0  ;;  %v630_v18 = vadd.f32 %v629_v27, %v628_v53  ;;  %v10800_v3 = vld [vmem:[#allocation2 + $0x1f4] sm:$0xf0] }
 0x1c6   :  { %v12064_v36 = vmul.f32 0.0078125, %v575_v10  ;;  %v651_v44 = vadd.f32 %v650_v38, %v649_v51  ;;  %v10741_v51 = vld [vmem:[#allocation2 + $0x24] sm:$0xf]  ;;  %1481 = vmatpush.bf16.msrb.mxu2 %v9061_v45  ;;  %1430 = vmatpush.bf16.msra.mxu1 %v8965_v29  ;;  %v9057_v10 = vor.u32 %v10771_v32, %v9056_v58 }
 0x1c7   :  { %v652_v13 = vmul.f32 0.0078125, %v630_v18  ;;  %v654_v24 = vmul.f32 %v12062_v23, %v12062_v23  ;;  %v688_v48 = vsub.f32 %v12050_v17, %v12062_v23  ;;  %v8949_v27 = vor.u32 %v10741_v51, %v8946_v9  ;;  %v10737_v38 = vld [vmem:[#allocation2 + $0x4] sm:$0xf]  ;;  %1334 = vmatpush.bf16.msrb.mxu3 %v8929_v62  ;;  %v9178_v18 = vld [vmem:[#allocation2 + $0x1f8] sm:$0xf0] }
 0x1c8   :  { %v653_v53 = vmul.f32 0.0078125, %v651_v44  ;;  %v655_v25 = vmul.f32 %v12064_v36, %v12064_v36  ;;  %v689_v57 = vsub.f32 %v12054_v59, %v12064_v36  ;;  %1383 = vmatpush.bf16.msrb.mxu0 %v9057_v10  ;;  %v9181_v52 = vor.u32 %v10798_v19, %v9178_v18  ;;  %v10768_v44 = vld [vmem:[#allocation2 + $0xf4] sm:$0xf0]  ;;  %v783_v51 = vld [vmem:[#allocation12 + $0x1] ss:$2 sm:$0x3] }
 0x1c9   :  { %v656_v0 = vsub.f32 %v652_v13, %v654_v24  ;;  %v8933_v45 = vor.u32 %v10737_v38, %v8930_v4  ;;  %v9049_v20 = vor.u32 %v10768_v44, %v9048_v40  ;;  %v9050_v13 = vld [vmem:[#allocation2 + $0xf8] sm:$0xf0]  ;;  %v9176_v24 = vld [vmem:[#allocation2 + $0x1e8] sm:$0xf]  ;;  %v12096_v40 = vperm.slane %v783_v51, 0 }
 0x1ca   :  { %v657_v35 = vsub.f32 %v653_v53, %v655_v25  ;;  %1431 = vmatpush.bf16.msra.mxu1 %v8949_v27  ;;  %1670 = vmatpush.bf16.msra.mxu2 %v9181_v52  ;;  %v9053_v29 = vor.u32 %v10766_v60, %v9050_v13  ;;  %v9177_v55 = vor.u32 %v10800_v3, %v9176_v24  ;;  %v744_v53 = vld [vmem:[#allocation12] ss:$2 sm:$0x3]  ;;  %v12098_v44 = vperm.slane %v783_v51, 1  ;;  %v10764_v18 = vld [vmem:[#allocation2 + $0xd4] sm:$0xf0] }
 0x1cb   :  { %v690_v16 = vadd.f32 0.8, %v656_v0  ;;  %1523 = vmatpush.bf16.msra.mxu3 %v9049_v20  ;;  %v12089_v38 = vperm.slane %v744_v53, 0  ;;  %v12092_v19 = vperm.slane %v744_v53, 1  ;;  %v658_v60 = vsub.f32 %v11878_v39, %v12062_v23  ;;  %v10762_v10 = vld [vmem:[#allocation2 + $0xcc] sm:$0xf] }
 0x1cc   :  { %v12074_v26 = vadd.f32 0.8, %v657_v35  ;;  %1572 = vmatpush.bf16.msra.mxu0 %v9177_v55  ;;  %v660_v13 = vsub.f32 %v11866_v30, %v12062_v23  ;;  %v659_v24 = vsub.f32 %v11848_v11, %v12064_v36  ;;  %v661_v3 = vsub.f32 %v11843_v8, %v12064_v36  ;;  %v9034_v9 = vld [vmem:[#allocation2 + $0xd8] sm:$0xf0]  ;;  %v9160_v25 = vld [vmem:[#allocation2 + $0x1c8] sm:$0xf] }
 0x1cd   :  { %11216 = vrsqrt.f32 %v690_v16  ;;  %v662_v55 = vsub.f32 %v11882_v21, %v12062_v23  ;;  %vm698_vm2 = vweird.f32 %v690_v16  ;;  %v664_v51 = vsub.f32 %v11893_v46, %v12062_v23  ;;  %v9162_v46 = vld [vmem:[#allocation2 + $0x1d8] sm:$0xf0]  ;;  %v10796_v8 = vld [vmem:[#allocation2 + $0x1d4] sm:$0xf0] }
 0x1ce   :  { %11218 = vrsqrt.f32 %v12074_v26  ;;  %1432 = vmatpush.bf16.msra.mxu1 %v8933_v45  ;;  %v663_v39 = vsub.f32 %v11851_v12, %v12064_v36  ;;  %vm708_vm3 = vweird.f32 %v12074_v26  ;;  %v665_v11 = vsub.f32 %v11858_v15, %v12064_v36  ;;  %v9032_v45 = vld [vmem:[#allocation2 + $0xc8] sm:$0xf] }
 0x1cf   :  { %v669_v58 = vsub.f32 %v11910_v50, %v12064_v36  ;;  %v9033_v0 = vor.u32 %v10764_v18, %v9032_v45  ;;  %v9161_v18 = vor.u32 %v10796_v8, %v9160_v25  ;;  %v673_v45 = vsub.f32 %v11952_v42, %v12064_v36  ;;  %v9144_v50 = vld [vmem:[#allocation2 + $0x1a8] sm:$0xf] }
 0x1d0   :  { %v17206_v15 = vsub.f32 %v11916_v54, %v12062_v23 }
 0x1d1   :  { %1524 = vmatpush.bf16.msra.mxu3 %v9033_v0  ;;  %1573 = vmatpush.bf16.msra.mxu0 %v9161_v18 }
 0x1d2   :  { %1621 = vmatpush.bf16.msrb.mxu1 %v9053_v29 }
 0x1d3   :  { %v11217_v62 = vpop.eup %11216 }
 0x1d4   :  { %v11219_v32 = vpop.eup %11218  ;;  %v693_v35 = vmul.f32 %v11217_v62, %v690_v16  ;;  %vm699_vm1 = vweird.f32 %v11217_v62  ;;  %v10794_v16 = vld [vmem:[#allocation2 + $0x1cc] sm:$0xf] }
 0x1d5   :  { %v703_v4 = vmul.f32 %v11219_v32, %v12074_v26  ;;  %vm12121_vm4 = vmor %vm698_vm2, %vm699_vm1  ;;  %vm709_vm5 = vweird.f32 %v11219_v32 }
 0x1d6   :  { %v694_v52 = vmul.f32 %v11217_v62, %v693_v35  ;;  %vm710_vm6 = vmor %vm708_vm3, %vm709_vm5 }
 0x1d7   :  { %v704_v20 = vmul.f32 %v11219_v32, %v703_v4  ;;  %v672_v4 = vsub.f32 %v11937_v7, %v12062_v23 }
 0x1d8   :  { %v695_v29 = vmul.f32 0.5, %v694_v52  ;;  %v667_v52 = vsub.f32 %v11887_v41, %v12064_v36 }
 0x1d9   :  { %v705_v53 = vmul.f32 0.5, %v704_v20 }
 0x1da   :  { %v696_v30 = vsub.f32 1.5, %v695_v29  ;;  %v9165_v29 = vor.u32 %v10794_v16, %v9162_v46 }
 0x1db   :  { %v706_v21 = vsub.f32 1.5, %v705_v53  ;;  %v670_v53 = vsub.f32 %v11924_v63, %v12062_v23 }
 0x1dc   :  { %v697_v20 = vmul.f32 %v11217_v62, %v696_v30  ;;  %1671 = vmatpush.bf16.msra.mxu2 %v9165_v29 }
 0x1dd   :  { %v707_v27 = vmul.f32 %v11219_v32, %v706_v21  ;;  %v9037_v21 = vor.u32 %v10762_v10, %v9034_v9 }
 0x1de   :  { %v12139_v16 = vsel %vm12121_vm4, %v11217_v62, %v697_v20 }
 0x1df   :  { %v742_v46 = vmul.f32 %v12139_v16, %v688_v48  ;;  %v12150_v30 = vsel %vm710_vm6, %v11219_v32, %v707_v27  ;;  %v712_v62 = vmul.f32 %v12139_v16, %v658_v60  ;;  %v714_v35 = vmul.f32 %v12139_v16, %v660_v13  ;;  %1622 = vmatpush.bf16.msrb.mxu1 %v9037_v21 }
 0x1e0   :  { %v743_v26 = vmul.f32 %v12150_v30, %v689_v57  ;;  %v713_v25 = vmul.f32 %v12150_v30, %v659_v24  ;;  %v715_v9 = vmul.f32 %v12150_v30, %v661_v3  ;;  %v716_v17 = vmul.f32 %v12139_v16, %v662_v55 }
 0x1e1   :  { %v780_v48 = vmul.f32 %v12089_v38, %v742_v46  ;;  %v750_v27 = vmul.f32 %v12089_v38, %v712_v62  ;;  %v752_v32 = vmul.f32 %v12089_v38, %v714_v35  ;;  %v718_v0 = vmul.f32 %v12139_v16, %v664_v51 }
 0x1e2   :  { %v781_v59 = vmul.f32 %v12092_v19, %v743_v26  ;;  %v751_v57 = vmul.f32 %v12092_v19, %v713_v25  ;;  %v753_v10 = vmul.f32 %v12092_v19, %v715_v9  ;;  %v754_v60 = vmul.f32 %v12089_v38, %v716_v17 }
 0x1e3   :  { %v12170_v13 = vadd.f32 %v12096_v40, %v780_v48  ;;  %v789_v24 = vadd.f32 %v12096_v40, %v750_v27  ;;  %v791_v3 = vadd.f32 %v12096_v40, %v752_v32  ;;  %v756_v55 = vmul.f32 %v12089_v38, %v718_v0 }
 0x1e4   :  { %v12176_v51 = vadd.f32 %v12098_v44, %v781_v59  ;;  %v790_v8 = vadd.f32 %v12098_v44, %v751_v57  ;;  %v792_v20 = vadd.f32 %v12098_v44, %v753_v10  ;;  %v793_v29 = vadd.f32 %v12096_v40, %v754_v60 }
 0x1e5   :  { %vm821_vm7 = vcmp.gt.f32.partialorder %v789_v24, 0.0  ;;  %vm823_vm8 = vcmp.gt.f32.partialorder %v791_v3, 0.0  ;;  %v853_v21 = vmul.f32 0.2, %v789_v24  ;;  %v855_v18 = vmul.f32 0.2, %v791_v3 }
 0x1e6   :  { %vm822_vm9 = vcmp.gt.f32.partialorder %v790_v8, 0.0  ;;  %vm824_vm10 = vcmp.gt.f32.partialorder %v792_v20, 0.0  ;;  %v854_v46 = vmul.f32 0.2, %v790_v8  ;;  %v856_v62 = vmul.f32 0.2, %v792_v20 }
 0x1e7   :  { %v885_v35 = vsel %vm821_vm7, %v789_v24, %v853_v21  ;;  %v887_v26 = vsel %vm823_vm8, %v791_v3, %v855_v18  ;;  %v795_v25 = vadd.f32 %v12096_v40, %v756_v55  ;;  %vm825_vm11 = vcmp.gt.f32.partialorder %v793_v29, 0.0  ;;  %v10790_v3 = vld [vmem:[#allocation2 + $0x1ac] sm:$0xf]  ;;  %v9016_v55 = vld [vmem:[#allocation2 + $0xa8] sm:$0xf] }
 0x1e8   :  { %v12182_v9 = vpack.c.bf16 %v887_v26, %v885_v35  ;;  %v886_v17 = vsel %vm822_vm9, %v790_v8, %v854_v46  ;;  %v888_v48 = vsel %vm824_vm10, %v792_v20, %v856_v62  ;;  %v857_v27 = vmul.f32 0.2, %v793_v29  ;;  %v10760_v21 = vld [vmem:[#allocation2 + $0xb4] sm:$0xf0] }
 0x1e9   :  { %v12184_v32 = vpack.c.bf16 %v888_v48, %v886_v17  ;;  %vm827_vm12 = vcmp.gt.f32.partialorder %v795_v25, 0.0  ;;  %v859_v0 = vmul.f32 0.2, %v795_v25  ;;  %v717_v59 = vmul.f32 %v12150_v30, %v663_v39  ;;  %v10758_v17 = vld [vmem:[#allocation2 + $0xac] sm:$0xf] }
 0x1ea   :  { %1335 = vmatmul.bf16.vlgmr.msrb.gmra.mxu3 %v12182_v9  ;;  %1433 = vmatmul.bf16.vlgmr.msra.gmra.mxu1 %v12182_v9  ;;  %v719_v57 = vmul.f32 %v12150_v30, %v665_v11  ;;  %v17205_v10 = vsub.f32 %v11902_v2, %v12062_v23  ;;  %v674_v24 = vsub.f32 %v11945_v37, %v12062_v23  ;;  %v9146_v2 = vld [vmem:[#allocation2 + $0x1b8] sm:$0xf0] }
 0x1eb   :  { %1384 = vmatmul.bf16.vlgmr.msrb.gmra.mxu0 %v12184_v32  ;;  %1482 = vmatmul.bf16.vlgmr.msrb.gmra.mxu2 %v12184_v32  ;;  %v889_v12 = vsel %vm825_vm11, %v793_v29, %v857_v27  ;;  %v755_v39 = vmul.f32 %v12092_v19, %v717_v59  ;;  %v722_v11 = vmul.f32 %v12139_v16, %v17206_v15 }
 0x1ec   :  { %v720_v60 = vmul.f32 %v12139_v16, %v17205_v10  ;;  %v891_v8 = vsel %vm827_vm12, %v795_v25, %v859_v0  ;;  %v757_v37 = vmul.f32 %v12092_v19, %v719_v57  ;;  %v721_v29 = vmul.f32 %v12150_v30, %v667_v52  ;;  %v9018_v52 = vld [vmem:[#allocation2 + $0xb8] sm:$0xf0] }
 0x1ed   :  { %v794_v18 = vadd.f32 %v12098_v44, %v755_v39  ;;  %v760_v54 = vmul.f32 %v12089_v38, %v722_v11  ;;  %v723_v46 = vmul.f32 %v12150_v30, %v669_v58  ;;  %v9149_v62 = vor.u32 %v10790_v3, %v9146_v2  ;;  %v10792_v39 = vld [vmem:[#allocation2 + $0x1b4] sm:$0xf0] }
 0x1ee   :  { %v758_v20 = vmul.f32 %v12089_v38, %v720_v60  ;;  %v796_v35 = vadd.f32 %v12098_v44, %v757_v37  ;;  %v759_v25 = vmul.f32 %v12092_v19, %v721_v29  ;;  %v9017_v41 = vor.u32 %v10760_v21, %v9016_v55 }
 0x1ef   :  { %vm826_vm13 = vcmp.gt.f32.partialorder %v794_v18, 0.0  ;;  %v858_v48 = vmul.f32 0.2, %v794_v18  ;;  %v799_v27 = vadd.f32 %v12096_v40, %v760_v54  ;;  %v761_v0 = vmul.f32 %v12092_v19, %v723_v46  ;;  %1672 = vmatpush.bf16.msra.mxu2 %v9149_v62 }
 0x1f0   :  { %v797_v26 = vadd.f32 %v12096_v40, %v758_v20  ;;  %vm828_vm14 = vcmp.gt.f32.partialorder %v796_v35, 0.0  ;;  %v860_v58 = vmul.f32 0.2, %v796_v35  ;;  %1525 = vmatpush.bf16.msra.mxu3 %v9017_v41  ;;  %v798_v60 = vadd.f32 %v12098_v44, %v759_v25 }
 0x1f1   :  { %v890_v57 = vsel %vm826_vm13, %v794_v18, %v858_v48  ;;  %vm831_vm0 = vcmp.gt.f32.partialorder %v799_v27, 0.0  ;;  %v863_v10 = vmul.f32 0.2, %v799_v27  ;;  %v800_v11 = vadd.f32 %v12098_v44, %v761_v0 }
 0x1f2   :  { %vm829_vm15 = vcmp.gt.f32.partialorder %v797_v26, 0.0  ;;  %v861_v59 = vmul.f32 0.2, %v797_v26  ;;  %v892_v15 = vsel %vm828_vm14, %v796_v35, %v860_v58  ;;  %v9021_v3 = vor.u32 %v10758_v17, %v9018_v52 }
 0x1f3   :  { %v676_v2 = vsub.f32 %v11963_v31, %v12062_v23  ;;  %v12232_v55 = vpack.c.bf16 %v891_v8, %v889_v12  ;;  %v675_v20 = vsub.f32 %v11956_v22, %v12064_v36  ;;  %v677_v29 = vsub.f32 %v11968_v43, %v12064_v36 }
 0x1f4   :  { %v893_v37 = vsel %vm829_vm15, %v797_v26, %v861_v59  ;;  %v12238_v21 = vpack.c.bf16 %v892_v15, %v890_v57  ;;  %v895_v18 = vsel %vm831_vm0, %v799_v27, %v863_v10  ;;  %vm830_vm1 = vcmp.gt.f32.partialorder %v798_v60, 0.0  ;;  %1623 = vmatpush.bf16.msrb.mxu1 %v9021_v3  ;;  %v9000_v15 = vld [vmem:[#allocation2 + $0x88] sm:$0xf] }
 0x1f5   :  { %v9145_v54 = vor.u32 %v10792_v39, %v9144_v50  ;;  %v862_v46 = vmul.f32 0.2, %v798_v60  ;;  %v724_v31 = vmul.f32 %v12139_v16, %v670_v53  ;;  %v726_v22 = vmul.f32 %v12139_v16, %v672_v4  ;;  %v9130_v39 = vld [vmem:[#allocation2 + $0x198] sm:$0xf0] }
 0x1f6   :  { %v17207_v43 = vsub.f32 %v11931_v1, %v12064_v36  ;;  %vm832_vm2 = vcmp.gt.f32.partialorder %v800_v11, 0.0  ;;  %v727_v8 = vmul.f32 %v12150_v30, %v673_v45  ;;  %v728_v63 = vmul.f32 %v12139_v16, %v674_v24 }
 0x1f7   :  { %1574 = vmatpush.bf16.msra.mxu0 %v9145_v54  ;;  %v730_v53 = vmul.f32 %v12139_v16, %v676_v2  ;;  %v864_v62 = vmul.f32 0.2, %v800_v11  ;;  %v762_v7 = vmul.f32 %v12089_v38, %v724_v31  ;;  %v764_v4 = vmul.f32 %v12089_v38, %v726_v22  ;;  %v10754_v31 = vld [vmem:[#allocation2 + $0x8c] sm:$0xf]  ;;  %v9002_v22 = vld [vmem:[#allocation2 + $0x98] sm:$0xf0] }
 0x1f8   :  { %v725_v12 = vmul.f32 %v12150_v30, %v17207_v43  ;;  %v765_v35 = vmul.f32 %v12092_v19, %v727_v8  ;;  %v766_v26 = vmul.f32 %v12089_v38, %v728_v63  ;;  %v729_v42 = vmul.f32 %v12150_v30, %v675_v20  ;;  %v9128_v63 = vld [vmem:[#allocation2 + $0x188] sm:$0xf] }
 0x1f9   :  { %v768_v25 = vmul.f32 %v12089_v38, %v730_v53  ;;  %v801_v45 = vadd.f32 %v12096_v40, %v762_v7  ;;  %v803_v24 = vadd.f32 %v12096_v40, %v764_v4  ;;  %v731_v17 = vmul.f32 %v12150_v30, %v677_v29  ;;  %v10788_v53 = vld [vmem:[#allocation2 + $0x194] sm:$0xf0] }
 0x1fa   :  { %v763_v1 = vmul.f32 %v12092_v19, %v725_v12  ;;  %1340 = vmatmul.bf16.gmra.mxu3 %v12232_v55  ;;  %1438 = vmatmul.bf16.gmra.mxu1 %v12232_v55  ;;  %v894_v52 = vsel %vm830_vm1, %v798_v60, %v862_v46  ;;  %v805_v48 = vadd.f32 %v12096_v40, %v766_v26  ;;  %v10786_v60 = vld [vmem:[#allocation2 + $0x18c] sm:$0xf]  ;;  %v10756_v46 = vld [vmem:[#allocation2 + $0x94] sm:$0xf0]  ;;  %vm851_vm13 = vcmp.gt.f32.partialorder %v12170_v13, 0.0 }
 0x1fb   :  { %v807_v27 = vadd.f32 %v12096_v40, %v768_v25  ;;  %1389 = vmatmul.bf16.gmra.mxu0 %v12238_v21  ;;  %1487 = vmatmul.bf16.gmra.mxu2 %v12238_v21  ;;  %v896_v0 = vsel %vm832_vm2, %v800_v11, %v864_v62  ;;  %vm833_vm3 = vcmp.gt.f32.partialorder %v801_v45, 0.0  ;;  %v865_v50 = vmul.f32 0.2, %v801_v45 }
 0x1fc   :  { %v12268_v41 = vadd.f32 %v12098_v44, %v763_v1  ;;  %v867_v58 = vmul.f32 0.2, %v803_v24  ;;  %vm835_vm4 = vcmp.gt.f32.partialorder %v803_v24, 0.0  ;;  %v678_v57 = vsub.f32 %v11979_v47, %v12062_v23 }
 0x1fd   :  { %v12285_v10 = vadd.f32 %v12098_v44, %v765_v35  ;;  %v767_v3 = vmul.f32 %v12092_v19, %v729_v42  ;;  %v769_v11 = vmul.f32 %v12092_v19, %v731_v17  ;;  %v679_v2 = vsub.f32 %v11986_v49, %v12064_v36 }
 0x1fe   :  { %v12280_v59 = vmul.f32 0.2, %v12268_v41  ;;  %v12291_v20 = vpack.c.bf16 %v895_v18, %v893_v37  ;;  %v12293_v29 = vpack.c.bf16 %v896_v0, %v894_v52  ;;  %v12295_v54 = vsel %vm833_vm3, %v801_v45, %v865_v50 }
 0x1ff   :  { %v9133_v47 = vor.u32 %v10786_v60, %v9130_v39  ;;  %v12298_v43 = vsel %vm835_vm4, %v803_v24, %v867_v58  ;;  %v9001_v12 = vor.u32 %v10756_v46, %v9000_v15  ;;  %v9005_v8 = vor.u32 %v10754_v31, %v9002_v22 }
 0x200   :  { %vm837_vm5 = vcmp.gt.f32.partialorder %v805_v48, 0.0  ;;  %vm834_vm6 = vcmp.gt.f32.partialorder %v12268_v41, 0.0  ;;  %v9129_v49 = vor.u32 %v10788_v53, %v9128_v63  ;;  %vm839_vm7 = vcmp.gt.f32.partialorder %v807_v27, 0.0 }
 0x201   :  { %1673 = vmatpush.bf16.msra.mxu2 %v9133_v47  ;;  %v869_v37 = vmul.f32 0.2, %v805_v48  ;;  %v871_v18 = vmul.f32 0.2, %v807_v27  ;;  %v12302_v62 = vmul.f32 0.2, %v12285_v10  ;;  %1526 = vmatpush.bf16.msra.mxu3 %v9001_v12  ;;  %v806_v7 = vadd.f32 %v12098_v44, %v767_v3 }
 0x202   :  { %1624 = vmatpush.bf16.msrb.mxu1 %v9005_v8  ;;  %v808_v4 = vadd.f32 %v12098_v44, %v769_v11  ;;  %v732_v1 = vmul.f32 %v12139_v16, %v678_v57  ;;  %1575 = vmatpush.bf16.msra.mxu0 %v9129_v49  ;;  %v17208_v25 = vsub.f32 %v11993_v6, %v12062_v23  ;;  %vm836_vm14 = vcmp.gt.f32.partialorder %v12285_v10, 0.0 }
 0x203   :  { %v901_v35 = vsel %vm837_vm5, %v805_v48, %v869_v37  ;;  %v903_v26 = vsel %vm839_vm7, %v807_v27, %v871_v18  ;;  %v733_v45 = vmul.f32 %v12150_v30, %v679_v2  ;;  %vm838_vm8 = vcmp.gt.f32.partialorder %v806_v7, 0.0 }
 0x204   :  { %v734_v42 = vmul.f32 %v12139_v16, %v17208_v25  ;;  %v12312_v24 = vpack.c.bf16 %v903_v26, %v901_v35  ;;  %vm840_vm9 = vcmp.gt.f32.partialorder %v808_v4, 0.0  ;;  %v870_v17 = vmul.f32 0.2, %v806_v7  ;;  %v8984_v35 = vld [vmem:[#allocation2 + $0x68] sm:$0xf] }
 0x205   :  { %v872_v52 = vmul.f32 0.2, %v808_v4  ;;  %v770_v0 = vmul.f32 %v12089_v38, %v732_v1  ;;  %v17209_v48 = vsub.f32 %v11998_v28, %v12064_v36  ;;  %v771_v58 = vmul.f32 %v12092_v19, %v733_v45  ;;  %v9114_v1 = vld [vmem:[#allocation2 + $0x178] sm:$0xf0] }
 0x206   :  { %v772_v50 = vmul.f32 %v12089_v38, %v734_v42  ;;  %v902_v6 = vsel %vm838_vm8, %v806_v7, %v870_v17  ;;  %v17210_v57 = vsub.f32 %v12004_v5, %v12062_v23  ;;  %v17211_v39 = vsub.f32 %v12016_v56, %v12062_v23  ;;  %v10752_v17 = vld [vmem:[#allocation2 + $0x74] sm:$0xf0] }
 0x207   :  { %v735_v27 = vmul.f32 %v12150_v30, %v17209_v48  ;;  %v904_v3 = vsel %vm840_vm9, %v808_v4, %v872_v52  ;;  %v809_v11 = vadd.f32 %v12096_v40, %v770_v0  ;;  %v810_v46 = vadd.f32 %v12098_v44, %v771_v58  ;;  %v10782_v4 = vld [vmem:[#allocation2 + $0x16c] sm:$0xf]  ;;  %v8986_v0 = vld [vmem:[#allocation2 + $0x78] sm:$0xf0]  ;;  %v9112_v58 = vld [vmem:[#allocation2 + $0x168] sm:$0xf] }
 0x208   :  { %v736_v60 = vmul.f32 %v12139_v16, %v17210_v57  ;;  %v738_v15 = vmul.f32 %v12139_v16, %v17211_v39  ;;  %v811_v28 = vadd.f32 %v12096_v40, %v772_v50  ;;  %v12332_v47 = vpack.c.bf16 %v904_v3, %v902_v6  ;;  %v10750_v52 = vld [vmem:[#allocation2 + $0x6c] sm:$0xf]  ;;  %v10784_v57 = vld [vmem:[#allocation2 + $0x174] sm:$0xf0] }
 0x209   :  { %v773_v2 = vmul.f32 %v12092_v19, %v735_v27  ;;  %vm841_vm10 = vcmp.gt.f32.partialorder %v809_v11, 0.0  ;;  %v873_v56 = vmul.f32 0.2, %v809_v11  ;;  %vm842_vm12 = vcmp.gt.f32.partialorder %v810_v46, 0.0 }
 0x20a   :  { %v774_v5 = vmul.f32 %v12089_v38, %v736_v60  ;;  %v776_v31 = vmul.f32 %v12089_v38, %v738_v15  ;;  %vm843_vm11 = vcmp.gt.f32.partialorder %v811_v28, 0.0  ;;  %v875_v22 = vmul.f32 0.2, %v811_v28  ;;  %1345 = vmatmul.bf16.gmra.mxu3 %v12291_v20  ;;  %1443 = vmatmul.bf16.gmra.mxu1 %v12291_v20 }
 0x20b   :  { %v812_v12 = vadd.f32 %v12098_v44, %v773_v2  ;;  %v874_v8 = vmul.f32 0.2, %v810_v46  ;;  %v905_v53 = vsel %vm841_vm10, %v809_v11, %v873_v56  ;;  %v883_v18 = vmul.f32 0.2, %v12170_v13  ;;  %1394 = vmatmul.bf16.gmra.mxu0 %v12293_v29  ;;  %1492 = vmatmul.bf16.gmra.mxu2 %v12293_v29 }
 0x20c   :  { %v813_v63 = vadd.f32 %v12096_v40, %v774_v5  ;;  %v907_v49 = vsel %vm843_vm11, %v811_v28, %v875_v22  ;;  %v815_v37 = vadd.f32 %v12096_v40, %v776_v31  ;;  %v12351_v7 = vsel %vm834_vm6, %v12268_v41, %v12280_v59 }
 0x20d   :  { %v12353_v26 = vpack.c.bf16 %v907_v49, %v905_v53  ;;  %v17212_v25 = vsub.f32 %v12010_v14, %v12064_v36  ;;  %v9117_v45 = vor.u32 %v10782_v4, %v9114_v1  ;;  %v906_v50 = vsel %vm842_vm12, %v810_v46, %v874_v8 }
 0x20e   :  { %v17213_v41 = vsub.f32 %v12022_v34, %v12064_v36  ;;  %v17214_v48 = vsub.f32 %v12028_v33, %v12062_v23  ;;  %v8985_v6 = vor.u32 %v10752_v17, %v8984_v35  ;;  %v8989_v14 = vor.u32 %v10750_v52, %v8986_v0  ;;  %v8970_v17 = vld [vmem:[#allocation2 + $0x58] sm:$0xf0]  ;;  %v9096_v0 = vld [vmem:[#allocation2 + $0x148] sm:$0xf] }
 0x20f   :  { %v737_v42 = vmul.f32 %v12150_v30, %v17212_v25  ;;  %vm844_vm15 = vcmp.gt.f32.partialorder %v812_v12, 0.0  ;;  %vm845_vm0 = vcmp.gt.f32.partialorder %v813_v63, 0.0  ;;  %1674 = vmatpush.bf16.msra.mxu2 %v9117_v45  ;;  %v9113_v60 = vor.u32 %v10784_v57, %v9112_v58  ;;  %v10742_v58 = vld [vmem:[#allocation2 + $0x2c] sm:$0xf]  ;;  %v8954_v57 = vld [vmem:[#allocation2 + $0x38] sm:$0xf0] }
 0x210   :  { %v739_v59 = vmul.f32 %v12150_v30, %v17213_v41  ;;  %v740_v27 = vmul.f32 %v12139_v16, %v17214_v48  ;;  %v876_v39 = vmul.f32 0.2, %v812_v12  ;;  %vm847_vm1 = vcmp.gt.f32.partialorder %v815_v37, 0.0  ;;  %1527 = vmatpush.bf16.msra.mxu3 %v8985_v6  ;;  %1625 = vmatpush.bf16.msrb.mxu1 %v8989_v14  ;;  %v9082_v48 = vld [vmem:[#allocation2 + $0x138] sm:$0xf0] }
 0x211   :  { %v877_v15 = vmul.f32 0.2, %v813_v63  ;;  %v879_v34 = vmul.f32 0.2, %v815_v37  ;;  %v775_v3 = vmul.f32 %v12092_v19, %v737_v42  ;;  %1576 = vmatpush.bf16.msra.mxu0 %v9113_v60  ;;  %v17215_v28 = vsub.f32 %v12034_v61, %v12064_v36  ;;  %v8968_v42 = vld [vmem:[#allocation2 + $0x48] sm:$0xf] }
 0x212   :  { %v777_v33 = vmul.f32 %v12092_v19, %v739_v59  ;;  %v778_v23 = vmul.f32 %v12089_v38, %v740_v27  ;;  %v908_v16 = vsel %vm844_vm15, %v812_v12, %v876_v39  ;;  %v884_v46 = vmul.f32 0.2, %v12176_v51  ;;  %v10774_v59 = vld [vmem:[#allocation2 + $0x12c] sm:$0xf]  ;;  %v8952_v27 = vld [vmem:[#allocation2 + $0x28] sm:$0xf] }
 0x213   :  { %v909_v11 = vsel %vm845_vm0, %v813_v63, %v877_v15  ;;  %v741_v2 = vmul.f32 %v12150_v30, %v17215_v28  ;;  %v12376_v5 = vpack.c.bf16 %v908_v16, %v906_v50  ;;  %v911_v31 = vsel %vm847_vm1, %v815_v37, %v879_v34  ;;  %v10780_v50 = vld [vmem:[#allocation2 + $0x154] sm:$0xf0]  ;;  %v9080_v15 = vld [vmem:[#allocation2 + $0x128] sm:$0xf] }
 0x214   :  { %v814_v56 = vadd.f32 %v12098_v44, %v775_v3  ;;  %v816_v22 = vadd.f32 %v12098_v44, %v777_v33  ;;  %v12380_v8 = vpack.c.bf16 %v911_v31, %v909_v11  ;;  %v817_v38 = vadd.f32 %v12096_v40, %v778_v23  ;;  %v10744_v14 = vld [vmem:[#allocation2 + $0x34] sm:$0xf0]  ;;  %v10770_v33 = vld [vmem:[#allocation2 + $0x10c] sm:$0xf]  ;;  %v9066_v23 = vld [vmem:[#allocation2 + $0x118] sm:$0xf0] }
 0x215   :  { %v779_v12 = vmul.f32 %v12092_v19, %v741_v2  ;;  %vm852_vm2 = vcmp.gt.f32.partialorder %v12176_v51, 0.0  ;;  %v915_v63 = vsel %vm851_vm13, %v12170_v13, %v883_v18  ;;  %v900_v40 = vsel %vm836_vm14, %v12285_v10, %v12302_v62  ;;  %v9098_v62 = vld [vmem:[#allocation2 + $0x158] sm:$0xf0]  ;;  %v10776_v34 = vld [vmem:[#allocation2 + $0x134] sm:$0xf0] }
 0x216   :  { %vm846_vm3 = vcmp.gt.f32.partialorder %v814_v56, 0.0  ;;  %vm848_vm4 = vcmp.gt.f32.partialorder %v816_v22, 0.0  ;;  %v878_v61 = vmul.f32 0.2, %v814_v56  ;;  %v880_v36 = vmul.f32 0.2, %v816_v22 }
 0x217   :  { %vm849_vm5 = vcmp.gt.f32.partialorder %v817_v38, 0.0  ;;  %v881_v30 = vmul.f32 0.2, %v817_v38  ;;  %v818_v53 = vadd.f32 %v12098_v44, %v779_v12  ;;  %v916_v37 = vsel %vm852_vm2, %v12176_v51, %v884_v46  ;;  %v10778_v51 = vld [vmem:[#allocation2 + $0x14c] sm:$0xf] }
 0x218   :  { %v910_v19 = vsel %vm846_vm3, %v814_v56, %v878_v61  ;;  %v912_v49 = vsel %vm848_vm4, %v816_v22, %v880_v36  ;;  %v12400_v13 = vpack.c.bf16 %v12298_v43, %v12295_v54  ;;  %v12403_v18 = vpack.c.bf16 %v900_v40, %v12351_v7  ;;  %v10748_v54 = vld [vmem:[#allocation2 + $0x54] sm:$0xf0]  ;;  %v10746_v43 = vld [vmem:[#allocation2 + $0x4c] sm:$0xf]  ;;  %v8936_v16 = vld [vmem:[#allocation2 + $0x8] sm:$0xf] }
 0x219   :  { %v12394_v4 = vpack.c.bf16 %v912_v49, %v910_v19  ;;  %v913_v1 = vsel %vm849_vm5, %v817_v38, %v881_v30  ;;  %vm850_vm6 = vcmp.gt.f32.partialorder %v818_v53, 0.0  ;;  %v882_v35 = vmul.f32 0.2, %v818_v53  ;;  %v10740_v28 = vld [vmem:[#allocation2 + $0x14] sm:$0xf0] }
 0x21a   :  { %v12396_v25 = vpack.c.bf16 %v915_v63, %v913_v1  ;;  %1350 = vmatmul.bf16.gmra.mxu3 %v12400_v13  ;;  %1448 = vmatmul.bf16.gmra.mxu1 %v12400_v13  ;;  %v9101_v45 = vor.u32 %v10778_v51, %v9098_v62  ;;  %v8969_v52 = vor.u32 %v10748_v54, %v8968_v42  ;;  %v10738_v2 = vld [vmem:[#allocation2 + $0xc] sm:$0xf]  ;;  %v8938_v46 = vld [vmem:[#allocation2 + $0x18] sm:$0xf0]  ;;  %v9064_v22 = vld [vmem:[#allocation2 + $0x108] sm:$0xf] }
 0x21b   :  { %v914_v44 = vsel %vm850_vm6, %v818_v53, %v882_v35  ;;  %1399 = vmatmul.bf16.gmra.mxu0 %v12403_v18  ;;  %1497 = vmatmul.bf16.gmra.mxu2 %v12403_v18  ;;  %v8973_v7 = vor.u32 %v10746_v43, %v8970_v17  ;;  %v9097_v41 = vor.u32 %v10780_v50, %v9096_v0  ;;  %v10772_v38 = vld [vmem:[#allocation2 + $0x114] sm:$0xf0]  ;;  %v12427_v61 = vld [vmem:[#allocation9] sm:$0xf] }
 0x21c   :  { %v12405_v10 = vpack.c.bf16 %v916_v37, %v914_v44  ;;  %1675 = vmatpush.bf16.msra.mxu2 %v9101_v45  ;;  %1528 = vmatpush.bf16.msra.mxu3 %v8969_v52  ;;  %v9085_v6 = vor.u32 %v10774_v59, %v9082_v48  ;;  %v8953_v60 = vor.u32 %v10744_v14, %v8952_v27  ;;  %v12430_v63 = vperm.slane %v12427_v61, 1 }
 0x21d   :  { %1626 = vmatpush.bf16.msrb.mxu1 %v8973_v7  ;;  %1577 = vmatpush.bf16.msra.mxu0 %v9097_v41  ;;  %v8957_v39 = vor.u32 %v10742_v58, %v8954_v57  ;;  %v9081_v3 = vor.u32 %v10776_v34, %v9080_v15  ;;  %v9069_v11 = vor.u32 %v10770_v33, %v9066_v23  ;;  %v12435_v53 = vperm.slane %v12427_v61, 0 }
 0x21e   :  { %v8937_v31 = vor.u32 %v10740_v28, %v8936_v16  ;;  %v8941_v56 = vor.u32 %v10738_v2, %v8938_v46  ;;  %v9065_v12 = vor.u32 %v10772_v38, %v9064_v22 }
 0x220   :  { %1676 = vmatpush.bf16.msra.mxu2 %v9085_v6  ;;  %1529 = vmatpush.bf16.msra.mxu3 %v8953_v60 }
 0x221   :  { %1627 = vmatpush.bf16.msrb.mxu1 %v8957_v39  ;;  %1578 = vmatpush.bf16.msra.mxu0 %v9081_v3 }
 0x224   :  { %1677 = vmatpush.bf16.msra.mxu2 %v9069_v11  ;;  %1530 = vmatpush.bf16.msra.mxu3 %v8937_v31 }
 0x225   :  { %1628 = vmatpush.bf16.msrb.mxu1 %v8941_v56  ;;  %1579 = vmatpush.bf16.msra.mxu0 %v9065_v12 }
 0x22a   :  { %1355 = vmatmul.bf16.gmra.mxu3 %v12312_v24  ;;  %1453 = vmatmul.bf16.gmra.mxu1 %v12312_v24 }
 0x22b   :  { %1404 = vmatmul.bf16.gmra.mxu0 %v12332_v47  ;;  %1502 = vmatmul.bf16.gmra.mxu2 %v12332_v47 }
 0x23a   :  { %1360 = vmatmul.bf16.gmra.mxu3 %v12353_v26  ;;  %1458 = vmatmul.bf16.gmra.mxu1 %v12353_v26 }
 0x23b   :  { %1409 = vmatmul.bf16.gmra.mxu0 %v12376_v5  ;;  %1507 = vmatmul.bf16.gmra.mxu2 %v12376_v5 }
 0x24a   :  { %1365 = vmatmul.bf16.gmra.mxu3 %v12380_v8  ;;  %1463 = vmatmul.bf16.gmra.mxu1 %v12380_v8 }
 0x24b   :  { %1414 = vmatmul.bf16.gmra.mxu0 %v12394_v4  ;;  %1512 = vmatmul.bf16.gmra.mxu2 %v12394_v4 }
 0x25a   :  { %1370 = vmatmul.bf16.gmra.mxu3 %v12396_v25  ;;  %1468 = vmatmul.bf16.gmra.mxu1 %v12396_v25 }
 0x25b   :  { %1419 = vmatmul.bf16.gmra.mxu0 %v12405_v10  ;;  %1517 = vmatmul.bf16.gmra.mxu2 %v12405_v10 }
 0x267   :  { %v1434_v36 = vpop.f32.mrf.mxu1 }
 0x268   :  { %v1385_v30 = vpop.f32.mrf.mxu0  ;;  %v1435_v40 = vadd.f32 %v1434_v36, %v12430_v63 }
 0x26a   :  { %1531 = vmatmul.bf16.vlgmr.msra.gmra.mxu3 %v12182_v9  ;;  %1629 = vmatmul.bf16.vlgmr.msrb.gmra.mxu1 %v12182_v9 }
 0x26b   :  { %1580 = vmatmul.bf16.vlgmr.msra.gmra.mxu0 %v12184_v32  ;;  %1678 = vmatmul.bf16.vlgmr.msra.gmra.mxu2 %v12184_v32 }
 0x26d   :  { %v1336_v19 = vpop.f32.mrf.mxu3 }
 0x26e   :  { %v1337_v49 = vadd.f32 %v1336_v19, %v12435_v53  ;;  %v1483_v37 = vpop.f32.mrf.mxu2 }
 0x26f   :  { %v12441_v1 = vadd.f32 %v1483_v37, %v1435_v40  ;;  %v1436_v35 = vpop.f32.mrf.mxu1 }
 0x270   :  { %v12443_v44 = vadd.f32 %v1385_v30, %v1337_v49  ;;  %v1387_v51 = vpop.f32.mrf.mxu0  ;;  %v1437_v9 = vadd.f32 %v1436_v35, %v12430_v63 }
 0x275   :  { %v1338_v62 = vpop.f32.mrf.mxu3 }
 0x276   :  { %v1339_v42 = vadd.f32 %v1338_v62, %v12435_v53  ;;  %v1485_v45 = vpop.f32.mrf.mxu2 }
 0x277   :  { %v12447_v54 = vadd.f32 %v1485_v45, %v1437_v9  ;;  %v1439_v32 = vpop.f32.mrf.mxu1 }
 0x278   :  { %v12449_v43 = vadd.f32 %v1387_v51, %v1339_v42  ;;  %v1390_v17 = vpop.f32.mrf.mxu0  ;;  %v1440_v52 = vadd.f32 %v1439_v32, %v12430_v63 }
 0x27a   :  { %1536 = vmatmul.bf16.gmra.mxu3 %v12232_v55  ;;  %1634 = vmatmul.bf16.gmra.mxu1 %v12232_v55 }
 0x27b   :  { %1585 = vmatmul.bf16.gmra.mxu0 %v12238_v21  ;;  %1683 = vmatmul.bf16.gmra.mxu2 %v12238_v21 }
 0x27d   :  { %v1341_v7 = vpop.f32.mrf.mxu3 }
 0x27e   :  { %v1342_v0 = vadd.f32 %v1341_v7, %v12435_v53  ;;  %v1488_v50 = vpop.f32.mrf.mxu2 }
 0x27f   :  { %v12457_v41 = vadd.f32 %v1488_v50, %v1440_v52  ;;  %v1441_v59 = vpop.f32.mrf.mxu1 }
 0x280   :  { %v12459_v48 = vadd.f32 %v1390_v17, %v1342_v0  ;;  %v1392_v27 = vpop.f32.mrf.mxu0  ;;  %v1442_v6 = vadd.f32 %v1441_v59, %v12430_v63  ;;  %v1807_v17 = vmul.f32 %v12443_v44, %v12443_v44 }
 0x282   :  { %v1815_v52 = vmul.f32 %v12459_v48, %v12459_v48 }
 0x285   :  { %v1343_v14 = vpop.f32.mrf.mxu3 }
 0x286   :  { %v1344_v55 = vadd.f32 %v1343_v14, %v12435_v53  ;;  %v1490_v58 = vpop.f32.mrf.mxu2 }
 0x287   :  { %v12463_v57 = vadd.f32 %v1490_v58, %v1442_v6  ;;  %v1444_v21 = vpop.f32.mrf.mxu1 }
 0x288   :  { %v12465_v60 = vadd.f32 %v1392_v27, %v1344_v55  ;;  %v1395_v39 = vpop.f32.mrf.mxu0  ;;  %v1445_v15 = vadd.f32 %v1444_v21, %v12430_v63 }
 0x28a   :  { %1541 = vmatmul.bf16.gmra.mxu3 %v12291_v20  ;;  %1639 = vmatmul.bf16.gmra.mxu1 %v12291_v20  ;;  %v1819_v27 = vmul.f32 %v12465_v60, %v12465_v60 }
 0x28b   :  { %1590 = vmatmul.bf16.gmra.mxu0 %v12293_v29  ;;  %1688 = vmatmul.bf16.gmra.mxu2 %v12293_v29 }
 0x28d   :  { %v1346_v34 = vpop.f32.mrf.mxu3 }
 0x28e   :  { %v1347_v3 = vadd.f32 %v1346_v34, %v12435_v53  ;;  %v1493_v33 = vpop.f32.mrf.mxu2 }
 0x28f   :  { %v12473_v23 = vadd.f32 %v1493_v33, %v1445_v15  ;;  %v12475_v16 = vpop.f32.mrf.mxu1 }
 0x290   :  { %v12477_v11 = vadd.f32 %v1395_v39, %v1347_v3  ;;  %v1397_v28 = vpop.f32.mrf.mxu0 }
 0x292   :  { %v1823_v21 = vmul.f32 %v12477_v11, %v12477_v11 }
 0x295   :  { %v1348_v2 = vpop.f32.mrf.mxu3 }
 0x296   :  { %v12479_v46 = vpop.f32.mrf.mxu2 }
 0x297   :  { %v12481_v20 = vpop.f32.mrf.mxu1 }
 0x298   :  { %v1400_v31 = vpop.f32.mrf.mxu0 }
 0x29a   :  { %1546 = vmatmul.bf16.gmra.mxu3 %v12400_v13  ;;  %1644 = vmatmul.bf16.gmra.mxu1 %v12400_v13 }
 0x29b   :  { %1595 = vmatmul.bf16.gmra.mxu0 %v12403_v18  ;;  %1693 = vmatmul.bf16.gmra.mxu2 %v12403_v18 }
 0x29d   :  { %v1351_v29 = vpop.f32.mrf.mxu3 }
 0x29e   :  { %v12487_v56 = vpop.f32.mrf.mxu2  ;;  %v1352_v7 = vadd.f32 %v1351_v29, %v12435_v53 }
 0x29f   :  { %v12489_v22 = vpop.f32.mrf.mxu1 }
 0x2a0   :  { %v1402_v38 = vpop.f32.mrf.mxu0  ;;  %v12547_v39 = vadd.f32 %v1400_v31, %v1352_v7 }
 0x2a2   :  { %17216 = vst [vmem:[#allocation20_spill] sm:$0xff] %v12547_v39 }
 0x2a5   :  { %v1353_v12 = vpop.f32.mrf.mxu3 }
 0x2a6   :  { %v12491_v36 = vpop.f32.mrf.mxu2 }
 0x2a7   :  { %v12493_v40 = vpop.f32.mrf.mxu1 }
 0x2a8   :  { %v1405_v30 = vpop.f32.mrf.mxu0 }
 0x2aa   :  { %1551 = vmatmul.bf16.gmra.mxu3 %v12312_v24  ;;  %1649 = vmatmul.bf16.gmra.mxu1 %v12312_v24 }
 0x2ab   :  { %1600 = vmatmul.bf16.gmra.mxu0 %v12332_v47  ;;  %1698 = vmatmul.bf16.gmra.mxu2 %v12332_v47 }
 0x2ad   :  { %v1356_v13 = vpop.f32.mrf.mxu3 }
 0x2ae   :  { %v12499_v18 = vpop.f32.mrf.mxu2  ;;  %v1357_v15 = vadd.f32 %v1356_v13, %v12435_v53  ;;  %v1831_v13 = vmul.f32 %v12547_v39, %v12547_v39 }
 0x2af   :  { %v12501_v49 = vpop.f32.mrf.mxu1 }
 0x2b0   :  { %v1407_v19 = vpop.f32.mrf.mxu0 }
 0x2b5   :  { %v1358_v37 = vpop.f32.mrf.mxu3 }
 0x2b6   :  { %v12505_v51 = vpop.f32.mrf.mxu2 }
 0x2b7   :  { %v12511_v24 = vpop.f32.mrf.mxu1 }
 0x2b8   :  { %v12503_v35 = vpop.f32.mrf.mxu0 }
 0x2ba   :  { %1556 = vmatmul.bf16.gmra.mxu3 %v12353_v26  ;;  %1654 = vmatmul.bf16.gmra.mxu1 %v12353_v26  ;;  %v1811_v26 = vmul.f32 %v12449_v43, %v12449_v43 }
 0x2bb   :  { %1605 = vmatmul.bf16.gmra.mxu0 %v12376_v5  ;;  %1703 = vmatmul.bf16.gmra.mxu2 %v12376_v5  ;;  %v1349_v5 = vadd.f32 %v1348_v2, %v12435_v53 }
 0x2bc   :  { %v1871_v59 = vadd.f32 %v1811_v26, %v1807_v17  ;;  %v1812_v26 = vmul.f32 %v12447_v54, %v12447_v54 }
 0x2bd   :  { %v1361_v47 = vpop.f32.mrf.mxu3  ;;  %v12539_v6 = vadd.f32 %v1397_v28, %v1349_v5  ;;  %v12561_v5 = vadd.f32 %v1405_v30, %v1357_v15 }
 0x2be   :  { %v12515_v62 = vpop.f32.mrf.mxu2  ;;  %v1872_v58 = vadd.f32 %v1871_v59, %v1815_v52  ;;  %v1808_v52 = vmul.f32 %v12441_v1, %v12441_v1  ;;  %v1362_v7 = vadd.f32 %v1361_v47, %v12435_v53 }
 0x2bf   :  { %v12517_v45 = vpop.f32.mrf.mxu1  ;;  %v1827_v33 = vmul.f32 %v12539_v6, %v12539_v6  ;;  %17218 = vst [vmem:[#allocation22_spill] sm:$0xff] %v12561_v5 }
 0x2c0   :  { %v12513_v9 = vpop.f32.mrf.mxu0  ;;  %v1873_v3 = vadd.f32 %v1872_v58, %v1819_v27 }
 0x2c2   :  { %v1874_v31 = vadd.f32 %v1873_v3, %v1823_v21  ;;  %v1892_v21 = vadd.f32 %v1812_v26, %v1808_v52  ;;  %v1450_v52 = vadd.f32 %v12481_v20, %v12430_v63 }
 0x2c4   :  { %v1875_v59 = vadd.f32 %v1874_v31, %v1827_v33  ;;  %v12584_v33 = vadd.f32 %v12503_v35, %v1362_v7  ;;  %v12620_v20 = vadd.f32 %v12487_v56, %v1450_v52  ;;  %v1455_v56 = vadd.f32 %v12493_v40, %v12430_v63 }
 0x2c5   :  { %v1363_v42 = vpop.f32.mrf.mxu3 }
 0x2c6   :  { %v12535_v50 = vpop.f32.mrf.mxu2  ;;  %v1876_v15 = vadd.f32 %v1875_v59, %v1831_v13  ;;  %17220 = vst [vmem:[#allocation24_spill] sm:$0xff] %v12584_v33  ;;  %v12647_v40 = vadd.f32 %v12499_v18, %v1455_v56 }
 0x2c7   :  { %v12543_v55 = vpop.f32.mrf.mxu1  ;;  %17223 = vst [vmem:[#allocation27_spill] sm:$0xff] %v12620_v20 }
 0x2c8   :  { %v12519_v32 = vpop.f32.mrf.mxu0  ;;  %17226 = vst [vmem:[#allocation30_spill] sm:$0xff] %v12647_v40 }
 0x2ca   :  { %1561 = vmatmul.bf16.gmra.mxu3 %v12380_v8  ;;  %1659 = vmatmul.bf16.gmra.mxu1 %v12380_v8  ;;  %v1719_v8 = vadd.f32 %v12449_v43, %v12443_v44 }
 0x2cb   :  { %1610 = vmatmul.bf16.gmra.mxu0 %v12394_v4  ;;  %1708 = vmatmul.bf16.gmra.mxu2 %v12394_v4  ;;  %v1354_v4 = vadd.f32 %v1353_v12, %v12435_v53  ;;  %v1359_v12 = vadd.f32 %v1358_v37, %v12435_v53  ;;  %v1740_v37 = vadd.f32 %v12447_v54, %v12441_v1 }
 0x2cc   :  { %v1720_v14 = vadd.f32 %v1719_v8, %v12459_v48  ;;  %v1816_v8 = vmul.f32 %v12457_v41, %v12457_v41 }
 0x2cd   :  { %v1366_v0 = vpop.f32.mrf.mxu3  ;;  %v12553_v28 = vadd.f32 %v1402_v38, %v1354_v4  ;;  %v12574_v4 = vadd.f32 %v1407_v19, %v1359_v12  ;;  %v1741_v47 = vadd.f32 %v1740_v37, %v12457_v41  ;;  %v1447_v12 = vadd.f32 %v12475_v16, %v12430_v63 }
 0x2ce   :  { %v1721_v34 = vadd.f32 %v1720_v14, %v12465_v60  ;;  %v1364_v14 = vadd.f32 %v1363_v42, %v12435_v53  ;;  %v12577_v58 = vpop.f32.mrf.mxu2  ;;  %v1893_v42 = vadd.f32 %v1892_v21, %v1816_v8 }
 0x2cf   :  { %17217 = vst [vmem:[#allocation21_spill] sm:$0xff] %v12553_v28  ;;  %v1835_v27 = vmul.f32 %v12553_v28, %v12553_v28  ;;  %v12587_v19 = vpop.f32.mrf.mxu1  ;;  %v12605_v16 = vadd.f32 %v12479_v46, %v1447_v12  ;;  %v1742_v59 = vadd.f32 %v1741_v47, %v12463_v57  ;;  %v1824_v46 = vmul.f32 %v12473_v23, %v12473_v23 }
 0x2d0   :  { %v1417_v2 = vpop.f32.mrf.mxu0  ;;  %v1722_v29 = vadd.f32 %v1721_v34, %v12477_v11  ;;  %17219 = vst [vmem:[#allocation23_spill] sm:$0xff] %v12574_v4  ;;  %v1839_v34 = vmul.f32 %v12561_v5, %v12561_v5  ;;  %v12599_v31 = vadd.f32 %v12513_v9, %v1364_v14  ;;  %v1847_v9 = vmul.f32 %v12584_v33, %v12584_v33 }
 0x2d1   :  { %v1877_v26 = vadd.f32 %v1876_v15, %v1835_v27  ;;  %v1452_v27 = vadd.f32 %v12489_v22, %v12430_v63  ;;  %v1828_v47 = vmul.f32 %v12605_v16, %v12605_v16 }
 0x2d2   :  { %v1723_v38 = vadd.f32 %v1722_v29, %v12539_v6  ;;  %v1367_v29 = vadd.f32 %v1366_v0, %v12435_v53  ;;  %v1843_v0 = vmul.f32 %v12574_v4, %v12574_v4  ;;  %17221 = vst [vmem:[#allocation25_spill] sm:$0xff] %v12599_v31 }
 0x2d4   :  { %v1724_v30 = vadd.f32 %v1723_v38, %v12547_v39  ;;  %v12613_v8 = vadd.f32 %v12519_v32, %v1367_v29  ;;  %v1851_v32 = vmul.f32 %v12599_v31, %v12599_v31 }
 0x2d5   :  { %v1368_v17 = vpop.f32.mrf.mxu3 }
 0x2d6   :  { %v1725_v3 = vadd.f32 %v1724_v30, %v12553_v28  ;;  %v1369_v13 = vadd.f32 %v1368_v17, %v12435_v53  ;;  %17222 = vst [vmem:[#allocation26_spill] sm:$0xff] %v12613_v8  ;;  %v1855_v29 = vmul.f32 %v12613_v8, %v12613_v8  ;;  %v1515_v12 = vpop.f32.mrf.mxu2 }
 0x2d7   :  { %v1469_v52 = vpop.f32.mrf.mxu1 }
 0x2d8   :  { %v1726_v35 = vadd.f32 %v1725_v3, %v12561_v5  ;;  %v1420_v38 = vpop.f32.mrf.mxu0  ;;  %v12627_v21 = vadd.f32 %v1417_v2, %v1369_v13  ;;  %v1743_v2 = vadd.f32 %v1742_v59, %v12473_v23 }
 0x2da   :  { %1566 = vmatmul.bf16.gmra.mxu3 %v12396_v25  ;;  %1664 = vmatmul.bf16.gmra.mxu1 %v12396_v25  ;;  %v1820_v25 = vmul.f32 %v12463_v57, %v12463_v57  ;;  %v1727_v37 = vadd.f32 %v1726_v35, %v12574_v4  ;;  %17224 = vst [vmem:[#allocation28_spill] sm:$0xff] %v12627_v21 }
 0x2db   :  { %1615 = vmatmul.bf16.gmra.mxu0 %v12405_v10  ;;  %1713 = vmatmul.bf16.gmra.mxu2 %v12405_v10  ;;  %v1878_v10 = vadd.f32 %v1877_v26, %v1839_v34  ;;  %v12632_v34 = vadd.f32 %v12491_v36, %v1452_v27  ;;  %v1832_v35 = vmul.f32 %v12620_v20, %v12620_v20 }
 0x2dc   :  { %v1728_v14 = vadd.f32 %v1727_v37, %v12584_v33  ;;  %v1894_v15 = vadd.f32 %v1893_v42, %v1820_v25  ;;  %v1457_v36 = vadd.f32 %v12501_v49, %v12430_v63  ;;  %v1859_v25 = vmul.f32 %v12627_v21, %v12627_v21  ;;  %v10829_v33 = vld [vmem:[#allocation4 + $0xdc] sm:$0xf0] }
 0x2dd   :  { %v1371_v7 = vpop.f32.mrf.mxu3  ;;  %v1879_v30 = vadd.f32 %v1878_v10, %v1843_v0  ;;  %17225 = vst [vmem:[#allocation29_spill] sm:$0xff] %v12632_v34  ;;  %v1744_v10 = vadd.f32 %v1743_v2, %v12605_v16 }
 0x2de   :  { %v1372_v17 = vadd.f32 %v1371_v7, %v12435_v53  ;;  %v1729_v22 = vadd.f32 %v1728_v14, %v12599_v31  ;;  %v1895_v42 = vadd.f32 %v1894_v15, %v1824_v46  ;;  %v1836_v7 = vmul.f32 %v12632_v34, %v12632_v34  ;;  %v9312_v31 = vld [vmem:[#allocation4 + $0x100] sm:$0xf] }
 0x2df   :  { %v1880_v3 = vadd.f32 %v1879_v30, %v1847_v9  ;;  %v12656_v37 = vadd.f32 %v12505_v51, %v1457_v36  ;;  %v1745_v46 = vadd.f32 %v1744_v10, %v12620_v20  ;;  %v1460_v30 = vadd.f32 %v12511_v24, %v12430_v63  ;;  %v10885_v20 = vld [vmem:[#allocation4 + $0x29c] sm:$0xf0] }
 0x2e0   :  { %v12639_v26 = vadd.f32 %v1420_v38, %v1372_v17  ;;  %v1730_v13 = vadd.f32 %v1729_v22, %v12613_v8  ;;  %v1896_v38 = vadd.f32 %v1895_v42, %v1828_v47  ;;  %v1422_v14 = vpop.f32.mrf.mxu0  ;;  %v1840_v51 = vmul.f32 %v12647_v40, %v12647_v40 }
 0x2e1   :  { %v1881_v0 = vadd.f32 %v1880_v3, %v1851_v32  ;;  %17227 = vst [vmem:[#allocation31_spill] sm:$0xff] %v12656_v37  ;;  %v1746_v56 = vadd.f32 %v1745_v46, %v12632_v34  ;;  %v1462_v22 = vadd.f32 %v12517_v45, %v12430_v63  ;;  %v1844_v24 = vmul.f32 %v12656_v37, %v12656_v37  ;;  %v9504_v34 = vld [vmem:[#allocation4 + $0x280] sm:$0xf] }
 0x2e2   :  { %v1731_v18 = vadd.f32 %v1730_v13, %v12627_v21  ;;  %v1863_v17 = vmul.f32 %v12639_v26, %v12639_v26  ;;  %v1897_v27 = vadd.f32 %v1896_v38, %v1832_v35  ;;  %v1518_v13 = vpop.f32.mrf.mxu2 }
 0x2e3   :  { %v1882_v9 = vadd.f32 %v1881_v0, %v1855_v29  ;;  %v1747_v35 = vadd.f32 %v1746_v56, %v12647_v40  ;;  %v12683_v36 = vadd.f32 %v12535_v50, %v1462_v22 }
 0x2e4   :  { %v1732_v15 = vadd.f32 %v1731_v18, %v12639_v26  ;;  %v1898_v3 = vadd.f32 %v1897_v27, %v1836_v7  ;;  %v1470_v27 = vadd.f32 %v1469_v52, %v12430_v63 }
 0x2e5   :  { %v1373_v49 = vpop.f32.mrf.mxu3  ;;  %v1883_v32 = vadd.f32 %v1882_v9, %v1859_v25  ;;  %17229 = vst [vmem:[#allocation33_spill] sm:$0xff] %v12683_v36  ;;  %v1748_v10 = vadd.f32 %v1747_v35, %v12656_v37  ;;  %v1471_v9 = vpop.f32.mrf.mxu1 }
 0x2e6   :  { %v1374_v59 = vadd.f32 %v1373_v49, %v12435_v53  ;;  %v12672_v53 = vadd.f32 %v12515_v62, %v1460_v30  ;;  %v1465_v62 = vadd.f32 %v12543_v55, %v12430_v63  ;;  %v1899_v0 = vadd.f32 %v1898_v3, %v1840_v51 }
 0x2e7   :  { %v1884_v29 = vadd.f32 %v1883_v32, %v1863_v17  ;;  %v1467_v49 = vadd.f32 %v12587_v19, %v12430_v63  ;;  %v12704_v32 = vadd.f32 %v1518_v13, %v1470_v27  ;;  %v1472_v35 = vadd.f32 %v1471_v9, %v12430_v63 }
 0x2e8   :  { %v12668_v47 = vadd.f32 %v1422_v14, %v1374_v59  ;;  %17228 = vst [vmem:[#allocation32_spill] sm:$0xff] %v12672_v53  ;;  %v1848_v38 = vmul.f32 %v12672_v53, %v12672_v53  ;;  %v12691_v7 = vadd.f32 %v12577_v58, %v1465_v62  ;;  %v1900_v50 = vadd.f32 %v1899_v0, %v1844_v24 }
 0x2e9   :  { %v1749_v55 = vadd.f32 %v1748_v10, %v12672_v53  ;;  %v1852_v59 = vmul.f32 %v12683_v36, %v12683_v36  ;;  %v12698_v46 = vadd.f32 %v1515_v12, %v1467_v49  ;;  %v12722_v63 = vperm.slane %v12427_v61, 3 }
 0x2ea   :  { %v1733_v2 = vadd.f32 %v1732_v15, %v12668_v47  ;;  %v1867_v42 = vmul.f32 %v12668_v47, %v12668_v47  ;;  %17230 = vst [vmem:[#allocation34_spill] sm:$0xff] %v12691_v7  ;;  %v1901_v58 = vadd.f32 %v1900_v50, %v1848_v38  ;;  %v1856_v19 = vmul.f32 %v12691_v7, %v12691_v7  ;;  %v1520_v13 = vpop.f32.mrf.mxu2  ;;  %v1581_v50 = vpop.f32.mrf.mxu0 }
 0x2eb   :  { %17231 = vst [vmem:[#allocation35_spill] sm:$0xff] %v12698_v46  ;;  %v1750_v51 = vadd.f32 %v1749_v55, %v12683_v36  ;;  %v1860_v12 = vmul.f32 %v12698_v46, %v12698_v46  ;;  %v12714_v10 = vadd.f32 %v1520_v13, %v1472_v35  ;;  %v10176_v36 = vld [vmem:[#allocation4 + $0x7c0] sm:$0xf] }
 0x2ec   :  { %v1734_v45 = vrot.slane %v1733_v2, 4  ;;  %v1885_v25 = vadd.f32 %v1884_v29, %v1867_v42  ;;  %v1902_v3 = vadd.f32 %v1901_v58, %v1852_v59  ;;  %v1864_v42 = vmul.f32 %v12704_v32, %v12704_v32 }
 0x2ed   :  { %v1751_v22 = vadd.f32 %v1750_v51, %v12691_v7  ;;  %v1868_v59 = vmul.f32 %v12714_v10, %v12714_v10  ;;  %v10901_v7 = vld [vmem:[#allocation4 + $0x31c] sm:$0xf0] }
 0x2ee   :  { %v1735_v18 = vadd.f32 %v1734_v45, %v1733_v2  ;;  %v1886_v17 = vrot.slane %v1885_v25, 4  ;;  %v1903_v29 = vadd.f32 %v1902_v3, %v1856_v19 }
 0x2ef   :  { %v1752_v2 = vadd.f32 %v1751_v22, %v12698_v46  ;;  %v1532_v22 = vpop.f32.mrf.mxu3 }
 0x2f0   :  { %v1736_v30 = vrot.slane %v1735_v18, 2  ;;  %v1887_v14 = vadd.f32 %v1886_v17, %v1885_v25  ;;  %v1904_v45 = vadd.f32 %v1903_v29, %v1860_v12 }
 0x2f1   :  { %v1753_v25 = vadd.f32 %v1752_v2, %v12704_v32 }
 0x2f2   :  { %v1737_v15 = vadd.f32 %v1736_v30, %v1735_v18  ;;  %v1888_v56 = vrot.slane %v1887_v14, 2  ;;  %v1630_v18 = vpop.f32.mrf.mxu1  ;;  %v1905_v17 = vadd.f32 %v1904_v45, %v1864_v42  ;;  %v1679_v12 = vpop.f32.mrf.mxu2 }
 0x2f3   :  { %v1754_v55 = vadd.f32 %v1753_v25, %v12714_v10  ;;  %v12733_v42 = vpop.f32.mrf.mxu0 }
 0x2f4   :  { %v1738_v24 = vrot.slane %v1737_v15, 1  ;;  %v1889_v52 = vadd.f32 %v1888_v56, %v1887_v14  ;;  %v1906_v14 = vadd.f32 %v1905_v17, %v1868_v59  ;;  %v12728_v56 = vperm.slane %v12427_v61, 2 }
 0x2f5   :  { %v1755_v30 = vrot.slane %v1754_v55, 4 }
 0x2f6   :  { %v1739_v62 = vadd.f32 %v1738_v24, %v1737_v15  ;;  %v1890_v0 = vrot.slane %v1889_v52, 1  ;;  %v1907_v19 = vrot.slane %v1906_v14, 4  ;;  %v1631_v15 = vadd.f32 %v1630_v18, %v12722_v63 }
 0x2f7   :  { %v1756_v51 = vadd.f32 %v1755_v30, %v1754_v55  ;;  %v1533_v29 = vadd.f32 %v1532_v22, %v12728_v56  ;;  %v12739_v17 = vpop.f32.mrf.mxu3 }
 0x2f8   :  { %v12716_v38 = vmul.f32 0.0078125, %v1739_v62  ;;  %v1891_v49 = vadd.f32 %v1890_v0, %v1889_v52  ;;  %v1908_v52 = vadd.f32 %v1907_v19, %v1906_v14  ;;  %v12731_v2 = vadd.f32 %v1679_v12, %v1631_v15  ;;  %v9664_v19 = vld [vmem:[#allocation4 + $0x3c0] sm:$0xf] }
 0x2f9   :  { %v1757_v24 = vrot.slane %v1756_v51, 2  ;;  %v12737_v13 = vadd.f32 %v1581_v50, %v1533_v29  ;;  %v10925_v15 = vld [vmem:[#allocation4 + $0x3dc] sm:$0xf0] }
 0x2fa   :  { %v1955_v9 = vmul.f32 0.0078125, %v1891_v49  ;;  %v1959_v27 = vmul.f32 %v12716_v38, %v12716_v38  ;;  %17232 = vst [vmem:[#allocation36_spill] sm:$0xff] %v12731_v2  ;;  %v12735_v35 = vpop.f32.mrf.mxu1  ;;  %v1909_v0 = vrot.slane %v1908_v52, 2  ;;  %v12741_v55 = vpop.f32.mrf.mxu2  ;;  %v10861_v29 = vld [vmem:[#allocation4 + $0x1dc] sm:$0xf0]  ;;  %v1967_v37 = vsub.f32 %v12443_v44, %v12716_v38 }
 0x2fb   :  { %v1758_v62 = vadd.f32 %v1757_v24, %v1756_v51  ;;  %17233 = vst [vmem:[#allocation37_spill] sm:$0xff] %v12737_v13  ;;  %v1586_v30 = vpop.f32.mrf.mxu0  ;;  %v9665_v24 = vor.u32 %v10925_v15, %v9664_v19  ;;  %v9600_v19 = vld [vmem:[#allocation4 + $0x340] sm:$0xf]  ;;  %v1971_v44 = vsub.f32 %v12449_v43, %v12716_v38 }
 0x2fc   :  { %v1963_v58 = vsub.f32 %v1955_v9, %v1959_v27  ;;  %v1910_v45 = vadd.f32 %v1909_v0, %v1908_v52  ;;  %v9408_v52 = vld [vmem:[#allocation4 + $0x1c0] sm:$0xf] }
 0x2fd   :  { %v1759_v61 = vrot.slane %v1758_v62, 1  ;;  %v9632_v0 = vld [vmem:[#allocation4 + $0x380] sm:$0xf]  ;;  %4115 = vmatpush.bf16.msrb.mxu0 %v9665_v24  ;;  %v2023_v24 = vsub.f32 %v12639_v26, %v12716_v38 }
 0x2fe   :  { %v2031_v3 = vadd.f32 0.8, %v1963_v58  ;;  %v1911_v49 = vrot.slane %v1910_v45, 1  ;;  %v10909_v15 = vld [vmem:[#allocation4 + $0x35c] sm:$0xf0] }
 0x2ff   :  { %v1760_v25 = vadd.f32 %v1759_v61, %v1758_v62  ;;  %v9409_v62 = vor.u32 %v10861_v29, %v9408_v52  ;;  %v10917_v61 = vld [vmem:[#allocation4 + $0x39c] sm:$0xf0]  ;;  %v9601_v26 = vor.u32 %v10909_v15, %v9600_v19 }
 0x300   :  { %11220 = vrsqrt.f32 %v2031_v3  ;;  %v1912_v27 = vadd.f32 %v1911_v49, %v1910_v45  ;;  %v12747_v45 = vld [vmem:[#allocation13] ss:$2 sm:$0xf]  ;;  %vm2041_vm8 = vweird.f32 %v2031_v3  ;;  %v9344_v29 = vld [vmem:[#allocation4 + $0x140] sm:$0xf] }
 0x301   :  { %v12743_v9 = vmul.f32 0.0078125, %v1760_v25  ;;  %v9376_v25 = vld [vmem:[#allocation4 + $0x180] sm:$0xf]  ;;  %4066 = vmatpush.bf16.msrb.mxu3 %v9409_v62  ;;  %v12760_v62 = vperm.slane %v12747_v45, 0 }
 0x302   :  { %v1635_v14 = vpop.f32.mrf.mxu1  ;;  %v1956_v51 = vmul.f32 0.0078125, %v1912_v27  ;;  %v10853_v27 = vld [vmem:[#allocation4 + $0x19c] sm:$0xf0] }
 0x303   :  { %v1960_v50 = vmul.f32 %v12743_v9, %v12743_v9  ;;  %v1636_v8 = vadd.f32 %v1635_v14, %v12722_v63  ;;  %v2027_v14 = vsub.f32 %v12668_v47, %v12716_v38  ;;  %v9472_v43 = vld [vmem:[#allocation4 + $0x240] sm:$0xf] }
 0x305   :  { %v1964_v12 = vsub.f32 %v1956_v51, %v1960_v50  ;;  %v1684_v51 = vpop.f32.mrf.mxu2  ;;  %v9377_v50 = vor.u32 %v10853_v27, %v9376_v25  ;;  %v12770_v25 = vld [vmem:[#allocation13 + $0x1] ss:$2 sm:$0xf] }
 0x306   :  { %v11221_v18 = vpop.eup %11220  ;;  %v12777_v46 = vperm.slane %v12770_v25, 0 }
 0x307   :  { %v2036_v59 = vmul.f32 %v11221_v18, %v2031_v3  ;;  %vm2042_vm7 = vweird.f32 %v11221_v18  ;;  %v12749_v49 = vadd.f32 0.8, %v1964_v12  ;;  %v10845_v12 = vld [vmem:[#allocation4 + $0x15c] sm:$0xf0]  ;;  %4067 = vmatpush.bf16.msrb.mxu3 %v9377_v50 }
 0x308   :  { %vm2043_vm9 = vmor %vm2041_vm8, %vm2042_vm7 }
 0x309   :  { %v2037_v58 = vmul.f32 %v11221_v18, %v2036_v59  ;;  %v9633_v59 = vor.u32 %v10917_v61, %v9632_v0  ;;  %11222 = vrsqrt.f32 %v12749_v49  ;;  %v12762_v0 = vadd.f32 %v1684_v51, %v1636_v8  ;;  %v9568_v51 = vld [vmem:[#allocation4 + $0x300] sm:$0xf] }
 0x30a   :  { %v12766_v3 = vpop.f32.mrf.mxu1  ;;  %v9345_v8 = vor.u32 %v10845_v12, %v9344_v29  ;;  %vm2051_vm13 = vweird.f32 %v12749_v49 }
 0x30b   :  { %v2038_v22 = vmul.f32 0.5, %v2037_v58  ;;  %v1537_v58 = vpop.f32.mrf.mxu3  ;;  %4116 = vmatpush.bf16.msrb.mxu0 %v9633_v59  ;;  %v9569_v59 = vor.u32 %v10901_v7, %v9568_v51 }
 0x30c   :  { %4068 = vmatpush.bf16.msrb.mxu3 %v9345_v8  ;;  %v9920_v8 = vld [vmem:[#allocation4 + $0x5c0] sm:$0xf] }
 0x30d   :  { %v2039_v21 = vsub.f32 1.5, %v2038_v22  ;;  %v1538_v22 = vadd.f32 %v1537_v58, %v12728_v56  ;;  %v12789_v12 = vpop.f32.mrf.mxu2 }
 0x30e   :  { %17235 = vst [vmem:[#allocation39_spill] sm:$0xff] %v12789_v12  ;;  %v9248_v12 = vld [vmem:[#allocation4 + $0x80] sm:$0xf] }
 0x30f   :  { %v2040_v52 = vmul.f32 %v11221_v18, %v2039_v21  ;;  %v12764_v21 = vpop.f32.mrf.mxu0  ;;  %v12772_v27 = vadd.f32 %v1586_v30, %v1538_v22  ;;  %v12781_v22 = vpop.eup %11222  ;;  %4117 = vmatpush.bf16.msrb.mxu0 %v9601_v26  ;;  %v11053_v26 = vld [vmem:[#allocation4 + $0x7dc] sm:$0xf0] }
 0x310   :  { %17234 = vst [vmem:[#allocation38_spill] sm:$0xff] %v12764_v21  ;;  %v2046_v50 = vmul.f32 %v12781_v22, %v12749_v49  ;;  %v10177_v21 = vor.u32 %v11053_v26, %v10176_v36  ;;  %vm2052_vm12 = vweird.f32 %v12781_v22  ;;  %v12806_v36 = vperm.slane %v12770_v25, 1 }
 0x311   :  { %v12768_v61 = vsel %vm2043_vm9, %v11221_v18, %v2040_v52  ;;  %v10837_v18 = vld [vmem:[#allocation4 + $0x11c] sm:$0xf0]  ;;  %vm2053_vm14 = vmor %vm2051_vm13, %vm2052_vm12  ;;  %v1968_v26 = vsub.f32 %v12441_v1, %v12743_v9 }
 0x312   :  { %v2131_v47 = vmul.f32 %v12768_v61, %v2023_v24  ;;  %v2135_v58 = vmul.f32 %v12768_v61, %v2027_v14  ;;  %v9313_v24 = vor.u32 %v10837_v18, %v9312_v31  ;;  %v9536_v14 = vld [vmem:[#allocation4 + $0x2c0] sm:$0xf]  ;;  %v1640_v40 = vpop.f32.mrf.mxu1  ;;  %4213 = vmatpush.bf16.msrb.mxu2 %v10177_v21 }
 0x313   :  { %v12787_v29 = vpop.f32.mrf.mxu3  ;;  %4118 = vmatpush.bf16.msrb.mxu0 %v9569_v59  ;;  %v10989_v31 = vld [vmem:[#allocation4 + $0x5dc] sm:$0xf0]  ;;  %v12797_v59 = vperm.slane %v12747_v45, 1 }
 0x314   :  { %v2205_v52 = vmul.f32 %v12760_v62, %v2131_v47  ;;  %v2209_v30 = vmul.f32 %v12760_v62, %v2135_v58  ;;  %v10893_v47 = vld [vmem:[#allocation4 + $0x2dc] sm:$0xf0]  ;;  %4069 = vmatpush.bf16.msrb.mxu3 %v9313_v24 }
 0x315   :  { %v9280_v58 = vld [vmem:[#allocation4 + $0xc0] sm:$0xf]  ;;  %v9537_v53 = vor.u32 %v10893_v47, %v9536_v14  ;;  %v1689_v21 = vpop.f32.mrf.mxu2 }
 0x316   :  { %v2280_v19 = vadd.f32 %v12777_v46, %v2205_v52  ;;  %v2284_v15 = vadd.f32 %v12777_v46, %v2209_v30  ;;  %v2047_v30 = vmul.f32 %v12781_v22, %v2046_v50  ;;  %v9281_v5 = vor.u32 %v10829_v33, %v9280_v58  ;;  %v10821_v50 = vld [vmem:[#allocation4 + $0x9c] sm:$0xf0] }
 0x317   :  { %v1591_v52 = vpop.f32.mrf.mxu0  ;;  %v1641_v33 = vadd.f32 %v1640_v40, %v12722_v63  ;;  %4119 = vmatpush.bf16.msrb.mxu0 %v9537_v53  ;;  %v9249_v14 = vor.u32 %v10821_v50, %v9248_v12  ;;  %v10877_v47 = vld [vmem:[#allocation4 + $0x25c] sm:$0xf0]  ;;  %v2024_v58 = vsub.f32 %v12704_v32, %v12743_v9 }
 0x318   :  { %vm2344_vm10 = vcmp.gt.f32.partialorder %v2280_v19, 0.0  ;;  %vm2348_vm11 = vcmp.gt.f32.partialorder %v2284_v15, 0.0  ;;  %v2408_v7 = vmul.f32 0.2, %v2280_v19  ;;  %v2412_v51 = vmul.f32 0.2, %v2284_v15  ;;  %4070 = vmatpush.bf16.msrb.mxu3 %v9281_v5 }
 0x319   :  { %v2048_v39 = vmul.f32 0.5, %v2047_v30  ;;  %v12811_v53 = vadd.f32 %v1689_v21, %v1641_v33  ;;  %v2028_v5 = vsub.f32 %v12714_v10, %v12743_v9  ;;  %v9473_v32 = vor.u32 %v10877_v47, %v9472_v43  ;;  %v10869_v1 = vld [vmem:[#allocation4 + $0x21c] sm:$0xf0] }
 0x31a   :  { %v2472_v18 = vsel %vm2344_vm10, %v2280_v19, %v2408_v7  ;;  %v2476_v4 = vsel %vm2348_vm11, %v2284_v15, %v2412_v51  ;;  %v2075_v19 = vmul.f32 %v12768_v61, %v1967_v37  ;;  %v9921_v15 = vor.u32 %v10989_v31, %v9920_v8 }
 0x31b   :  { %v12794_v28 = vpack.c.bf16 %v2476_v4, %v2472_v18  ;;  %v2049_v24 = vsub.f32 1.5, %v2048_v39  ;;  %v9505_v4 = vor.u32 %v10885_v20, %v9504_v34  ;;  %v1542_v45 = vpop.f32.mrf.mxu3  ;;  %v2079_v37 = vmul.f32 %v12768_v61, %v1971_v44  ;;  %v9216_v20 = vld [vmem:[#allocation4 + $0x40] sm:$0xf] }
 0x31c   :  { %4164 = vmatpush.bf16.msra.mxu1 %v9921_v15  ;;  %v1543_v40 = vadd.f32 %v1542_v45, %v12728_v56  ;;  %v10813_v34 = vld [vmem:[#allocation4 + $0x5c] sm:$0xf0]  ;;  %v2149_v25 = vmul.f32 %v12760_v62, %v2075_v19  ;;  %v1972_v10 = vsub.f32 %v12447_v54, %v12743_v9  ;;  %4071 = vmatpush.bf16.msrb.mxu3 %v9249_v14 }
 0x31d   :  { %17236 = vst [vmem:[#allocation40_spill] sm:$0xff] %v12794_v28  ;;  %v2050_v39 = vmul.f32 %v12781_v22, %v2049_v24  ;;  %v2153_v7 = vmul.f32 %v12760_v62, %v2079_v37  ;;  %4120 = vmatpush.bf16.msrb.mxu0 %v9505_v4  ;;  %v9217_v31 = vor.u32 %v10813_v34, %v9216_v20  ;;  %v9440_v18 = vld [vmem:[#allocation4 + $0x200] sm:$0xf]  ;;  %v12841_v24 = vpop.f32.mrf.mxu1 }
 0x31e   :  { %v12830_v30 = vadd.f32 %v1591_v52, %v1543_v40  ;;  %v9184_v44 = vld [vmem:[#allocation4] sm:$0xf]  ;;  %v2224_v19 = vadd.f32 %v12777_v46, %v2149_v25  ;;  %v9441_v45 = vor.u32 %v10869_v1, %v9440_v18  ;;  %v1975_v1 = vsub.f32 %v12459_v48, %v12716_v38 }
 0x31f   :  { %v12822_v12 = vpop.f32.mrf.mxu0  ;;  %v12828_v51 = vsel %vm2053_vm14, %v12781_v22, %v2050_v39  ;;  %v10805_v22 = vld [vmem:[#allocation4 + $0x1c] sm:$0xf0]  ;;  %v2228_v4 = vadd.f32 %v12777_v46, %v2153_v7  ;;  %v12850_v39 = vpop.f32.mrf.mxu2 }
 0x320   :  { %v2132_v49 = vmul.f32 %v12828_v51, %v2024_v58  ;;  %v2136_v8 = vmul.f32 %v12828_v51, %v2028_v5  ;;  %v2076_v50 = vmul.f32 %v12828_v51, %v1968_v26  ;;  %v2080_v52 = vmul.f32 %v12828_v51, %v1972_v10  ;;  %4072 = vmatpush.bf16.msrb.mxu3 %v9217_v31  ;;  %v10144_v31 = vld [vmem:[#allocation4 + $0x780] sm:$0xf] }
 0x321   :  { %4121 = vmatpush.bf16.msrb.mxu0 %v9473_v32  ;;  %v9185_v37 = vor.u32 %v10805_v22, %v9184_v44  ;;  %v2352_v34 = vmul.f32 0.2, %v2224_v19  ;;  %v2356_v25 = vmul.f32 0.2, %v2228_v4  ;;  %vm2288_vm1 = vcmp.gt.f32.partialorder %v2224_v19, 0.0 }
 0x322   :  { %v2206_v15 = vmul.f32 %v12797_v59, %v2132_v49  ;;  %v2210_v54 = vmul.f32 %v12797_v59, %v2136_v8  ;;  %v2150_v33 = vmul.f32 %v12797_v59, %v2076_v50  ;;  %v2154_v21 = vmul.f32 %v12797_v59, %v2080_v52  ;;  %v11045_v18 = vld [vmem:[#allocation4 + $0x79c] sm:$0xf0] }
 0x323   :  { %v12848_v47 = vpop.f32.mrf.mxu3  ;;  %vm2292_vm2 = vcmp.gt.f32.partialorder %v2228_v4, 0.0  ;;  %v1976_v10 = vsub.f32 %v12457_v41, %v12743_v9  ;;  %v1980_v49 = vsub.f32 %v12463_v57, %v12743_v9  ;;  %v2416_v22 = vsel %vm2288_vm1, %v2224_v19, %v2352_v34 }
 0x324   :  { %v2281_v14 = vadd.f32 %v12806_v36, %v2206_v15  ;;  %v2285_v43 = vadd.f32 %v12806_v36, %v2210_v54  ;;  %v2225_v40 = vadd.f32 %v12806_v36, %v2150_v33  ;;  %v2229_v20 = vadd.f32 %v12806_v36, %v2154_v21  ;;  %4073 = vmatpush.bf16.msrb.mxu3 %v9185_v37  ;;  %v9888_v33 = vld [vmem:[#allocation4 + $0x580] sm:$0xf] }
 0x325   :  { %4122 = vmatpush.bf16.msrb.mxu0 %v9441_v45  ;;  %v2420_v52 = vsel %vm2292_vm2, %v2228_v4, %v2356_v25  ;;  %v2084_v41 = vmul.f32 %v12828_v51, %v1976_v10  ;;  %v2088_v54 = vmul.f32 %v12828_v51, %v1980_v49  ;;  %v1979_v57 = vsub.f32 %v12465_v60, %v12716_v38  ;;  %v10981_v45 = vld [vmem:[#allocation4 + $0x59c] sm:$0xf0]  ;;  %v12870_v21 = vpop.f32.mrf.mxu1 }
 0x326   :  { %vm2345_vm15 = vcmp.gt.f32.partialorder %v2281_v14, 0.0  ;;  %vm2349_vm0 = vcmp.gt.f32.partialorder %v2285_v43, 0.0  ;;  %v2409_v58 = vmul.f32 0.2, %v2281_v14  ;;  %v2413_v5 = vmul.f32 0.2, %v2285_v43 }
 0x327   :  { %v12854_v26 = vpop.f32.mrf.mxu0  ;;  %vm2289_vm3 = vcmp.gt.f32.partialorder %v2225_v40, 0.0  ;;  %vm2293_vm4 = vcmp.gt.f32.partialorder %v2229_v20, 0.0  ;;  %v2353_v50 = vmul.f32 0.2, %v2225_v40  ;;  %v2357_v44 = vmul.f32 0.2, %v2229_v20 }
 0x328   :  { %v2473_v7 = vsel %vm2345_vm15, %v2281_v14, %v2409_v58  ;;  %v2477_v32 = vsel %vm2349_vm0, %v2285_v43, %v2413_v5  ;;  %v12864_v15 = vpack.c.bf16 %v2420_v52, %v2416_v22  ;;  %v10145_v19 = vor.u32 %v11045_v18, %v10144_v31  ;;  %v12887_v5 = vpop.f32.mrf.mxu2 }
 0x329   :  { %v12860_v8 = vpack.c.bf16 %v2477_v32, %v2473_v7  ;;  %v2417_v14 = vsel %vm2289_vm3, %v2225_v40, %v2353_v50  ;;  %v2421_v48 = vsel %vm2293_vm4, %v2229_v20, %v2357_v44  ;;  %v2083_v4 = vmul.f32 %v12768_v61, %v1975_v1 }
 0x32a   :  { %17238 = vst [vmem:[#allocation42_spill] sm:$0xff] %v12864_v15  ;;  %v12877_v37 = vpack.c.bf16 %v2421_v48, %v2417_v14  ;;  %4074 = vmatmul.bf16.vlgmr.msrb.gmra.mxu3 %v12864_v15  ;;  %v2158_v34 = vmul.f32 %v12797_v59, %v2084_v41  ;;  %v2162_v25 = vmul.f32 %v12797_v59, %v2088_v54  ;;  %v11037_v14 = vld [vmem:[#allocation4 + $0x75c] sm:$0xf0] }
 0x32b   :  { %17237 = vst [vmem:[#allocation41_spill] sm:$0xff] %v12860_v8  ;;  %v12874_v43 = vpop.f32.mrf.mxu3  ;;  %4214 = vmatpush.bf16.msrb.mxu2 %v10145_v19  ;;  %v2087_v40 = vmul.f32 %v12768_v61, %v1979_v57  ;;  %v2157_v20 = vmul.f32 %v12760_v62, %v2083_v4  ;;  %v9889_v58 = vor.u32 %v10981_v45, %v9888_v33  ;;  %v10112_v45 = vld [vmem:[#allocation4 + $0x740] sm:$0xf] }
 0x32c   :  { %17239 = vst [vmem:[#allocation43_spill] sm:$0xff] %v12877_v37  ;;  %4123 = vmatmul.bf16.vlgmr.msrb.gmra.mxu0 %v12877_v37  ;;  %v2233_v10 = vadd.f32 %v12806_v36, %v2158_v34  ;;  %v2237_v49 = vadd.f32 %v12806_v36, %v2162_v25  ;;  %v1633_v50 = vadd.f32 %v12735_v35, %v12722_v63  ;;  %v9856_v4 = vld [vmem:[#allocation4 + $0x540] sm:$0xf] }
 0x32d   :  { %v2161_v7 = vmul.f32 %v12760_v62, %v2087_v40  ;;  %v2232_v32 = vadd.f32 %v12777_v46, %v2157_v20  ;;  %4165 = vmatpush.bf16.msra.mxu1 %v9889_v58  ;;  %v12898_v44 = vpop.f32.mrf.mxu1  ;;  %v1535_v57 = vadd.f32 %v12739_v17, %v12728_v56  ;;  %v1984_v33 = vsub.f32 %v12473_v23, %v12743_v9  ;;  %v10973_v34 = vld [vmem:[#allocation4 + $0x55c] sm:$0xf0] }
 0x32e   :  { %v2361_v52 = vmul.f32 0.2, %v2233_v10  ;;  %v2365_v41 = vmul.f32 0.2, %v2237_v49  ;;  %vm2297_vm7 = vcmp.gt.f32.partialorder %v2233_v10, 0.0  ;;  %vm2301_vm8 = vcmp.gt.f32.partialorder %v2237_v49, 0.0 }
 0x32f   :  { %v12881_v60 = vpop.f32.mrf.mxu0  ;;  %v2236_v31 = vadd.f32 %v12777_v46, %v2161_v7  ;;  %v2360_v1 = vmul.f32 0.2, %v2232_v32  ;;  %vm2296_vm5 = vcmp.gt.f32.partialorder %v2232_v32, 0.0  ;;  %v1988_v35 = vsub.f32 %v12605_v16, %v12743_v9  ;;  %v17252_v37 = vld [vmem:[#allocation29_spill] sm:$0xff] }
 0x330   :  { %v12909_v25 = vadd.f32 %v12741_v55, %v1633_v50  ;;  %v12911_v40 = vpop.f32.mrf.mxu2  ;;  %v2092_v17 = vmul.f32 %v12828_v51, %v1984_v33  ;;  %v2425_v20 = vsel %vm2297_vm7, %v2233_v10, %v2361_v52  ;;  %v2429_v58 = vsel %vm2301_vm8, %v2237_v49, %v2365_v41  ;;  %v11029_v33 = vld [vmem:[#allocation4 + $0x71c] sm:$0xf0] }
 0x331   :  { %vm2300_vm6 = vcmp.gt.f32.partialorder %v2236_v31, 0.0  ;;  %v2364_v54 = vmul.f32 0.2, %v2236_v31  ;;  %v2424_v48 = vsel %vm2296_vm5, %v2232_v32, %v2360_v1  ;;  %v2096_v23 = vmul.f32 %v12828_v51, %v1988_v35 }
 0x332   :  { %17240 = vst [vmem:[#allocation44_spill] sm:$0xff] %v12909_v25  ;;  %v10113_v7 = vor.u32 %v11037_v14, %v10112_v45  ;;  %v12916_v32 = vadd.f32 %v12733_v42, %v1535_v57  ;;  %v1983_v16 = vsub.f32 %v12477_v11, %v12716_v38  ;;  %v9857_v1 = vor.u32 %v10973_v34, %v9856_v4  ;;  %v10080_v57 = vld [vmem:[#allocation4 + $0x700] sm:$0xf] }
 0x333   :  { %v12894_v18 = vpop.f32.mrf.mxu3  ;;  %v2428_v19 = vsel %vm2300_vm6, %v2236_v31, %v2364_v54  ;;  %v1987_v50 = vsub.f32 %v12539_v6, %v12716_v38  ;;  %v12926_v10 = vpack.c.bf16 %v2429_v58, %v2425_v20  ;;  %v2166_v49 = vmul.f32 %v12797_v59, %v2092_v17 }
 0x334   :  { %17241 = vst [vmem:[#allocation45_spill] sm:$0xff] %v12916_v32  ;;  %v12918_v31 = vpack.c.bf16 %v2428_v19, %v2424_v48  ;;  %4215 = vmatpush.bf16.msrb.mxu2 %v10113_v7  ;;  %v2091_v42 = vmul.f32 %v12768_v61, %v1983_v16  ;;  %v2170_v41 = vmul.f32 %v12797_v59, %v2096_v23 }
 0x335   :  { %17243 = vst [vmem:[#allocation47_spill] sm:$0xff] %v12926_v10  ;;  %v2095_v11 = vmul.f32 %v12768_v61, %v1987_v50  ;;  %4166 = vmatpush.bf16.msra.mxu1 %v9857_v1  ;;  %v1813_v54 = vmul.f32 %v12916_v32, %v12916_v32  ;;  %v1814_v6 = vmul.f32 %v12909_v25, %v12909_v25  ;;  %v12942_v14 = vpop.f32.mrf.mxu1 }
 0x336   :  { %17242 = vst [vmem:[#allocation46_spill] sm:$0xff] %v12918_v31  ;;  %v1810_v45 = vmul.f32 %v12731_v2, %v12731_v2  ;;  %v2165_v48 = vmul.f32 %v12760_v62, %v2091_v42  ;;  %v1809_v35 = vmul.f32 %v12737_v13, %v12737_v13  ;;  %v1782_v4 = vadd.f32 %v12909_v25, %v12731_v2  ;;  %v9824_v2 = vld [vmem:[#allocation4 + $0x500] sm:$0xf] }
 0x337   :  { %v12900_v22 = vpop.f32.mrf.mxu0  ;;  %v2169_v19 = vmul.f32 %v12760_v62, %v2095_v11  ;;  %v2241_v34 = vadd.f32 %v12806_v36, %v2166_v49  ;;  %v10081_v17 = vor.u32 %v11029_v33, %v10080_v57  ;;  %v1761_v20 = vadd.f32 %v12916_v32, %v12737_v13  ;;  %v10965_v32 = vld [vmem:[#allocation4 + $0x51c] sm:$0xf0] }
 0x338   :  { %v2245_v58 = vadd.f32 %v12806_v36, %v2170_v41  ;;  %v2240_v23 = vadd.f32 %v12777_v46, %v2165_v48  ;;  %v1913_v16 = vadd.f32 %v1813_v54, %v1809_v35  ;;  %v1934_v1 = vadd.f32 %v1814_v6, %v1810_v45  ;;  %v12960_v11 = vpop.f32.mrf.mxu2  ;;  %v17246_v6 = vld [vmem:[#allocation39_spill] sm:$0xff] }
 0x339   :  { %v2244_v7 = vadd.f32 %v12777_v46, %v2169_v19  ;;  %v1638_v50 = vadd.f32 %v12766_v3, %v12722_v63  ;;  %v1540_v42 = vadd.f32 %v12787_v29, %v12728_v56  ;;  %4216 = vmatpush.bf16.msrb.mxu2 %v10081_v17  ;;  %v1817_v49 = vmul.f32 %v12772_v27, %v12772_v27  ;;  %v17248_v19 = vld [vmem:[#allocation20_spill] sm:$0xff]  ;;  %v17249_v17 = vld [vmem:[#allocation21_spill] sm:$0xff] }
 0x33a   :  { %4079 = vmatmul.bf16.gmra.mxu3 %v12918_v31  ;;  %v1818_v41 = vmul.f32 %v12762_v0, %v12762_v0  ;;  %v2368_v33 = vmul.f32 0.2, %v2240_v23  ;;  %v2369_v3 = vmul.f32 0.2, %v2241_v34  ;;  %vm2304_vm9 = vcmp.gt.f32.partialorder %v2240_v23, 0.0 }
 0x33b   :  { %v12922_v55 = vpop.f32.mrf.mxu3  ;;  %v2372_v54 = vmul.f32 0.2, %v2244_v7  ;;  %v12969_v45 = vadd.f32 %v17246_v6, %v1638_v50  ;;  %vm2308_vm10 = vcmp.gt.f32.partialorder %v2244_v7, 0.0  ;;  %vm2305_vm11 = vcmp.gt.f32.partialorder %v2241_v34, 0.0  ;;  %v17251_v50 = vld [vmem:[#allocation27_spill] sm:$0xff] }
 0x33c   :  { %4128 = vmatmul.bf16.gmra.mxu0 %v12926_v10  ;;  %v2373_v48 = vmul.f32 0.2, %v2245_v58  ;;  %v1991_v35 = vsub.f32 %v17248_v19, %v12716_v38  ;;  %v1995_v31 = vsub.f32 %v17249_v17, %v12716_v38  ;;  %v17250_v10 = vld [vmem:[#allocation38_spill] sm:$0xff]  ;;  %vm2309_vm12 = vcmp.gt.f32.partialorder %v2245_v58, 0.0 }
 0x33d   :  { %v12978_v15 = vadd.f32 %v17250_v10, %v1540_v42  ;;  %v1992_v6 = vsub.f32 %v17251_v50, %v12743_v9  ;;  %v1996_v25 = vsub.f32 %v17252_v37, %v12743_v9  ;;  %v2432_v13 = vsel %vm2304_vm9, %v2240_v23, %v2368_v33 }
 0x33e   :  { %v2436_v8 = vsel %vm2308_vm10, %v2244_v7, %v2372_v54  ;;  %v2099_v28 = vmul.f32 %v12768_v61, %v1991_v35  ;;  %v2103_v19 = vmul.f32 %v12768_v61, %v1995_v31  ;;  %v1762_v17 = vadd.f32 %v1761_v20, %v12772_v27  ;;  %v10048_v35 = vld [vmem:[#allocation4 + $0x6c0] sm:$0xf] }
 0x33f   :  { %v12931_v52 = vpop.f32.mrf.mxu0  ;;  %v1783_v10 = vadd.f32 %v1782_v4, %v12762_v0  ;;  %v1935_v42 = vadd.f32 %v1934_v1, %v1818_v41  ;;  %v2437_v50 = vsel %vm2309_vm12, %v2245_v58, %v2373_v48  ;;  %v2100_v37 = vmul.f32 %v12828_v51, %v1992_v6  ;;  %v11021_v6 = vld [vmem:[#allocation4 + $0x6dc] sm:$0xf0] }
 0x340   :  { %17244 = vst [vmem:[#allocation48_spill] sm:$0xff] %v12931_v52  ;;  %v12989_v52 = vpop.f32.mrf.mxu1  ;;  %v9825_v23 = vor.u32 %v10965_v32, %v9824_v2  ;;  %v1821_v7 = vmul.f32 %v12978_v15, %v12978_v15  ;;  %v1822_v31 = vmul.f32 %v12969_v45, %v12969_v45  ;;  %v1545_v4 = vadd.f32 %v12848_v47, %v12728_v56 }
 0x341   :  { %v12999_v20 = vpack.c.bf16 %v2436_v8, %v2432_v13  ;;  %v1643_v58 = vadd.f32 %v12841_v24, %v12722_v63  ;;  %v2177_v2 = vmul.f32 %v12760_v62, %v2103_v19  ;;  %v1763_v32 = vadd.f32 %v1762_v17, %v12978_v15  ;;  %v13011_v13 = vpop.f32.mrf.mxu2 }
 0x342   :  { %4167 = vmatpush.bf16.msra.mxu1 %v9825_v23  ;;  %v1784_v41 = vadd.f32 %v1783_v10, %v12969_v45  ;;  %v1826_v47 = vmul.f32 %v12811_v53, %v12811_v53  ;;  %v1825_v24 = vmul.f32 %v12830_v30, %v12830_v30  ;;  %v13026_v48 = vadd.f32 %v12822_v12, %v1545_v4 }
 0x343   :  { %v12966_v57 = vpop.f32.mrf.mxu3  ;;  %17253 = vst [vmem:[#allocation20_spill] sm:$0xff] %v12999_v20  ;;  %v2252_v17 = vadd.f32 %v12777_v46, %v2177_v2  ;;  %v10049_v10 = vor.u32 %v11021_v6, %v10048_v35  ;;  %v1646_v12 = vadd.f32 %v12870_v21, %v12722_v63  ;;  %v9792_v21 = vld [vmem:[#allocation4 + $0x4c0] sm:$0xf] }
 0x344   :  { %17245 = vst [vmem:[#allocation49_spill] sm:$0xff] %v12966_v57  ;;  %v2104_v57 = vmul.f32 %v12828_v51, %v1996_v25  ;;  %v2173_v25 = vmul.f32 %v12760_v62, %v2099_v28  ;;  %v13019_v28 = vadd.f32 %v12850_v39, %v1643_v58  ;;  %v1785_v39 = vadd.f32 %v1784_v41, %v12811_v53  ;;  %v10957_v58 = vld [vmem:[#allocation4 + $0x4dc] sm:$0xf0] }
 0x345   :  { %4217 = vmatpush.bf16.msrb.mxu2 %v10049_v10  ;;  %vm2316_vm14 = vcmp.gt.f32.partialorder %v2252_v17, 0.0 }
 0x346   :  { %17255 = vst [vmem:[#allocation38_spill] sm:$0xff] %v13019_v28  ;;  %v2178_v33 = vmul.f32 %v12797_v59, %v2104_v57  ;;  %v2248_v19 = vadd.f32 %v12777_v46, %v2173_v25  ;;  %v1764_v57 = vadd.f32 %v1763_v32, %v12830_v30  ;;  %v1648_v25 = vadd.f32 %v12898_v44, %v12722_v63 }
 0x347   :  { %v12971_v29 = vpop.f32.mrf.mxu0 }
 0x348   :  { %17247 = vst [vmem:[#allocation39_spill] sm:$0xff] %v12971_v29  ;;  %v2433_v29 = vsel %vm2305_vm11, %v2241_v34, %v2369_v3  ;;  %v1914_v34 = vadd.f32 %v1913_v16, %v1817_v49  ;;  %v2174_v49 = vmul.f32 %v12797_v59, %v2100_v37  ;;  %v1936_v3 = vadd.f32 %v1935_v42, %v1822_v31  ;;  %v13051_v2 = vpop.f32.mrf.mxu1 }
 0x349   :  { %v13013_v8 = vpack.c.bf16 %v2437_v50, %v2433_v29  ;;  %v1548_v29 = vadd.f32 %v12874_v43, %v12728_v56  ;;  %v1786_v43 = vadd.f32 %v1785_v39, %v13019_v28  ;;  %v2253_v23 = vadd.f32 %v12806_v36, %v2178_v33  ;;  %v13063_v6 = vpop.f32.mrf.mxu2 }
 0x34a   :  { %4084 = vmatmul.bf16.gmra.mxu3 %v12999_v20  ;;  %v1915_v54 = vadd.f32 %v1914_v34, %v1821_v7  ;;  %v1937_v42 = vadd.f32 %v1936_v3, %v1826_v47  ;;  %v2249_v37 = vadd.f32 %v12806_v36, %v2174_v49  ;;  %v1765_v7 = vadd.f32 %v1764_v57, %v13026_v48  ;;  %v17257_v3 = vld [vmem:[#allocation30_spill] sm:$0xff] }
 0x34b   :  { %v13003_v1 = vpop.f32.mrf.mxu3  ;;  %17254 = vst [vmem:[#allocation21_spill] sm:$0xff] %v13013_v8  ;;  %v1830_v31 = vmul.f32 %v13019_v28, %v13019_v28  ;;  %v13044_v4 = vadd.f32 %v12854_v26, %v1548_v29  ;;  %v13047_v34 = vadd.f32 %v12887_v5, %v1646_v12  ;;  %v2376_v41 = vmul.f32 0.2, %v2248_v19  ;;  %v17256_v26 = vld [vmem:[#allocation22_spill] sm:$0xff]  ;;  %v17258_v29 = vld [vmem:[#allocation23_spill] sm:$0xff] }
 0x34c   :  { %4133 = vmatmul.bf16.gmra.mxu0 %v13013_v8  ;;  %v1916_v50 = vadd.f32 %v1915_v54, %v1825_v24  ;;  %v2380_v47 = vmul.f32 0.2, %v2252_v17  ;;  %v9793_v24 = vor.u32 %v10957_v58, %v9792_v21  ;;  %v1550_v49 = vadd.f32 %v12894_v18, %v12728_v56  ;;  %v17259_v18 = vld [vmem:[#allocation31_spill] sm:$0xff] }
 0x34d   :  { %vm2312_vm13 = vcmp.gt.f32.partialorder %v2248_v19, 0.0  ;;  %v1999_v5 = vsub.f32 %v17256_v26, %v12716_v38  ;;  %v2377_v33 = vmul.f32 0.2, %v2249_v37  ;;  %v2381_v54 = vmul.f32 0.2, %v2253_v23 }
 0x34e   :  { %v2000_v44 = vsub.f32 %v17257_v3, %v12743_v9  ;;  %v2003_v35 = vsub.f32 %v17258_v29, %v12716_v38  ;;  %4168 = vmatpush.bf16.msra.mxu1 %v9793_v24  ;;  %vm2313_vm15 = vcmp.gt.f32.partialorder %v2249_v37, 0.0  ;;  %vm2317_vm0 = vcmp.gt.f32.partialorder %v2253_v23, 0.0 }
 0x34f   :  { %v13021_v16 = vpop.f32.mrf.mxu0  ;;  %v2004_v39 = vsub.f32 %v17259_v18, %v12743_v9  ;;  %v2107_v10 = vmul.f32 %v12768_v61, %v1999_v5  ;;  %v1829_v57 = vmul.f32 %v13026_v48, %v13026_v48  ;;  %v2440_v21 = vsel %vm2312_vm13, %v2248_v19, %v2376_v41 }
 0x350   :  { %v2444_v58 = vsel %vm2316_vm14, %v2252_v17, %v2380_v47  ;;  %v2111_v26 = vmul.f32 %v12768_v61, %v2003_v35  ;;  %v1938_v3 = vadd.f32 %v1937_v42, %v1830_v31  ;;  %v13074_v24 = vadd.f32 %v12911_v40, %v1648_v25 }
 0x351   :  { %v2108_v29 = vmul.f32 %v12828_v51, %v2000_v44  ;;  %v2112_v20 = vmul.f32 %v12828_v51, %v2004_v39  ;;  %v13079_v18 = vadd.f32 %v12881_v60, %v1550_v49  ;;  %v1553_v5 = vadd.f32 %v12922_v55, %v12728_v56  ;;  %v17263_v44 = vld [vmem:[#allocation49_spill] sm:$0xff] }
 0x352   :  { %v2441_v8 = vsel %vm2313_vm15, %v2249_v37, %v2377_v33  ;;  %v2445_v28 = vsel %vm2317_vm0, %v2253_v23, %v2381_v54  ;;  %v1833_v19 = vmul.f32 %v13044_v4, %v13044_v4  ;;  %v1834_v17 = vmul.f32 %v13047_v34, %v13047_v34  ;;  %v13110_v54 = vpop.f32.mrf.mxu1 }
 0x353   :  { %v13053_v32 = vpop.f32.mrf.mxu3  ;;  %v13087_v40 = vpack.c.bf16 %v2444_v58, %v2440_v21  ;;  %v2181_v42 = vmul.f32 %v12760_v62, %v2107_v10  ;;  %v1917_v31 = vadd.f32 %v1916_v50, %v1829_v57  ;;  %v1787_v25 = vadd.f32 %v1786_v43, %v13047_v34  ;;  %v13123_v21 = vpop.f32.mrf.mxu2 }
 0x354   :  { %v1651_v60 = vadd.f32 %v12942_v14, %v12722_v63  ;;  %v2185_v55 = vmul.f32 %v12760_v62, %v2111_v26  ;;  %v1838_v37 = vmul.f32 %v13074_v24, %v13074_v24  ;;  %v13096_v23 = vpack.c.bf16 %v2445_v28, %v2441_v8 }
 0x355   :  { %17260 = vst [vmem:[#allocation27_spill] sm:$0xff] %v13087_v40  ;;  %v2182_v47 = vmul.f32 %v12797_v59, %v2108_v29  ;;  %v2186_v49 = vmul.f32 %v12797_v59, %v2112_v20  ;;  %v1766_v50 = vadd.f32 %v1765_v7, %v13044_v4  ;;  %v1837_v43 = vmul.f32 %v13079_v18, %v13079_v18 }
 0x356   :  { %17261 = vst [vmem:[#allocation29_spill] sm:$0xff] %v13096_v23  ;;  %v13105_v14 = vadd.f32 %v12900_v22, %v1553_v5  ;;  %v13108_v33 = vadd.f32 %v12960_v11, %v1651_v60  ;;  %v1918_v8 = vadd.f32 %v1917_v31, %v1833_v19  ;;  %v1939_v28 = vadd.f32 %v1938_v3, %v1834_v17  ;;  %v17265_v60 = vld [vmem:[#allocation39_spill] sm:$0xff] }
 0x357   :  { %v13070_v12 = vpop.f32.mrf.mxu0  ;;  %v1555_v35 = vadd.f32 %v17263_v44, %v12728_v56  ;;  %v2256_v20 = vadd.f32 %v12777_v46, %v2181_v42  ;;  %v1767_v7 = vadd.f32 %v1766_v50, %v13079_v18  ;;  %v1788_v39 = vadd.f32 %v1787_v25, %v13074_v24  ;;  %v17264_v42 = vld [vmem:[#allocation48_spill] sm:$0xff] }
 0x358   :  { %17262 = vst [vmem:[#allocation22_spill] sm:$0xff] %v13105_v14  ;;  %v1558_v22 = vadd.f32 %v13003_v1, %v12728_v56  ;;  %v2260_v11 = vadd.f32 %v12777_v46, %v2185_v55  ;;  %v1940_v10 = vadd.f32 %v1939_v28, %v1838_v37  ;;  %v1653_v57 = vadd.f32 %v12989_v52, %v12722_v63  ;;  %v17267_v28 = vld [vmem:[#allocation33_spill] sm:$0xff] }
 0x359   :  { %v2257_v58 = vadd.f32 %v12806_v36, %v2182_v47  ;;  %v2261_v26 = vadd.f32 %v12806_v36, %v2186_v49  ;;  %v1919_v3 = vadd.f32 %v1918_v8, %v1837_v43  ;;  %v1768_v29 = vadd.f32 %v1767_v7, %v13105_v14  ;;  %v17266_v49 = vld [vmem:[#allocation32_spill] sm:$0xff] }
 0x35a   :  { %4089 = vmatmul.bf16.gmra.mxu3 %v13087_v40  ;;  %v1789_v5 = vadd.f32 %v1788_v39, %v13108_v33  ;;  %v1842_v1 = vmul.f32 %v13108_v33, %v13108_v33  ;;  %v1841_v17 = vmul.f32 %v13105_v14, %v13105_v14  ;;  %v13134_v52 = vadd.f32 %v17264_v42, %v1555_v35  ;;  %v17268_v7 = vld [vmem:[#allocation24_spill] sm:$0xff] }
 0x35b   :  { %v1562_v41 = vpop.f32.mrf.mxu3  ;;  %v13137_v31 = vadd.f32 %v13011_v13, %v1653_v57  ;;  %v2384_v25 = vmul.f32 0.2, %v2256_v20  ;;  %v13140_v55 = vadd.f32 %v17265_v60, %v1558_v22  ;;  %vm2320_vm1 = vcmp.gt.f32.partialorder %v2256_v20, 0.0  ;;  %v17269_v22 = vld [vmem:[#allocation25_spill] sm:$0xff] }
 0x35c   :  { %4138 = vmatmul.bf16.gmra.mxu0 %v13096_v23  ;;  %v2388_v47 = vmul.f32 0.2, %v2260_v11  ;;  %v2008_v50 = vsub.f32 %v17266_v49, %v12743_v9  ;;  %v2385_v43 = vmul.f32 0.2, %v2257_v58  ;;  %v2389_v8 = vmul.f32 0.2, %v2261_v26  ;;  %v13154_v49 = vpop.f32.mrf.mxu1 }
 0x35d   :  { %vm2324_vm2 = vcmp.gt.f32.partialorder %v2260_v11, 0.0  ;;  %v2012_v44 = vsub.f32 %v17267_v28, %v12743_v9  ;;  %v1560_v13 = vadd.f32 %v13053_v32, %v12728_v56  ;;  %v2007_v39 = vsub.f32 %v17268_v7, %v12716_v38 }
 0x35e   :  { %v2116_v35 = vmul.f32 %v12828_v51, %v2008_v50  ;;  %v2011_v57 = vsub.f32 %v17269_v22, %v12716_v38  ;;  %vm2321_vm3 = vcmp.gt.f32.partialorder %v2257_v58, 0.0  ;;  %vm2325_vm4 = vcmp.gt.f32.partialorder %v2261_v26, 0.0 }
 0x35f   :  { %v1613_v19 = vpop.f32.mrf.mxu0  ;;  %v2448_v42 = vsel %vm2320_vm1, %v2256_v20, %v2384_v25  ;;  %v2120_v60 = vmul.f32 %v12828_v51, %v2012_v44  ;;  %v1563_v28 = vadd.f32 %v1562_v41, %v12728_v56  ;;  %v2452_v40 = vsel %vm2324_vm2, %v2260_v11, %v2388_v47  ;;  %v13170_v47 = vpop.f32.mrf.mxu2 }
 0x360   :  { %v2115_v32 = vmul.f32 %v12768_v61, %v2007_v39  ;;  %v2119_v50 = vmul.f32 %v12768_v61, %v2011_v57  ;;  %v1920_v23 = vadd.f32 %v1919_v3, %v1841_v17  ;;  %v1941_v14 = vadd.f32 %v1940_v10, %v1842_v1 }
 0x361   :  { %v1845_v7 = vmul.f32 %v13134_v52, %v13134_v52  ;;  %v1846_v22 = vmul.f32 %v13137_v31, %v13137_v31  ;;  %v13164_v20 = vadd.f32 %v13021_v16, %v1560_v13  ;;  %v2449_v25 = vsel %vm2321_vm3, %v2257_v58, %v2385_v43 }
 0x362   :  { %v2453_v44 = vsel %vm2325_vm4, %v2261_v26, %v2389_v8  ;;  %v2190_v41 = vmul.f32 %v12797_v59, %v2116_v35  ;;  %v13168_v11 = vadd.f32 %v1789_v5, %v13137_v31  ;;  %v13173_v3 = vpack.c.bf16 %v2452_v40, %v2448_v42 }
 0x363   :  { %v1564_v37 = vpop.f32.mrf.mxu3  ;;  %v2194_v1 = vmul.f32 %v12797_v59, %v2120_v60  ;;  %v1849_v17 = vmul.f32 %v13140_v55, %v13140_v55  ;;  %v13179_v16 = vadd.f32 %v13070_v12, %v1563_v28  ;;  %v2189_v43 = vmul.f32 %v12760_v62, %v2115_v32 }
 0x364   :  { %v1565_v10 = vadd.f32 %v1564_v37, %v12728_v56  ;;  %17270 = vst [vmem:[#allocation30_spill] sm:$0xff] %v13173_v3  ;;  %v2193_v5 = vmul.f32 %v12760_v62, %v2119_v50  ;;  %v1769_v8 = vadd.f32 %v1768_v29, %v13134_v52  ;;  %v1656_v40 = vadd.f32 %v13051_v2, %v12722_v63 }
 0x365   :  { %v13186_v37 = vpack.c.bf16 %v2453_v44, %v2449_v25  ;;  %v1921_v35 = vadd.f32 %v1920_v23, %v1845_v7  ;;  %v13190_v12 = vadd.f32 %v1941_v14, %v1846_v22  ;;  %v1853_v39 = vmul.f32 %v13164_v20, %v13164_v20  ;;  %v1662_v25 = vpop.f32.mrf.mxu1 }
 0x366   :  { %v2265_v57 = vadd.f32 %v12806_v36, %v2190_v41  ;;  %v1770_v42 = vadd.f32 %v1769_v8, %v13140_v55  ;;  %v1658_v29 = vadd.f32 %v13110_v54, %v12722_v63  ;;  %v13198_v2 = vadd.f32 %v1613_v19, %v1565_v10  ;;  %v17272_v41 = vld [vmem:[#allocation34_spill] sm:$0xff] }
 0x367   :  { %v1616_v58 = vpop.f32.mrf.mxu0  ;;  %17271 = vst [vmem:[#allocation23_spill] sm:$0xff] %v13186_v37  ;;  %v2269_v60 = vadd.f32 %v12806_v36, %v2194_v1  ;;  %v1922_v28 = vadd.f32 %v1921_v35, %v1849_v17  ;;  %v1857_v23 = vmul.f32 %v13179_v16, %v13179_v16  ;;  %v2264_v14 = vadd.f32 %v12777_v46, %v2189_v43  ;;  %v17273_v17 = vld [vmem:[#allocation35_spill] sm:$0xff]  ;;  %v1711_v35 = vpop.f32.mrf.mxu2 }
 0x368   :  { %v2268_v32 = vadd.f32 %v12777_v46, %v2193_v5  ;;  %v13207_v50 = vadd.f32 %v13063_v6, %v1656_v40  ;;  %v1771_v7 = vadd.f32 %v1770_v42, %v13164_v20  ;;  %v13211_v54 = vadd.f32 %v13123_v21, %v1658_v29 }
 0x369   :  { %v1923_v22 = vadd.f32 %v1922_v28, %v1853_v39  ;;  %vm2329_vm5 = vcmp.gt.f32.partialorder %v2265_v57, 0.0  ;;  %v2393_v44 = vmul.f32 0.2, %v2265_v57  ;;  %v2016_v10 = vsub.f32 %v17272_v41, %v12743_v9 }
 0x36a   :  { %4094 = vmatmul.bf16.gmra.mxu3 %v13173_v3  ;;  %v1772_v1 = vadd.f32 %v1771_v7, %v13179_v16  ;;  %v1861_v6 = vmul.f32 %v13198_v2, %v13198_v2  ;;  %vm2333_vm6 = vcmp.gt.f32.partialorder %v2269_v60, 0.0  ;;  %vm2328_vm7 = vcmp.gt.f32.partialorder %v2264_v14, 0.0 }
 0x36b   :  { %v1567_v26 = vpop.f32.mrf.mxu3  ;;  %v1924_v21 = vadd.f32 %v1923_v22, %v1857_v23  ;;  %v2396_v5 = vmul.f32 0.2, %v2268_v32  ;;  %vm2332_vm8 = vcmp.gt.f32.partialorder %v2268_v32, 0.0  ;;  %v2397_v42 = vmul.f32 0.2, %v2269_v60  ;;  %v17275_v23 = vld [vmem:[#allocation28_spill] sm:$0xff] }
 0x36c   :  { %v1568_v13 = vadd.f32 %v1567_v26, %v12728_v56  ;;  %4143 = vmatmul.bf16.gmra.mxu0 %v13186_v37  ;;  %v2020_v26 = vsub.f32 %v17273_v17, %v12743_v9  ;;  %v1773_v8 = vadd.f32 %v1772_v1, %v13198_v2  ;;  %v2124_v29 = vmul.f32 %v12828_v51, %v2016_v10  ;;  %v17274_v9 = vld [vmem:[#allocation26_spill] sm:$0xff] }
 0x36d   :  { %v2015_v28 = vsub.f32 %v17274_v9, %v12716_v38  ;;  %v2019_v7 = vsub.f32 %v17275_v23, %v12716_v38  ;;  %v1925_v22 = vadd.f32 %v1924_v21, %v1861_v6  ;;  %v1850_v9 = vmul.f32 %v13207_v50, %v13207_v50 }
 0x36e   :  { %v13213_v19 = vadd.f32 %v1616_v58, %v1568_v13  ;;  %v2392_v58 = vmul.f32 0.2, %v2264_v14  ;;  %v2128_v17 = vmul.f32 %v12828_v51, %v2020_v26  ;;  %v1661_v21 = vadd.f32 %v13154_v49, %v12722_v63 }
 0x36f   :  { %v1618_v39 = vpop.f32.mrf.mxu0  ;;  %v2123_v3 = vmul.f32 %v12768_v61, %v2015_v28  ;;  %v2127_v10 = vmul.f32 %v12768_v61, %v2019_v7  ;;  %v2457_v51 = vsel %vm2329_vm5, %v2265_v57, %v2393_v44 }
 0x370   :  { %v1865_v40 = vmul.f32 %v13213_v19, %v13213_v19  ;;  %v1774_v41 = vadd.f32 %v1773_v8, %v13213_v19  ;;  %v1791_v8 = vadd.f32 %v13168_v11, %v13207_v50 }
 0x371   :  { %v2197_v49 = vmul.f32 %v12760_v62, %v2123_v3  ;;  %v2201_v57 = vmul.f32 %v12760_v62, %v2127_v10  ;;  %v1714_v3 = vpop.f32.mrf.mxu2 }
 0x372   :  { %v1926_v37 = vadd.f32 %v1925_v22, %v1865_v40  ;;  %v1854_v40 = vmul.f32 %v13211_v54, %v13211_v54 }
 0x373   :  { %v1569_v43 = vpop.f32.mrf.mxu3  ;;  %v2272_v23 = vadd.f32 %v12777_v46, %v2197_v49  ;;  %v2276_v7 = vadd.f32 %v12777_v46, %v2201_v57 }
 0x374   :  { %v1570_v13 = vadd.f32 %v1569_v43, %v12728_v56  ;;  %v2456_v56 = vsel %vm2328_vm7, %v2264_v14, %v2392_v58  ;;  %v2460_v43 = vsel %vm2332_vm8, %v2268_v32, %v2396_v5  ;;  %v2461_v14 = vsel %vm2333_vm6, %v2269_v60, %v2397_v42 }
 0x375   :  { %v2198_v32 = vmul.f32 %v12797_v59, %v2124_v29  ;;  %v13248_v58 = vpack.c.bf16 %v2460_v43, %v2456_v56  ;;  %v2202_v5 = vmul.f32 %v12797_v59, %v2128_v17  ;;  %v13258_v60 = vadd.f32 %v13170_v47, %v1661_v21 }
 0x376   :  { %v13232_v1 = vadd.f32 %v1618_v39, %v1570_v13  ;;  %v1665_v13 = vpop.f32.mrf.mxu1  ;;  %v13260_v39 = vpack.c.bf16 %v2461_v14, %v2457_v51  ;;  %v1943_v59 = vadd.f32 %v13190_v12, %v1850_v9  ;;  %v1792_v42 = vadd.f32 %v1791_v8, %v13211_v54 }
 0x377   :  { %17276 = vst [vmem:[#allocation31_spill] sm:$0xff] %v13248_v58  ;;  %v2273_v11 = vadd.f32 %v12806_v36, %v2198_v32  ;;  %v2277_v62 = vadd.f32 %v12806_v36, %v2202_v5  ;;  %v1663_v47 = vadd.f32 %v1662_v25, %v12722_v63  ;;  %v1858_v56 = vmul.f32 %v13258_v60, %v13258_v60 }
 0x378   :  { %v1775_v38 = vadd.f32 %v1774_v41, %v13232_v1  ;;  %v1869_v6 = vmul.f32 %v13232_v1, %v13232_v1  ;;  %v1944_v22 = vadd.f32 %v1943_v59, %v1854_v40  ;;  %v1793_v12 = vadd.f32 %v1792_v42, %v13258_v60 }
 0x379   :  { %v13274_v43 = vadd.f32 %v1711_v35, %v1663_v47  ;;  %v1666_v10 = vadd.f32 %v1665_v13, %v12722_v63  ;;  %vm2337_vm9 = vcmp.gt.f32.partialorder %v2273_v11, 0.0  ;;  %vm2341_vm10 = vcmp.gt.f32.partialorder %v2277_v62, 0.0 }
 0x37a   :  { %v1776_v26 = vrot.slane %v1775_v38, 4  ;;  %v1927_v61 = vadd.f32 %v1926_v37, %v1869_v6  ;;  %4099 = vmatmul.bf16.gmra.mxu3 %v13248_v58  ;;  %v2401_v9 = vmul.f32 0.2, %v2273_v11  ;;  %v2405_v46 = vmul.f32 0.2, %v2277_v62 }
 0x37b   :  { %v2400_v6 = vmul.f32 0.2, %v2272_v23  ;;  %v2404_v21 = vmul.f32 0.2, %v2276_v7  ;;  %vm2336_vm11 = vcmp.gt.f32.partialorder %v2272_v23, 0.0  ;;  %vm2340_vm12 = vcmp.gt.f32.partialorder %v2276_v7, 0.0 }
 0x37c   :  { %v1777_v44 = vadd.f32 %v1776_v26, %v1775_v38  ;;  %v1928_v37 = vrot.slane %v1927_v61, 4  ;;  %4148 = vmatmul.bf16.gmra.mxu0 %v13260_v39  ;;  %v13277_v38 = vadd.f32 %v1714_v3, %v1666_v10  ;;  %v1862_v35 = vmul.f32 %v13274_v43, %v13274_v43 }
 0x37d   :  { %v1945_v26 = vadd.f32 %v1944_v22, %v1858_v56  ;;  %v2465_v40 = vsel %vm2337_vm9, %v2273_v11, %v2401_v9  ;;  %v2469_v13 = vsel %vm2341_vm10, %v2277_v62, %v2405_v46  ;;  %v2464_v49 = vsel %vm2336_vm11, %v2272_v23, %v2400_v6 }
 0x37e   :  { %v1778_v29 = vrot.slane %v1777_v44, 2  ;;  %v1929_v28 = vadd.f32 %v1928_v37, %v1927_v61  ;;  %v1667_v32 = vpop.f32.mrf.mxu1  ;;  %v1794_v61 = vadd.f32 %v1793_v12, %v13274_v43  ;;  %v2468_v57 = vsel %vm2340_vm12, %v2276_v7, %v2404_v21 }
 0x37f   :  { %v1668_v37 = vadd.f32 %v1667_v32, %v12722_v63  ;;  %v13294_v11 = vpack.c.bf16 %v2468_v57, %v2464_v49  ;;  %v13296_v62 = vpack.c.bf16 %v2469_v13, %v2465_v40  ;;  %v13305_v49 = vld [vmem:[#allocation13] ss:$2 sm:$0xf] }
 0x380   :  { %v1779_v41 = vadd.f32 %v1778_v29, %v1777_v44  ;;  %v1930_v17 = vrot.slane %v1929_v28, 2  ;;  %v1866_v44 = vmul.f32 %v13277_v38, %v13277_v38  ;;  %v1946_v29 = vadd.f32 %v1945_v26, %v1862_v35 }
 0x381   :  { %v1795_v47 = vadd.f32 %v1794_v61, %v13277_v38  ;;  %17277 = vst [vmem:[#allocation49_spill] sm:$0xff] %v13294_v11  ;;  %v13308_v57 = vperm.slane %v13305_v49, 2 }
 0x382   :  { %v1780_v36 = vrot.slane %v1779_v41, 1  ;;  %v1931_v25 = vadd.f32 %v1930_v17, %v1929_v28  ;;  %v1716_v28 = vpop.f32.mrf.mxu2  ;;  %17278 = vst [vmem:[#allocation48_spill] sm:$0xff] %v13296_v62  ;;  %v1947_v23 = vadd.f32 %v1946_v29, %v1866_v44  ;;  %v13310_v44 = vld [vmem:[#allocation13 + $0x1] ss:$2 sm:$0xf] }
 0x383   :  { %v13292_v22 = vadd.f32 %v1716_v28, %v1668_v37  ;;  %v13313_v37 = vperm.slane %v13310_v44, 2  ;;  %v10997_v28 = vld [vmem:[#allocation4 + $0x61c] sm:$0xf0] }
 0x384   :  { %v1781_v51 = vadd.f32 %v1780_v36, %v1779_v41  ;;  %v1932_v14 = vrot.slane %v1931_v25, 1 }
 0x385   :  { %v1796_v12 = vadd.f32 %v1795_v47, %v13292_v22  ;;  %v1870_v63 = vmul.f32 %v13292_v22, %v13292_v22  ;;  %v9952_v47 = vld [vmem:[#allocation4 + $0x600] sm:$0xf] }
 0x386   :  { %v13282_v5 = vmul.f32 0.0078125, %v1781_v51  ;;  %v1933_v8 = vadd.f32 %v1932_v14, %v1931_v25 }
 0x387   :  { %v1797_v41 = vrot.slane %v1796_v12, 4  ;;  %v1948_v17 = vadd.f32 %v1947_v23, %v1870_v63  ;;  %v9760_v63 = vld [vmem:[#allocation4 + $0x480] sm:$0xf] }
 0x388   :  { %v1957_v59 = vmul.f32 0.0078125, %v1933_v8  ;;  %v1961_v42 = vmul.f32 %v13282_v5, %v13282_v5 }
 0x389   :  { %v1798_v56 = vadd.f32 %v1797_v41, %v1796_v12  ;;  %v1949_v10 = vrot.slane %v1948_v17, 4  ;;  %v11013_v12 = vld [vmem:[#allocation4 + $0x69c] sm:$0xf0]  ;;  %v2025_v41 = vsub.f32 %v13213_v19, %v13282_v5 }
 0x38a   :  { %v1965_v3 = vsub.f32 %v1957_v59, %v1961_v42  ;;  %4104 = vmatmul.bf16.gmra.mxu3 %v13294_v11  ;;  %v10941_v59 = vld [vmem:[#allocation4 + $0x45c] sm:$0xf0]  ;;  %v9922_v11 = vld [vmem:[#allocation4 + $0x5e0] sm:$0xf0] }
 0x38b   :  { %v1799_v36 = vrot.slane %v1798_v56, 2  ;;  %v1950_v25 = vadd.f32 %v1949_v10, %v1948_v17  ;;  %v2029_v17 = vsub.f32 %v13232_v1, %v13282_v5 }
 0x38c   :  { %v2033_v7 = vadd.f32 0.8, %v1965_v3  ;;  %4153 = vmatmul.bf16.gmra.mxu0 %v13296_v62  ;;  %v17281_v3 = vld [vmem:[#allocation40_spill] sm:$0xff]  ;;  %v11041_v62 = vld [vmem:[#allocation4 + $0x784] sm:$0xf] }
 0x38d   :  { %v1800_v46 = vadd.f32 %v1799_v36, %v1798_v56  ;;  %v1951_v6 = vrot.slane %v1950_v25, 2  ;;  %v10949_v36 = vld [vmem:[#allocation4 + $0x49c] sm:$0xf0] }
 0x38e   :  { %11224 = vrsqrt.f32 %v2033_v7  ;;  %vm2061_vm14 = vweird.f32 %v2033_v7 }
 0x38f   :  { %v1801_v51 = vrot.slane %v1800_v46, 1  ;;  %v1952_v14 = vadd.f32 %v1951_v6, %v1950_v25  ;;  %v9984_v25 = vld [vmem:[#allocation4 + $0x640] sm:$0xf] }
 0x390   :  { %v17282_v6 = vld [vmem:[#allocation41_spill] sm:$0xff] }
 0x391   :  { %v1802_v32 = vadd.f32 %v1801_v51, %v1800_v46  ;;  %v1953_v26 = vrot.slane %v1952_v14, 1  ;;  %v11005_v46 = vld [vmem:[#allocation4 + $0x65c] sm:$0xf0]  ;;  %v9761_v51 = vor.u32 %v10949_v36, %v9760_v63 }
 0x392   :  { %v17284_v36 = vld [vmem:[#allocation45_spill] sm:$0xff] }
 0x393   :  { %v13303_v8 = vmul.f32 0.0078125, %v1802_v32  ;;  %v1954_v40 = vadd.f32 %v1953_v26, %v1952_v14  ;;  %v9985_v14 = vor.u32 %v11005_v46, %v9984_v25  ;;  %v9666_v32 = vld [vmem:[#allocation4 + $0x3e0] sm:$0xf0]  ;;  %4169 = vmatpush.bf16.msra.mxu1 %v9761_v51  ;;  %v1973_v25 = vsub.f32 %v17284_v36, %v13282_v5 }
 0x394   :  { %v11225_v9 = vpop.eup %11224  ;;  %v10857_v26 = vld [vmem:[#allocation4 + $0x1c4] sm:$0xf] }
 0x395   :  { %v2056_v21 = vmul.f32 %v11225_v9, %v2033_v7  ;;  %vm2062_vm13 = vweird.f32 %v11225_v9  ;;  %v1958_v42 = vmul.f32 0.0078125, %v1954_v40  ;;  %v1962_v29 = vmul.f32 %v13303_v8, %v13303_v8  ;;  %v10016_v7 = vld [vmem:[#allocation4 + $0x680] sm:$0xf] }
 0x396   :  { %vm13315_vm15 = vmor %vm2061_vm14, %vm2062_vm13  ;;  %v10017_v10 = vor.u32 %v11013_v12, %v10016_v7  ;;  %v17283_v7 = vld [vmem:[#allocation37_spill] sm:$0xff] }
 0x397   :  { %v2057_v35 = vmul.f32 %v11225_v9, %v2056_v21  ;;  %v1966_v56 = vsub.f32 %v1958_v42, %v1962_v29  ;;  %v9728_v42 = vld [vmem:[#allocation4 + $0x440] sm:$0xf]  ;;  %v1969_v12 = vsub.f32 %v17283_v7, %v13282_v5 }
 0x398   :  { %4218 = vmatpush.bf16.msrb.mxu2 %v10017_v10  ;;  %v10905_v10 = vld [vmem:[#allocation4 + $0x344] sm:$0xf]  ;;  %v9729_v46 = vor.u32 %v10941_v59, %v9728_v42 }
 0x399   :  { %v2058_v61 = vmul.f32 0.5, %v2057_v35  ;;  %v10921_v35 = vld [vmem:[#allocation4 + $0x3c4] sm:$0xf] }
 0x39a   :  { %4109 = vmatmul.bf16.gmra.mxu3 %v17281_v3  ;;  %v9669_v40 = vor.u32 %v10921_v35, %v9666_v32  ;;  %v9602_v32 = vld [vmem:[#allocation4 + $0x360] sm:$0xf0]  ;;  %4170 = vmatpush.bf16.msra.mxu1 %v9729_v46  ;;  %v9696_v46 = vld [vmem:[#allocation4 + $0x400] sm:$0xf] }
 0x39b   :  { %v2059_v13 = vsub.f32 1.5, %v2058_v61  ;;  %v13337_v61 = vadd.f32 0.8, %v1966_v56  ;;  %v9378_v56 = vld [vmem:[#allocation4 + $0x1a0] sm:$0xf0]  ;;  %v9605_v7 = vor.u32 %v10905_v10, %v9602_v32 }
 0x39c   :  { %4158 = vmatmul.bf16.gmra.mxu0 %v17282_v6  ;;  %4219 = vmatpush.bf16.msrb.mxu2 %v9985_v14  ;;  %v10833_v14 = vld [vmem:[#allocation4 + $0x104] sm:$0xf]  ;;  %v10933_v32 = vld [vmem:[#allocation4 + $0x41c] sm:$0xf0] }
 0x39d   :  { %v2060_v23 = vmul.f32 %v11225_v9, %v2059_v13  ;;  %v9410_v13 = vld [vmem:[#allocation4 + $0x1e0] sm:$0xf0]  ;;  %11226 = vrsqrt.f32 %v13337_v61  ;;  %4311 = vmatpush.bf16.msra.mxu0 %v9669_v40  ;;  %vm2071_vm5 = vweird.f32 %v13337_v61 }
 0x39e   :  { %v9413_v29 = vor.u32 %v10857_v26, %v9410_v13  ;;  %v10841_v13 = vld [vmem:[#allocation4 + $0x144] sm:$0xf] }
 0x39f   :  { %v13333_v21 = vsel %vm13315_vm15, %v11225_v9, %v2060_v23  ;;  %v10913_v9 = vld [vmem:[#allocation4 + $0x384] sm:$0xf] }
 0x3a0   :  { %v2133_v19 = vmul.f32 %v13333_v21, %v2025_v41  ;;  %v2137_v1 = vmul.f32 %v13333_v21, %v2029_v17  ;;  %v9634_v23 = vld [vmem:[#allocation4 + $0x3a0] sm:$0xf0]  ;;  %4262 = vmatpush.bf16.msra.mxu3 %v9413_v29  ;;  %v2077_v26 = vmul.f32 %v13333_v21, %v1969_v12  ;;  %v2081_v36 = vmul.f32 %v13333_v21, %v1973_v25 }
 0x3a1   :  { %v10849_v17 = vld [vmem:[#allocation4 + $0x184] sm:$0xf]  ;;  %v9637_v51 = vor.u32 %v10913_v9, %v9634_v23 }
 0x3a2   :  { %v2207_v63 = vmul.f32 %v13308_v57, %v2133_v19  ;;  %v2211_v41 = vmul.f32 %v13308_v57, %v2137_v1  ;;  %v9381_v35 = vor.u32 %v10849_v17, %v9378_v56  ;;  %v9346_v40 = vld [vmem:[#allocation4 + $0x160] sm:$0xf0]  ;;  %v2151_v42 = vmul.f32 %v13308_v57, %v2077_v26 }
 0x3a3   :  { %4312 = vmatpush.bf16.msra.mxu0 %v9637_v51  ;;  %v9349_v9 = vor.u32 %v10841_v13, %v9346_v40  ;;  %v10897_v23 = vld [vmem:[#allocation4 + $0x304] sm:$0xf]  ;;  %v13352_v17 = vpop.eup %11226 }
 0x3a4   :  { %v2282_v19 = vadd.f32 %v13313_v37, %v2207_v63  ;;  %v2286_v1 = vadd.f32 %v13313_v37, %v2211_v41  ;;  %4263 = vmatpush.bf16.msra.mxu3 %v9381_v35  ;;  %v9570_v12 = vld [vmem:[#allocation4 + $0x320] sm:$0xf0]  ;;  %v9953_v63 = vor.u32 %v10997_v28, %v9952_v47  ;;  %v2155_v41 = vmul.f32 %v13308_v57, %v2081_v36 }
 0x3a5   :  { %v9314_v25 = vld [vmem:[#allocation4 + $0x120] sm:$0xf0]  ;;  %v2066_v51 = vmul.f32 %v13352_v17, %v13337_v61  ;;  %v2226_v35 = vadd.f32 %v13313_v37, %v2151_v42  ;;  %v9573_v13 = vor.u32 %v10897_v23, %v9570_v12  ;;  %v9697_v28 = vor.u32 %v10933_v32, %v9696_v46 }
 0x3a6   :  { %vm2346_vm0 = vcmp.gt.f32.partialorder %v2282_v19, 0.0  ;;  %vm2350_vm1 = vcmp.gt.f32.partialorder %v2286_v1, 0.0  ;;  %v2410_v29 = vmul.f32 0.2, %v2282_v19  ;;  %v2414_v59 = vmul.f32 0.2, %v2286_v1  ;;  %4220 = vmatpush.bf16.msrb.mxu2 %v9953_v63 }
 0x3a7   :  { %4313 = vmatpush.bf16.msra.mxu0 %v9605_v7  ;;  %v2230_v47 = vadd.f32 %v13313_v37, %v2155_v41  ;;  %v2067_v40 = vmul.f32 %v13352_v17, %v2066_v51  ;;  %v9538_v36 = vld [vmem:[#allocation4 + $0x2e0] sm:$0xf0]  ;;  %4171 = vmatpush.bf16.msra.mxu1 %v9697_v28  ;;  %vm2290_vm2 = vcmp.gt.f32.partialorder %v2226_v35, 0.0  ;;  %v2354_v51 = vmul.f32 0.2, %v2226_v35 }
 0x3a8   :  { %v2474_v56 = vsel %vm2346_vm0, %v2282_v19, %v2410_v29  ;;  %v2478_v10 = vsel %vm2350_vm1, %v2286_v1, %v2414_v59  ;;  %4264 = vmatpush.bf16.msra.mxu3 %v9349_v9  ;;  %v9317_v19 = vor.u32 %v10833_v14, %v9314_v25  ;;  %v10889_v1 = vld [vmem:[#allocation4 + $0x2c4] sm:$0xf]  ;;  %v13364_v59 = vperm.slane %v13305_v49, 3  ;;  %v17286_v9 = vld [vmem:[#allocation36_spill] sm:$0xff] }
 0x3a9   :  { %v13354_v26 = vpack.c.bf16 %v2478_v10, %v2474_v56  ;;  %v13361_v29 = vpop.f32.mrf.mxu0  ;;  %v10825_v56 = vld [vmem:[#allocation4 + $0xc4] sm:$0xf]  ;;  %v2068_v42 = vmul.f32 0.5, %v2067_v40  ;;  %v1970_v14 = vsub.f32 %v17286_v9, %v13303_v8  ;;  %vm2294_vm3 = vcmp.gt.f32.partialorder %v2230_v47, 0.0  ;;  %v17287_v25 = vld [vmem:[#allocation44_spill] sm:$0xff] }
 0x3aa   :  { %v9282_v63 = vld [vmem:[#allocation4 + $0xe0] sm:$0xf0]  ;;  %v9541_v49 = vor.u32 %v10889_v1, %v9538_v36  ;;  %v1974_v46 = vsub.f32 %v17287_v25, %v13303_v8  ;;  %v2358_v28 = vmul.f32 0.2, %v2230_v47  ;;  %vm2072_vm4 = vweird.f32 %v13352_v17 }
 0x3ab   :  { %17285 = vst [vmem:[#allocation39_spill] sm:$0xff] %v13354_v26  ;;  %v13366_v7 = vld [vmem:[#allocation4 + $0x284] sm:$0xf]  ;;  %4314 = vmatpush.bf16.msra.mxu0 %v9573_v13  ;;  %v2069_v40 = vsub.f32 1.5, %v2068_v42  ;;  %v9285_v3 = vor.u32 %v10825_v56, %v9282_v63  ;;  %v2418_v13 = vsel %vm2290_vm2, %v2226_v35, %v2354_v51  ;;  %v1977_v56 = vsub.f32 %v12772_v27, %v13282_v5  ;;  %vm2073_vm6 = vmor %vm2071_vm5, %vm2072_vm4 }
 0x3ac   :  { %v13368_v23 = vld [vmem:[#allocation4 + $0x2a0] sm:$0xf0]  ;;  %4265 = vmatpush.bf16.msra.mxu3 %v9317_v19  ;;  %v2422_v1 = vsel %vm2294_vm3, %v2230_v47, %v2358_v28  ;;  %v1981_v63 = vsub.f32 %v12978_v15, %v13282_v5  ;;  %v13394_v61 = vperm.slane %v13310_v44, 3 }
 0x3ad   :  { %v13370_v12 = vld [vmem:[#allocation4 + $0x84] sm:$0xf]  ;;  %v13379_v9 = vpop.f32.mrf.mxu3  ;;  %v2070_v25 = vmul.f32 %v13352_v17, %v2069_v40  ;;  %v13385_v42 = vpack.c.bf16 %v2422_v1, %v2418_v13  ;;  %v1978_v1 = vsub.f32 %v12762_v0, %v13303_v8  ;;  %v1982_v0 = vsub.f32 %v12969_v45, %v13303_v8 }
 0x3ae   :  { %v13372_v41 = vld [vmem:[#allocation4 + $0xa0] sm:$0xf0] }
 0x3af   :  { %v11049_v10 = vld [vmem:[#allocation4 + $0x7c4] sm:$0xf]  ;;  %17288 = vst [vmem:[#allocation32_spill] sm:$0xff] %v13385_v42  ;;  %4315 = vmatpush.bf16.msra.mxu0 %v9541_v49  ;;  %v13401_v47 = vsel %vm2073_vm6, %v13352_v17, %v2070_v25  ;;  %4172 = vmatmul.bf16.vlgmr.msra.gmra.mxu1 %v13385_v42  ;;  %v17290_v17 = vsub.f32 %v13292_v22, %v13303_v8 }
 0x3b0   :  { %v10178_v32 = vld [vmem:[#allocation4 + $0x7e0] sm:$0xf0]  ;;  %4266 = vmatpush.bf16.msra.mxu3 %v9285_v3  ;;  %v2078_v28 = vmul.f32 %v13401_v47, %v1970_v14  ;;  %v2082_v40 = vmul.f32 %v13401_v47, %v1974_v46 }
 0x3b1   :  { %v10181_v6 = vor.u32 %v11049_v10, %v10178_v32  ;;  %v10985_v26 = vld [vmem:[#allocation4 + $0x5c4] sm:$0xf]  ;;  %v13404_v44 = vpop.f32.mrf.mxu0  ;;  %v2138_v3 = vmul.f32 %v13401_v47, %v17290_v17 }
 0x3b2   :  { %v9925_v36 = vor.u32 %v10985_v26, %v9922_v11  ;;  %v10146_v19 = vld [vmem:[#allocation4 + $0x7a0] sm:$0xf0]  ;;  %v9509_v11 = vor.u32 %v13366_v7, %v13368_v23  ;;  %v2085_v7 = vmul.f32 %v13333_v21, %v1977_v56  ;;  %v2089_v23 = vmul.f32 %v13333_v21, %v1981_v63 }
 0x3b3   :  { %4409 = vmatpush.bf16.msra.mxu2 %v10181_v6  ;;  %v9253_v6 = vor.u32 %v13370_v12, %v13372_v41  ;;  %v10873_v26 = vld [vmem:[#allocation4 + $0x244] sm:$0xf]  ;;  %v10149_v27 = vor.u32 %v11041_v62, %v10146_v19  ;;  %v17289_v12 = vsub.f32 %v13277_v38, %v13303_v8  ;;  %v2212_v25 = vmul.f32 %v13364_v59, %v2138_v3 }
 0x3b4   :  { %v9474_v35 = vld [vmem:[#allocation4 + $0x260] sm:$0xf0]  ;;  %4360 = vmatpush.bf16.msrb.mxu1 %v9925_v36  ;;  %v2159_v38 = vmul.f32 %v13308_v57, %v2085_v7  ;;  %v2163_v36 = vmul.f32 %v13308_v57, %v2089_v23  ;;  %4316 = vmatpush.bf16.msra.mxu0 %v9509_v11  ;;  %v2152_v19 = vmul.f32 %v13364_v59, %v2078_v28 }
 0x3b5   :  { %v10809_v15 = vld [vmem:[#allocation4 + $0x44] sm:$0xf]  ;;  %v2134_v62 = vmul.f32 %v13401_v47, %v17289_v12  ;;  %v9477_v13 = vor.u32 %v10873_v26, %v9474_v35  ;;  %v2156_v14 = vmul.f32 %v13364_v59, %v2082_v40  ;;  %4267 = vmatpush.bf16.msra.mxu3 %v9253_v6  ;;  %v13426_v26 = vpop.f32.mrf.mxu3  ;;  %v2086_v23 = vmul.f32 %v13401_v47, %v1978_v1 }
 0x3b6   :  { %v9218_v10 = vld [vmem:[#allocation4 + $0x60] sm:$0xf0]  ;;  %v2227_v7 = vadd.f32 %v13394_v61, %v2152_v19  ;;  %v2090_v6 = vmul.f32 %v13401_v47, %v1982_v0  ;;  %v17293_v0 = vld [vmem:[#allocation43_spill] sm:$0xff] }
 0x3b7   :  { %v10865_v32 = vld [vmem:[#allocation4 + $0x204] sm:$0xf]  ;;  %4410 = vmatpush.bf16.msra.mxu2 %v10149_v27  ;;  %v2208_v22 = vmul.f32 %v13364_v59, %v2134_v62  ;;  %v9221_v46 = vor.u32 %v10809_v15, %v9218_v10  ;;  %v2287_v27 = vadd.f32 %v13394_v61, %v2212_v25  ;;  %v2231_v11 = vadd.f32 %v13394_v61, %v2156_v14 }
 0x3b8   :  { %v9442_v41 = vld [vmem:[#allocation4 + $0x220] sm:$0xf0]  ;;  %v2234_v15 = vadd.f32 %v13313_v37, %v2159_v38  ;;  %v2238_v10 = vadd.f32 %v13313_v37, %v2163_v36  ;;  %4317 = vmatpush.bf16.msra.mxu0 %v9477_v13  ;;  %vm2291_vm9 = vcmp.gt.f32.partialorder %v2227_v7, 0.0  ;;  %v2355_v12 = vmul.f32 0.2, %v2227_v7 }
 0x3b9   :  { %v10801_v49 = vld [vmem:[#allocation4 + $0x4] sm:$0xf]  ;;  %v9445_v56 = vor.u32 %v10865_v32, %v9442_v41  ;;  %v2283_v35 = vadd.f32 %v13394_v61, %v2208_v22  ;;  %vm2351_vm8 = vcmp.gt.f32.partialorder %v2287_v27, 0.0  ;;  %v2415_v45 = vmul.f32 0.2, %v2287_v27  ;;  %4268 = vmatpush.bf16.msra.mxu3 %v9221_v46  ;;  %v13438_v17 = vpop.f32.mrf.mxu0 }
 0x3ba   :  { %v9186_v51 = vld [vmem:[#allocation4 + $0x20] sm:$0xf0]  ;;  %vm2295_vm10 = vcmp.gt.f32.partialorder %v2231_v11, 0.0  ;;  %v2359_v62 = vmul.f32 0.2, %v2231_v11  ;;  %v2419_v40 = vsel %vm2291_vm9, %v2227_v7, %v2355_v12  ;;  %vm2298_vm11 = vcmp.gt.f32.partialorder %v2234_v15, 0.0 }
 0x3bb   :  { %v9189_v63 = vor.u32 %v10801_v49, %v9186_v51  ;;  %vm2347_vm7 = vcmp.gt.f32.partialorder %v2283_v35, 0.0  ;;  %v2411_v32 = vmul.f32 0.2, %v2283_v35  ;;  %v2479_v41 = vsel %vm2351_vm8, %v2287_v27, %v2415_v45  ;;  %v10977_v49 = vld [vmem:[#allocation4 + $0x584] sm:$0xf] }
 0x3bc   :  { %v9890_v51 = vld [vmem:[#allocation4 + $0x5a0] sm:$0xf0]  ;;  %v2423_v1 = vsel %vm2295_vm10, %v2231_v11, %v2359_v62  ;;  %4318 = vmatpush.bf16.msra.mxu0 %v9445_v56  ;;  %vm2302_vm12 = vcmp.gt.f32.partialorder %v2238_v10, 0.0  ;;  %v2362_v13 = vmul.f32 0.2, %v2234_v15  ;;  %v2160_v36 = vmul.f32 %v13364_v59, %v2086_v23 }
 0x3bd   :  { %v2475_v3 = vsel %vm2347_vm7, %v2283_v35, %v2411_v32  ;;  %v13442_v38 = vpack.c.bf16 %v2423_v1, %v2419_v40  ;;  %4269 = vmatpush.bf16.msra.mxu3 %v9189_v63  ;;  %v2164_v22 = vmul.f32 %v13364_v59, %v2090_v6  ;;  %v2366_v25 = vmul.f32 0.2, %v2238_v10  ;;  %v13446_v14 = vpop.f32.mrf.mxu3  ;;  %v11033_v56 = vld [vmem:[#allocation4 + $0x744] sm:$0xf] }
 0x3be   :  { %v13440_v28 = vpack.c.bf16 %v2479_v41, %v2475_v3  ;;  %v9893_v19 = vor.u32 %v10977_v49, %v9890_v51  ;;  %v2426_v46 = vsel %vm2298_vm11, %v2234_v15, %v2362_v13  ;;  %v10114_v27 = vld [vmem:[#allocation4 + $0x760] sm:$0xf0]  ;;  %v1985_v23 = vsub.f32 %v12830_v30, %v13282_v5 }
 0x3bf   :  { %17292 = vst [vmem:[#allocation24_spill] sm:$0xff] %v13442_v38  ;;  %4221 = vmatmul.bf16.vlgmr.msrb.gmra.mxu2 %v13442_v38  ;;  %4319 = vmatmul.bf16.vlgmr.msra.gmra.mxu0 %v17293_v0  ;;  %v2430_v35 = vsel %vm2302_vm12, %v2238_v10, %v2366_v25  ;;  %v17294_v7 = vld [vmem:[#allocation42_spill] sm:$0xff]  ;;  %v10117_v11 = vor.u32 %v11033_v56, %v10114_v27 }
 0x3c0   :  { %17291 = vst [vmem:[#allocation33_spill] sm:$0xff] %v13440_v28  ;;  %4361 = vmatpush.bf16.msrb.mxu1 %v9893_v19  ;;  %4270 = vmatmul.bf16.vlgmr.msra.gmra.mxu3 %v17294_v7  ;;  %v13451_v63 = vpack.c.bf16 %v2430_v35, %v2426_v46  ;;  %v10969_v6 = vld [vmem:[#allocation4 + $0x544] sm:$0xf]  ;;  %v2235_v45 = vadd.f32 %v13394_v61, %v2160_v36 }
 0x3c1   :  { %v9858_v32 = vld [vmem:[#allocation4 + $0x560] sm:$0xf0]  ;;  %v2239_v15 = vadd.f32 %v13394_v61, %v2164_v22  ;;  %v13457_v12 = vpop.f32.mrf.mxu0  ;;  %v1989_v10 = vsub.f32 %v13026_v48, %v13282_v5  ;;  %v1986_v3 = vsub.f32 %v12811_v53, %v13303_v8  ;;  %4411 = vmatpush.bf16.msra.mxu2 %v10117_v11  ;;  %v2093_v30 = vmul.f32 %v13333_v21, %v1985_v23 }
 0x3c2   :  { %17295 = vst [vmem:[#allocation25_spill] sm:$0xff] %v13451_v63  ;;  %v9861_v62 = vor.u32 %v10969_v6, %v9858_v32  ;;  %4177 = vmatmul.bf16.gmra.mxu1 %v13451_v63  ;;  %v2363_v40 = vmul.f32 0.2, %v2235_v45  ;;  %v17296_v48 = vld [vmem:[#allocation38_spill] sm:$0xff]  ;;  %vm2299_vm13 = vcmp.gt.f32.partialorder %v2235_v45, 0.0 }
 0x3c3   :  { %v2097_v41 = vmul.f32 %v13333_v21, %v1989_v10  ;;  %v2094_v49 = vmul.f32 %v13401_v47, %v1986_v3  ;;  %v2167_v51 = vmul.f32 %v13308_v57, %v2093_v30  ;;  %v2367_v1 = vmul.f32 0.2, %v2239_v15 }
 0x3c4   :  { %4362 = vmatpush.bf16.msrb.mxu1 %v9861_v62  ;;  %v1990_v36 = vsub.f32 %v17296_v48, %v13303_v8  ;;  %vm2303_vm14 = vcmp.gt.f32.partialorder %v2239_v15, 0.0  ;;  %v2427_v35 = vsel %vm2299_vm13, %v2235_v45, %v2363_v40  ;;  %v1994_v62 = vsub.f32 %v13047_v34, %v13303_v8  ;;  %v17298_v40 = vld [vmem:[#allocation47_spill] sm:$0xff]  ;;  %v11025_v48 = vld [vmem:[#allocation4 + $0x704] sm:$0xf] }
 0x3c5   :  { %v13468_v13 = vpop.f32.mrf.mxu3  ;;  %v2171_v22 = vmul.f32 %v13308_v57, %v2097_v41  ;;  %v2242_v53 = vadd.f32 %v13313_v37, %v2167_v51  ;;  %v2168_v46 = vmul.f32 %v13364_v59, %v2094_v49  ;;  %v2431_v56 = vsel %vm2303_vm14, %v2239_v15, %v2367_v1 }
 0x3c6   :  { %v2098_v25 = vmul.f32 %v13401_v47, %v1990_v36  ;;  %v13480_v32 = vpack.c.bf16 %v2431_v56, %v2427_v35  ;;  %v1993_v45 = vsub.f32 %v13044_v4, %v13282_v5  ;;  %v1997_v15 = vsub.f32 %v13079_v18, %v13282_v5  ;;  %v10082_v36 = vld [vmem:[#allocation4 + $0x720] sm:$0xf0] }
 0x3c7   :  { %v2246_v19 = vadd.f32 %v13313_v37, %v2171_v22  ;;  %v2370_v11 = vmul.f32 0.2, %v2242_v53  ;;  %vm2306_vm15 = vcmp.gt.f32.partialorder %v2242_v53, 0.0  ;;  %v2243_v10 = vadd.f32 %v13394_v61, %v2168_v46 }
 0x3c8   :  { %v2172_v6 = vmul.f32 %v13364_v59, %v2098_v25  ;;  %17297 = vst [vmem:[#allocation34_spill] sm:$0xff] %v13480_v32  ;;  %v1998_v49 = vsub.f32 %v13074_v24, %v13303_v8  ;;  %v2002_v51 = vsub.f32 %v13108_v33, %v13303_v8  ;;  %v2006_v34 = vsub.f32 %v13137_v31, %v13303_v8  ;;  %v10961_v25 = vld [vmem:[#allocation4 + $0x504] sm:$0xf] }
 0x3c9   :  { %v13477_v27 = vpop.f32.mrf.mxu0  ;;  %v2374_v23 = vmul.f32 0.2, %v2246_v19  ;;  %vm2310_vm0 = vcmp.gt.f32.partialorder %v2246_v19, 0.0  ;;  %v2434_v3 = vsel %vm2306_vm15, %v2242_v53, %v2370_v11  ;;  %v2102_v4 = vmul.f32 %v13401_v47, %v1994_v62  ;;  %v17299_v53 = vld [vmem:[#allocation46_spill] sm:$0xff] }
 0x3ca   :  { %v2247_v1 = vadd.f32 %v13394_v61, %v2172_v6  ;;  %v2101_v18 = vmul.f32 %v13333_v21, %v1993_v45  ;;  %v2105_v22 = vmul.f32 %v13333_v21, %v1997_v15  ;;  %v10085_v33 = vor.u32 %v11025_v48, %v10082_v36 }
 0x3cb   :  { %v2438_v30 = vsel %vm2310_vm0, %v2246_v19, %v2374_v23  ;;  %v9826_v19 = vld [vmem:[#allocation4 + $0x520] sm:$0xf0]  ;;  %v2110_v31 = vmul.f32 %v13401_v47, %v2002_v51  ;;  %v2114_v46 = vmul.f32 %v13401_v47, %v2006_v34  ;;  %v2371_v35 = vmul.f32 0.2, %v2243_v10 }
 0x3cc   :  { %v13504_v24 = vpack.c.bf16 %v2438_v30, %v2434_v3  ;;  %v2175_v11 = vmul.f32 %v13308_v57, %v2101_v18  ;;  %v2179_v23 = vmul.f32 %v13308_v57, %v2105_v22  ;;  %v9829_v6 = vor.u32 %v10961_v25, %v9826_v19  ;;  %4412 = vmatpush.bf16.msra.mxu2 %v10085_v33 }
 0x3cd   :  { %v13485_v41 = vpop.f32.mrf.mxu3  ;;  %vm2307_vm1 = vcmp.gt.f32.partialorder %v2243_v10, 0.0  ;;  %v2106_v62 = vmul.f32 %v13401_v47, %v1998_v49  ;;  %v2184_v3 = vmul.f32 %v13364_v59, %v2110_v31  ;;  %v2188_v30 = vmul.f32 %v13364_v59, %v2114_v46 }
 0x3ce   :  { %17300 = vst [vmem:[#allocation35_spill] sm:$0xff] %v13504_v24  ;;  %v2375_v45 = vmul.f32 0.2, %v2247_v1  ;;  %4363 = vmatpush.bf16.msrb.mxu1 %v9829_v6  ;;  %vm2311_vm2 = vcmp.gt.f32.partialorder %v2247_v1, 0.0  ;;  %v2250_v15 = vadd.f32 %v13313_v37, %v2175_v11  ;;  %v2435_v48 = vsel %vm2307_vm1, %v2243_v10, %v2371_v35 }
 0x3cf   :  { %4226 = vmatmul.bf16.gmra.mxu2 %v13480_v32  ;;  %4324 = vmatmul.bf16.gmra.mxu0 %v17298_v40  ;;  %v2259_v51 = vadd.f32 %v13394_v61, %v2184_v3  ;;  %v2263_v34 = vadd.f32 %v13394_v61, %v2188_v30  ;;  %v2176_v18 = vmul.f32 %v13364_v59, %v2102_v4 }
 0x3d0   :  { %4275 = vmatmul.bf16.gmra.mxu3 %v17299_v53  ;;  %v2254_v49 = vadd.f32 %v13313_v37, %v2179_v23  ;;  %v2010_v22 = vsub.f32 %v13207_v50, %v13303_v8  ;;  %v2180_v33 = vmul.f32 %v13364_v59, %v2106_v62  ;;  %v2439_v19 = vsel %vm2311_vm2, %v2247_v1, %v2375_v45 }
 0x3d1   :  { %v13508_v56 = vpop.f32.mrf.mxu0  ;;  %vm2323_vm3 = vcmp.gt.f32.partialorder %v2259_v51, 0.0  ;;  %vm2327_vm4 = vcmp.gt.f32.partialorder %v2263_v34, 0.0  ;;  %v2387_v25 = vmul.f32 0.2, %v2259_v51  ;;  %v2391_v31 = vmul.f32 0.2, %v2263_v34 }
 0x3d2   :  { %17301 = vst [vmem:[#allocation26_spill] sm:$0xff] %v13508_v56  ;;  %4182 = vmatmul.bf16.gmra.mxu1 %v13504_v24  ;;  %v2014_v46 = vsub.f32 %v13211_v54, %v13303_v8  ;;  %v2118_v10 = vmul.f32 %v13401_v47, %v2010_v22  ;;  %vm2314_vm5 = vcmp.gt.f32.partialorder %v2250_v15, 0.0  ;;  %v2378_v35 = vmul.f32 0.2, %v2250_v15  ;;  %v17304_v54 = vld [vmem:[#allocation22_spill] sm:$0xff] }
 0x3d3   :  { %v2451_v4 = vsel %vm2323_vm3, %v2259_v51, %v2387_v25  ;;  %v2018_v11 = vsub.f32 %v13258_v60, %v13303_v8  ;;  %v2382_v50 = vmul.f32 0.2, %v2254_v49  ;;  %v2455_v6 = vsel %vm2327_vm4, %v2263_v34, %v2391_v31  ;;  %v13544_v60 = vld [vmem:[%s17032_s8] sm:$0xff] }
 0x3d4   :  { %v2122_v62 = vmul.f32 %v13401_v47, %v2014_v46  ;;  %v2192_v1 = vmul.f32 %v13364_v59, %v2118_v10  ;;  %vm2318_vm6 = vcmp.gt.f32.partialorder %v2254_v49, 0.0  ;;  %v13535_v3 = vpack.c.bf16 %v2455_v6, %v2451_v4 }
 0x3d5   :  { %v13519_v36 = vpop.f32.mrf.mxu3  ;;  %v2001_v30 = vsub.f32 %v17304_v54, %v13282_v5  ;;  %v2022_v45 = vsub.f32 %v13274_v43, %v13303_v8  ;;  %v2005_v51 = vsub.f32 %v13134_v52, %v13282_v5  ;;  %v2126_v25 = vmul.f32 %v13401_v47, %v2018_v11 }
 0x3d6   :  { %17302 = vst [vmem:[#allocation28_spill] sm:$0xff] %v13519_v36  ;;  %v2196_v34 = vmul.f32 %v13364_v59, %v2122_v62  ;;  %v2267_v22 = vadd.f32 %v13394_v61, %v2192_v1  ;;  %v13551_v31 = vpack.c.bf16 %v2439_v19, %v2435_v48  ;;  %v2442_v46 = vsel %vm2314_vm5, %v2250_v15, %v2378_v35  ;;  %v17306_v48 = vld [vmem:[#allocation21_spill] sm:$0xff] }
 0x3d7   :  { %17303 = vst [vmem:[#allocation37_spill] sm:$0xff] %v13535_v3  ;;  %v2109_v43 = vmul.f32 %v13333_v21, %v2001_v30  ;;  %v2130_v8 = vmul.f32 %v13401_v47, %v2022_v45  ;;  %v2446_v10 = vsel %vm2318_vm6, %v2254_v49, %v2382_v50  ;;  %v2113_v4 = vmul.f32 %v13333_v21, %v2005_v51  ;;  %v11017_v47 = vld [vmem:[#allocation4 + $0x6c4] sm:$0xf]  ;;  %v17307_v50 = vld [vmem:[#allocation20_spill] sm:$0xff] }
 0x3d8   :  { %17305 = vst [vmem:[#allocation45_spill] sm:$0xff] %v13551_v31  ;;  %v2271_v6 = vadd.f32 %v13394_v61, %v2196_v34  ;;  %v2395_v52 = vmul.f32 0.2, %v2267_v22  ;;  %v13559_v62 = vperm.slane %v13544_v60, 0  ;;  %vm2331_vm7 = vcmp.gt.f32.partialorder %v2267_v22, 0.0 }
 0x3d9   :  { %v13531_v23 = vpop.f32.mrf.mxu0  ;;  %v2251_v15 = vadd.f32 %v13394_v61, %v2176_v18  ;;  %v2255_v19 = vadd.f32 %v13394_v61, %v2180_v33  ;;  %v10050_v49 = vld [vmem:[#allocation4 + $0x6e0] sm:$0xf0]  ;;  %v2200_v11 = vmul.f32 %v13364_v59, %v2126_v25  ;;  %v13569_v1 = vpack.c.bf16 %v2446_v10, %v2442_v46 }
 0x3da   :  { %v10053_v54 = vor.u32 %v11017_v47, %v10050_v49  ;;  %v2183_v30 = vmul.f32 %v13308_v57, %v2109_v43  ;;  %v10953_v45 = vld [vmem:[#allocation4 + $0x4c4] sm:$0xf]  ;;  %vm2335_vm8 = vcmp.gt.f32.partialorder %v2271_v6, 0.0  ;;  %v2187_v18 = vmul.f32 %v13308_v57, %v2113_v4 }
 0x3db   :  { %17308 = vst [vmem:[#allocation36_spill] sm:$0xff] %v13569_v1  ;;  %v9794_v51 = vld [vmem:[#allocation4 + $0x4e0] sm:$0xf0]  ;;  %v2399_v33 = vmul.f32 0.2, %v2271_v6  ;;  %v2459_v56 = vsel %vm2331_vm7, %v2267_v22, %v2395_v52  ;;  %v4076_v36 = vadd.f32 %v13379_v9, %v13559_v62  ;;  %v2204_v46 = vmul.f32 %v13364_v59, %v2130_v8 }
 0x3dc   :  { %v9797_v34 = vor.u32 %v10953_v45, %v9794_v51  ;;  %4413 = vmatpush.bf16.msra.mxu2 %v10053_v54  ;;  %vm2315_vm9 = vcmp.gt.f32.partialorder %v2251_v15, 0.0  ;;  %v2379_v43 = vmul.f32 0.2, %v2251_v15  ;;  %v2275_v4 = vadd.f32 %v13394_v61, %v2200_v11 }
 0x3dd   :  { %v13565_v35 = vpop.f32.mrf.mxu3  ;;  %v2463_v10 = vsel %vm2335_vm8, %v2271_v6, %v2399_v33  ;;  %vm2319_vm10 = vcmp.gt.f32.partialorder %v2255_v19, 0.0  ;;  %v2383_v47 = vmul.f32 0.2, %v2255_v19  ;;  %v2279_v22 = vadd.f32 %v13394_v61, %v2204_v46 }
 0x3de   :  { %4364 = vmatpush.bf16.msrb.mxu1 %v9797_v34  ;;  %v13581_v49 = vpack.c.bf16 %v2463_v10, %v2459_v56  ;;  %v2258_v9 = vadd.f32 %v13313_v37, %v2183_v30  ;;  %v2262_v52 = vadd.f32 %v13313_v37, %v2187_v18  ;;  %vm2339_vm11 = vcmp.gt.f32.partialorder %v2275_v4, 0.0 }
 0x3df   :  { %4231 = vmatmul.bf16.gmra.mxu2 %v13551_v31  ;;  %4329 = vmatmul.bf16.gmra.mxu0 %v17306_v48  ;;  %v2403_v54 = vmul.f32 0.2, %v2275_v4  ;;  %vm2343_vm12 = vcmp.gt.f32.partialorder %v2279_v22, 0.0  ;;  %v2407_v59 = vmul.f32 0.2, %v2279_v22  ;;  %v2443_v45 = vsel %vm2315_vm9, %v2251_v15, %v2379_v43 }
 0x3e0   :  { %4280 = vmatmul.bf16.gmra.mxu3 %v17307_v50  ;;  %17309 = vst [vmem:[#allocation44_spill] sm:$0xff] %v13581_v49  ;;  %v2447_v6 = vsel %vm2319_vm10, %v2255_v19, %v2383_v47  ;;  %v2386_v34 = vmul.f32 0.2, %v2258_v9  ;;  %v2390_v56 = vmul.f32 0.2, %v2262_v52  ;;  %v13592_v61 = vadd.f32 %v13361_v29, %v4076_v36  ;;  %v17311_v29 = vld [vmem:[#allocation29_spill] sm:$0xff] }
 0x3e1   :  { %v13577_v25 = vpop.f32.mrf.mxu0  ;;  %v2467_v8 = vsel %vm2339_vm11, %v2275_v4, %v2403_v54  ;;  %v2471_v51 = vsel %vm2343_vm12, %v2279_v22, %v2407_v59  ;;  %vm2322_vm13 = vcmp.gt.f32.partialorder %v2258_v9, 0.0  ;;  %vm2326_vm14 = vcmp.gt.f32.partialorder %v2262_v52, 0.0  ;;  %v11009_v36 = vld [vmem:[#allocation4 + $0x684] sm:$0xf] }
 0x3e2   :  { %4187 = vmatmul.bf16.gmra.mxu1 %v13569_v1  ;;  %v13589_v33 = vpack.c.bf16 %v2471_v51, %v2467_v8  ;;  %v2009_v30 = vsub.f32 %v13140_v55, %v13282_v5  ;;  %v2013_v18 = vsub.f32 %v13164_v20, %v13282_v5  ;;  %v13598_v15 = vpack.c.bf16 %v2447_v6, %v2443_v45  ;;  %v10018_v47 = vld [vmem:[#allocation4 + $0x6a0] sm:$0xf0]  ;;  %v17312_v55 = vld [vmem:[#allocation27_spill] sm:$0xff] }
 0x3e3   :  { %v2450_v46 = vsel %vm2322_vm13, %v2258_v9, %v2386_v34  ;;  %v2454_v43 = vsel %vm2326_vm14, %v2262_v52, %v2390_v56  ;;  %v10021_v20 = vor.u32 %v11009_v36, %v10018_v47  ;;  %v10945_v54 = vld [vmem:[#allocation4 + $0x484] sm:$0xf]  ;;  %v4081_v6 = vadd.f32 %v13446_v14, %v13559_v62 }
 0x3e4   :  { %17310 = vst [vmem:[#allocation38_spill] sm:$0xff] %v13598_v15  ;;  %v2117_v10 = vmul.f32 %v13333_v21, %v2009_v30  ;;  %v2121_v4 = vmul.f32 %v13333_v21, %v2013_v18  ;;  %v13607_v22 = vpack.c.bf16 %v2454_v43, %v2450_v46  ;;  %v9762_v59 = vld [vmem:[#allocation4 + $0x4a0] sm:$0xf0]  ;;  %v2017_v43 = vsub.f32 %v13179_v16, %v13282_v5 }
 0x3e5   :  { %v13587_v11 = vpop.f32.mrf.mxu3  ;;  %v9765_v8 = vor.u32 %v10945_v54, %v9762_v59  ;;  %4414 = vmatpush.bf16.msra.mxu2 %v10021_v20  ;;  %v13621_v46 = vadd.f32 %v13438_v17, %v4081_v6  ;;  %v17316_v17 = vld [vmem:[#allocation23_spill] sm:$0xff]  ;;  %v11001_v54 = vld [vmem:[#allocation4 + $0x644] sm:$0xf] }
 0x3e6   :  { %17313 = vst [vmem:[#allocation22_spill] sm:$0xff] %v13607_v22  ;;  %v2191_v9 = vmul.f32 %v13308_v57, %v2117_v10  ;;  %v2195_v52 = vmul.f32 %v13308_v57, %v2121_v4  ;;  %v2021_v10 = vsub.f32 %v13198_v2, %v13282_v5  ;;  %v2125_v14 = vmul.f32 %v13333_v21, %v2017_v43  ;;  %v9986_v59 = vld [vmem:[#allocation4 + $0x660] sm:$0xf0] }
 0x3e7   :  { %4365 = vmatpush.bf16.msrb.mxu1 %v9765_v8  ;;  %v9989_v5 = vor.u32 %v11001_v54, %v9986_v59  ;;  %v10926_v8 = vld [vmem:[#allocation4 + $0x3e4] sm:$0xf0]  ;;  %v10937_v43 = vld [vmem:[#allocation4 + $0x444] sm:$0xf] }
 0x3e8   :  { %v2266_v51 = vadd.f32 %v13313_v37, %v2191_v9  ;;  %v2270_v34 = vadd.f32 %v13313_v37, %v2195_v52  ;;  %v2129_v20 = vmul.f32 %v13333_v21, %v2021_v10  ;;  %v9672_v9 = vld [vmem:[#allocation4 + $0x3c8] sm:$0xf]  ;;  %v2199_v6 = vmul.f32 %v13308_v57, %v2125_v14  ;;  %v9730_v10 = vld [vmem:[#allocation4 + $0x460] sm:$0xf0] }
 0x3e9   :  { %v13600_v19 = vpop.f32.mrf.mxu0  ;;  %v17317_v52 = vld [vmem:[#allocation30_spill] sm:$0xff]  ;;  %v9673_v21 = vor.u32 %v10926_v8, %v9672_v9  ;;  %4415 = vmatpush.bf16.msra.mxu2 %v9989_v5 }
 0x3ea   :  { %v2394_v30 = vmul.f32 0.2, %v2266_v51  ;;  %v2398_v18 = vmul.f32 0.2, %v2270_v34  ;;  %vm2330_vm15 = vcmp.gt.f32.partialorder %v2266_v51, 0.0  ;;  %vm2334_vm0 = vcmp.gt.f32.partialorder %v2270_v34, 0.0 }
 0x3eb   :  { %4507 = vmatpush.bf16.msrb.mxu0 %v9673_v21  ;;  %v9608_v59 = vld [vmem:[#allocation4 + $0x348] sm:$0xf]  ;;  %v2274_v9 = vadd.f32 %v13313_v37, %v2199_v6 }
 0x3ec   :  { %v2458_v36 = vsel %vm2330_vm15, %v2266_v51, %v2394_v30  ;;  %v2462_v47 = vsel %vm2334_vm0, %v2270_v34, %v2398_v18  ;;  %v9416_v51 = vld [vmem:[#allocation4 + $0x1c8] sm:$0xf]  ;;  %v2203_v30 = vmul.f32 %v13308_v57, %v2129_v20 }
 0x3ed   :  { %v13612_v45 = vpop.f32.mrf.mxu3  ;;  %v13636_v2 = vpack.c.bf16 %v2462_v47, %v2458_v36  ;;  %v10862_v34 = vld [vmem:[#allocation4 + $0x1e4] sm:$0xf0]  ;;  %vm2338_vm1 = vcmp.gt.f32.partialorder %v2274_v9, 0.0 }
 0x3ee   :  { %v9417_v18 = vor.u32 %v10862_v34, %v9416_v51  ;;  %v9384_v36 = vld [vmem:[#allocation4 + $0x188] sm:$0xf]  ;;  %v4086_v51 = vadd.f32 %v13485_v41, %v13559_v62  ;;  %v2278_v5 = vadd.f32 %v13313_v37, %v2203_v30 }
 0x3ef   :  { %4236 = vmatmul.bf16.gmra.mxu2 %v13598_v15  ;;  %4334 = vmatmul.bf16.gmra.mxu0 %v17311_v29  ;;  %17318 = vst [vmem:[#allocation52_spill] sm:$0xff] %v13636_v2  ;;  %v10854_v47 = vld [vmem:[#allocation4 + $0x1a4] sm:$0xf0] }
 0x3f0   :  { %4285 = vmatmul.bf16.gmra.mxu3 %v17312_v55  ;;  %v9385_v14 = vor.u32 %v10854_v47, %v9384_v36  ;;  %v10910_v57 = vld [vmem:[#allocation4 + $0x364] sm:$0xf0]  ;;  %v13648_v36 = vadd.f32 %v13477_v27, %v4086_v51  ;;  %vm2342_vm2 = vcmp.gt.f32.partialorder %v2278_v5, 0.0 }
 0x3f1   :  { %v13618_v56 = vpop.f32.mrf.mxu0  ;;  %4458 = vmatpush.bf16.msrb.mxu3 %v9417_v18  ;;  %v9352_v20 = vld [vmem:[#allocation4 + $0x148] sm:$0xf]  ;;  %v9609_v21 = vor.u32 %v10910_v57, %v9608_v59  ;;  %v9954_v59 = vld [vmem:[#allocation4 + $0x620] sm:$0xf0] }
 0x3f2   :  { %4192 = vmatmul.bf16.gmra.mxu1 %v13607_v22  ;;  %17314 = vst [vmem:[#allocation50_spill] sm:$0xff] %v13618_v56  ;;  %v9640_v56 = vld [vmem:[#allocation4 + $0x388] sm:$0xf] }
 0x3f3   :  { %v10846_v8 = vld [vmem:[#allocation4 + $0x164] sm:$0xf0] }
 0x3f4   :  { %v9353_v18 = vor.u32 %v10846_v8, %v9352_v20  ;;  %v9576_v6 = vld [vmem:[#allocation4 + $0x308] sm:$0xf] }
 0x3f5   :  { %v13628_v4 = vpop.f32.mrf.mxu3  ;;  %4459 = vmatpush.bf16.msrb.mxu3 %v9385_v14  ;;  %v10993_v14 = vld [vmem:[#allocation4 + $0x604] sm:$0xf]  ;;  %v9544_v57 = vld [vmem:[#allocation4 + $0x2c8] sm:$0xf] }
 0x3f6   :  { %17315 = vst [vmem:[#allocation51_spill] sm:$0xff] %v13628_v4  ;;  %v9733_v4 = vor.u32 %v10937_v43, %v9730_v10  ;;  %v10838_v43 = vld [vmem:[#allocation4 + $0x124] sm:$0xf0]  ;;  %v2406_v10 = vmul.f32 0.2, %v2278_v5  ;;  %v9957_v20 = vor.u32 %v10993_v14, %v9954_v59 }
 0x3f7   :  { %v10894_v8 = vld [vmem:[#allocation4 + $0x2e4] sm:$0xf0] }
 0x3f8   :  { %4366 = vmatpush.bf16.msrb.mxu1 %v9733_v4  ;;  %v10902_v4 = vld [vmem:[#allocation4 + $0x324] sm:$0xf0]  ;;  %4416 = vmatpush.bf16.msra.mxu2 %v9957_v20 }
 0x3f9   :  { %v13634_v16 = vpop.f32.mrf.mxu0  ;;  %4460 = vmatpush.bf16.msrb.mxu3 %v9353_v18  ;;  %v9577_v41 = vor.u32 %v10902_v4, %v9576_v6  ;;  %v9288_v51 = vld [vmem:[#allocation4 + $0xc8] sm:$0xf] }
 0x3fa   :  { %v10886_v6 = vld [vmem:[#allocation4 + $0x2a4] sm:$0xf0] }
 0x3fb   :  { %v9256_v4 = vld [vmem:[#allocation4 + $0x88] sm:$0xf] }
 0x3fc   :  { %v9224_v14 = vld [vmem:[#allocation4 + $0x48] sm:$0xf] }
 0x3fd   :  { %v13645_v34 = vpop.f32.mrf.mxu3  ;;  %v10814_v59 = vld [vmem:[#allocation4 + $0x64] sm:$0xf0] }
 0x3fe   :  { %v9225_v20 = vor.u32 %v10814_v59, %v9224_v14  ;;  %v17321_v59 = vld [vmem:[#allocation39_spill] sm:$0xff] }
 0x3ff   :  { %4241 = vmatmul.bf16.gmra.mxu2 %v13535_v3  ;;  %4339 = vmatmul.bf16.gmra.mxu0 %v17316_v17 }
 0x400   :  { %4290 = vmatmul.bf16.gmra.mxu3 %v17317_v52  ;;  %v10918_v52 = vld [vmem:[#allocation4 + $0x3a4] sm:$0xf0] }
 0x401   :  { %v9641_v54 = vor.u32 %v10918_v52, %v9640_v56  ;;  %v2402_v56 = vmul.f32 0.2, %v2274_v9  ;;  %v9320_v52 = vld [vmem:[#allocation4 + $0x108] sm:$0xf]  ;;  %v13650_v47 = vpop.f32.mrf.mxu0 }
 0x402   :  { %4197 = vmatmul.bf16.gmra.mxu1 %v13636_v2  ;;  %v9321_v37 = vor.u32 %v10838_v43, %v9320_v52  ;;  %v9698_v52 = vld [vmem:[#allocation4 + $0x420] sm:$0xf0]  ;;  %v9512_v43 = vld [vmem:[#allocation4 + $0x288] sm:$0xf] }
 0x403   :  { %4508 = vmatpush.bf16.msrb.mxu0 %v9641_v54  ;;  %v2466_v30 = vsel %vm2338_vm1, %v2274_v9, %v2402_v56  ;;  %v2470_v54 = vsel %vm2342_vm2, %v2278_v5, %v2406_v10  ;;  %v9545_v9 = vor.u32 %v10894_v8, %v9544_v57  ;;  %v10929_v56 = vld [vmem:[#allocation4 + $0x404] sm:$0xf]  ;;  %v4091_v57 = vadd.f32 %v13565_v35, %v13559_v62  ;;  %v9480_v8 = vld [vmem:[#allocation4 + $0x248] sm:$0xf] }
 0x404   :  { %4461 = vmatpush.bf16.msrb.mxu3 %v9321_v37  ;;  %v13655_v27 = vpack.c.bf16 %v2470_v54, %v2466_v30  ;;  %v9701_v10 = vor.u32 %v10929_v56, %v9698_v52  ;;  %v10822_v37 = vld [vmem:[#allocation4 + $0xa4] sm:$0xf0]  ;;  %v9513_v54 = vor.u32 %v10886_v6, %v9512_v43 }
 0x405   :  { %v13657_v18 = vpop.f32.mrf.mxu3  ;;  %v13665_v56 = vadd.f32 %v13531_v23, %v4091_v57  ;;  %v10870_v52 = vld [vmem:[#allocation4 + $0x224] sm:$0xf0]  ;;  %v17320_v23 = vld [vmem:[#allocation49_spill] sm:$0xff] }
 0x406   :  { %4367 = vmatpush.bf16.msrb.mxu1 %v9701_v10  ;;  %v9192_v43 = vld [vmem:[#allocation4 + $0x8] sm:$0xf] }
 0x407   :  { %4509 = vmatpush.bf16.msrb.mxu0 %v9609_v21  ;;  %v10830_v21 = vld [vmem:[#allocation4 + $0xe4] sm:$0xf0] }
 0x408   :  { %v9289_v5 = vor.u32 %v10830_v21, %v9288_v51  ;;  %v10878_v51 = vld [vmem:[#allocation4 + $0x264] sm:$0xf0] }
 0x409   :  { %v13660_v30 = vpop.f32.mrf.mxu0  ;;  %v9481_v21 = vor.u32 %v10878_v51, %v9480_v8  ;;  %v10806_v6 = vld [vmem:[#allocation4 + $0x24] sm:$0xf0]  ;;  %v4096_v51 = vadd.f32 %v13612_v45, %v13559_v62  ;;  %v17323_v45 = vld [vmem:[#allocation40_spill] sm:$0xff] }
 0x40a   :  { %4462 = vmatpush.bf16.msrb.mxu3 %v9289_v5  ;;  %v9928_v57 = vld [vmem:[#allocation4 + $0x5c8] sm:$0xf] }
 0x40b   :  { %4510 = vmatpush.bf16.msrb.mxu0 %v9577_v41  ;;  %v9257_v41 = vor.u32 %v10822_v37, %v9256_v4  ;;  %v9193_v4 = vor.u32 %v10806_v6, %v9192_v43  ;;  %v17319_v37 = vld [vmem:[#allocation48_spill] sm:$0xff]  ;;  %v10990_v8 = vld [vmem:[#allocation4 + $0x5e4] sm:$0xf0] }
 0x40d   :  { %v13667_v5 = vpop.f32.mrf.mxu3 }
 0x40e   :  { %4463 = vmatpush.bf16.msrb.mxu3 %v9257_v41  ;;  %v10184_v41 = vld [vmem:[#allocation4 + $0x7c8] sm:$0xf] }
 0x40f   :  { %4246 = vmatmul.bf16.gmra.mxu2 %v13581_v49  ;;  %4344 = vmatmul.bf16.gmra.mxu0 %v13260_v39 }
 0x410   :  { %4295 = vmatmul.bf16.gmra.mxu3 %v13248_v58  ;;  %4511 = vmatpush.bf16.msrb.mxu0 %v9545_v9  ;;  %v9448_v9 = vld [vmem:[#allocation4 + $0x208] sm:$0xf] }
 0x411   :  { %v9449_v10 = vor.u32 %v10870_v52, %v9448_v9  ;;  %v13670_v35 = vpop.f32.mrf.mxu0  ;;  %v13682_v52 = vadd.f32 %v13600_v19, %v4096_v51  ;;  %v4101_v19 = vadd.f32 %v13645_v34, %v13559_v62  ;;  %v9896_v51 = vld [vmem:[#allocation4 + $0x588] sm:$0xf] }
 0x412   :  { %4202 = vmatmul.bf16.gmra.mxu1 %v13655_v27  ;;  %4464 = vmatpush.bf16.msrb.mxu3 %v9225_v20 }
 0x414   :  { %4512 = vmatpush.bf16.msrb.mxu0 %v9513_v54  ;;  %v11054_v54 = vld [vmem:[#allocation4 + $0x7e4] sm:$0xf0] }
 0x415   :  { %v10185_v14 = vor.u32 %v11054_v54, %v10184_v41  ;;  %v13677_v20 = vpop.f32.mrf.mxu3  ;;  %v10152_v41 = vld [vmem:[#allocation4 + $0x788] sm:$0xf] }
 0x416   :  { %4465 = vmatpush.bf16.msrb.mxu3 %v9193_v4  ;;  %v11046_v54 = vld [vmem:[#allocation4 + $0x7a4] sm:$0xf0] }
 0x417   :  { %4605 = vmatpush.bf16.msrb.mxu2 %v10185_v14  ;;  %v10153_v14 = vor.u32 %v11046_v54, %v10152_v41  ;;  %v10120_v54 = vld [vmem:[#allocation4 + $0x748] sm:$0xf] }
 0x418   :  { %4513 = vmatpush.bf16.msrb.mxu0 %v9481_v21  ;;  %v9929_v21 = vor.u32 %v10990_v8, %v9928_v57 }
 0x419   :  { %v13679_v9 = vpop.f32.mrf.mxu0 }
 0x41a   :  { %4556 = vmatpush.bf16.msra.mxu1 %v9929_v21  ;;  %v10982_v21 = vld [vmem:[#allocation4 + $0x5a4] sm:$0xf0] }
 0x41b   :  { %4606 = vmatpush.bf16.msrb.mxu2 %v10153_v14  ;;  %v11038_v14 = vld [vmem:[#allocation4 + $0x764] sm:$0xf0] }
 0x41c   :  { %4514 = vmatpush.bf16.msrb.mxu0 %v9449_v10  ;;  %v17322_v10 = vld [vmem:[#allocation41_spill] sm:$0xff] }
 0x41d   :  { %v4110_v6 = vpop.f32.mrf.mxu3 }
 0x41f   :  { %4251 = vmatmul.bf16.gmra.mxu2 %v13589_v33  ;;  %4349 = vmatmul.bf16.gmra.mxu0 %v17319_v37 }
 0x420   :  { %4300 = vmatmul.bf16.gmra.mxu3 %v17320_v23 }
 0x421   :  { %v13688_v57 = vpop.f32.mrf.mxu0 }
 0x422   :  { %4207 = vmatmul.bf16.gmra.mxu1 %v17321_v59 }
 0x42c   :  { %v4173_v43 = vpop.f32.mrf.mxu1 }
 0x42d   :  { %v4174_v4 = vadd.f32 %v4173_v43, %v13592_v61  ;;  %v13696_v61 = vadd.f32 %v13634_v16, %v4101_v19 }
 0x42f   :  { %4256 = vmatmul.bf16.gmra.mxu2 %v13440_v28  ;;  %4354 = vmatmul.bf16.gmra.mxu0 %v17322_v10  ;;  %v9897_v10 = vor.u32 %v10982_v21, %v9896_v51  ;;  %v13693_v28 = vpop.f32.mrf.mxu3  ;;  %v10121_v51 = vor.u32 %v11038_v14, %v10120_v54 }
 0x430   :  { %4305 = vmatmul.bf16.gmra.mxu3 %v17323_v45 }
 0x431   :  { %4557 = vmatpush.bf16.msra.mxu1 %v9897_v10  ;;  %v4078_v10 = vadd.f32 %v13426_v26, %v13559_v62  ;;  %4607 = vmatpush.bf16.msrb.mxu2 %v10121_v51 }
 0x432   :  { %4368 = vmatmul.bf16.vlgmr.msrb.gmra.mxu1 %v13385_v42  ;;  %v9864_v42 = vld [vmem:[#allocation4 + $0x548] sm:$0xf] }
 0x434   :  { %v4175_v8 = vpop.f32.mrf.mxu1 }
 0x43c   :  { %v13698_v43 = vpop.f32.mrf.mxu0 }
 0x43f   :  { %4417 = vmatmul.bf16.vlgmr.msra.gmra.mxu2 %v13442_v38  ;;  %4515 = vmatmul.bf16.vlgmr.msrb.gmra.mxu0 %v17293_v0  ;;  %v4178_v41 = vpop.f32.mrf.mxu1  ;;  %v4106_v0 = vadd.f32 %v13667_v5, %v13559_v62  ;;  %v10088_v5 = vld [vmem:[#allocation4 + $0x708] sm:$0xf] }
 0x440   :  { %4466 = vmatmul.bf16.vlgmr.msrb.gmra.mxu3 %v17294_v7  ;;  %v4179_v34 = vadd.f32 %v4178_v41, %v13621_v46  ;;  %v4127_v7 = vadd.f32 %v13404_v44, %v4078_v10  ;;  %v10974_v46 = vld [vmem:[#allocation4 + $0x564] sm:$0xf0] }
 0x441   :  { %v9865_v54 = vor.u32 %v10974_v46, %v9864_v42  ;;  %v13715_v26 = vadd.f32 %v13660_v30, %v4106_v0  ;;  %v11030_v10 = vld [vmem:[#allocation4 + $0x724] sm:$0xf0]  ;;  %v4083_v0 = vadd.f32 %v13468_v13, %v13559_v62 }
 0x442   :  { %v4222_v21 = vpop.f32.mrf.mxu2  ;;  %4373 = vmatmul.bf16.gmra.mxu1 %v13451_v63  ;;  %v4176_v14 = vadd.f32 %v4175_v8, %v4127_v7  ;;  %v10089_v7 = vor.u32 %v11030_v10, %v10088_v5 }
 0x443   :  { %v13706_v16 = vadd.f32 %v4222_v21, %v4174_v4  ;;  %v4271_v19 = vpop.f32.mrf.mxu3  ;;  %4558 = vmatpush.bf16.msra.mxu1 %v9865_v54  ;;  %v4111_v54 = vadd.f32 %v4110_v6, %v13559_v62  ;;  %v10056_v6 = vld [vmem:[#allocation4 + $0x6c8] sm:$0xf] }
 0x444   :  { %v13709_v38 = vpop.f32.mrf.mxu0  ;;  %4608 = vmatpush.bf16.msrb.mxu2 %v10089_v7 }
 0x445   :  { %v13735_v13 = vadd.f32 %v13679_v9, %v4111_v54  ;;  %v13746_v9 = vperm.slane %v13544_v60, 1  ;;  %v17324_v54 = vld [vmem:[#allocation28_spill] sm:$0xff]  ;;  %v10958_v60 = vld [vmem:[#allocation4 + $0x4e4] sm:$0xf0] }
 0x447   :  { %v4180_v41 = vpop.f32.mrf.mxu1 }
 0x44a   :  { %v4224_v45 = vpop.f32.mrf.mxu2 }
 0x44b   :  { %v13717_v4 = vadd.f32 %v4224_v45, %v4176_v14  ;;  %v4273_v51 = vpop.f32.mrf.mxu3  ;;  %v4132_v14 = vadd.f32 %v13457_v12, %v4083_v0  ;;  %v11022_v0 = vld [vmem:[#allocation4 + $0x6e4] sm:$0xf0] }
 0x44c   :  { %v13719_v21 = vpop.f32.mrf.mxu0 }
 0x44d   :  { %v4181_v5 = vadd.f32 %v4180_v41, %v4132_v14  ;;  %v4088_v14 = vadd.f32 %v17324_v54, %v13559_v62 }
 0x44f   :  { %4422 = vmatmul.bf16.gmra.mxu2 %v13480_v32  ;;  %4520 = vmatmul.bf16.gmra.mxu0 %v17298_v40  ;;  %v4183_v44 = vpop.f32.mrf.mxu1  ;;  %v10966_v40 = vld [vmem:[#allocation4 + $0x524] sm:$0xf0] }
 0x450   :  { %4471 = vmatmul.bf16.gmra.mxu3 %v17299_v53  ;;  %v4184_v42 = vadd.f32 %v4183_v44, %v13648_v36  ;;  %v9832_v53 = vld [vmem:[#allocation4 + $0x508] sm:$0xf] }
 0x451   :  { %v9833_v44 = vor.u32 %v10966_v40, %v9832_v53  ;;  %v10057_v53 = vor.u32 %v11022_v0, %v10056_v6  ;;  %v9800_v6 = vld [vmem:[#allocation4 + $0x4c8] sm:$0xf] }
 0x452   :  { %v4227_v8 = vpop.f32.mrf.mxu2  ;;  %4378 = vmatmul.bf16.gmra.mxu1 %v13504_v24 }
 0x453   :  { %v13727_v30 = vadd.f32 %v4227_v8, %v4179_v34  ;;  %v4276_v45 = vpop.f32.mrf.mxu3  ;;  %4559 = vmatpush.bf16.msra.mxu1 %v9833_v44  ;;  %4609 = vmatpush.bf16.msrb.mxu2 %v10057_v53 }
 0x454   :  { %v13730_v46 = vpop.f32.mrf.mxu0 }
 0x457   :  { %v4185_v36 = vpop.f32.mrf.mxu1 }
 0x45a   :  { %v4229_v10 = vpop.f32.mrf.mxu2 }
 0x45b   :  { %v13737_v34 = vadd.f32 %v4229_v10, %v4181_v5  ;;  %v4278_v7 = vpop.f32.mrf.mxu3 }
 0x45c   :  { %v13739_v8 = vpop.f32.mrf.mxu0 }
 0x45f   :  { %4427 = vmatmul.bf16.gmra.mxu2 %v13551_v31  ;;  %4525 = vmatmul.bf16.gmra.mxu0 %v17306_v48  ;;  %v4188_v12 = vpop.f32.mrf.mxu1  ;;  %v9801_v48 = vor.u32 %v10958_v60, %v9800_v6  ;;  %v4277_v60 = vadd.f32 %v4276_v45, %v13746_v9  ;;  %v4279_v45 = vadd.f32 %v4278_v7, %v13746_v9  ;;  %v17328_v7 = vld [vmem:[#allocation51_spill] sm:$0xff] }
 0x460   :  { %4476 = vmatmul.bf16.gmra.mxu3 %v17307_v50  ;;  %v4189_v40 = vadd.f32 %v4188_v12, %v13665_v56  ;;  %v4272_v50 = vadd.f32 %v4271_v19, %v13746_v9  ;;  %v17325_v56 = vld [vmem:[#allocation26_spill] sm:$0xff]  ;;  %v4274_v19 = vadd.f32 %v4273_v51, %v13746_v9 }
 0x461   :  { %v4137_v12 = vadd.f32 %v17325_v56, %v4088_v14  ;;  %4560 = vmatpush.bf16.msra.mxu1 %v9801_v48  ;;  %v10024_v56 = vld [vmem:[#allocation4 + $0x688] sm:$0xf] }
 0x462   :  { %v4232_v41 = vpop.f32.mrf.mxu2  ;;  %4383 = vmatmul.bf16.gmra.mxu1 %v13569_v1 }
 0x463   :  { %v13750_v44 = vadd.f32 %v4232_v41, %v4184_v42  ;;  %v13753_v5 = vpop.f32.mrf.mxu3  ;;  %v4186_v31 = vadd.f32 %v4185_v36, %v4137_v12  ;;  %v13760_v42 = vadd.f32 %v13698_v43, %v4272_v50  ;;  %v11014_v36 = vld [vmem:[#allocation4 + $0x6a4] sm:$0xf0]  ;;  %v4093_v43 = vadd.f32 %v13587_v11, %v13559_v62 }
 0x464   :  { %v13755_v10 = vpop.f32.mrf.mxu0  ;;  %v10025_v50 = vor.u32 %v11014_v36, %v10024_v56  ;;  %v10950_v56 = vld [vmem:[#allocation4 + $0x4a4] sm:$0xf0]  ;;  %v13788_v11 = vadd.f32 %v13719_v21, %v4277_v60  ;;  %v9674_v60 = vld [vmem:[#allocation4 + $0x3e8] sm:$0xf0] }
 0x466   :  { %4610 = vmatpush.bf16.msrb.mxu2 %v10025_v50 }
 0x467   :  { %v4190_v0 = vpop.f32.mrf.mxu1 }
 0x46a   :  { %v4234_v24 = vpop.f32.mrf.mxu2 }
 0x46b   :  { %v13762_v41 = vadd.f32 %v4234_v24, %v4186_v31  ;;  %v13764_v53 = vpop.f32.mrf.mxu3  ;;  %v13774_v31 = vadd.f32 %v13709_v38, %v4274_v19 }
 0x46c   :  { %v13766_v54 = vpop.f32.mrf.mxu0 }
 0x46f   :  { %4432 = vmatmul.bf16.gmra.mxu2 %v13598_v15  ;;  %4530 = vmatmul.bf16.gmra.mxu0 %v17311_v29  ;;  %v4193_v14 = vpop.f32.mrf.mxu1  ;;  %v9386_v15 = vld [vmem:[#allocation4 + $0x1a8] sm:$0xf0] }
 0x470   :  { %4481 = vmatmul.bf16.gmra.mxu3 %v17312_v55  ;;  %v4194_v48 = vadd.f32 %v4193_v14, %v13682_v52  ;;  %v4142_v52 = vadd.f32 %v13577_v25, %v4093_v43  ;;  %v9768_v14 = vld [vmem:[#allocation4 + $0x488] sm:$0xf] }
 0x471   :  { %v9769_v19 = vor.u32 %v10950_v56, %v9768_v14  ;;  %v9992_v43 = vld [vmem:[#allocation4 + $0x648] sm:$0xf] }
 0x472   :  { %v4237_v24 = vpop.f32.mrf.mxu2  ;;  %4388 = vmatmul.bf16.gmra.mxu1 %v13607_v22  ;;  %v4191_v36 = vadd.f32 %v4190_v0, %v4142_v52  ;;  %v11006_v0 = vld [vmem:[#allocation4 + $0x664] sm:$0xf0]  ;;  %v10922_v52 = vld [vmem:[#allocation4 + $0x3cc] sm:$0xf] }
 0x473   :  { %v13778_v51 = vadd.f32 %v4237_v24, %v4189_v40  ;;  %v13781_v12 = vpop.f32.mrf.mxu3  ;;  %4561 = vmatpush.bf16.msra.mxu1 %v9769_v19  ;;  %v17326_v14 = vld [vmem:[#allocation30_spill] sm:$0xff]  ;;  %v9677_v19 = vor.u32 %v10922_v52, %v9674_v60 }
 0x474   :  { %v13783_v6 = vpop.f32.mrf.mxu0  ;;  %v9736_v52 = vld [vmem:[#allocation4 + $0x448] sm:$0xf] }
 0x475   :  { %4703 = vmatpush.bf16.msra.mxu0 %v9677_v19  ;;  %v10850_v19 = vld [vmem:[#allocation4 + $0x18c] sm:$0xf] }
 0x477   :  { %v4195_v38 = vpop.f32.mrf.mxu1 }
 0x47a   :  { %v4239_v55 = vpop.f32.mrf.mxu2 }
 0x47b   :  { %v13790_v40 = vadd.f32 %v4239_v55, %v4191_v36  ;;  %v13792_v50 = vpop.f32.mrf.mxu3  ;;  %v9993_v55 = vor.u32 %v11006_v0, %v9992_v43  ;;  %v13804_v36 = vadd.f32 %v13730_v46, %v4279_v45  ;;  %v17330_v43 = vld [vmem:[#allocation50_spill] sm:$0xff] }
 0x47c   :  { %v13794_v24 = vpop.f32.mrf.mxu0  ;;  %v10858_v46 = vld [vmem:[#allocation4 + $0x1cc] sm:$0xf] }
 0x47d   :  { %17327 = vst [vmem:[#allocation28_spill] sm:$0xff] %v13804_v36  ;;  %4611 = vmatpush.bf16.msrb.mxu2 %v9993_v55  ;;  %v9418_v45 = vld [vmem:[#allocation4 + $0x1e8] sm:$0xf0] }
 0x47e   :  { %v9610_v36 = vld [vmem:[#allocation4 + $0x368] sm:$0xf0] }
 0x47f   :  { %4437 = vmatmul.bf16.gmra.mxu2 %v13535_v3  ;;  %4535 = vmatmul.bf16.gmra.mxu0 %v17316_v17  ;;  %v4198_v25 = vpop.f32.mrf.mxu1  ;;  %v4098_v3 = vadd.f32 %v17328_v7, %v13559_v62  ;;  %v10914_v7 = vld [vmem:[#allocation4 + $0x38c] sm:$0xf] }
 0x480   :  { %4486 = vmatmul.bf16.gmra.mxu3 %v17326_v14  ;;  %v13801_v21 = vadd.f32 %v4198_v25, %v13696_v61  ;;  %v4282_v25 = vadd.f32 %v13753_v5, %v13746_v9  ;;  %v9642_v14 = vld [vmem:[#allocation4 + $0x3a8] sm:$0xf0]  ;;  %v9389_v5 = vor.u32 %v10850_v19, %v9386_v15 }
 0x481   :  { %v4147_v0 = vadd.f32 %v17330_v43, %v4098_v3  ;;  %v9645_v22 = vor.u32 %v10914_v7, %v9642_v14  ;;  %v4284_v14 = vadd.f32 %v13764_v53, %v13746_v9  ;;  %v10842_v15 = vld [vmem:[#allocation4 + $0x14c] sm:$0xf] }
 0x482   :  { %v4242_v56 = vpop.f32.mrf.mxu2  ;;  %4393 = vmatmul.bf16.gmra.mxu1 %v13636_v2  ;;  %v13821_v3 = vadd.f32 %v13739_v8, %v4282_v25  ;;  %v10898_v8 = vld [vmem:[#allocation4 + $0x30c] sm:$0xf] }
 0x483   :  { %v13808_v17 = vadd.f32 %v4242_v56, %v4194_v48  ;;  %v13811_v29 = vpop.f32.mrf.mxu3  ;;  %v9421_v48 = vor.u32 %v10858_v46, %v9418_v45  ;;  %v10942_v56 = vld [vmem:[#allocation4 + $0x464] sm:$0xf0]  ;;  %v4196_v55 = vadd.f32 %v4195_v38, %v4147_v0  ;;  %4704 = vmatpush.bf16.msra.mxu0 %v9645_v22  ;;  %v9354_v0 = vld [vmem:[#allocation4 + $0x168] sm:$0xf0] }
 0x484   :  { %v13813_v61 = vpop.f32.mrf.mxu0  ;;  %v9737_v2 = vor.u32 %v10942_v56, %v9736_v52  ;;  %v9578_v22 = vld [vmem:[#allocation4 + $0x328] sm:$0xf0]  ;;  %v9960_v52 = vld [vmem:[#allocation4 + $0x608] sm:$0xf] }
 0x485   :  { %17329 = vst [vmem:[#allocation26_spill] sm:$0xff] %v13813_v61  ;;  %v10906_v61 = vld [vmem:[#allocation4 + $0x34c] sm:$0xf]  ;;  %4654 = vmatpush.bf16.msra.mxu3 %v9421_v48  ;;  %v9581_v53 = vor.u32 %v10898_v8, %v9578_v22  ;;  %v10998_v48 = vld [vmem:[#allocation4 + $0x624] sm:$0xf0] }
 0x486   :  { %4562 = vmatpush.bf16.msra.mxu1 %v9737_v2  ;;  %v9613_v46 = vor.u32 %v10906_v61, %v9610_v36  ;;  %v9357_v2 = vor.u32 %v10842_v15, %v9354_v0  ;;  %v10834_v36 = vld [vmem:[#allocation4 + $0x10c] sm:$0xf]  ;;  %v9961_v19 = vor.u32 %v10998_v48, %v9960_v52  ;;  %v4103_v15 = vadd.f32 %v13657_v18, %v13559_v62 }
 0x487   :  { %v13818_v60 = vpop.f32.mrf.mxu1  ;;  %v9322_v61 = vld [vmem:[#allocation4 + $0x128] sm:$0xf0] }
 0x488   :  { %4705 = vmatpush.bf16.msra.mxu0 %v9613_v46  ;;  %v10890_v56 = vld [vmem:[#allocation4 + $0x2cc] sm:$0xf]  ;;  %v13838_v46 = vadd.f32 %v13755_v10, %v4284_v14  ;;  %4612 = vmatpush.bf16.msrb.mxu2 %v9961_v19  ;;  %v4152_v10 = vadd.f32 %v13650_v47, %v4103_v15 }
 0x489   :  { %4655 = vmatpush.bf16.msra.mxu3 %v9389_v5  ;;  %v9546_v5 = vld [vmem:[#allocation4 + $0x2e8] sm:$0xf0] }
 0x48a   :  { %v4244_v1 = vpop.f32.mrf.mxu2  ;;  %v10826_v18 = vld [vmem:[#allocation4 + $0xcc] sm:$0xf]  ;;  %v4201_v48 = vadd.f32 %v13818_v60, %v4152_v10  ;;  %v5818_v60 = vmul.f32 %v13717_v4, %v13717_v4  ;;  %v4289_v10 = vadd.f32 %v13792_v50, %v13746_v9  ;;  %v5634_v50 = vadd.f32 %v13717_v4, %v13706_v16 }
 0x48b   :  { %v13823_v43 = vadd.f32 %v4244_v1, %v4196_v55  ;;  %v13825_v45 = vpop.f32.mrf.mxu3  ;;  %v9325_v55 = vor.u32 %v10834_v36, %v9322_v61  ;;  %v9290_v14 = vld [vmem:[#allocation4 + $0xe8] sm:$0xf0]  ;;  %v10934_v61 = vld [vmem:[#allocation4 + $0x424] sm:$0xf0] }
 0x48c   :  { %v13827_v38 = vpop.f32.mrf.mxu0  ;;  %4706 = vmatpush.bf16.msra.mxu0 %v9581_v53  ;;  %v9293_v36 = vor.u32 %v10826_v18, %v9290_v14  ;;  %v10882_v53 = vld [vmem:[#allocation4 + $0x28c] sm:$0xf] }
 0x48d   :  { %4656 = vmatpush.bf16.msra.mxu3 %v9357_v2  ;;  %v4287_v2 = vadd.f32 %v13781_v12, %v13746_v9  ;;  %v9514_v52 = vld [vmem:[#allocation4 + $0x2a8] sm:$0xf0] }
 0x48e   :  { %v10818_v19 = vld [vmem:[#allocation4 + $0x8c] sm:$0xf] }
 0x48f   :  { %4442 = vmatmul.bf16.gmra.mxu2 %v13581_v49  ;;  %4540 = vmatmul.bf16.gmra.mxu0 %v13260_v39  ;;  %v4203_v1 = vpop.f32.mrf.mxu1  ;;  %v9482_v47 = vld [vmem:[#allocation4 + $0x268] sm:$0xf0]  ;;  %v13855_v15 = vadd.f32 %v13766_v54, %v4287_v2  ;;  %v5810_v54 = vmul.f32 %v13706_v16, %v13706_v16 }
 0x490   :  { %4491 = vmatmul.bf16.gmra.mxu3 %v13248_v58  ;;  %v13835_v25 = vadd.f32 %v4203_v1, %v13715_v26  ;;  %v9549_v26 = vor.u32 %v10890_v56, %v9546_v5  ;;  %v9258_v5 = vld [vmem:[#allocation4 + $0xa8] sm:$0xf0] }
 0x491   :  { %4657 = vmatpush.bf16.msra.mxu3 %v9325_v55  ;;  %v10874_v58 = vld [vmem:[#allocation4 + $0x24c] sm:$0xf]  ;;  %v9261_v55 = vor.u32 %v10818_v19, %v9258_v5  ;;  %v5635_v19 = vadd.f32 %v5634_v50, %v13727_v30 }
 0x492   :  { %v4247_v7 = vpop.f32.mrf.mxu2  ;;  %4398 = vmatmul.bf16.gmra.mxu1 %v13655_v27  ;;  %4707 = vmatpush.bf16.msra.mxu0 %v9549_v26  ;;  %v9485_v18 = vor.u32 %v10874_v58, %v9482_v47  ;;  %v5826_v58 = vmul.f32 %v13727_v30, %v13727_v30 }
 0x493   :  { %v13843_v0 = vadd.f32 %v4247_v7, %v13801_v21  ;;  %v13846_v8 = vpop.f32.mrf.mxu3  ;;  %v9704_v21 = vld [vmem:[#allocation4 + $0x408] sm:$0xf]  ;;  %v9517_v7 = vor.u32 %v10882_v53, %v9514_v52  ;;  %v5834_v53 = vmul.f32 %v13737_v34, %v13737_v34 }
 0x494   :  { %v13848_v1 = vpop.f32.mrf.mxu0  ;;  %v9705_v56 = vor.u32 %v10934_v61, %v9704_v21  ;;  %v5938_v61 = vadd.f32 %v5818_v60, %v5810_v54  ;;  %v5858_v54 = vmul.f32 %v13778_v51, %v13778_v51 }
 0x495   :  { %4658 = vmatpush.bf16.msra.mxu3 %v9293_v36 }
 0x496   :  { %4563 = vmatpush.bf16.msra.mxu1 %v9705_v56  ;;  %4708 = vmatpush.bf16.msra.mxu0 %v9517_v7  ;;  %v4108_v56 = vadd.f32 %v13677_v20, %v13559_v62  ;;  %v4113_v7 = vadd.f32 %v13693_v28, %v13559_v62  ;;  %v4292_v20 = vadd.f32 %v13811_v29, %v13746_v9 }
 0x497   :  { %v4205_v22 = vpop.f32.mrf.mxu1  ;;  %v5850_v28 = vmul.f32 %v13762_v41, %v13762_v41 }
 0x498   :  { %v4157_v62 = vadd.f32 %v13670_v35, %v4108_v56 }
 0x499   :  { %4659 = vmatpush.bf16.msra.mxu3 %v9261_v55 }
 0x49a   :  { %v4249_v12 = vpop.f32.mrf.mxu2  ;;  %4709 = vmatpush.bf16.msra.mxu0 %v9485_v18  ;;  %v4206_v29 = vadd.f32 %v4205_v22, %v4157_v62  ;;  %v17335_v62 = vld [vmem:[#allocation40_spill] sm:$0xff] }
 0x49b   :  { %v13857_v26 = vadd.f32 %v4249_v12, %v4201_v48  ;;  %v13863_v14 = vpop.f32.mrf.mxu3  ;;  %v13880_v48 = vadd.f32 %v13783_v6, %v4289_v10  ;;  %v5842_v12 = vmul.f32 %v13750_v44, %v13750_v44  ;;  %v5636_v6 = vadd.f32 %v5635_v19, %v13737_v34 }
 0x49c   :  { %v13865_v21 = vpop.f32.mrf.mxu0 }
 0x49d   :  { %v5637_v47 = vadd.f32 %v5636_v6, %v13750_v44  ;;  %v17333_v6 = vld [vmem:[#allocation33_spill] sm:$0xff] }
 0x49f   :  { %4447 = vmatmul.bf16.gmra.mxu2 %v13589_v33  ;;  %4545 = vmatmul.bf16.gmra.mxu0 %v17319_v37  ;;  %v4208_v2 = vpop.f32.mrf.mxu1  ;;  %v5638_v10 = vadd.f32 %v5637_v47, %v13762_v41  ;;  %v9930_v37 = vld [vmem:[#allocation4 + $0x5e8] sm:$0xf0] }
 0x4a0   :  { %4496 = vmatmul.bf16.gmra.mxu3 %v17320_v23  ;;  %v4209_v36 = vadd.f32 %v4208_v2, %v13735_v13  ;;  %v5939_v13 = vadd.f32 %v5938_v61, %v5826_v58 }
 0x4a1   :  { %v5639_v35 = vadd.f32 %v5638_v10, %v13778_v51  ;;  %v5898_v10 = vmul.f32 %v13857_v26, %v13857_v26 }
 0x4a2   :  { %v4252_v52 = vpop.f32.mrf.mxu2  ;;  %4403 = vmatmul.bf16.gmra.mxu1 %v17321_v59  ;;  %v5940_v55 = vadd.f32 %v5939_v13, %v5834_v53  ;;  %v13907_v53 = vadd.f32 %v13794_v24, %v4292_v20  ;;  %v5874_v13 = vmul.f32 %v13808_v17, %v13808_v17  ;;  %v5882_v24 = vmul.f32 %v13823_v43, %v13823_v43 }
 0x4a3   :  { %v13888_v5 = vadd.f32 %v4252_v52, %v13835_v25  ;;  %v4162_v25 = vadd.f32 %v13688_v57, %v4113_v7  ;;  %v4301_v58 = vpop.f32.mrf.mxu3  ;;  %v5866_v57 = vmul.f32 %v13790_v40, %v13790_v40  ;;  %v5640_v19 = vadd.f32 %v5639_v35, %v13790_v40 }
 0x4a4   :  { %v5941_v18 = vadd.f32 %v5940_v55, %v5842_v12  ;;  %v13904_v2 = vpop.f32.mrf.mxu0  ;;  %v17334_v55 = vld [vmem:[#allocation41_spill] sm:$0xff] }
 0x4a5   :  { %17331 = vst [vmem:[#allocation51_spill] sm:$0xff] %v13904_v2  ;;  %v5641_v12 = vadd.f32 %v5640_v19, %v13808_v17  ;;  %v4297_v19 = vadd.f32 %v13846_v8, %v13746_v9  ;;  %v10986_v2 = vld [vmem:[#allocation4 + $0x5cc] sm:$0xf] }
 0x4a6   :  { %v5942_v52 = vadd.f32 %v5941_v18, %v5850_v28  ;;  %v5890_v28 = vmul.f32 %v13843_v0, %v13843_v0 }
 0x4a7   :  { %v4210_v60 = vpop.f32.mrf.mxu1  ;;  %v5642_v47 = vadd.f32 %v5641_v12, %v13823_v43 }
 0x4a8   :  { %v4211_v50 = vadd.f32 %v4210_v60, %v4162_v25  ;;  %v5943_v7 = vadd.f32 %v5942_v52, %v5858_v54  ;;  %v17336_v52 = vld [vmem:[#allocation32_spill] sm:$0xff] }
 0x4a9   :  { %v5643_v60 = vadd.f32 %v5642_v47, %v13843_v0 }
 0x4aa   :  { %v4254_v61 = vpop.f32.mrf.mxu2  ;;  %v5944_v22 = vadd.f32 %v5943_v7, %v5866_v57  ;;  %v5906_v7 = vmul.f32 %v13888_v5, %v13888_v5 }
 0x4ab   :  { %v13912_v56 = vadd.f32 %v4254_v61, %v4206_v29  ;;  %v13929_v54 = vpop.f32.mrf.mxu3  ;;  %v5644_v57 = vadd.f32 %v5643_v60, %v13857_v26 }
 0x4ac   :  { %v5945_v20 = vadd.f32 %v5944_v22, %v5874_v13  ;;  %v13931_v29 = vpop.f32.mrf.mxu0 }
 0x4ad   :  { %17332 = vst [vmem:[#allocation50_spill] sm:$0xff] %v13912_v56  ;;  %v5645_v22 = vadd.f32 %v5644_v57, %v13888_v5  ;;  %v5914_v12 = vmul.f32 %v13912_v56, %v13912_v56 }
 0x4ae   :  { %v5946_v18 = vadd.f32 %v5945_v20, %v5882_v24 }
 0x4af   :  { %4452 = vmatmul.bf16.gmra.mxu2 %v17333_v6  ;;  %4550 = vmatmul.bf16.gmra.mxu0 %v17334_v55  ;;  %v9226_v55 = vld [vmem:[#allocation4 + $0x68] sm:$0xf0] }
 0x4b0   :  { %4501 = vmatmul.bf16.gmra.mxu3 %v17335_v62  ;;  %v5947_v35 = vadd.f32 %v5946_v18, %v5890_v28  ;;  %v13948_v28 = vadd.f32 %v13827_v38, %v4297_v19  ;;  %v17337_v62 = vld [vmem:[#allocation24_spill] sm:$0xff]  ;;  %v11050_v6 = vld [vmem:[#allocation4 + $0x7cc] sm:$0xf] }
 0x4b2   :  { %v4257_v25 = vpop.f32.mrf.mxu2  ;;  %4564 = vmatmul.bf16.vlgmr.msra.gmra.mxu1 %v17336_v52  ;;  %v5948_v13 = vadd.f32 %v5947_v35, %v5898_v10 }
 0x4b3   :  { %v13933_v61 = vadd.f32 %v4257_v25, %v4209_v36  ;;  %v5646_v36 = vadd.f32 %v5645_v22, %v13912_v56  ;;  %v13953_v10 = vpop.f32.mrf.mxu3 }
 0x4b4   :  { %v5949_v24 = vadd.f32 %v5948_v13, %v5906_v7  ;;  %v13955_v35 = vpop.f32.mrf.mxu0 }
 0x4b5   :  { %v5922_v20 = vmul.f32 %v13933_v61, %v13933_v61  ;;  %v5647_v18 = vadd.f32 %v5646_v36, %v13933_v61 }
 0x4b6   :  { %v5950_v25 = vadd.f32 %v5949_v24, %v5914_v12 }
 0x4b8   :  { %v5951_v60 = vadd.f32 %v5950_v25, %v5922_v20  ;;  %v4302_v20 = vadd.f32 %v4301_v58, %v13746_v9  ;;  %v9194_v58 = vld [vmem:[#allocation4 + $0x28] sm:$0xf0] }
 0x4ba   :  { %v4259_v47 = vpop.f32.mrf.mxu2  ;;  %v13969_v59 = vadd.f32 %v13865_v21, %v4302_v20 }
 0x4bb   :  { %v13951_v8 = vadd.f32 %v4259_v47, %v4211_v50  ;;  %v13963_v52 = vpop.f32.mrf.mxu3 }
 0x4bc   :  { %v13965_v23 = vpop.f32.mrf.mxu0 }
 0x4bd   :  { %v5648_v57 = vadd.f32 %v5647_v18, %v13951_v8  ;;  %v5930_v7 = vmul.f32 %v13951_v8, %v13951_v8  ;;  %v10810_v18 = vld [vmem:[#allocation4 + $0x4c] sm:$0xf] }
 0x4bf   :  { %v5649_v13 = vrot.slane %v5648_v57, 4  ;;  %v5952_v22 = vadd.f32 %v5951_v60, %v5930_v7  ;;  %4613 = vmatmul.bf16.vlgmr.msrb.gmra.mxu2 %v17337_v62  ;;  %v9229_v60 = vor.u32 %v10810_v18, %v9226_v55  ;;  %v10866_v7 = vld [vmem:[#allocation4 + $0x20c] sm:$0xf] }
 0x4c0   :  { %v10802_v62 = vld [vmem:[#allocation4 + $0xc] sm:$0xf] }
 0x4c1   :  { %v5650_v38 = vadd.f32 %v5649_v13, %v5648_v57  ;;  %v5953_v19 = vrot.slane %v5952_v22, 4  ;;  %v9450_v57 = vld [vmem:[#allocation4 + $0x228] sm:$0xf0]  ;;  %v4369_v13 = vpop.f32.mrf.mxu1  ;;  %4660 = vmatpush.bf16.msra.mxu3 %v9229_v60 }
 0x4c2   :  { %4569 = vmatmul.bf16.gmra.mxu1 %v13451_v63 }
 0x4c3   :  { %v5651_v12 = vrot.slane %v5650_v38, 2  ;;  %v5954_v24 = vadd.f32 %v5953_v19, %v5952_v22  ;;  %v4418_v22 = vpop.f32.mrf.mxu2 }
 0x4c5   :  { %v5652_v50 = vadd.f32 %v5651_v12, %v5650_v38  ;;  %v5955_v36 = vrot.slane %v5954_v24, 2  ;;  %v9453_v38 = vor.u32 %v10866_v7, %v9450_v57  ;;  %v4370_v12 = vadd.f32 %v4369_v13, %v13760_v42  ;;  %v10154_v7 = vld [vmem:[#allocation4 + $0x7a8] sm:$0xf0] }
 0x4c6   :  { %v9933_v42 = vor.u32 %v10986_v2, %v9930_v37  ;;  %v10978_v57 = vld [vmem:[#allocation4 + $0x58c] sm:$0xf]  ;;  %v13980_v37 = vpop.f32.mrf.mxu0 }
 0x4c7   :  { %v5653_v47 = vrot.slane %v5652_v50, 1  ;;  %v5956_v25 = vadd.f32 %v5955_v36, %v5954_v24  ;;  %v9197_v24 = vor.u32 %v10802_v62, %v9194_v58  ;;  %v10186_v36 = vld [vmem:[#allocation4 + $0x7e8] sm:$0xf0]  ;;  %4710 = vmatpush.bf16.msra.mxu0 %v9453_v38 }
 0x4c8   :  { %v10189_v56 = vor.u32 %v11050_v6, %v10186_v36  ;;  %v9898_v13 = vld [vmem:[#allocation4 + $0x5a8] sm:$0xf0]  ;;  %4752 = vmatpush.bf16.msrb.mxu1 %v9933_v42 }
 0x4c9   :  { %v5654_v19 = vadd.f32 %v5653_v47, %v5652_v50  ;;  %v5957_v63 = vrot.slane %v5956_v25, 1  ;;  %v13973_v50 = vadd.f32 %v4418_v22, %v4370_v12  ;;  %v11042_v47 = vld [vmem:[#allocation4 + $0x78c] sm:$0xf]  ;;  %4661 = vmatpush.bf16.msra.mxu3 %v9197_v24  ;;  %v9901_v2 = vor.u32 %v10978_v57, %v9898_v13  ;;  %v4371_v38 = vpop.f32.mrf.mxu1 }
 0x4ca   :  { %4801 = vmatpush.bf16.msra.mxu2 %v10189_v56  ;;  %v10157_v20 = vor.u32 %v11042_v47, %v10154_v7  ;;  %v11034_v6 = vld [vmem:[#allocation4 + $0x74c] sm:$0xf]  ;;  %v4372_v56 = vadd.f32 %v4371_v38, %v13774_v31  ;;  %v4307_v57 = vadd.f32 %v13953_v10, %v13746_v9  ;;  %v4309_v10 = vadd.f32 %v13963_v52, %v13746_v9 }
 0x4cb   :  { %v13971_v55 = vmul.f32 0.0078125, %v5654_v19  ;;  %v5958_v18 = vadd.f32 %v5957_v63, %v5956_v25  ;;  %17338 = vst [vmem:[#allocation53_spill] sm:$0xff] %v13973_v50  ;;  %v17339_v63 = vld [vmem:[#allocation43_spill] sm:$0xff]  ;;  %v4467_v19 = vpop.f32.mrf.mxu3  ;;  %v4420_v12 = vpop.f32.mrf.mxu2  ;;  %v17340_v36 = vld [vmem:[#allocation42_spill] sm:$0xff] }
 0x4cc   :  { %4711 = vmatmul.bf16.vlgmr.msra.gmra.mxu0 %v17339_v63  ;;  %v10122_v25 = vld [vmem:[#allocation4 + $0x768] sm:$0xf0]  ;;  %4662 = vmatmul.bf16.vlgmr.msra.gmra.mxu3 %v17340_v36  ;;  %v13985_v7 = vadd.f32 %v4420_v12, %v4372_v56  ;;  %v13994_v38 = vadd.f32 %v13931_v29, %v4307_v57  ;;  %v17346_v36 = vld [vmem:[#allocation45_spill] sm:$0xff] }
 0x4cd   :  { %v6106_v60 = vmul.f32 0.0078125, %v5958_v18  ;;  %v6114_v62 = vmul.f32 %v13971_v55, %v13971_v55  ;;  %v10125_v24 = vor.u32 %v11034_v6, %v10122_v25  ;;  %v10970_v18 = vld [vmem:[#allocation4 + $0x54c] sm:$0xf]  ;;  %4753 = vmatpush.bf16.msrb.mxu1 %v9901_v2 }
 0x4ce   :  { %4802 = vmatpush.bf16.msra.mxu2 %v10157_v20  ;;  %v9866_v47 = vld [vmem:[#allocation4 + $0x568] sm:$0xf0]  ;;  %17341 = vst [vmem:[#allocation54_spill] sm:$0xff] %v13985_v7 }
 0x4cf   :  { %v6122_v22 = vsub.f32 %v6106_v60, %v6114_v62  ;;  %4618 = vmatmul.bf16.gmra.mxu2 %v13480_v32  ;;  %v9869_v42 = vor.u32 %v10970_v18, %v9866_v47  ;;  %v17342_v60 = vld [vmem:[#allocation35_spill] sm:$0xff]  ;;  %v13990_v62 = vpop.f32.mrf.mxu0  ;;  %17343 = vst [vmem:[#allocation55_spill] sm:$0xff] %v13994_v38 }
 0x4d0   :  { %v11026_v18 = vld [vmem:[#allocation4 + $0x70c] sm:$0xf]  ;;  %v9616_v38 = vld [vmem:[#allocation4 + $0x350] sm:$0xf] }
 0x4d1   :  { %v6258_v58 = vadd.f32 0.8, %v6122_v22  ;;  %4754 = vmatpush.bf16.msrb.mxu1 %v9869_v42  ;;  %v4374_v31 = vpop.f32.mrf.mxu1  ;;  %v10090_v47 = vld [vmem:[#allocation4 + $0x728] sm:$0xf0] }
 0x4d2   :  { %4574 = vmatmul.bf16.gmra.mxu1 %v17342_v60  ;;  %4803 = vmatpush.bf16.msra.mxu2 %v10125_v24  ;;  %v4375_v25 = vadd.f32 %v4374_v31, %v13788_v11  ;;  %v17345_v24 = vld [vmem:[#allocation47_spill] sm:$0xff]  ;;  %v10093_v11 = vor.u32 %v11026_v18, %v10090_v47  ;;  %v14015_v47 = vadd.f32 %v13955_v35, %v4309_v10 }
 0x4d3   :  { %11228 = vrsqrt.f32 %v6258_v58  ;;  %v4469_v13 = vpop.f32.mrf.mxu3  ;;  %v4423_v20 = vpop.f32.mrf.mxu2  ;;  %vm6272_vm4 = vweird.f32 %v6258_v58 }
 0x4d4   :  { %v13996_v2 = vadd.f32 %v4423_v20, %v4375_v25  ;;  %v14007_v20 = vld [vmem:[%s17032_s8] sm:$0xff] }
 0x4d5   :  { %17347 = vst [vmem:[#allocation57_spill] sm:$0xff] %v14007_v20  ;;  %v14010_v52 = vperm.slane %v14007_v20, 2  ;;  %v17348_v25 = vld [vmem:[#allocation46_spill] sm:$0xff]  ;;  %v17352_v20 = vld [vmem:[#allocation36_spill] sm:$0xff] }
 0x4d6   :  { %17344 = vst [vmem:[#allocation56_spill] sm:$0xff] %v13996_v2  ;;  %4804 = vmatpush.bf16.msra.mxu2 %v10093_v11 }
 0x4d7   :  { %v14001_v21 = vpop.f32.mrf.mxu0 }
 0x4d9   :  { %v11229_v6 = vpop.eup %11228  ;;  %v4376_v29 = vpop.f32.mrf.mxu1 }
 0x4da   :  { %v6267_v22 = vmul.f32 %v11229_v6, %v6258_v58  ;;  %vm6273_vm3 = vweird.f32 %v11229_v6  ;;  %v4468_v58 = vadd.f32 %v4467_v19, %v14010_v52 }
 0x4db   :  { %v4472_v42 = vpop.f32.mrf.mxu3  ;;  %v4425_v57 = vpop.f32.mrf.mxu2  ;;  %vm6274_vm5 = vmor %vm6272_vm4, %vm6273_vm3 }
 0x4dc   :  { %v6268_v12 = vmul.f32 %v11229_v6, %v6267_v22  ;;  %4716 = vmatmul.bf16.gmra.mxu0 %v17345_v24  ;;  %4667 = vmatmul.bf16.gmra.mxu3 %v17348_v25  ;;  %v17349_v22 = vld [vmem:[#allocation28_spill] sm:$0xff]  ;;  %v10962_v24 = vld [vmem:[#allocation4 + $0x50c] sm:$0xf]  ;;  %v17353_v25 = vsub.f32 %v13951_v8, %v13971_v55  ;;  %v4470_v8 = vadd.f32 %v4469_v13, %v14010_v52 }
 0x4dd   :  { %17350 = vst [vmem:[#allocation28_spill] sm:$0xff] %v14015_v47  ;;  %v9802_v13 = vld [vmem:[#allocation4 + $0x4e8] sm:$0xf0] }
 0x4de   :  { %v6269_v56 = vmul.f32 0.5, %v6268_v12  ;;  %v4377_v12 = vadd.f32 %v4376_v29, %v17349_v22  ;;  %v10058_v22 = vld [vmem:[#allocation4 + $0x6e8] sm:$0xf0] }
 0x4df   :  { %4623 = vmatmul.bf16.gmra.mxu2 %v17346_v36  ;;  %v9834_v36 = vld [vmem:[#allocation4 + $0x528] sm:$0xf0] }
 0x4e0   :  { %v6270_v31 = vsub.f32 1.5, %v6269_v56  ;;  %v9837_v56 = vor.u32 %v10962_v24, %v9834_v36  ;;  %v14017_v63 = vadd.f32 %v4425_v57, %v4377_v12  ;;  %v14029_v24 = vpop.f32.mrf.mxu0  ;;  %v17356_v57 = vld [vmem:[#allocation21_spill] sm:$0xff]  ;;  %v17365_v47 = vld [vmem:[#allocation27_spill] sm:$0xff] }
 0x4e1   :  { %v4379_v35 = vpop.f32.mrf.mxu1 }
 0x4e2   :  { %v6271_v18 = vmul.f32 %v11229_v6, %v6270_v31  ;;  %17351 = vst [vmem:[#allocation58_spill] sm:$0xff] %v14017_v63  ;;  %4579 = vmatmul.bf16.gmra.mxu1 %v17352_v20  ;;  %v4380_v31 = vadd.f32 %v4379_v35, %v13821_v3  ;;  %v17358_v35 = vld [vmem:[#allocation20_spill] sm:$0xff]  ;;  %v5835_v32 = vmul.f32 %v14017_v63, %v14017_v63 }
 0x4e3   :  { %4755 = vmatpush.bf16.msrb.mxu1 %v9837_v56  ;;  %v4474_v36 = vpop.f32.mrf.mxu3  ;;  %v4428_v10 = vpop.f32.mrf.mxu2 }
 0x4e4   :  { %v14019_v60 = vsel %vm6274_vm5, %v11229_v6, %v6271_v18  ;;  %v14033_v6 = vadd.f32 %v13965_v23, %v4468_v58  ;;  %v14035_v29 = vadd.f32 %v4428_v10, %v4380_v31  ;;  %v17357_v18 = vld [vmem:[#allocation38_spill] sm:$0xff]  ;;  %v14047_v31 = vadd.f32 %v13980_v37, %v4470_v8 }
 0x4e5   :  { %v14026_v11 = vmul.f32 %v14019_v60, %v17353_v25  ;;  %v11018_v25 = vld [vmem:[#allocation4 + $0x6cc] sm:$0xf] }
 0x4e6   :  { %17354 = vst [vmem:[#allocation59_spill] sm:$0xff] %v14033_v6  ;;  %v10061_v56 = vor.u32 %v11018_v25, %v10058_v22  ;;  %v10954_v58 = vld [vmem:[#allocation4 + $0x4cc] sm:$0xf]  ;;  %v4473_v22 = vadd.f32 %v4472_v42, %v14010_v52  ;;  %v17364_v25 = vld [vmem:[#allocation37_spill] sm:$0xff] }
 0x4e7   :  { %17355 = vst [vmem:[#allocation60_spill] sm:$0xff] %v14035_v29  ;;  %v9805_v10 = vor.u32 %v10954_v58, %v9802_v13  ;;  %v17360_v6 = vld [vmem:[#allocation22_spill] sm:$0xff]  ;;  %v4475_v13 = vadd.f32 %v4474_v36, %v14010_v52  ;;  %v4294_v36 = vadd.f32 %v13825_v45, %v13746_v9 }
 0x4e8   :  { %v14041_v19 = vpop.f32.mrf.mxu0  ;;  %4805 = vmatpush.bf16.msra.mxu2 %v10061_v56  ;;  %17359 = vst [vmem:[#allocation61_spill] sm:$0xff] %v14047_v31  ;;  %v14061_v37 = vadd.f32 %v13990_v62, %v4473_v22  ;;  %v14070_v42 = vld [vmem:[%s17036_s12] ss:$2 sm:$0xff]  ;;  %v5655_v22 = vadd.f32 %v13985_v7, %v13973_v50 }
 0x4e9   :  { %v4381_v20 = vpop.f32.mrf.mxu1  ;;  %4756 = vmatpush.bf16.msrb.mxu1 %v9805_v10  ;;  %17362 = vst [vmem:[#allocation63_spill] sm:$0xff] %v14070_v42  ;;  %v17363_v10 = vld [vmem:[#allocation29_spill] sm:$0xff]  ;;  %v10026_v62 = vld [vmem:[#allocation4 + $0x6a8] sm:$0xf0] }
 0x4ea   :  { %v4382_v23 = vadd.f32 %v4381_v20, %v13838_v46  ;;  %17361 = vst [vmem:[#allocation62_spill] sm:$0xff] %v14061_v37  ;;  %v10946_v45 = vld [vmem:[#allocation4 + $0x48c] sm:$0xf] }
 0x4eb   :  { %v14039_v12 = vpop.f32.mrf.mxu3  ;;  %v4430_v3 = vpop.f32.mrf.mxu2 }
 0x4ec   :  { %4721 = vmatmul.bf16.gmra.mxu0 %v17356_v57  ;;  %4672 = vmatmul.bf16.gmra.mxu3 %v17358_v35  ;;  %v14049_v57 = vadd.f32 %v4430_v3, %v4382_v23  ;;  %v5819_v3 = vmul.f32 %v13985_v7, %v13985_v7  ;;  %v5811_v23 = vmul.f32 %v13973_v50, %v13973_v50  ;;  %v14090_v7 = vperm.slane %v14070_v42, 0 }
 0x4ed   :  { %v5656_v50 = vadd.f32 %v5655_v22, %v13996_v2  ;;  %v14105_v22 = vadd.f32 %v13929_v54, %v13746_v9  ;;  %v6130_v54 = vsub.f32 %v13706_v16, %v13971_v55  ;;  %v6178_v16 = vsub.f32 %v13778_v51, %v13971_v55 }
 0x4ef   :  { %4628 = vmatmul.bf16.gmra.mxu2 %v17357_v18  ;;  %v5959_v18 = vadd.f32 %v5819_v3, %v5811_v23  ;;  %v5657_v23 = vadd.f32 %v5656_v50, %v14017_v63 }
 0x4f0   :  { %v14057_v46 = vpop.f32.mrf.mxu0 }
 0x4f1   :  { %v4384_v20 = vpop.f32.mrf.mxu1 }
 0x4f2   :  { %4584 = vmatmul.bf16.gmra.mxu1 %v17360_v6  ;;  %v4385_v58 = vadd.f32 %v4384_v20, %v13855_v15  ;;  %v11010_v15 = vld [vmem:[#allocation4 + $0x68c] sm:$0xf]  ;;  %v5827_v20 = vmul.f32 %v13996_v2, %v13996_v2 }
 0x4f3   :  { %v14055_v35 = vpop.f32.mrf.mxu3  ;;  %v4433_v56 = vpop.f32.mrf.mxu2  ;;  %v10029_v6 = vor.u32 %v11010_v15, %v10026_v62  ;;  %v9770_v62 = vld [vmem:[#allocation4 + $0x4a8] sm:$0xf0] }
 0x4f4   :  { %v14063_v8 = vadd.f32 %v4433_v56, %v4385_v58  ;;  %v5960_v3 = vadd.f32 %v5959_v18, %v5827_v20  ;;  %v17367_v2 = vld [vmem:[#allocation26_spill] sm:$0xff]  ;;  %v14118_v18 = vadd.f32 %v5657_v23, %v14035_v29 }
 0x4f5   :  { %4806 = vmatpush.bf16.msra.mxu2 %v10029_v6  ;;  %v14113_v6 = vmul.f32 %v14090_v7, %v14026_v11 }
 0x4f8   :  { %v14082_v58 = vpop.f32.mrf.mxu0 }
 0x4f9   :  { %v4386_v37 = vpop.f32.mrf.mxu1 }
 0x4fa   :  { %v4387_v15 = vadd.f32 %v4386_v37, %v13880_v48  ;;  %v17368_v48 = vld [vmem:[#allocation52_spill] sm:$0xff] }
 0x4fb   :  { %v14080_v56 = vpop.f32.mrf.mxu3  ;;  %v4435_v31 = vpop.f32.mrf.mxu2 }
 0x4fc   :  { %4726 = vmatmul.bf16.gmra.mxu0 %v17363_v10  ;;  %v4299_v10 = vadd.f32 %v13863_v14, %v13746_v9  ;;  %4677 = vmatmul.bf16.gmra.mxu3 %v17365_v47  ;;  %v14098_v14 = vadd.f32 %v14001_v21, %v4475_v13  ;;  %v14101_v42 = vadd.f32 %v4435_v31, %v4387_v15 }
 0x4fd   :  { %v14108_v47 = vadd.f32 %v17367_v2, %v4294_v36  ;;  %v14115_v21 = vadd.f32 %v5960_v3, %v5835_v32  ;;  %v4478_v9 = vadd.f32 %v14039_v12, %v14010_v52  ;;  %v6138_v2 = vsub.f32 %v13717_v4, %v13971_v55 }
 0x4fe   :  { %17366 = vst [vmem:[#allocation64_spill] sm:$0xff] %v14098_v14  ;;  %v14121_v50 = vadd.f32 %v13848_v1, %v4299_v10  ;;  %v6146_v32 = vsub.f32 %v13727_v30, %v13971_v55  ;;  %v6154_v1 = vsub.f32 %v13737_v34, %v13971_v55  ;;  %v6170_v12 = vsub.f32 %v13762_v41, %v13971_v55  ;;  %v9392_v14 = vld [vmem:[#allocation4 + $0x190] sm:$0xf] }
 0x4ff   :  { %4633 = vmatmul.bf16.gmra.mxu2 %v17364_v25  ;;  %v9773_v25 = vor.u32 %v10946_v45, %v9770_v62  ;;  %v6346_v30 = vmul.f32 %v14019_v60, %v6130_v54  ;;  %v6354_v13 = vmul.f32 %v14019_v60, %v6138_v2  ;;  %v6186_v34 = vsub.f32 %v13790_v40, %v13971_v55 }
 0x500   :  { %v14133_v31 = vpop.f32.mrf.mxu0  ;;  %v6362_v10 = vmul.f32 %v14019_v60, %v6146_v32  ;;  %v6370_v41 = vmul.f32 %v14019_v60, %v6154_v1  ;;  %v6386_v36 = vmul.f32 %v14019_v60, %v6170_v12  ;;  %v14158_v15 = vadd.f32 %v14029_v24, %v4478_v9 }
 0x501   :  { %4757 = vmatpush.bf16.msrb.mxu1 %v9773_v25  ;;  %v6162_v25 = vsub.f32 %v13750_v44, %v13971_v55  ;;  %v4389_v4 = vpop.f32.mrf.mxu1  ;;  %v14152_v44 = vld [vmem:[%s17036_s12 + $0x1] ss:$2 sm:$0xff]  ;;  %v6492_v45 = vmul.f32 %v14090_v7, %v6346_v30  ;;  %v6500_v40 = vmul.f32 %v14090_v7, %v6354_v13  ;;  %v6394_v32 = vmul.f32 %v14019_v60, %v6178_v16 }
 0x502   :  { %4589 = vmatmul.bf16.gmra.mxu1 %v17368_v48  ;;  %v4390_v20 = vadd.f32 %v4389_v4, %v13907_v53  ;;  %17369 = vst [vmem:[#allocation26_spill] sm:$0xff] %v14152_v44  ;;  %v14163_v53 = vperm.slane %v14152_v44, 0  ;;  %v6508_v3 = vmul.f32 %v14090_v7, %v6362_v10  ;;  %v6516_v23 = vmul.f32 %v14090_v7, %v6370_v41  ;;  %v17371_v30 = vld [vmem:[#allocation23_spill] sm:$0xff]  ;;  %v17373_v44 = vld [vmem:[#allocation30_spill] sm:$0xff] }
 0x503   :  { %v14131_v11 = vpop.f32.mrf.mxu3  ;;  %v4438_v37 = vpop.f32.mrf.mxu2  ;;  %v6378_v51 = vmul.f32 %v14019_v60, %v6162_v25  ;;  %17370 = vst [vmem:[#allocation65_spill] sm:$0xff] %v14158_v15  ;;  %v6532_v9 = vmul.f32 %v14090_v7, %v6386_v36  ;;  %v14176_v1 = vmul.f32 %v14035_v29, %v14035_v29  ;;  %v11002_v13 = vld [vmem:[#allocation4 + $0x64c] sm:$0xf]  ;;  %v9680_v10 = vld [vmem:[#allocation4 + $0x3d0] sm:$0xf]  ;;  %v6540_v29 = vmul.f32 %v14090_v7, %v6394_v32 }
 0x504   :  { %v14165_v62 = vadd.f32 %v4438_v37, %v4390_v20  ;;  %v6639_v2 = vadd.f32 %v14163_v53, %v6492_v45  ;;  %v6647_v24 = vadd.f32 %v14163_v53, %v6500_v40  ;;  %v4480_v37 = vadd.f32 %v14055_v35, %v14010_v52  ;;  %v9994_v16 = vld [vmem:[#allocation4 + $0x668] sm:$0xf0]  ;;  %v10927_v4 = vld [vmem:[#allocation4 + $0x3ec] sm:$0xf0] }
 0x505   :  { %v6524_v54 = vmul.f32 %v14090_v7, %v6378_v51  ;;  %v6655_v20 = vadd.f32 %v14163_v53, %v6508_v3  ;;  %v6663_v41 = vadd.f32 %v14163_v53, %v6516_v23  ;;  %v6402_v51 = vmul.f32 %v14019_v60, %v6186_v34  ;;  %v10919_v48 = vld [vmem:[#allocation4 + $0x3ac] sm:$0xf0] }
 0x506   :  { %v9997_v40 = vor.u32 %v11002_v13, %v9994_v16  ;;  %vm6767_vm6 = vcmp.gt.f32.partialorder %v6639_v2, 0.0  ;;  %vm6775_vm7 = vcmp.gt.f32.partialorder %v6647_v24, 0.0  ;;  %v9681_v3 = vor.u32 %v10927_v4, %v9680_v10  ;;  %v9424_v13 = vld [vmem:[#allocation4 + $0x1d0] sm:$0xf]  ;;  %v9738_v4 = vld [vmem:[#allocation4 + $0x468] sm:$0xf0] }
 0x507   :  { %v14196_v35 = vadd.f32 %v14163_v53, %v6524_v54  ;;  %v6903_v23 = vmul.f32 0.2, %v6647_v24  ;;  %v14199_v34 = vadd.f32 %v14163_v53, %v6532_v9  ;;  %v10863_v16 = vld [vmem:[#allocation4 + $0x1ec] sm:$0xf0]  ;;  %v6548_v54 = vmul.f32 %v14090_v7, %v6402_v51 }
 0x508   :  { %v14192_v45 = vpop.f32.mrf.mxu0  ;;  %4807 = vmatpush.bf16.msra.mxu2 %v9997_v40  ;;  %4899 = vmatpush.bf16.msrb.mxu0 %v9681_v3  ;;  %v9425_v63 = vor.u32 %v10863_v16, %v9424_v13  ;;  %v9648_v10 = vld [vmem:[#allocation4 + $0x390] sm:$0xf]  ;;  %v14206_v9 = vadd.f32 %v14041_v19, %v4480_v37  ;;  %vm6783_vm8 = vcmp.gt.f32.partialorder %v6655_v20, 0.0  ;;  %vm6791_vm9 = vcmp.gt.f32.partialorder %v6663_v41, 0.0 }
 0x509   :  { %17372 = vst [vmem:[#allocation66_spill] sm:$0xff] %v14192_v45  ;;  %v4391_v12 = vpop.f32.mrf.mxu1  ;;  %v9649_v15 = vor.u32 %v10919_v48, %v9648_v10  ;;  %v10855_v32 = vld [vmem:[#allocation4 + $0x1ac] sm:$0xf0]  ;;  %v6911_v19 = vmul.f32 0.2, %v6655_v20  ;;  %v6687_v48 = vadd.f32 %v14163_v53, %v6540_v29  ;;  %vm6799_vm10 = vcmp.gt.f32.partialorder %v14196_v35, 0.0 }
 0x50a   :  { %v4392_v45 = vadd.f32 %v4391_v12, %v14108_v47  ;;  %v7031_v47 = vsel %vm6775_vm7, %v6647_v24, %v6903_v23  ;;  %4850 = vmatpush.bf16.msrb.mxu3 %v9425_v63  ;;  %v9393_v3 = vor.u32 %v10855_v32, %v9392_v14  ;;  %v10911_v13 = vld [vmem:[#allocation4 + $0x36c] sm:$0xf0]  ;;  %vm6807_vm11 = vcmp.gt.f32.partialorder %v14199_v34, 0.0 }
 0x50b   :  { %v14190_v36 = vpop.f32.mrf.mxu3  ;;  %v4440_v25 = vpop.f32.mrf.mxu2  ;;  %v9617_v24 = vor.u32 %v10911_v13, %v9616_v38  ;;  %v6927_v63 = vmul.f32 0.2, %v14196_v35  ;;  %v9360_v37 = vld [vmem:[#allocation4 + $0x150] sm:$0xf]  ;;  %v6935_v38 = vmul.f32 0.2, %v14199_v34  ;;  %v6695_v29 = vadd.f32 %v14163_v53, %v6548_v54 }
 0x50c   :  { %4731 = vmatmul.bf16.gmra.mxu0 %v17371_v30  ;;  %v6895_v30 = vmul.f32 0.2, %v6639_v2  ;;  %4682 = vmatmul.bf16.gmra.mxu3 %v17373_v44  ;;  %v14210_v12 = vadd.f32 %v4440_v25, %v4392_v45  ;;  %v7039_v25 = vsel %vm6783_vm8, %v6655_v20, %v6911_v19  ;;  %v9584_v16 = vld [vmem:[#allocation4 + $0x310] sm:$0xf]  ;;  %vm6815_vm12 = vcmp.gt.f32.partialorder %v6687_v48, 0.0 }
 0x50d   :  { %4900 = vmatpush.bf16.msrb.mxu0 %v9649_v15  ;;  %v6218_v15 = vsub.f32 %v13857_v26, %v13971_v55  ;;  %v9328_v32 = vld [vmem:[#allocation4 + $0x110] sm:$0xf]  ;;  %vm6823_vm13 = vcmp.gt.f32.partialorder %v6695_v29, 0.0 }
 0x50e   :  { %v7023_v44 = vsel %vm6767_vm6, %v6639_v2, %v6895_v30  ;;  %v4483_v2 = vadd.f32 %v14080_v56, %v14010_v52  ;;  %v10847_v30 = vld [vmem:[#allocation4 + $0x16c] sm:$0xf0]  ;;  %4851 = vmatpush.bf16.msrb.mxu3 %v9393_v3  ;;  %v7063_v3 = vsel %vm6807_vm11, %v14199_v34, %v6935_v38  ;;  %v17378_v34 = vsub.f32 %v13823_v43, %v13971_v55 }
 0x50f   :  { %4638 = vmatmul.bf16.gmra.mxu2 %v13581_v49  ;;  %v10938_v49 = vld [vmem:[#allocation4 + $0x44c] sm:$0xf]  ;;  %v14212_v51 = vpack.c.bf16 %v7031_v47, %v7023_v44  ;;  %v9361_v23 = vor.u32 %v10847_v30, %v9360_v37  ;;  %v7055_v47 = vsel %vm6799_vm10, %v14196_v35, %v6927_v63  ;;  %v10839_v26 = vld [vmem:[#allocation4 + $0x12c] sm:$0xf0]  ;;  %v6434_v37 = vmul.f32 %v14019_v60, %v6218_v15 }
 0x510   :  { %v9741_v40 = vor.u32 %v10938_v49, %v9738_v4  ;;  %v6919_v49 = vmul.f32 0.2, %v6663_v41  ;;  %v14223_v44 = vpop.f32.mrf.mxu0  ;;  %v10903_v4 = vld [vmem:[#allocation4 + $0x32c] sm:$0xf0]  ;;  %v9329_v13 = vor.u32 %v10839_v26, %v9328_v32  ;;  %v14242_v19 = vadd.f32 %v14057_v46, %v4483_v2 }
 0x511   :  { %17374 = vst [vmem:[#allocation67_spill] sm:$0xff] %v14212_v51  ;;  %v4394_v20 = vpop.f32.mrf.mxu1  ;;  %4901 = vmatpush.bf16.msrb.mxu0 %v9617_v24  ;;  %v6418_v24 = vmul.f32 %v14019_v60, %v17378_v34  ;;  %v17379_v46 = vsub.f32 %v13843_v0, %v13971_v55  ;;  %v9552_v0 = vld [vmem:[#allocation4 + $0x2d0] sm:$0xf] }
 0x512   :  { %4594 = vmatmul.bf16.gmra.mxu1 %v13655_v27  ;;  %v7047_v56 = vsel %vm6791_vm9, %v6663_v41, %v6919_v49  ;;  %v6226_v41 = vsub.f32 %v13888_v5, %v13971_v55  ;;  %v4395_v54 = vadd.f32 %v4394_v20, %v13948_v28  ;;  %v14244_v49 = vpack.c.bf16 %v7063_v3, %v7055_v47  ;;  %v10994_v20 = vld [vmem:[#allocation4 + $0x60c] sm:$0xf]  ;;  %v10831_v34 = vld [vmem:[#allocation4 + $0xec] sm:$0xf0] }
 0x513   :  { %4758 = vmatpush.bf16.msrb.mxu1 %v9741_v40  ;;  %v14221_v14 = vpop.f32.mrf.mxu3  ;;  %v4443_v45 = vpop.f32.mrf.mxu2  ;;  %v14230_v10 = vpack.c.bf16 %v7047_v56, %v7039_v25  ;;  %v9585_v40 = vor.u32 %v10903_v4, %v9584_v16  ;;  %v6943_v5 = vmul.f32 0.2, %v6687_v48  ;;  %v6951_v28 = vmul.f32 0.2, %v6695_v29  ;;  %4852 = vmatpush.bf16.msrb.mxu3 %v9361_v23  ;;  %v17381_v47 = vld [vmem:[#allocation50_spill] sm:$0xff] }
 0x514   :  { %17376 = vst [vmem:[#allocation69_spill] sm:$0xff] %v14244_v49  ;;  %v14246_v35 = vadd.f32 %v4443_v45, %v4395_v54  ;;  %v17377_v25 = vsub.f32 %v13808_v17, %v13971_v55  ;;  %v6426_v2 = vmul.f32 %v14019_v60, %v17379_v46  ;;  %v6442_v30 = vmul.f32 %v14019_v60, %v6226_v41  ;;  %v9962_v45 = vld [vmem:[#allocation4 + $0x628] sm:$0xf0]  ;;  %v11055_v49 = vld [vmem:[#allocation4 + $0x7ec] sm:$0xf0] }
 0x515   :  { %17375 = vst [vmem:[#allocation68_spill] sm:$0xff] %v14230_v10  ;;  %v5962_v17 = vadd.f32 %v14115_v21, %v14176_v1  ;;  %v4485_v56 = vadd.f32 %v14131_v11, %v14010_v52  ;;  %v7071_v38 = vsel %vm6815_vm12, %v6687_v48, %v6943_v5  ;;  %v7079_v43 = vsel %vm6823_vm13, %v6695_v29, %v6951_v28  ;;  %v10895_v48 = vld [vmem:[#allocation4 + $0x2ec] sm:$0xf0] }
 0x516   :  { %v6410_v63 = vmul.f32 %v14019_v60, %v17377_v25  ;;  %v14268_v23 = vpack.c.bf16 %v7079_v43, %v7071_v38  ;;  %v6564_v16 = vmul.f32 %v14090_v7, %v6418_v24  ;;  %v6572_v4 = vmul.f32 %v14090_v7, %v6426_v2  ;;  %4902 = vmatpush.bf16.msrb.mxu0 %v9585_v40  ;;  %v17382_v25 = vld [vmem:[#allocation31_spill] sm:$0xff] }
 0x517   :  { %v9965_v11 = vor.u32 %v10994_v20, %v9962_v45  ;;  %v6580_v29 = vmul.f32 %v14090_v7, %v6434_v37  ;;  %v6234_v41 = vsub.f32 %v17381_v47, %v13971_v55  ;;  %v5851_v54 = vmul.f32 %v14049_v57, %v14049_v57  ;;  %4853 = vmatpush.bf16.msrb.mxu3 %v9329_v13  ;;  %v10930_v24 = vld [vmem:[#allocation4 + $0x40c] sm:$0xf]  ;;  %v9520_v13 = vld [vmem:[#allocation4 + $0x290] sm:$0xf] }
 0x518   :  { %17380 = vst [vmem:[#allocation70_spill] sm:$0xff] %v14268_v23  ;;  %v6556_v15 = vmul.f32 %v14090_v7, %v6410_v63  ;;  %v14275_v1 = vpop.f32.mrf.mxu0  ;;  %v9553_v3 = vor.u32 %v10895_v48, %v9552_v0  ;;  %v6711_v28 = vadd.f32 %v14163_v53, %v6564_v16  ;;  %v9296_v63 = vld [vmem:[#allocation4 + $0xd0] sm:$0xf]  ;;  %v6719_v46 = vadd.f32 %v14163_v53, %v6572_v4  ;;  %v9706_v38 = vld [vmem:[#allocation4 + $0x428] sm:$0xf0] }
 0x519   :  { %v4396_v32 = vpop.f32.mrf.mxu1  ;;  %4808 = vmatpush.bf16.msra.mxu2 %v9965_v11  ;;  %v6727_v2 = vadd.f32 %v14163_v53, %v6580_v29  ;;  %v9297_v37 = vor.u32 %v10831_v34, %v9296_v63  ;;  %v10887_v43 = vld [vmem:[#allocation4 + $0x2ac] sm:$0xf0]  ;;  %v14290_v20 = vadd.f32 %v14082_v58, %v4485_v56  ;;  %v6450_v45 = vmul.f32 %v14019_v60, %v6234_v41 }
 0x51a   :  { %v6703_v5 = vadd.f32 %v14163_v53, %v6556_v15  ;;  %v4397_v40 = vadd.f32 %v4396_v32, %v14121_v50  ;;  %v6588_v0 = vmul.f32 %v14090_v7, %v6442_v30  ;;  %4903 = vmatpush.bf16.msrb.mxu0 %v9553_v3  ;;  %v9709_v15 = vor.u32 %v10930_v24, %v9706_v38  ;;  %v9264_v11 = vld [vmem:[#allocation4 + $0x90] sm:$0xf] }
 0x51b   :  { %v14273_v21 = vpop.f32.mrf.mxu3  ;;  %v4445_v26 = vpop.f32.mrf.mxu2  ;;  %v9521_v16 = vor.u32 %v10887_v43, %v9520_v13  ;;  %v10823_v4 = vld [vmem:[#allocation4 + $0xac] sm:$0xf0]  ;;  %v17383_v29 = vsub.f32 %v13933_v61, %v13971_v55  ;;  %4854 = vmatpush.bf16.msrb.mxu3 %v9297_v37  ;;  %vm6839_vm15 = vcmp.gt.f32.partialorder %v6711_v28, 0.0  ;;  %v5659_v41 = vadd.f32 %v14118_v18, %v14049_v57 }
 0x51c   :  { %4736 = vmatmul.bf16.gmra.mxu0 %v13260_v39  ;;  %4687 = vmatmul.bf16.gmra.mxu3 %v17382_v25  ;;  %v14294_v50 = vadd.f32 %v4445_v26, %v4397_v40  ;;  %v9488_v48 = vld [vmem:[#allocation4 + $0x250] sm:$0xf]  ;;  %v9265_v58 = vor.u32 %v10823_v4, %v9264_v11  ;;  %vm6831_vm14 = vcmp.gt.f32.partialorder %v6703_v5, 0.0  ;;  %v6959_v30 = vmul.f32 0.2, %v6703_v5 }
 0x51d   :  { %v6458_v47 = vmul.f32 %v14019_v60, %v17383_v29  ;;  %v17384_v32 = vld [vmem:[#allocation39_spill] sm:$0xff]  ;;  %v5963_v26 = vadd.f32 %v5962_v17, %v5851_v54  ;;  %v4488_v3 = vadd.f32 %v14190_v36, %v14010_v52  ;;  %4759 = vmatpush.bf16.msrb.mxu1 %v9709_v15  ;;  %v6967_v40 = vmul.f32 0.2, %v6711_v28 }
 0x51e   :  { %v10879_v56 = vld [vmem:[#allocation4 + $0x26c] sm:$0xf0]  ;;  %v7087_v61 = vsel %vm6831_vm14, %v6703_v5, %v6959_v30  ;;  %vm6847_vm0 = vcmp.gt.f32.partialorder %v6719_v46, 0.0  ;;  %vm6855_vm1 = vcmp.gt.f32.partialorder %v6727_v2, 0.0  ;;  %v6975_v55 = vmul.f32 0.2, %v6719_v46  ;;  %4904 = vmatpush.bf16.msrb.mxu0 %v9521_v16 }
 0x51f   :  { %4643 = vmatmul.bf16.gmra.mxu2 %v13589_v33  ;;  %v9489_v34 = vor.u32 %v10879_v56, %v9488_v48  ;;  %v7095_v24 = vsel %vm6839_vm15, %v6711_v28, %v6967_v40  ;;  %v6983_v37 = vmul.f32 0.2, %v6727_v2  ;;  %v6596_v18 = vmul.f32 %v14090_v7, %v6450_v45  ;;  %4855 = vmatpush.bf16.msrb.mxu3 %v9265_v58  ;;  %v17387_v58 = vld [vmem:[#allocation48_spill] sm:$0xff]  ;;  %v9936_v10 = vld [vmem:[#allocation4 + $0x5d0] sm:$0xf] }
 0x520   :  { %v14307_v63 = vpop.f32.mrf.mxu0  ;;  %v5859_v17 = vmul.f32 %v14063_v8, %v14063_v8  ;;  %v14312_v5 = vpack.c.bf16 %v7095_v24, %v7087_v61  ;;  %v7103_v38 = vsel %vm6847_vm0, %v6719_v46, %v6975_v55  ;;  %v6735_v13 = vadd.f32 %v14163_v53, %v6588_v0  ;;  %v17389_v55 = vld [vmem:[#allocation51_spill] sm:$0xff] }
 0x521   :  { %v4399_v36 = vpop.f32.mrf.mxu1  ;;  %v7111_v15 = vsel %vm6855_vm1, %v6727_v2, %v6983_v37  ;;  %v6743_v28 = vadd.f32 %v14163_v53, %v6596_v18  ;;  %v6604_v16 = vmul.f32 %v14090_v7, %v6458_v47  ;;  %v14320_v45 = vadd.f32 %v14133_v31, %v4488_v3  ;;  %v10991_v51 = vld [vmem:[#allocation4 + $0x5ec] sm:$0xf0] }
 0x522   :  { %4599 = vmatmul.bf16.gmra.mxu1 %v17384_v32  ;;  %17385 = vst [vmem:[#allocation50_spill] sm:$0xff] %v14312_v5  ;;  %v4400_v43 = vadd.f32 %v4399_v36, %v13969_v59  ;;  %v14322_v11 = vpack.c.bf16 %v7111_v15, %v7103_v38  ;;  %vm6863_vm2 = vcmp.gt.f32.partialorder %v6735_v13, 0.0  ;;  %v6991_v4 = vmul.f32 0.2, %v6735_v13  ;;  %4905 = vmatpush.bf16.msrb.mxu0 %v9489_v34  ;;  %v17391_v36 = vld [vmem:[#allocation49_spill] sm:$0xff]  ;;  %v17401_v5 = vld [vmem:[#allocation34_spill] sm:$0xff] }
 0x523   :  { %v14305_v60 = vpop.f32.mrf.mxu3  ;;  %v4448_v54 = vpop.f32.mrf.mxu2  ;;  %vm6871_vm3 = vcmp.gt.f32.partialorder %v6743_v28, 0.0  ;;  %v6999_v46 = vmul.f32 0.2, %v6743_v28  ;;  %v6751_v59 = vadd.f32 %v14163_v53, %v6604_v16  ;;  %v5867_v2 = vmul.f32 %v14101_v42, %v14101_v42 }
 0x524   :  { %17386 = vst [vmem:[#allocation39_spill] sm:$0xff] %v14322_v11  ;;  %v14324_v48 = vadd.f32 %v4448_v54, %v4400_v43  ;;  %v7119_v0 = vsel %vm6863_vm2, %v6735_v13, %v6991_v4  ;;  %v6759_v7 = vadd.f32 %v14163_v53, %v14113_v6  ;;  %v5660_v31 = vadd.f32 %v5659_v41, %v14063_v8  ;;  %v17390_v53 = vld [vmem:[#allocation33_spill] sm:$0xff]  ;;  %v17394_v4 = vld [vmem:[#allocation32_spill] sm:$0xff] }
 0x525   :  { %v5964_v29 = vadd.f32 %v5963_v26, %v5859_v17  ;;  %v7127_v47 = vsel %vm6871_vm3, %v6743_v28, %v6999_v46  ;;  %vm6879_vm4 = vcmp.gt.f32.partialorder %v6751_v59, 0.0  ;;  %v7007_v30 = vmul.f32 0.2, %v6751_v59 }
 0x526   :  { %v14333_v56 = vpack.c.bf16 %v7127_v47, %v7119_v0  ;;  %vm6887_vm5 = vcmp.gt.f32.partialorder %v6759_v7, 0.0  ;;  %v7015_v3 = vmul.f32 0.2, %v6759_v7  ;;  %v5661_v40 = vadd.f32 %v5660_v31, %v14101_v42 }
 0x527   :  { %v5875_v61 = vmul.f32 %v14165_v62, %v14165_v62  ;;  %v4353_v6 = vadd.f32 %v17389_v55, %v14105_v22  ;;  %v5965_v41 = vadd.f32 %v5964_v29, %v5867_v2  ;;  %v7135_v24 = vsel %vm6879_vm4, %v6751_v59, %v7007_v30  ;;  %v17395_v55 = vld [vmem:[#allocation55_spill] sm:$0xff] }
 0x528   :  { %17388 = vst [vmem:[#allocation71_spill] sm:$0xff] %v14333_v56  ;;  %v7143_v37 = vsel %vm6887_vm5, %v6759_v7, %v7015_v3  ;;  %v5662_v18 = vadd.f32 %v5661_v40, %v14165_v62  ;;  %v5883_v17 = vmul.f32 %v14210_v12, %v14210_v12  ;;  %v14345_v38 = vpop.f32.mrf.mxu0  ;;  %v5891_v28 = vmul.f32 %v14246_v35, %v14246_v35 }
 0x529   :  { %v4401_v26 = vpop.f32.mrf.mxu1  ;;  %17392 = vst [vmem:[#allocation51_spill] sm:$0xff] %v14345_v38  ;;  %v14347_v43 = vpack.c.bf16 %v7143_v37, %v7135_v24  ;;  %v5966_v22 = vadd.f32 %v5965_v41, %v5875_v61  ;;  %v5899_v2 = vmul.f32 %v14294_v50, %v14294_v50  ;;  %v4493_v0 = vadd.f32 %v14273_v21, %v14010_v52 }
 0x52a   :  { %v4402_v13 = vadd.f32 %v4401_v26, %v4353_v6  ;;  %v5663_v15 = vadd.f32 %v5662_v18, %v14210_v12  ;;  %v5907_v29 = vmul.f32 %v14324_v48, %v14324_v48 }
 0x52b   :  { %v4450_v34 = vpop.f32.mrf.mxu2  ;;  %v4497_v54 = vpop.f32.mrf.mxu3  ;;  %17393 = vst [vmem:[#allocation33_spill] sm:$0xff] %v14347_v43  ;;  %v5967_v46 = vadd.f32 %v5966_v22, %v5883_v17  ;;  %v14368_v41 = vadd.f32 %v14223_v44, %v4493_v0  ;;  %v17396_v22 = vld [vmem:[#allocation41_spill] sm:$0xff]  ;;  %v17397_v44 = vld [vmem:[#allocation24_spill] sm:$0xff]  ;;  %v9232_v43 = vld [vmem:[#allocation4 + $0x50] sm:$0xf] }
 0x52c   :  { %4741 = vmatmul.bf16.gmra.mxu0 %v17387_v58  ;;  %4692 = vmatmul.bf16.gmra.mxu3 %v17391_v36  ;;  %v14352_v16 = vadd.f32 %v4450_v34, %v4402_v13  ;;  %v5664_v59 = vadd.f32 %v5663_v15, %v14246_v35  ;;  %v10951_v36 = vld [vmem:[#allocation4 + $0x4ac] sm:$0xf0] }
 0x52d   :  { %v5968_v7 = vadd.f32 %v5967_v46, %v5891_v28 }
 0x52e   :  { %v5665_v31 = vadd.f32 %v5664_v59, %v14294_v50  ;;  %v5915_v61 = vmul.f32 %v14352_v16, %v14352_v16  ;;  %v17398_v59 = vld [vmem:[#allocation40_spill] sm:$0xff] }
 0x52f   :  { %4648 = vmatmul.bf16.gmra.mxu2 %v17390_v53  ;;  %v5969_v3 = vadd.f32 %v5968_v7, %v5899_v2  ;;  %v17399_v2 = vld [vmem:[#allocation28_spill] sm:$0xff] }
 0x530   :  { %v5666_v40 = vadd.f32 %v5665_v31, %v14324_v48  ;;  %v14373_v24 = vpop.f32.mrf.mxu0  ;;  %v17400_v31 = vld [vmem:[#allocation25_spill] sm:$0xff] }
 0x531   :  { %v4404_v47 = vpop.f32.mrf.mxu1  ;;  %v5970_v21 = vadd.f32 %v5969_v3, %v5907_v29 }
 0x532   :  { %4760 = vmatmul.bf16.vlgmr.msrb.gmra.mxu1 %v17394_v4  ;;  %v4405_v6 = vadd.f32 %v4404_v47, %v17395_v55  ;;  %v5667_v26 = vadd.f32 %v5666_v40, %v14352_v16  ;;  %v4498_v40 = vadd.f32 %v4497_v54, %v14010_v52 }
 0x533   :  { %v4453_v30 = vpop.f32.mrf.mxu2  ;;  %v14371_v34 = vpop.f32.mrf.mxu3  ;;  %v5971_v18 = vadd.f32 %v5970_v21, %v5915_v61 }
 0x534   :  { %v14375_v37 = vadd.f32 %v4453_v30, %v4405_v6 }
 0x536   :  { %v5668_v17 = vadd.f32 %v5667_v26, %v14375_v37  ;;  %v5923_v13 = vmul.f32 %v14375_v37, %v14375_v37  ;;  %v14394_v26 = vadd.f32 %v14307_v63, %v4498_v40 }
 0x538   :  { %v5972_v15 = vadd.f32 %v5971_v18, %v5923_v13  ;;  %v14387_v47 = vpop.f32.mrf.mxu0 }
 0x539   :  { %v4406_v28 = vpop.f32.mrf.mxu1 }
 0x53a   :  { %v4407_v0 = vadd.f32 %v4406_v28, %v17399_v2 }
 0x53b   :  { %v4455_v46 = vpop.f32.mrf.mxu2  ;;  %v4502_v29 = vpop.f32.mrf.mxu3 }
 0x53c   :  { %4746 = vmatmul.bf16.gmra.mxu0 %v17396_v22  ;;  %4697 = vmatmul.bf16.gmra.mxu3 %v17398_v59  ;;  %v14384_v7 = vadd.f32 %v4455_v46, %v4407_v0  ;;  %v10160_v22 = vld [vmem:[#allocation4 + $0x790] sm:$0xf] }
 0x53e   :  { %v5669_v30 = vadd.f32 %v5668_v17, %v14384_v7  ;;  %v5931_v3 = vmul.f32 %v14384_v7, %v14384_v7  ;;  %v10815_v17 = vld [vmem:[#allocation4 + $0x6c] sm:$0xf0] }
 0x53f   :  { %4809 = vmatmul.bf16.vlgmr.msra.gmra.mxu2 %v17397_v44  ;;  %v9233_v54 = vor.u32 %v10815_v17, %v9232_v43 }
 0x540   :  { %v5670_v61 = vrot.slane %v5669_v30, 4  ;;  %v5973_v55 = vadd.f32 %v5972_v15, %v5931_v3  ;;  %v9456_v15 = vld [vmem:[#allocation4 + $0x210] sm:$0xf] }
 0x541   :  { %v4565_v3 = vpop.f32.mrf.mxu1  ;;  %4856 = vmatpush.bf16.msrb.mxu3 %v9233_v54 }
 0x542   :  { %4765 = vmatmul.bf16.gmra.mxu1 %v17400_v31  ;;  %v5671_v6 = vadd.f32 %v5670_v61, %v5669_v30  ;;  %v5974_v21 = vrot.slane %v5973_v55, 4  ;;  %v10871_v30 = vld [vmem:[#allocation4 + $0x22c] sm:$0xf0] }
 0x543   :  { %v4504_v56 = vpop.f32.mrf.mxu3  ;;  %v9200_v61 = vld [vmem:[#allocation4 + $0x10] sm:$0xf]  ;;  %v4614_v63 = vpop.f32.mrf.mxu2 }
 0x544   :  { %v5672_v18 = vrot.slane %v5671_v6, 2  ;;  %v5975_v13 = vadd.f32 %v5974_v21, %v5973_v55  ;;  %v9457_v55 = vor.u32 %v10871_v30, %v9456_v15  ;;  %v9904_v15 = vld [vmem:[#allocation4 + $0x590] sm:$0xf] }
 0x545   :  { %v10983_v30 = vld [vmem:[#allocation4 + $0x5ac] sm:$0xf0] }
 0x546   :  { %v5673_v28 = vadd.f32 %v5672_v18, %v5671_v6  ;;  %v5976_v46 = vrot.slane %v5975_v13, 2  ;;  %v17402_v6 = vld [vmem:[#allocation59_spill] sm:$0xff]  ;;  %4906 = vmatpush.bf16.msrb.mxu0 %v9457_v55 }
 0x547   :  { %v4566_v21 = vadd.f32 %v4565_v3, %v17402_v6  ;;  %v10807_v18 = vld [vmem:[#allocation4 + $0x2c] sm:$0xf0] }
 0x548   :  { %v5674_v2 = vrot.slane %v5673_v28, 1  ;;  %v5977_v0 = vadd.f32 %v5976_v46, %v5975_v13  ;;  %v10192_v13 = vld [vmem:[#allocation4 + $0x7d0] sm:$0xf]  ;;  %v9201_v46 = vor.u32 %v10807_v18, %v9200_v61 }
 0x549   :  { %v14396_v11 = vpop.f32.mrf.mxu0  ;;  %v10193_v17 = vor.u32 %v11055_v49, %v10192_v13  ;;  %v17403_v3 = vld [vmem:[#allocation35_spill] sm:$0xff]  ;;  %v4503_v49 = vadd.f32 %v4502_v29, %v14010_v52  ;;  %v4567_v18 = vpop.f32.mrf.mxu1 }
 0x54a   :  { %v5675_v40 = vadd.f32 %v5674_v2, %v5673_v28  ;;  %v5978_v23 = vrot.slane %v5977_v0, 1  ;;  %v11047_v28 = vld [vmem:[#allocation4 + $0x7ac] sm:$0xf0]  ;;  %v9937_v2 = vor.u32 %v10991_v51, %v9936_v10  ;;  %4857 = vmatpush.bf16.msrb.mxu3 %v9201_v46 }
 0x54b   :  { %4997 = vmatpush.bf16.msrb.mxu2 %v10193_v17  ;;  %v11039_v51 = vld [vmem:[#allocation4 + $0x76c] sm:$0xf0]  ;;  %v4616_v13 = vpop.f32.mrf.mxu2  ;;  %v17406_v17 = vld [vmem:[#allocation61_spill] sm:$0xff]  ;;  %v14416_v61 = vadd.f32 %v14373_v24, %v4503_v49 }
 0x54c   :  { %v14400_v59 = vmul.f32 0.0078125, %v5675_v40  ;;  %v5979_v43 = vadd.f32 %v5978_v23, %v5977_v0  ;;  %v10161_v23 = vor.u32 %v11047_v28, %v10160_v22  ;;  %v17404_v0 = vld [vmem:[#allocation43_spill] sm:$0xff]  ;;  %4948 = vmatpush.bf16.msra.mxu1 %v9937_v2  ;;  %v4568_v22 = vadd.f32 %v4567_v18, %v17406_v17  ;;  %v17409_v18 = vld [vmem:[#allocation62_spill] sm:$0xff]  ;;  %v17410_v17 = vld [vmem:[#allocation57_spill] sm:$0xff] }
 0x54d   :  { %4907 = vmatmul.bf16.vlgmr.msrb.gmra.mxu0 %v17404_v0  ;;  %v9872_v46 = vld [vmem:[#allocation4 + $0x550] sm:$0xf]  ;;  %17407 = vst [vmem:[#allocation55_spill] sm:$0xff] %v14416_v61 }
 0x54e   :  { %v6107_v6 = vmul.f32 0.0078125, %v5979_v43  ;;  %v6115_v54 = vmul.f32 %v14400_v59, %v14400_v59  ;;  %v10975_v28 = vld [vmem:[#allocation4 + $0x56c] sm:$0xf0]  ;;  %v14418_v2 = vadd.f32 %v4616_v13, %v4568_v22  ;;  %v14426_v13 = vperm.slane %v17410_v17, 3 }
 0x54f   :  { %4814 = vmatmul.bf16.gmra.mxu2 %v17401_v5  ;;  %v14402_v5 = vadd.f32 %v4614_v63, %v4566_v21  ;;  %v10128_v63 = vld [vmem:[#allocation4 + $0x750] sm:$0xf]  ;;  %v4663_v40 = vpop.f32.mrf.mxu3  ;;  %v9905_v21 = vor.u32 %v10983_v30, %v9904_v15  ;;  %v4505_v15 = vadd.f32 %v4504_v56, %v14010_v52 }
 0x550   :  { %v6123_v10 = vsub.f32 %v6107_v6, %v6115_v54  ;;  %4998 = vmatpush.bf16.msrb.mxu2 %v10161_v23  ;;  %v10129_v29 = vor.u32 %v11039_v51, %v10128_v63  ;;  %v9873_v6 = vor.u32 %v10975_v28, %v9872_v46  ;;  %17411 = vst [vmem:[#allocation28_spill] sm:$0xff] %v14426_v13 }
 0x551   :  { %v14411_v55 = vpop.f32.mrf.mxu0  ;;  %4949 = vmatpush.bf16.msra.mxu1 %v9905_v21  ;;  %v4570_v23 = vpop.f32.mrf.mxu1  ;;  %v14429_v21 = vadd.f32 %v14387_v47, %v4505_v15  ;;  %v4664_v28 = vadd.f32 %v4663_v40, %v14426_v13  ;;  %v17415_v15 = vld [vmem:[#allocation46_spill] sm:$0xff] }
 0x552   :  { %4770 = vmatmul.bf16.gmra.mxu1 %v17403_v3  ;;  %v6259_v43 = vadd.f32 0.8, %v6123_v10  ;;  %v17405_v3 = vld [vmem:[#allocation42_spill] sm:$0xff]  ;;  %v17408_v10 = vld [vmem:[#allocation45_spill] sm:$0xff]  ;;  %v4571_v24 = vadd.f32 %v4570_v23, %v17409_v18 }
 0x553   :  { %4858 = vmatmul.bf16.vlgmr.msrb.gmra.mxu3 %v17405_v3  ;;  %v4619_v63 = vpop.f32.mrf.mxu2  ;;  %17412 = vst [vmem:[#allocation59_spill] sm:$0xff] %v14429_v21  ;;  %v10096_v3 = vld [vmem:[#allocation4 + $0x710] sm:$0xf] }
 0x554   :  { %11230 = vrsqrt.f32 %v6259_v43  ;;  %4999 = vmatpush.bf16.msrb.mxu2 %v10129_v29  ;;  %v14431_v22 = vadd.f32 %v4619_v63, %v4571_v24  ;;  %v17413_v29 = vld [vmem:[#allocation36_spill] sm:$0xff]  ;;  %vm6282_vm7 = vweird.f32 %v6259_v43  ;;  %v17418_v21 = vld [vmem:[#allocation63_spill] sm:$0xff] }
 0x555   :  { %4950 = vmatpush.bf16.msra.mxu1 %v9873_v6  ;;  %v17414_v6 = vld [vmem:[#allocation47_spill] sm:$0xff]  ;;  %v17416_v63 = vld [vmem:[#allocation64_spill] sm:$0xff] }
 0x557   :  { %v4665_v30 = vpop.f32.mrf.mxu3 }
 0x559   :  { %v14421_v54 = vpop.f32.mrf.mxu0  ;;  %v4572_v31 = vpop.f32.mrf.mxu1 }
 0x55a   :  { %v11231_v51 = vpop.eup %11230  ;;  %v4573_v24 = vadd.f32 %v4572_v31, %v17416_v63  ;;  %v17419_v31 = vsub.f32 %v14384_v7, %v14400_v59 }
 0x55b   :  { %v6277_v49 = vmul.f32 %v11231_v51, %v6259_v43  ;;  %vm6283_vm6 = vweird.f32 %v11231_v51  ;;  %v4621_v47 = vpop.f32.mrf.mxu2  ;;  %v4666_v43 = vadd.f32 %v4665_v30, %v14426_v13  ;;  %v9808_v30 = vld [vmem:[#allocation4 + $0x4d0] sm:$0xf] }
 0x55c   :  { %vm6284_vm8 = vmor %vm6282_vm7, %vm6283_vm6 }
 0x55d   :  { %v6278_v56 = vmul.f32 %v11231_v51, %v6277_v49  ;;  %4912 = vmatmul.bf16.gmra.mxu0 %v17414_v6  ;;  %v9840_v49 = vld [vmem:[#allocation4 + $0x510] sm:$0xf]  ;;  %v14439_v6 = vadd.f32 %v14396_v11, %v4664_v28 }
 0x55f   :  { %4819 = vmatmul.bf16.gmra.mxu2 %v17408_v10  ;;  %v6279_v46 = vmul.f32 0.5, %v6278_v56  ;;  %v11031_v10 = vld [vmem:[#allocation4 + $0x72c] sm:$0xf0]  ;;  %v4668_v23 = vpop.f32.mrf.mxu3  ;;  %17417 = vst [vmem:[#allocation61_spill] sm:$0xff] %v14439_v6 }
 0x560   :  { %v10097_v0 = vor.u32 %v11031_v10, %v10096_v3  ;;  %v10967_v56 = vld [vmem:[#allocation4 + $0x52c] sm:$0xf0]  ;;  %v14442_v3 = vperm.slane %v17418_v21, 1  ;;  %v14444_v10 = vadd.f32 %v4621_v47, %v4573_v24  ;;  %v17420_v21 = vld [vmem:[#allocation38_spill] sm:$0xff]  ;;  %v14461_v24 = vadd.f32 %v14411_v55, %v4666_v43 }
 0x561   :  { %v4719_v18 = vpop.f32.mrf.mxu0  ;;  %v6280_v17 = vsub.f32 1.5, %v6279_v46  ;;  %v9841_v40 = vor.u32 %v10967_v56, %v9840_v49  ;;  %v4575_v47 = vpop.f32.mrf.mxu1  ;;  %v17423_v49 = vld [vmem:[#allocation22_spill] sm:$0xff] }
 0x562   :  { %4775 = vmatmul.bf16.gmra.mxu1 %v17413_v29  ;;  %5000 = vmatpush.bf16.msrb.mxu2 %v10097_v0  ;;  %17422 = vst [vmem:[#allocation62_spill] sm:$0xff] %v14461_v24 }
 0x563   :  { %4863 = vmatmul.bf16.gmra.mxu3 %v17415_v15  ;;  %v6281_v29 = vmul.f32 %v11231_v51, %v6280_v17  ;;  %4951 = vmatpush.bf16.msra.mxu1 %v9841_v40  ;;  %v4624_v63 = vpop.f32.mrf.mxu2  ;;  %v4669_v40 = vadd.f32 %v4668_v23, %v14426_v13  ;;  %v11023_v15 = vld [vmem:[#allocation4 + $0x6ec] sm:$0xf0] }
 0x565   :  { %v14446_v46 = vsel %vm6284_vm8, %v11231_v51, %v6281_v29  ;;  %v17421_v51 = vld [vmem:[#allocation65_spill] sm:$0xff]  ;;  %v14477_v23 = vadd.f32 %v14421_v54, %v4669_v40  ;;  %v17430_v54 = vld [vmem:[#allocation52_spill] sm:$0xff] }
 0x566   :  { %v6467_v0 = vmul.f32 %v14446_v46, %v17419_v31  ;;  %v4576_v29 = vadd.f32 %v4575_v47, %v17421_v51  ;;  %v17424_v31 = vld [vmem:[#allocation21_spill] sm:$0xff] }
 0x567   :  { %v4670_v11 = vpop.f32.mrf.mxu3  ;;  %17426 = vst [vmem:[#allocation57_spill] sm:$0xff] %v14477_v23  ;;  %v17432_v40 = vld [vmem:[#allocation29_spill] sm:$0xff] }
 0x568   :  { %v14454_v17 = vmul.f32 %v14442_v3, %v6467_v0  ;;  %v14463_v7 = vadd.f32 %v4624_v63, %v4576_v29  ;;  %v10064_v0 = vld [vmem:[#allocation4 + $0x6d0] sm:$0xf]  ;;  %v17425_v29 = vld [vmem:[#allocation20_spill] sm:$0xff]  ;;  %v4671_v24 = vadd.f32 %v4670_v11, %v14426_v13  ;;  %v17431_v11 = vld [vmem:[#allocation53_spill] sm:$0xff] }
 0x569   :  { %v14456_v28 = vpop.f32.mrf.mxu0  ;;  %v10065_v55 = vor.u32 %v11023_v15, %v10064_v0  ;;  %v4577_v43 = vpop.f32.mrf.mxu1  ;;  %v17427_v0 = vld [vmem:[#allocation37_spill] sm:$0xff] }
 0x56b   :  { %v4626_v63 = vpop.f32.mrf.mxu2  ;;  %5001 = vmatpush.bf16.msrb.mxu2 %v10065_v55  ;;  %v14486_v55 = vadd.f32 %v4719_v18, %v4671_v24 }
 0x56d   :  { %4917 = vmatmul.bf16.gmra.mxu0 %v17424_v31  ;;  %17428 = vst [vmem:[#allocation64_spill] sm:$0xff] %v14486_v55 }
 0x56f   :  { %4824 = vmatmul.bf16.gmra.mxu2 %v17420_v21  ;;  %v4673_v47 = vpop.f32.mrf.mxu3  ;;  %v10959_v21 = vld [vmem:[#allocation4 + $0x4ec] sm:$0xf0] }
 0x570   :  { %v9809_v56 = vor.u32 %v10959_v21, %v9808_v30  ;;  %v6131_v30 = vsub.f32 %v17431_v11, %v14400_v59 }
 0x571   :  { %v14472_v51 = vpop.f32.mrf.mxu0 }
 0x572   :  { %4780 = vmatmul.bf16.gmra.mxu1 %v17423_v49  ;;  %v4578_v49 = vadd.f32 %v4577_v43, %v14206_v9  ;;  %v10032_v43 = vld [vmem:[#allocation4 + $0x690] sm:$0xf] }
 0x573   :  { %4868 = vmatmul.bf16.gmra.mxu3 %v17425_v29  ;;  %4952 = vmatpush.bf16.msra.mxu1 %v9809_v56  ;;  %v4580_v29 = vpop.f32.mrf.mxu1  ;;  %v4629_v61 = vpop.f32.mrf.mxu2  ;;  %v4674_v56 = vadd.f32 %v4673_v47, %v14426_v13  ;;  %v17436_v47 = vld [vmem:[#allocation60_spill] sm:$0xff] }
 0x574   :  { %v14479_v31 = vadd.f32 %v4626_v63, %v4578_v49  ;;  %v4581_v9 = vadd.f32 %v4580_v29, %v14242_v19  ;;  %v14493_v49 = vadd.f32 %v14221_v14, %v14010_v52  ;;  %v11015_v63 = vld [vmem:[#allocation4 + $0x6ac] sm:$0xf0]  ;;  %v17433_v19 = vld [vmem:[#allocation54_spill] sm:$0xff] }
 0x575   :  { %v6139_v18 = vsub.f32 %v17433_v19, %v14400_v59  ;;  %v17435_v29 = vld [vmem:[#allocation58_spill] sm:$0xff]  ;;  %v10033_v11 = vor.u32 %v11015_v63, %v10032_v43  ;;  %v6179_v19 = vsub.f32 %v14063_v8, %v14400_v59  ;;  %v6187_v43 = vsub.f32 %v14101_v42, %v14400_v59  ;;  %v17437_v63 = vld [vmem:[#allocation27_spill] sm:$0xff] }
 0x576   :  { %v14488_v21 = vadd.f32 %v4629_v61, %v4581_v9  ;;  %v17434_v61 = vld [vmem:[#allocation56_spill] sm:$0xff]  ;;  %v6155_v9 = vsub.f32 %v17435_v29, %v14400_v59 }
 0x577   :  { %v4675_v6 = vpop.f32.mrf.mxu3  ;;  %v6147_v24 = vsub.f32 %v17434_v61, %v14400_v59  ;;  %v6347_v61 = vmul.f32 %v14446_v46, %v6131_v30  ;;  %v6355_v29 = vmul.f32 %v14446_v46, %v6139_v18  ;;  %5002 = vmatpush.bf16.msrb.mxu2 %v10033_v11  ;;  %v14525_v30 = vadd.f32 %v14456_v28, %v4674_v56 }
 0x578   :  { %17429 = vst [vmem:[#allocation63_spill] sm:$0xff] %v14488_v21  ;;  %v6371_v8 = vmul.f32 %v14446_v46, %v6155_v9  ;;  %v6395_v28 = vmul.f32 %v14446_v46, %v6179_v19  ;;  %v6403_v56 = vmul.f32 %v14446_v46, %v6187_v43  ;;  %v4676_v9 = vadd.f32 %v4675_v6, %v14426_v13 }
 0x579   :  { %v14482_v15 = vpop.f32.mrf.mxu0  ;;  %v6363_v44 = vmul.f32 %v14446_v46, %v6147_v24  ;;  %17438 = vst [vmem:[#allocation65_spill] sm:$0xff] %v14525_v30  ;;  %v6493_v18 = vmul.f32 %v14442_v3, %v6347_v61  ;;  %v6501_v24 = vmul.f32 %v14442_v3, %v6355_v29  ;;  %v6195_v43 = vsub.f32 %v14165_v62, %v14400_v59 }
 0x57b   :  { %v4582_v55 = vpop.f32.mrf.mxu1  ;;  %v4631_v23 = vpop.f32.mrf.mxu2 }
 0x57d   :  { %4922 = vmatmul.bf16.gmra.mxu0 %v17432_v40  ;;  %v6171_v40 = vsub.f32 %v14049_v57, %v14400_v59  ;;  %v9776_v57 = vld [vmem:[#allocation4 + $0x490] sm:$0xf] }
 0x57e   :  { %v9777_v58 = vor.u32 %v10951_v36, %v9776_v57 }
 0x57f   :  { %4829 = vmatmul.bf16.gmra.mxu2 %v17427_v0  ;;  %v14505_v14 = vpop.f32.mrf.mxu3  ;;  %v6163_v0 = vsub.f32 %v17436_v47, %v14400_v59  ;;  %v4583_v47 = vadd.f32 %v4582_v55, %v14290_v20  ;;  %v6509_v20 = vmul.f32 %v14442_v3, %v6363_v44  ;;  %v6517_v55 = vmul.f32 %v14442_v3, %v6371_v8 }
 0x580   :  { %4953 = vmatpush.bf16.msra.mxu1 %v9777_v58  ;;  %v6203_v8 = vsub.f32 %v14210_v12, %v14400_v59 }
 0x581   :  { %v6379_v38 = vmul.f32 %v14446_v46, %v6163_v0  ;;  %v14529_v42 = vadd.f32 %v4631_v23, %v4583_v47  ;;  %v6387_v0 = vmul.f32 %v14446_v46, %v6171_v40  ;;  %v14542_v23 = vadd.f32 %v14305_v60, %v14010_v52  ;;  %v17441_v60 = vld [vmem:[#allocation44_spill] sm:$0xff] }
 0x582   :  { %4785 = vmatmul.bf16.gmra.mxu1 %v17430_v54  ;;  %v14507_v54 = vpop.f32.mrf.mxu0 }
 0x583   :  { %4873 = vmatmul.bf16.gmra.mxu3 %v17437_v63  ;;  %17439 = vst [vmem:[#allocation53_spill] sm:$0xff] %v14529_v42  ;;  %v17440_v63 = vld [vmem:[#allocation26_spill] sm:$0xff]  ;;  %v6525_v36 = vmul.f32 %v14442_v3, %v6379_v38  ;;  %v6533_v38 = vmul.f32 %v14442_v3, %v6387_v0  ;;  %v4634_v47 = vpop.f32.mrf.mxu2  ;;  %v14562_v0 = vadd.f32 %v14472_v51, %v4676_v9 }
 0x584   :  { %v14532_v4 = vperm.slane %v17440_v63, 1  ;;  %v4585_v63 = vpop.f32.mrf.mxu1  ;;  %v4679_v51 = vadd.f32 %v14505_v14, %v14426_v13  ;;  %v17444_v9 = vld [vmem:[#allocation66_spill] sm:$0xff] }
 0x586   :  { %v6640_v11 = vadd.f32 %v14532_v4, %v6493_v18  ;;  %v6648_v44 = vadd.f32 %v14532_v4, %v6501_v24  ;;  %v6656_v58 = vadd.f32 %v14532_v4, %v6509_v20  ;;  %v6664_v40 = vadd.f32 %v14532_v4, %v6517_v55 }
 0x587   :  { %v6672_v19 = vadd.f32 %v14532_v4, %v6525_v36  ;;  %v14551_v61 = vpop.f32.mrf.mxu3  ;;  %v4586_v18 = vadd.f32 %v4585_v63, %v14320_v45  ;;  %v17445_v63 = vld [vmem:[#allocation23_spill] sm:$0xff] }
 0x588   :  { %vm6768_vm9 = vcmp.gt.f32.partialorder %v6640_v11, 0.0  ;;  %vm6776_vm10 = vcmp.gt.f32.partialorder %v6648_v44, 0.0  ;;  %v6896_v6 = vmul.f32 0.2, %v6640_v11  ;;  %v6904_v57 = vmul.f32 0.2, %v6648_v44 }
 0x589   :  { %vm6784_vm11 = vcmp.gt.f32.partialorder %v6656_v58, 0.0  ;;  %vm6792_vm12 = vcmp.gt.f32.partialorder %v6664_v40, 0.0  ;;  %v6912_v20 = vmul.f32 0.2, %v6656_v58  ;;  %v6920_v55 = vmul.f32 0.2, %v6664_v40 }
 0x58a   :  { %v14553_v29 = vpop.f32.mrf.mxu0  ;;  %v7024_v24 = vsel %vm6768_vm9, %v6640_v11, %v6896_v6  ;;  %v7032_v36 = vsel %vm6776_vm10, %v6648_v44, %v6904_v57  ;;  %vm6800_vm13 = vcmp.gt.f32.partialorder %v6672_v19, 0.0  ;;  %v14565_v62 = vadd.f32 %v4634_v47, %v4586_v18  ;;  %v10923_v47 = vld [vmem:[#allocation4 + $0x3d4] sm:$0xf] }
 0x58b   :  { %v14567_v30 = vpack.c.bf16 %v7032_v36, %v7024_v24  ;;  %v7040_v42 = vsel %vm6784_vm11, %v6656_v58, %v6912_v20  ;;  %v7048_v21 = vsel %vm6792_vm12, %v6664_v40, %v6920_v55  ;;  %v6928_v45 = vmul.f32 0.2, %v6672_v19  ;;  %v10000_v58 = vld [vmem:[#allocation4 + $0x650] sm:$0xf] }
 0x58c   :  { %v14570_v12 = vpack.c.bf16 %v7048_v21, %v7040_v42  ;;  %v4539_v44 = vadd.f32 %v17444_v9, %v14493_v49  ;;  %v6549_v6 = vmul.f32 %v14442_v3, %v6403_v56  ;;  %v11007_v40 = vld [vmem:[#allocation4 + $0x66c] sm:$0xf0]  ;;  %v6411_v57 = vmul.f32 %v14446_v46, %v6195_v43 }
 0x58d   :  { %17442 = vst [vmem:[#allocation54_spill] sm:$0xff] %v14567_v30  ;;  %4927 = vmatmul.bf16.gmra.mxu0 %v17445_v63  ;;  %v7056_v21 = vsel %vm6800_vm13, %v6672_v19, %v6928_v45  ;;  %v6419_v18 = vmul.f32 %v14446_v46, %v6203_v8  ;;  %v10001_v49 = vor.u32 %v11007_v40, %v10000_v58  ;;  %v4587_v19 = vpop.f32.mrf.mxu1  ;;  %v10859_v58 = vld [vmem:[#allocation4 + $0x1d4] sm:$0xf] }
 0x58e   :  { %17443 = vst [vmem:[#allocation56_spill] sm:$0xff] %v14570_v12  ;;  %v6211_v56 = vsub.f32 %v14246_v35, %v14400_v59  ;;  %v6219_v55 = vsub.f32 %v14294_v50, %v14400_v59  ;;  %v6696_v8 = vadd.f32 %v14532_v4, %v6549_v6  ;;  %v6557_v45 = vmul.f32 %v14442_v3, %v6411_v57  ;;  %v9426_v40 = vld [vmem:[#allocation4 + $0x1f0] sm:$0xf0] }
 0x58f   :  { %4834 = vmatmul.bf16.gmra.mxu2 %v17441_v60  ;;  %v6680_v60 = vadd.f32 %v14532_v4, %v6533_v38  ;;  %v6541_v38 = vmul.f32 %v14442_v3, %v6395_v28  ;;  %v14582_v14 = vpop.f32.mrf.mxu3  ;;  %v9682_v28 = vld [vmem:[#allocation4 + $0x3f0] sm:$0xf0]  ;;  %v4588_v9 = vadd.f32 %v4587_v19, %v4539_v44  ;;  %v6565_v35 = vmul.f32 %v14442_v3, %v6419_v18 }
 0x590   :  { %v9685_v36 = vor.u32 %v10923_v47, %v9682_v28  ;;  %5003 = vmatpush.bf16.msrb.mxu2 %v10001_v49  ;;  %v6427_v50 = vmul.f32 %v14446_v46, %v6211_v56  ;;  %v10943_v47 = vld [vmem:[#allocation4 + $0x46c] sm:$0xf0]  ;;  %v10915_v28 = vld [vmem:[#allocation4 + $0x394] sm:$0xf]  ;;  %v14599_v6 = vadd.f32 %v14482_v15, %v4679_v51  ;;  %v6704_v57 = vadd.f32 %v14532_v4, %v6557_v45 }
 0x591   :  { %vm6808_vm14 = vcmp.gt.f32.partialorder %v6680_v60, 0.0  ;;  %v6936_v11 = vmul.f32 0.2, %v6680_v60  ;;  %v6688_v43 = vadd.f32 %v14532_v4, %v6541_v38  ;;  %v9650_v38 = vld [vmem:[#allocation4 + $0x3b0] sm:$0xf0]  ;;  %v6435_v44 = vmul.f32 %v14446_v46, %v6219_v55 }
 0x592   :  { %4790 = vmatmul.bf16.gmra.mxu1 %v13655_v27  ;;  %v14584_v24 = vpop.f32.mrf.mxu0  ;;  %5095 = vmatpush.bf16.msra.mxu0 %v9685_v36  ;;  %v10851_v12 = vld [vmem:[#allocation4 + $0x194] sm:$0xf]  ;;  %v6712_v56 = vadd.f32 %v14532_v4, %v6565_v35  ;;  %vm6824_vm0 = vcmp.gt.f32.partialorder %v6696_v8, 0.0  ;;  %v4681_v51 = vadd.f32 %v14551_v61, %v14426_v13  ;;  %vm6832_vm1 = vcmp.gt.f32.partialorder %v6704_v57, 0.0 }
 0x593   :  { %v7064_v42 = vsel %vm6808_vm14, %v6680_v60, %v6936_v11  ;;  %v4636_v60 = vpop.f32.mrf.mxu2  ;;  %v17447_v11 = vld [vmem:[#allocation30_spill] sm:$0xff]  ;;  %v9394_v18 = vld [vmem:[#allocation4 + $0x1b0] sm:$0xf0]  ;;  %vm6816_vm15 = vcmp.gt.f32.partialorder %v6688_v43, 0.0  ;;  %v6944_v15 = vmul.f32 0.2, %v6688_v43 }
 0x594   :  { %v14586_v20 = vpack.c.bf16 %v7064_v42, %v7056_v21  ;;  %4878 = vmatmul.bf16.gmra.mxu3 %v17447_v11  ;;  %v9744_v21 = vld [vmem:[#allocation4 + $0x450] sm:$0xf]  ;;  %v9429_v42 = vor.u32 %v10859_v58, %v9426_v40  ;;  %v14603_v49 = vadd.f32 %v4636_v60, %v4588_v9  ;;  %v10907_v30 = vld [vmem:[#allocation4 + $0x354] sm:$0xf]  ;;  %v9397_v36 = vor.u32 %v10851_v12, %v9394_v18 }
 0x595   :  { %v9745_v19 = vor.u32 %v10943_v47, %v9744_v21  ;;  %v9618_v58 = vld [vmem:[#allocation4 + $0x370] sm:$0xf0]  ;;  %v6952_v60 = vmul.f32 0.2, %v6696_v8  ;;  %v7072_v45 = vsel %vm6816_vm15, %v6688_v43, %v6944_v15  ;;  %vm6840_vm2 = vcmp.gt.f32.partialorder %v6712_v56, 0.0  ;;  %v4590_v43 = vpop.f32.mrf.mxu1 }
 0x596   :  { %17446 = vst [vmem:[#allocation58_spill] sm:$0xff] %v14586_v20  ;;  %v9653_v20 = vor.u32 %v10915_v28, %v9650_v38  ;;  %5046 = vmatpush.bf16.msra.mxu3 %v9429_v42  ;;  %v9621_v55 = vor.u32 %v10907_v30, %v9618_v58  ;;  %v6960_v9 = vmul.f32 0.2, %v6704_v57  ;;  %v14614_v12 = vadd.f32 %v14275_v1, %v14542_v23  ;;  %v10843_v35 = vld [vmem:[#allocation4 + $0x154] sm:$0xf] }
 0x597   :  { %4954 = vmatpush.bf16.msra.mxu1 %v9745_v19  ;;  %v14608_v40 = vpop.f32.mrf.mxu3  ;;  %v9362_v61 = vld [vmem:[#allocation4 + $0x170] sm:$0xf0]  ;;  %v7080_v30 = vsel %vm6824_vm0, %v6696_v8, %v6952_v60  ;;  %v6968_v42 = vmul.f32 0.2, %v6712_v56  ;;  %v6227_v23 = vsub.f32 %v14324_v48, %v14400_v59  ;;  %v4591_v58 = vadd.f32 %v4590_v43, %v14368_v41 }
 0x598   :  { %5096 = vmatpush.bf16.msra.mxu0 %v9653_v20  ;;  %v6573_v20 = vmul.f32 %v14442_v3, %v6427_v50  ;;  %v9365_v28 = vor.u32 %v10843_v35, %v9362_v61  ;;  %v10899_v38 = vld [vmem:[#allocation4 + $0x314] sm:$0xf]  ;;  %v14619_v18 = vpack.c.bf16 %v7080_v30, %v7072_v45  ;;  %v7088_v1 = vsel %vm6832_vm1, %v6704_v57, %v6960_v9 }
 0x599   :  { %v9586_v19 = vld [vmem:[#allocation4 + $0x330] sm:$0xf0]  ;;  %v7096_v50 = vsel %vm6840_vm2, %v6712_v56, %v6968_v42  ;;  %v6581_v11 = vmul.f32 %v14442_v3, %v6435_v44  ;;  %v14628_v35 = vadd.f32 %v14507_v54, %v4681_v51  ;;  %v6443_v41 = vmul.f32 %v14446_v46, %v6227_v23  ;;  %v9968_v42 = vld [vmem:[#allocation4 + $0x610] sm:$0xf] }
 0x59a   :  { %v14610_v21 = vpop.f32.mrf.mxu0  ;;  %5047 = vmatpush.bf16.msra.mxu3 %v9397_v36  ;;  %17448 = vst [vmem:[#allocation60_spill] sm:$0xff] %v14619_v18  ;;  %v9589_v15 = vor.u32 %v10899_v38, %v9586_v19  ;;  %v10835_v8 = vld [vmem:[#allocation4 + $0x114] sm:$0xf]  ;;  %v14630_v45 = vpack.c.bf16 %v7096_v50, %v7088_v1  ;;  %v6720_v57 = vadd.f32 %v14532_v4, %v6573_v20  ;;  %v10999_v20 = vld [vmem:[#allocation4 + $0x62c] sm:$0xf0] }
 0x59b   :  { %v4639_v47 = vpop.f32.mrf.mxu2  ;;  %v9330_v60 = vld [vmem:[#allocation4 + $0x130] sm:$0xf0]  ;;  %v6728_v48 = vadd.f32 %v14532_v4, %v6581_v11  ;;  %v17450_v56 = vsub.f32 %v14352_v16, %v14400_v59  ;;  %v17451_v51 = vsub.f32 %v14375_v37, %v14400_v59  ;;  %v14648_v11 = vadd.f32 %v14532_v4, %v14454_v17 }
 0x59c   :  { %5097 = vmatpush.bf16.msra.mxu0 %v9621_v55  ;;  %v9333_v36 = vor.u32 %v10835_v8, %v9330_v60  ;;  %17449 = vst [vmem:[#allocation26_spill] sm:$0xff] %v14630_v45  ;;  %v14633_v9 = vadd.f32 %v4639_v47, %v4591_v58  ;;  %vm6848_vm3 = vcmp.gt.f32.partialorder %v6720_v57, 0.0  ;;  %v6976_v54 = vmul.f32 0.2, %v6720_v57  ;;  %v10891_v43 = vld [vmem:[#allocation4 + $0x2d4] sm:$0xf] }
 0x59d   :  { %v6451_v44 = vmul.f32 %v14446_v46, %v17450_v56  ;;  %v6459_v55 = vmul.f32 %v14446_v46, %v17451_v51  ;;  %v5820_v61 = vmul.f32 %v14418_v2, %v14418_v2  ;;  %v4684_v16 = vadd.f32 %v14582_v14, %v14426_v13  ;;  %4932 = vmatmul.bf16.gmra.mxu0 %v13260_v39  ;;  %v9554_v1 = vld [vmem:[#allocation4 + $0x2f0] sm:$0xf0]  ;;  %v4592_v8 = vpop.f32.mrf.mxu1 }
 0x59e   :  { %5048 = vmatpush.bf16.msra.mxu3 %v9365_v28  ;;  %vm6856_vm4 = vcmp.gt.f32.partialorder %v6728_v48, 0.0  ;;  %v6984_v30 = vmul.f32 0.2, %v6728_v48  ;;  %v7104_v37 = vsel %vm6848_vm3, %v6720_v57, %v6976_v54  ;;  %v6589_v59 = vmul.f32 %v14442_v3, %v6443_v41  ;;  %v9298_v56 = vld [vmem:[#allocation4 + $0xf0] sm:$0xf0] }
 0x59f   :  { %4839 = vmatmul.bf16.gmra.mxu2 %v13589_v33  ;;  %v6597_v46 = vmul.f32 %v14442_v3, %v6451_v44  ;;  %v6605_v17 = vmul.f32 %v14442_v3, %v6459_v55  ;;  %v5812_v47 = vmul.f32 %v14402_v5, %v14402_v5  ;;  %v5676_v14 = vadd.f32 %v14418_v2, %v14402_v5  ;;  %v14662_v28 = vpop.f32.mrf.mxu3  ;;  %v9712_v44 = vld [vmem:[#allocation4 + $0x410] sm:$0xf]  ;;  %v9234_v18 = vld [vmem:[#allocation4 + $0x70] sm:$0xf0] }
 0x5a0   :  { %5098 = vmatpush.bf16.msra.mxu0 %v9589_v15  ;;  %v9969_v19 = vor.u32 %v10999_v20, %v9968_v42  ;;  %v7112_v23 = vsel %vm6856_vm4, %v6728_v48, %v6984_v30  ;;  %v5828_v58 = vmul.f32 %v14431_v22, %v14431_v22  ;;  %v9557_v60 = vor.u32 %v10891_v43, %v9554_v1  ;;  %v10827_v15 = vld [vmem:[#allocation4 + $0xd4] sm:$0xf]  ;;  %v10935_v30 = vld [vmem:[#allocation4 + $0x42c] sm:$0xf0] }
 0x5a1   :  { %v14669_v50 = vpack.c.bf16 %v7112_v23, %v7104_v37  ;;  %v6736_v57 = vadd.f32 %v14532_v4, %v6589_v59  ;;  %v4593_v41 = vadd.f32 %v4592_v8, %v14614_v12  ;;  %v6744_v48 = vadd.f32 %v14532_v4, %v6597_v46  ;;  %v10883_v42 = vld [vmem:[#allocation4 + $0x294] sm:$0xf] }
 0x5a2   :  { %4795 = vmatmul.bf16.gmra.mxu1 %v17384_v32  ;;  %v14664_v38 = vpop.f32.mrf.mxu0  ;;  %5049 = vmatpush.bf16.msra.mxu3 %v9333_v36  ;;  %v6752_v54 = vadd.f32 %v14532_v4, %v6605_v17  ;;  %v5980_v51 = vadd.f32 %v5820_v61, %v5812_v47  ;;  %v5677_v36 = vadd.f32 %v5676_v14, %v14431_v22  ;;  %v9522_v20 = vld [vmem:[#allocation4 + $0x2b0] sm:$0xf0]  ;;  %vm6888_vm7 = vcmp.gt.f32.partialorder %v14648_v11, 0.0 }
 0x5a3   :  { %v4641_v3 = vpop.f32.mrf.mxu2  ;;  %17452 = vst [vmem:[#allocation66_spill] sm:$0xff] %v14669_v50  ;;  %5004 = vmatpush.bf16.msrb.mxu2 %v9969_v19  ;;  %v9301_v55 = vor.u32 %v10827_v15, %v9298_v56  ;;  %v14678_v43 = vadd.f32 %v14553_v29, %v4684_v16  ;;  %v5836_v12 = vmul.f32 %v14444_v10, %v14444_v10  ;;  %v10819_v19 = vld [vmem:[#allocation4 + $0x94] sm:$0xf]  ;;  %vm6864_vm5 = vcmp.gt.f32.partialorder %v6736_v57, 0.0 }
 0x5a4   :  { %4883 = vmatmul.bf16.gmra.mxu3 %v17382_v25  ;;  %v14682_v37 = vadd.f32 %v4641_v3, %v4593_v41  ;;  %5099 = vmatpush.bf16.msra.mxu0 %v9557_v60  ;;  %v9713_v59 = vor.u32 %v10935_v30, %v9712_v44  ;;  %v9525_v46 = vor.u32 %v10883_v42, %v9522_v20  ;;  %v9266_v4 = vld [vmem:[#allocation4 + $0xb0] sm:$0xf0]  ;;  %vm6872_vm6 = vcmp.gt.f32.partialorder %v6744_v48, 0.0 }
 0x5a5   :  { %v10875_v61 = vld [vmem:[#allocation4 + $0x254] sm:$0xf]  ;;  %v9269_v17 = vor.u32 %v10819_v19, %v9266_v4  ;;  %v6992_v14 = vmul.f32 0.2, %v6736_v57  ;;  %v5981_v1 = vadd.f32 %v5980_v51, %v5828_v58  ;;  %v5678_v29 = vadd.f32 %v5677_v36, %v14444_v10  ;;  %v4595_v51 = vpop.f32.mrf.mxu1 }
 0x5a6   :  { %5050 = vmatpush.bf16.msra.mxu3 %v9301_v55  ;;  %v9490_v47 = vld [vmem:[#allocation4 + $0x270] sm:$0xf0]  ;;  %4955 = vmatpush.bf16.msra.mxu1 %v9713_v59  ;;  %v7000_v16 = vmul.f32 0.2, %v6744_v48  ;;  %vm6880_vm8 = vcmp.gt.f32.partialorder %v6752_v54, 0.0  ;;  %v5844_v60 = vmul.f32 %v14463_v7, %v14463_v7  ;;  %v5852_v20 = vmul.f32 %v14479_v31, %v14479_v31 }
 0x5a7   :  { %v7120_v23 = vsel %vm6864_vm5, %v6736_v57, %v6992_v14  ;;  %v7008_v8 = vmul.f32 0.2, %v6752_v54  ;;  %v7016_v3 = vmul.f32 0.2, %v14648_v11  ;;  %v14689_v41 = vpop.f32.mrf.mxu3  ;;  %v9493_v58 = vor.u32 %v10875_v61, %v9490_v47 }
 0x5a8   :  { %5100 = vmatpush.bf16.msra.mxu0 %v9525_v46  ;;  %v7128_v56 = vsel %vm6872_vm6, %v6744_v48, %v7000_v16  ;;  %v5982_v44 = vadd.f32 %v5981_v1, %v5836_v12  ;;  %v5679_v42 = vadd.f32 %v5678_v29, %v14463_v7  ;;  %v4596_v59 = vadd.f32 %v4595_v51, %v14394_v26  ;;  %v17457_v26 = vld [vmem:[#allocation53_spill] sm:$0xff] }
 0x5a9   :  { %v14695_v36 = vpack.c.bf16 %v7128_v56, %v7120_v23  ;;  %v7136_v55 = vsel %vm6880_vm8, %v6752_v54, %v7008_v8  ;;  %v7144_v30 = vsel %vm6888_vm7, %v14648_v11, %v7016_v3  ;;  %v4500_v48 = vadd.f32 %v14371_v34, %v14010_v52  ;;  %v17455_v54 = vld [vmem:[#allocation63_spill] sm:$0xff]  ;;  %v17456_v11 = vld [vmem:[#allocation32_spill] sm:$0xff]  ;;  %v17460_v51 = vld [vmem:[#allocation49_spill] sm:$0xff] }
 0x5aa   :  { %v14691_v15 = vpop.f32.mrf.mxu0  ;;  %5051 = vmatpush.bf16.msra.mxu3 %v9269_v17  ;;  %v14704_v46 = vpack.c.bf16 %v7144_v30, %v7136_v55  ;;  %v5983_v12 = vadd.f32 %v5982_v44, %v5844_v60  ;;  %v5680_v19 = vadd.f32 %v5679_v42, %v14479_v31  ;;  %v5860_v4 = vmul.f32 %v17455_v54, %v17455_v54  ;;  %v17458_v34 = vld [vmem:[#allocation48_spill] sm:$0xff]  ;;  %v17459_v23 = vld [vmem:[#allocation51_spill] sm:$0xff] }
 0x5ab   :  { %v4644_v57 = vpop.f32.mrf.mxu2  ;;  %17453 = vst [vmem:[#allocation23_spill] sm:$0xff] %v14695_v36  ;;  %v5868_v14 = vmul.f32 %v17457_v26, %v17457_v26  ;;  %v4689_v52 = vadd.f32 %v14662_v28, %v14426_v13  ;;  %v5876_v16 = vmul.f32 %v14565_v62, %v14565_v62  ;;  %v4549_v8 = vadd.f32 %v17459_v23, %v4500_v48 }
 0x5ac   :  { %17454 = vst [vmem:[#allocation72_spill] sm:$0xff] %v14704_v46  ;;  %v14711_v61 = vadd.f32 %v4644_v57, %v4596_v59  ;;  %5101 = vmatpush.bf16.msra.mxu0 %v9493_v58  ;;  %v5984_v17 = vadd.f32 %v5983_v12, %v5852_v20  ;;  %v5681_v47 = vadd.f32 %v5680_v19, %v17455_v54 }
 0x5ad   :  { %4937 = vmatmul.bf16.gmra.mxu0 %v17458_v34  ;;  %v4597_v3 = vpop.f32.mrf.mxu1  ;;  %v5884_v44 = vmul.f32 %v14603_v49, %v14603_v49  ;;  %v14731_v30 = vadd.f32 %v14610_v21, %v4689_v52  ;;  %v5892_v59 = vmul.f32 %v14633_v9, %v14633_v9 }
 0x5ae   :  { %v5985_v1 = vadd.f32 %v5984_v17, %v5860_v4  ;;  %v5682_v29 = vadd.f32 %v5681_v47, %v17457_v26  ;;  %v4598_v55 = vadd.f32 %v4597_v3, %v4549_v8  ;;  %v5900_v4 = vmul.f32 %v14682_v37, %v14682_v37  ;;  %v17463_v8 = vld [vmem:[#allocation55_spill] sm:$0xff] }
 0x5af   :  { %4844 = vmatmul.bf16.gmra.mxu2 %v17390_v53  ;;  %v4693_v28 = vpop.f32.mrf.mxu3  ;;  %v5908_v21 = vmul.f32 %v14711_v61, %v14711_v61 }
 0x5b0   :  { %v5986_v58 = vadd.f32 %v5985_v1, %v5868_v14  ;;  %v5683_v56 = vadd.f32 %v5682_v29, %v14565_v62  ;;  %v17462_v14 = vld [vmem:[#allocation24_spill] sm:$0xff] }
 0x5b2   :  { %4956 = vmatmul.bf16.vlgmr.msra.gmra.mxu1 %v17456_v11  ;;  %v14728_v57 = vpop.f32.mrf.mxu0  ;;  %v5987_v42 = vadd.f32 %v5986_v58, %v5876_v16  ;;  %v5684_v20 = vadd.f32 %v5683_v56, %v14603_v49 }
 0x5b3   :  { %v4646_v60 = vpop.f32.mrf.mxu2  ;;  %17461 = vst [vmem:[#allocation63_spill] sm:$0xff] %v14728_v57  ;;  %v9938_v57 = vld [vmem:[#allocation4 + $0x5f0] sm:$0xf0] }
 0x5b4   :  { %4888 = vmatmul.bf16.gmra.mxu3 %v17460_v51  ;;  %v14736_v48 = vadd.f32 %v4646_v60, %v4598_v55  ;;  %v5988_v12 = vadd.f32 %v5987_v42, %v5884_v44  ;;  %v5685_v19 = vadd.f32 %v5684_v20, %v14633_v9  ;;  %v17465_v42 = vld [vmem:[#allocation25_spill] sm:$0xff]  ;;  %v9202_v51 = vld [vmem:[#allocation4 + $0x30] sm:$0xf0] }
 0x5b5   :  { %v4600_v52 = vpop.f32.mrf.mxu1 }
 0x5b6   :  { %v5989_v17 = vadd.f32 %v5988_v12, %v5892_v59  ;;  %v5686_v47 = vadd.f32 %v5685_v19, %v14682_v37  ;;  %v5916_v23 = vmul.f32 %v14736_v48, %v14736_v48  ;;  %v4601_v3 = vadd.f32 %v4600_v52, %v17463_v8  ;;  %v17467_v52 = vld [vmem:[#allocation40_spill] sm:$0xff] }
 0x5b7   :  { %v14750_v56 = vpop.f32.mrf.mxu3  ;;  %v4694_v19 = vadd.f32 %v4693_v28, %v14426_v13 }
 0x5b8   :  { %v5990_v29 = vadd.f32 %v5989_v17, %v5900_v4  ;;  %v5687_v16 = vadd.f32 %v5686_v47, %v14711_v61  ;;  %17464 = vst [vmem:[#allocation53_spill] sm:$0xff] %v14750_v56  ;;  %v17466_v4 = vld [vmem:[#allocation41_spill] sm:$0xff] }
 0x5ba   :  { %v5991_v60 = vadd.f32 %v5990_v29, %v5908_v21  ;;  %v5688_v58 = vadd.f32 %v5687_v16, %v14736_v48  ;;  %v4747_v44 = vpop.f32.mrf.mxu0  ;;  %v17468_v29 = vld [vmem:[#allocation59_spill] sm:$0xff]  ;;  %v14763_v16 = vadd.f32 %v14691_v15, %v4694_v19 }
 0x5bb   :  { %v4649_v1 = vpop.f32.mrf.mxu2  ;;  %v17471_v15 = vld [vmem:[#allocation35_spill] sm:$0xff] }
 0x5bc   :  { %v14752_v55 = vadd.f32 %v4649_v1, %v4601_v3  ;;  %v5992_v20 = vadd.f32 %v5991_v60, %v5916_v23  ;;  %17469 = vst [vmem:[#allocation51_spill] sm:$0xff] %v14763_v16 }
 0x5bd   :  { %4942 = vmatmul.bf16.gmra.mxu0 %v17466_v4  ;;  %v4602_v47 = vpop.f32.mrf.mxu1 }
 0x5be   :  { %v5689_v59 = vadd.f32 %v5688_v58, %v14752_v55  ;;  %v5924_v12 = vmul.f32 %v14752_v55, %v14752_v55  ;;  %v4603_v1 = vadd.f32 %v4602_v47, %v17468_v29 }
 0x5bf   :  { %5005 = vmatmul.bf16.vlgmr.msrb.gmra.mxu2 %v17462_v14  ;;  %v4698_v8 = vpop.f32.mrf.mxu3  ;;  %v10987_v14 = vld [vmem:[#allocation4 + $0x5d4] sm:$0xf] }
 0x5c0   :  { %v5993_v17 = vadd.f32 %v5992_v20, %v5924_v12  ;;  %v17470_v12 = vld [vmem:[#allocation34_spill] sm:$0xff] }
 0x5c2   :  { %4961 = vmatmul.bf16.gmra.mxu1 %v17465_v42  ;;  %v14767_v3 = vpop.f32.mrf.mxu0 }
 0x5c3   :  { %v4651_v21 = vpop.f32.mrf.mxu2 }
 0x5c4   :  { %4893 = vmatmul.bf16.gmra.mxu3 %v17467_v52  ;;  %v14765_v23 = vadd.f32 %v4651_v21, %v4603_v1  ;;  %v4699_v1 = vadd.f32 %v4698_v8, %v14426_v13  ;;  %v11051_v8 = vld [vmem:[#allocation4 + $0x7d4] sm:$0xf] }
 0x5c6   :  { %v5690_v60 = vadd.f32 %v5689_v59, %v14765_v23  ;;  %v5932_v28 = vmul.f32 %v14765_v23, %v14765_v23  ;;  %v10811_v59 = vld [vmem:[#allocation4 + $0x54] sm:$0xf]  ;;  %v14778_v34 = vadd.f32 %v4747_v44, %v4699_v1 }
 0x5c7   :  { %v4700_v52 = vpop.f32.mrf.mxu3 }
 0x5c8   :  { %v5691_v58 = vrot.slane %v5690_v60, 4  ;;  %v5994_v20 = vadd.f32 %v5993_v17, %v5932_v28  ;;  %v9237_v17 = vor.u32 %v10811_v59, %v9234_v18  ;;  %v10867_v28 = vld [vmem:[#allocation4 + $0x214] sm:$0xf]  ;;  %17473 = vst [vmem:[#allocation55_spill] sm:$0xff] %v14778_v34 }
 0x5ca   :  { %v5692_v46 = vadd.f32 %v5691_v58, %v5690_v60  ;;  %v5995_v36 = vrot.slane %v5994_v20, 4  ;;  %v14775_v4 = vpop.f32.mrf.mxu0  ;;  %v4761_v60 = vpop.f32.mrf.mxu1  ;;  %v10803_v58 = vld [vmem:[#allocation4 + $0x14] sm:$0xf]  ;;  %5052 = vmatpush.bf16.msra.mxu3 %v9237_v17 }
 0x5cb   :  { %v4810_v42 = vpop.f32.mrf.mxu2  ;;  %v10130_v17 = vld [vmem:[#allocation4 + $0x770] sm:$0xf0] }
 0x5cc   :  { %v5693_v47 = vrot.slane %v5692_v46, 2  ;;  %v5996_v29 = vadd.f32 %v5995_v36, %v5994_v20 }
 0x5ce   :  { %v5694_v19 = vadd.f32 %v5693_v47, %v5692_v46  ;;  %v5997_v21 = vrot.slane %v5996_v29, 2  ;;  %v17472_v46 = vld [vmem:[#allocation61_spill] sm:$0xff] }
 0x5cf   :  { %5010 = vmatmul.bf16.gmra.mxu2 %v17470_v12  ;;  %v9458_v12 = vld [vmem:[#allocation4 + $0x230] sm:$0xf0]  ;;  %v4762_v47 = vadd.f32 %v4761_v60, %v17472_v46 }
 0x5d0   :  { %v5695_v50 = vrot.slane %v5694_v19, 1  ;;  %v5998_v45 = vadd.f32 %v5997_v21, %v5996_v29  ;;  %v9205_v29 = vor.u32 %v10803_v58, %v9202_v51  ;;  %v10194_v21 = vld [vmem:[#allocation4 + $0x7f0] sm:$0xf0] }
 0x5d1   :  { %v10197_v56 = vor.u32 %v11051_v8, %v10194_v21  ;;  %v14782_v16 = vadd.f32 %v4810_v42, %v4762_v47  ;;  %v9906_v60 = vld [vmem:[#allocation4 + $0x5b0] sm:$0xf0] }
 0x5d2   :  { %4966 = vmatmul.bf16.gmra.mxu1 %v17471_v15  ;;  %v5696_v36 = vadd.f32 %v5695_v50, %v5694_v19  ;;  %v5999_v20 = vrot.slane %v5998_v45, 1  ;;  %v9461_v15 = vor.u32 %v10867_v28, %v9458_v12  ;;  %v11043_v50 = vld [vmem:[#allocation4 + $0x794] sm:$0xf]  ;;  %v9941_v19 = vor.u32 %v10987_v14, %v9938_v57  ;;  %5053 = vmatpush.bf16.msra.mxu3 %v9205_v29  ;;  %v4910_v14 = vpop.f32.mrf.mxu0  ;;  %v4763_v47 = vpop.f32.mrf.mxu1 }
 0x5d3   :  { %17474 = vst [vmem:[#allocation59_spill] sm:$0xff] %v14782_v16  ;;  %v10162_v12 = vld [vmem:[#allocation4 + $0x7b0] sm:$0xf0]  ;;  %5193 = vmatpush.bf16.msra.mxu2 %v10197_v56  ;;  %v4812_v8 = vpop.f32.mrf.mxu2  ;;  %v17478_v56 = vld [vmem:[#allocation62_spill] sm:$0xff] }
 0x5d4   :  { %v14780_v18 = vmul.f32 0.0078125, %v5696_v36  ;;  %v6000_v59 = vadd.f32 %v5999_v20, %v5998_v45  ;;  %5102 = vmatpush.bf16.msra.mxu0 %v9461_v15  ;;  %v10979_v28 = vld [vmem:[#allocation4 + $0x594] sm:$0xf]  ;;  %v10165_v1 = vor.u32 %v11043_v50, %v10162_v12  ;;  %v4701_v45 = vadd.f32 %v4700_v52, %v14426_v13  ;;  %5144 = vmatpush.bf16.msrb.mxu1 %v9941_v19  ;;  %v17476_v20 = vld [vmem:[#allocation45_spill] sm:$0xff] }
 0x5d5   :  { %v17475_v15 = vld [vmem:[#allocation43_spill] sm:$0xff]  ;;  %v9909_v36 = vor.u32 %v10979_v28, %v9906_v60  ;;  %v4764_v50 = vadd.f32 %v4763_v47, %v17478_v56  ;;  %v14796_v19 = vld [vmem:[%s17032_s8] sm:$0xff] }
 0x5d6   :  { %v6108_v46 = vmul.f32 0.0078125, %v6000_v59  ;;  %v6116_v51 = vmul.f32 %v14780_v18, %v14780_v18  ;;  %v11035_v42 = vld [vmem:[#allocation4 + $0x754] sm:$0xf]  ;;  %v4859_v57 = vpop.f32.mrf.mxu3  ;;  %v17477_v59 = vld [vmem:[#allocation42_spill] sm:$0xff]  ;;  %17479 = vst [vmem:[#allocation61_spill] sm:$0xff] %v14796_v19  ;;  %v14799_v28 = vperm.slane %v14796_v19, 4  ;;  %v14802_v60 = vadd.f32 %v14767_v3, %v4701_v45 }
 0x5d7   :  { %5103 = vmatmul.bf16.vlgmr.msra.gmra.mxu0 %v17475_v15  ;;  %5054 = vmatmul.bf16.vlgmr.msra.gmra.mxu3 %v17477_v59  ;;  %v10133_v52 = vor.u32 %v11035_v42, %v10130_v17  ;;  %v10971_v29 = vld [vmem:[#allocation4 + $0x554] sm:$0xf]  ;;  %v17483_v19 = vld [vmem:[#allocation57_spill] sm:$0xff]  ;;  %v17486_v15 = vld [vmem:[#allocation38_spill] sm:$0xff] }
 0x5d8   :  { %v6124_v58 = vsub.f32 %v6108_v46, %v6116_v51  ;;  %5194 = vmatpush.bf16.msra.mxu2 %v10165_v1  ;;  %v9874_v12 = vld [vmem:[#allocation4 + $0x570] sm:$0xf0]  ;;  %17480 = vst [vmem:[#allocation62_spill] sm:$0xff] %v14802_v60  ;;  %v14804_v46 = vadd.f32 %v4812_v8, %v4764_v50  ;;  %5145 = vmatpush.bf16.msrb.mxu1 %v9909_v36 }
 0x5d9   :  { %v9877_v51 = vor.u32 %v10971_v29, %v9874_v12  ;;  %v17482_v1 = vld [vmem:[#allocation36_spill] sm:$0xff]  ;;  %v4860_v42 = vadd.f32 %v4859_v57, %v14799_v28  ;;  %v17485_v29 = vld [vmem:[#allocation47_spill] sm:$0xff] }
 0x5da   :  { %v6260_v21 = vadd.f32 0.8, %v6124_v58  ;;  %17481 = vst [vmem:[#allocation73_spill] sm:$0xff] %v14804_v46  ;;  %v4913_v58 = vpop.f32.mrf.mxu0  ;;  %v4766_v47 = vpop.f32.mrf.mxu1  ;;  %v11027_v57 = vld [vmem:[#allocation4 + $0x714] sm:$0xf] }
 0x5db   :  { %v4815_v56 = vpop.f32.mrf.mxu2  ;;  %v4767_v59 = vadd.f32 %v4766_v47, %v17483_v19  ;;  %v14810_v45 = vadd.f32 %v14775_v4, %v4860_v42  ;;  %v10098_v12 = vld [vmem:[#allocation4 + $0x730] sm:$0xf0]  ;;  %v17487_v42 = vld [vmem:[#allocation46_spill] sm:$0xff] }
 0x5dc   :  { %11232 = vrsqrt.f32 %v6260_v21  ;;  %5195 = vmatpush.bf16.msra.mxu2 %v10133_v52  ;;  %5146 = vmatpush.bf16.msrb.mxu1 %v9877_v51  ;;  %vm6292_vm10 = vweird.f32 %v6260_v21 }
 0x5dd   :  { %17484 = vst [vmem:[#allocation57_spill] sm:$0xff] %v14810_v45  ;;  %v14812_v8 = vadd.f32 %v4815_v56, %v4767_v59  ;;  %v17488_v59 = vld [vmem:[#allocation64_spill] sm:$0xff] }
 0x5de   :  { %v4861_v17 = vpop.f32.mrf.mxu3 }
 0x5df   :  { %5015 = vmatmul.bf16.gmra.mxu2 %v17476_v20  ;;  %v4862_v52 = vadd.f32 %v4861_v17, %v14799_v28  ;;  %v10101_v20 = vor.u32 %v11027_v57, %v10098_v12  ;;  %v9842_v17 = vld [vmem:[#allocation4 + $0x530] sm:$0xf0] }
 0x5e1   :  { %5196 = vmatpush.bf16.msra.mxu2 %v10101_v20  ;;  %v14819_v45 = vadd.f32 %v4910_v14, %v4862_v52  ;;  %v17491_v20 = vsub.f32 %v14765_v23, %v14780_v18  ;;  %v17493_v23 = vld [vmem:[#allocation65_spill] sm:$0xff] }
 0x5e2   :  { %4971 = vmatmul.bf16.gmra.mxu1 %v17482_v1  ;;  %v11233_v44 = vpop.eup %11232  ;;  %v4915_v1 = vpop.f32.mrf.mxu0 }
 0x5e3   :  { %v6287_v3 = vmul.f32 %v11233_v44, %v6260_v21  ;;  %vm6293_vm9 = vweird.f32 %v11233_v44  ;;  %v4768_v47 = vpop.f32.mrf.mxu1  ;;  %v4817_v4 = vpop.f32.mrf.mxu2  ;;  %17489 = vst [vmem:[#allocation64_spill] sm:$0xff] %v14819_v45  ;;  %v17492_v21 = vld [vmem:[#allocation22_spill] sm:$0xff] }
 0x5e4   :  { %v4769_v56 = vadd.f32 %v4768_v47, %v17488_v59  ;;  %vm6294_vm11 = vmor %vm6292_vm10, %vm6293_vm9 }
 0x5e5   :  { %v6288_v36 = vmul.f32 %v11233_v44, %v6287_v3  ;;  %v10963_v3 = vld [vmem:[#allocation4 + $0x514] sm:$0xf] }
 0x5e6   :  { %v4864_v51 = vpop.f32.mrf.mxu3  ;;  %v14829_v12 = vadd.f32 %v4817_v4, %v4769_v56 }
 0x5e7   :  { %v6289_v50 = vmul.f32 0.5, %v6288_v36  ;;  %5108 = vmatmul.bf16.gmra.mxu0 %v17485_v29  ;;  %5059 = vmatmul.bf16.gmra.mxu3 %v17487_v42  ;;  %v9845_v29 = vor.u32 %v10963_v3, %v9842_v17  ;;  %v4865_v52 = vadd.f32 %v4864_v51, %v14799_v28 }
 0x5e9   :  { %v6290_v19 = vsub.f32 1.5, %v6289_v50  ;;  %v14824_v50 = vld [vmem:[%s17036_s12] ss:$2 sm:$0xff]  ;;  %5147 = vmatpush.bf16.msrb.mxu1 %v9845_v29 }
 0x5ea   :  { %17490 = vst [vmem:[#allocation74_spill] sm:$0xff] %v14824_v50  ;;  %v14827_v57 = vperm.slane %v14824_v50, 2  ;;  %v4918_v29 = vpop.f32.mrf.mxu0  ;;  %v17495_v50 = vld [vmem:[#allocation21_spill] sm:$0xff] }
 0x5eb   :  { %v6291_v36 = vmul.f32 %v11233_v44, %v6290_v19  ;;  %v4771_v56 = vpop.f32.mrf.mxu1  ;;  %v4820_v3 = vpop.f32.mrf.mxu2  ;;  %v11019_v19 = vld [vmem:[#allocation4 + $0x6d4] sm:$0xf] }
 0x5ec   :  { %v4772_v17 = vadd.f32 %v4771_v56, %v17493_v23  ;;  %v17497_v56 = vld [vmem:[#allocation20_spill] sm:$0xff] }
 0x5ed   :  { %v14831_v47 = vsel %vm6294_vm11, %v11233_v44, %v6291_v36  ;;  %v14847_v36 = vadd.f32 %v4913_v58, %v4865_v52  ;;  %v4686_v58 = vadd.f32 %v14608_v40, %v14426_v13  ;;  %v5821_v52 = vmul.f32 %v14804_v46, %v14804_v46  ;;  %v9810_v23 = vld [vmem:[#allocation4 + $0x4f0] sm:$0xf0] }
 0x5ee   :  { %v6468_v14 = vmul.f32 %v14831_v47, %v17491_v20  ;;  %v4866_v44 = vpop.f32.mrf.mxu3  ;;  %v14849_v20 = vadd.f32 %v4820_v3, %v4772_v17  ;;  %v10955_v3 = vld [vmem:[#allocation4 + $0x4d4] sm:$0xf]  ;;  %v14870_v40 = vadd.f32 %v14689_v41, %v14426_v13  ;;  %v6140_v41 = vsub.f32 %v14418_v2, %v14780_v18 }
 0x5ef   :  { %5020 = vmatmul.bf16.gmra.mxu2 %v17486_v15  ;;  %17494 = vst [vmem:[#allocation65_spill] sm:$0xff] %v14847_v36  ;;  %v4867_v51 = vadd.f32 %v4866_v44, %v14799_v28  ;;  %v9813_v17 = vor.u32 %v10955_v3, %v9810_v23  ;;  %v10947_v36 = vld [vmem:[#allocation4 + $0x494] sm:$0xf] }
 0x5f0   :  { %v14844_v4 = vmul.f32 %v14827_v57, %v6468_v14  ;;  %v17496_v14 = vld [vmem:[#allocation37_spill] sm:$0xff]  ;;  %v6356_v23 = vmul.f32 %v14831_v47, %v6140_v41 }
 0x5f1   :  { %5148 = vmatpush.bf16.msrb.mxu1 %v9813_v17  ;;  %v14917_v41 = vld [vmem:[%s17036_s12 + $0x1] ss:$2 sm:$0xff] }
 0x5f2   :  { %4976 = vmatmul.bf16.gmra.mxu1 %v17492_v21  ;;  %v10066_v21 = vld [vmem:[#allocation4 + $0x6f0] sm:$0xf0]  ;;  %v14853_v42 = vpop.f32.mrf.mxu0  ;;  %17501 = vst [vmem:[#allocation77_spill] sm:$0xff] %v14917_v41 }
 0x5f3   :  { %v10069_v15 = vor.u32 %v11019_v19, %v10066_v21  ;;  %v4773_v45 = vpop.f32.mrf.mxu1  ;;  %v4822_v60 = vpop.f32.mrf.mxu2  ;;  %v5813_v21 = vmul.f32 %v14782_v16, %v14782_v16 }
 0x5f4   :  { %v4774_v44 = vadd.f32 %v4773_v45, %v14562_v0 }
 0x5f5   :  { %5197 = vmatpush.bf16.msra.mxu2 %v10069_v15  ;;  %v14876_v0 = vadd.f32 %v5821_v52, %v5813_v21  ;;  %v14879_v15 = vadd.f32 %v14584_v24, %v4686_v58  ;;  %v14891_v52 = vmul.f32 %v14812_v8, %v14812_v8  ;;  %v6156_v58 = vsub.f32 %v14444_v10, %v14780_v18 }
 0x5f6   :  { %v4869_v59 = vpop.f32.mrf.mxu3  ;;  %v14866_v19 = vadd.f32 %v4822_v60, %v4774_v44  ;;  %v6132_v60 = vsub.f32 %v14402_v5, %v14780_v18  ;;  %v6172_v5 = vsub.f32 %v14479_v31, %v14780_v18  ;;  %v6180_v21 = vsub.f32 %v17455_v54, %v14780_v18 }
 0x5f7   :  { %5113 = vmatmul.bf16.gmra.mxu0 %v17495_v50  ;;  %5064 = vmatmul.bf16.gmra.mxu3 %v17497_v56  ;;  %v14862_v50 = vadd.f32 %v4915_v1, %v4867_v51  ;;  %v14874_v56 = vadd.f32 %v14804_v46, %v14782_v16  ;;  %v17499_v1 = vld [vmem:[#allocation52_spill] sm:$0xff]  ;;  %v4870_v45 = vadd.f32 %v4869_v59, %v14799_v28  ;;  %v14920_v54 = vperm.slane %v14917_v41, 2 }
 0x5f8   :  { %v6148_v51 = vsub.f32 %v14431_v22, %v14780_v18  ;;  %v6164_v59 = vsub.f32 %v14463_v7, %v14780_v18  ;;  %v6348_v22 = vmul.f32 %v14831_v47, %v6132_v60  ;;  %v6372_v10 = vmul.f32 %v14831_v47, %v6156_v58 }
 0x5f9   :  { %17498 = vst [vmem:[#allocation75_spill] sm:$0xff] %v14862_v50  ;;  %v6388_v46 = vmul.f32 %v14831_v47, %v6172_v5  ;;  %v14910_v31 = vadd.f32 %v4918_v29, %v4870_v45  ;;  %v6502_v60 = vmul.f32 %v14827_v57, %v6356_v23  ;;  %v17504_v50 = vld [vmem:[#allocation27_spill] sm:$0xff] }
 0x5fa   :  { %v14893_v24 = vpop.f32.mrf.mxu0  ;;  %v6364_v17 = vmul.f32 %v14831_v47, %v6148_v51  ;;  %v6380_v7 = vmul.f32 %v14831_v47, %v6164_v59  ;;  %v6494_v16 = vmul.f32 %v14827_v57, %v6348_v22  ;;  %v6518_v58 = vmul.f32 %v14827_v57, %v6372_v10  ;;  %v17502_v10 = vld [vmem:[#allocation29_spill] sm:$0xff] }
 0x5fb   :  { %v4776_v2 = vpop.f32.mrf.mxu1  ;;  %v4825_v3 = vpop.f32.mrf.mxu2  ;;  %17500 = vst [vmem:[#allocation76_spill] sm:$0xff] %v14910_v31  ;;  %v6649_v59 = vadd.f32 %v14920_v54, %v6502_v60  ;;  %v6534_v5 = vmul.f32 %v14827_v57, %v6388_v46 }
 0x5fc   :  { %v6510_v51 = vmul.f32 %v14827_v57, %v6364_v17  ;;  %v6526_v29 = vmul.f32 %v14827_v57, %v6380_v7  ;;  %v6641_v45 = vadd.f32 %v14920_v54, %v6494_v16  ;;  %v6665_v23 = vadd.f32 %v14920_v54, %v6518_v58  ;;  %v11011_v16 = vld [vmem:[#allocation4 + $0x694] sm:$0xf] }
 0x5fd   :  { %v10034_v7 = vld [vmem:[#allocation4 + $0x6b0] sm:$0xf0]  ;;  %vm6777_vm13 = vcmp.gt.f32.partialorder %v6649_v59, 0.0  ;;  %v6905_v41 = vmul.f32 0.2, %v6649_v59 }
 0x5fe   :  { %v4871_v44 = vpop.f32.mrf.mxu3  ;;  %v6657_v22 = vadd.f32 %v14920_v54, %v6510_v51  ;;  %vm6769_vm12 = vcmp.gt.f32.partialorder %v6641_v45, 0.0  ;;  %v6673_v46 = vadd.f32 %v14920_v54, %v6526_v29  ;;  %v17503_v51 = vld [vmem:[#allocation44_spill] sm:$0xff]  ;;  %v10037_v58 = vor.u32 %v11011_v16, %v10034_v7 }
 0x5ff   :  { %5025 = vmatmul.bf16.gmra.mxu2 %v17496_v14  ;;  %v4872_v17 = vadd.f32 %v4871_v44, %v14799_v28  ;;  %vm6793_vm15 = vcmp.gt.f32.partialorder %v6665_v23, 0.0  ;;  %v6204_v14 = vsub.f32 %v14603_v49, %v14780_v18  ;;  %v7033_v7 = vsel %vm6777_vm13, %v6649_v59, %v6905_v41 }
 0x600   :  { %vm6785_vm14 = vcmp.gt.f32.partialorder %v6657_v22, 0.0  ;;  %5198 = vmatpush.bf16.msra.mxu2 %v10037_v58  ;;  %vm6801_vm0 = vcmp.gt.f32.partialorder %v6673_v46, 0.0 }
 0x601   :  { %v14951_v13 = vadd.f32 %v14853_v42, %v4872_v17 }
 0x602   :  { %4981 = vmatmul.bf16.gmra.mxu1 %v17499_v1  ;;  %v4777_v1 = vadd.f32 %v4776_v2, %v14599_v6  ;;  %v6396_v2 = vmul.f32 %v14831_v47, %v6180_v21  ;;  %v14940_v60 = vpop.f32.mrf.mxu0 }
 0x603   :  { %v4778_v31 = vpop.f32.mrf.mxu1  ;;  %v4827_v44 = vpop.f32.mrf.mxu2 }
 0x604   :  { %v14922_v6 = vadd.f32 %v4825_v3, %v4777_v1  ;;  %v6188_v1 = vsub.f32 %v17457_v26, %v14780_v18  ;;  %v6196_v3 = vsub.f32 %v14565_v62, %v14780_v18  ;;  %v6897_v26 = vmul.f32 0.2, %v6641_v45 }
 0x605   :  { %v6681_v62 = vadd.f32 %v14920_v54, %v6534_v5  ;;  %v4779_v29 = vadd.f32 %v4778_v31, %v14628_v35  ;;  %v6921_v5 = vmul.f32 0.2, %v6665_v23  ;;  %v6929_v31 = vmul.f32 0.2, %v6673_v46 }
 0x606   :  { %v4874_v21 = vpop.f32.mrf.mxu3  ;;  %v7025_v16 = vsel %vm6769_vm12, %v6641_v45, %v6897_v26  ;;  %v6404_v41 = vmul.f32 %v14831_v47, %v6188_v1  ;;  %v6542_v42 = vmul.f32 %v14827_v57, %v6396_v2  ;;  %v6412_v59 = vmul.f32 %v14831_v47, %v6196_v3 }
 0x607   :  { %5118 = vmatmul.bf16.gmra.mxu0 %v17502_v10  ;;  %v6913_v10 = vmul.f32 0.2, %v6657_v22  ;;  %5069 = vmatmul.bf16.gmra.mxu3 %v17504_v50  ;;  %v14953_v11 = vpack.c.bf16 %v7033_v7, %v7025_v16  ;;  %v14955_v49 = vadd.f32 %v4827_v44, %v4779_v29  ;;  %v7049_v50 = vsel %vm6793_vm15, %v6665_v23, %v6921_v5 }
 0x608   :  { %vm6809_vm1 = vcmp.gt.f32.partialorder %v6681_v62, 0.0  ;;  %v6937_v45 = vmul.f32 0.2, %v6681_v62  ;;  %v7057_v23 = vsel %vm6801_vm0, %v6673_v46, %v6929_v31  ;;  %v6558_v2 = vmul.f32 %v14827_v57, %v6412_v59 }
 0x609   :  { %17505 = vst [vmem:[#allocation78_spill] sm:$0xff] %v14953_v11  ;;  %v7041_v25 = vsel %vm6785_vm14, %v6657_v22, %v6913_v10  ;;  %v6212_v22 = vsub.f32 %v14633_v9, %v14780_v18  ;;  %v6220_v3 = vsub.f32 %v14682_v37, %v14780_v18  ;;  %v6228_v26 = vsub.f32 %v14711_v61, %v14780_v18  ;;  %v10808_v11 = vld [vmem:[#allocation4 + $0x34] sm:$0xf0] }
 0x60a   :  { %v14958_v35 = vpack.c.bf16 %v7049_v50, %v7041_v25  ;;  %v7065_v17 = vsel %vm6809_vm1, %v6681_v62, %v6937_v45  ;;  %v6550_v25 = vmul.f32 %v14827_v57, %v6404_v41  ;;  %v14969_v10 = vpop.f32.mrf.mxu0  ;;  %v6705_v29 = vadd.f32 %v14920_v54, %v6558_v2 }
 0x60b   :  { %v14971_v1 = vpack.c.bf16 %v7065_v17, %v7057_v23  ;;  %v4830_v9 = vpop.f32.mrf.mxu2  ;;  %v10002_v23 = vld [vmem:[#allocation4 + $0x670] sm:$0xf0]  ;;  %v9688_v17 = vld [vmem:[#allocation4 + $0x3d8] sm:$0xf]  ;;  %v6444_v2 = vmul.f32 %v14831_v47, %v6228_v26  ;;  %v5837_v26 = vmul.f32 %v14829_v12, %v14829_v12 }
 0x60c   :  { %17506 = vst [vmem:[#allocation79_spill] sm:$0xff] %v14958_v35  ;;  %v6697_v46 = vadd.f32 %v14920_v54, %v6550_v25  ;;  %vm6833_vm4 = vcmp.gt.f32.partialorder %v6705_v29, 0.0  ;;  %v6961_v45 = vmul.f32 0.2, %v6705_v29 }
 0x60d   :  { %17507 = vst [vmem:[#allocation80_spill] sm:$0xff] %v14971_v1 }
 0x60e   :  { %v4876_v50 = vpop.f32.mrf.mxu3  ;;  %vm6825_vm3 = vcmp.gt.f32.partialorder %v6697_v46, 0.0  ;;  %v6953_v37 = vmul.f32 0.2, %v6697_v46  ;;  %v7089_v59 = vsel %vm6833_vm4, %v6705_v29, %v6961_v45  ;;  %v10864_v45 = vld [vmem:[#allocation4 + $0x1f4] sm:$0xf0] }
 0x60f   :  { %5030 = vmatmul.bf16.gmra.mxu2 %v17503_v51  ;;  %v9778_v51 = vld [vmem:[#allocation4 + $0x4b0] sm:$0xf0] }
 0x610   :  { %v9781_v34 = vor.u32 %v10947_v36, %v9778_v51  ;;  %v4875_v36 = vadd.f32 %v4874_v21, %v14799_v28  ;;  %v6689_v21 = vadd.f32 %v14920_v54, %v6542_v42  ;;  %v4781_v51 = vpop.f32.mrf.mxu1  ;;  %v7081_v41 = vsel %vm6825_vm3, %v6697_v46, %v6953_v37  ;;  %v17511_v37 = vld [vmem:[#allocation30_spill] sm:$0xff] }
 0x611   :  { %v4782_v62 = vadd.f32 %v4781_v51, %v14678_v43  ;;  %v6436_v43 = vmul.f32 %v14831_v47, %v6220_v3  ;;  %v5698_v42 = vadd.f32 %v14874_v56, %v14812_v8  ;;  %v6002_v56 = vadd.f32 %v14876_v0, %v14891_v52 }
 0x612   :  { %5149 = vmatpush.bf16.msrb.mxu1 %v9781_v34  ;;  %v6420_v34 = vmul.f32 %v14831_v47, %v6204_v14  ;;  %v6428_v14 = vmul.f32 %v14831_v47, %v6212_v22  ;;  %vm6817_vm2 = vcmp.gt.f32.partialorder %v6689_v21, 0.0  ;;  %v6945_v44 = vmul.f32 0.2, %v6689_v21  ;;  %v11003_v22 = vld [vmem:[#allocation4 + $0x654] sm:$0xf] }
 0x613   :  { %4986 = vmatmul.bf16.gmra.mxu1 %v13655_v27  ;;  %v14985_v16 = vadd.f32 %v14893_v24, %v4875_v36  ;;  %v14988_v5 = vadd.f32 %v4830_v9, %v4782_v62  ;;  %v4877_v24 = vadd.f32 %v4876_v50, %v14799_v28  ;;  %v15002_v50 = vpop.f32.mrf.mxu0  ;;  %v10005_v51 = vor.u32 %v11003_v22, %v10002_v23  ;;  %v10928_v9 = vld [vmem:[#allocation4 + $0x3f4] sm:$0xf0] }
 0x614   :  { %v6566_v58 = vmul.f32 %v14827_v57, %v6420_v34  ;;  %v7073_v31 = vsel %vm6817_vm2, %v6689_v21, %v6945_v44  ;;  %v6574_v34 = vmul.f32 %v14827_v57, %v6428_v14  ;;  %v6582_v21 = vmul.f32 %v14827_v57, %v6436_v43  ;;  %v4832_v44 = vpop.f32.mrf.mxu2  ;;  %v9656_v22 = vld [vmem:[#allocation4 + $0x398] sm:$0xf] }
 0x615   :  { %v14994_v36 = vpack.c.bf16 %v7081_v41, %v7073_v31  ;;  %v9689_v0 = vor.u32 %v10928_v9, %v9688_v17  ;;  %5199 = vmatpush.bf16.msra.mxu2 %v10005_v51  ;;  %v9432_v31 = vld [vmem:[#allocation4 + $0x1d8] sm:$0xf]  ;;  %v6590_v41 = vmul.f32 %v14827_v57, %v6444_v2  ;;  %v15020_v17 = vadd.f32 %v14940_v60, %v4877_v24 }
 0x616   :  { %v6713_v7 = vadd.f32 %v14920_v54, %v6566_v58  ;;  %v17510_v58 = vsub.f32 %v14736_v48, %v14780_v18  ;;  %v6721_v52 = vadd.f32 %v14920_v54, %v6574_v34  ;;  %v6729_v29 = vadd.f32 %v14920_v54, %v6582_v21  ;;  %v10939_v48 = vld [vmem:[#allocation4 + $0x454] sm:$0xf]  ;;  %v10920_v23 = vld [vmem:[#allocation4 + $0x3b4] sm:$0xf0] }
 0x617   :  { %17508 = vst [vmem:[#allocation81_spill] sm:$0xff] %v14994_v36  ;;  %5123 = vmatmul.bf16.gmra.mxu0 %v17445_v63  ;;  %v4879_v3 = vpop.f32.mrf.mxu3  ;;  %5074 = vmatmul.bf16.gmra.mxu3 %v17511_v37  ;;  %v9433_v43 = vor.u32 %v10864_v45, %v9432_v31  ;;  %v6761_v34 = vadd.f32 %v14920_v54, %v14844_v4  ;;  %v9400_v9 = vld [vmem:[#allocation4 + $0x198] sm:$0xf] }
 0x618   :  { %vm6841_vm5 = vcmp.gt.f32.partialorder %v6713_v7, 0.0  ;;  %v6969_v61 = vmul.f32 0.2, %v6713_v7  ;;  %v6452_v14 = vmul.f32 %v14831_v47, %v17510_v58  ;;  %v4783_v62 = vpop.f32.mrf.mxu1  ;;  %5291 = vmatpush.bf16.msrb.mxu0 %v9689_v0  ;;  %v9657_v51 = vor.u32 %v10920_v23, %v9656_v22  ;;  %v10856_v58 = vld [vmem:[#allocation4 + $0x1b4] sm:$0xf0] }
 0x619   :  { %5242 = vmatpush.bf16.msrb.mxu3 %v9433_v43  ;;  %v9401_v60 = vor.u32 %v10856_v58, %v9400_v9  ;;  %v10912_v24 = vld [vmem:[#allocation4 + $0x374] sm:$0xf0]  ;;  %vm6849_vm6 = vcmp.gt.f32.partialorder %v6721_v52, 0.0  ;;  %vm6857_vm7 = vcmp.gt.f32.partialorder %v6729_v29, 0.0  ;;  %v6003_v45 = vadd.f32 %v6002_v56, %v5837_v26 }
 0x61a   :  { %v7097_v25 = vsel %vm6841_vm5, %v6713_v7, %v6969_v61  ;;  %v4784_v7 = vadd.f32 %v4783_v62, %v14879_v15  ;;  %v6598_v61 = vmul.f32 %v14827_v57, %v6452_v14  ;;  %v9624_v14 = vld [vmem:[#allocation4 + $0x358] sm:$0xf]  ;;  %v6737_v62 = vadd.f32 %v14920_v54, %v6590_v41 }
 0x61b   :  { %v15005_v46 = vpack.c.bf16 %v7097_v25, %v7089_v59  ;;  %v9746_v59 = vld [vmem:[#allocation4 + $0x470] sm:$0xf0]  ;;  %v17512_v25 = vsub.f32 %v14752_v55, %v14780_v18  ;;  %v6977_v55 = vmul.f32 0.2, %v6721_v52  ;;  %v5699_v18 = vadd.f32 %v5698_v42, %v14829_v12  ;;  %v15036_v43 = vpop.f32.mrf.mxu0  ;;  %v9368_v42 = vld [vmem:[#allocation4 + $0x158] sm:$0xf] }
 0x61c   :  { %v15028_v21 = vadd.f32 %v4832_v44, %v4784_v7  ;;  %v9749_v2 = vor.u32 %v10939_v48, %v9746_v59  ;;  %v9625_v4 = vor.u32 %v10912_v24, %v9624_v14  ;;  %v6985_v44 = vmul.f32 0.2, %v6729_v29  ;;  %5292 = vmatpush.bf16.msrb.mxu0 %v9657_v51  ;;  %v10848_v59 = vld [vmem:[#allocation4 + $0x174] sm:$0xf0] }
 0x61d   :  { %17509 = vst [vmem:[#allocation82_spill] sm:$0xff] %v15005_v46  ;;  %v6460_v15 = vmul.f32 %v14831_v47, %v17512_v25  ;;  %v4880_v47 = vadd.f32 %v4879_v3, %v14799_v28  ;;  %v7105_v0 = vsel %vm6849_vm6, %v6721_v52, %v6977_v55  ;;  %v6745_v7 = vadd.f32 %v14920_v54, %v6598_v61  ;;  %v4835_v25 = vpop.f32.mrf.mxu2  ;;  %v10904_v61 = vld [vmem:[#allocation4 + $0x334] sm:$0xf0] }
 0x61e   :  { %5150 = vmatpush.bf16.msrb.mxu1 %v9749_v2  ;;  %vm6865_vm8 = vcmp.gt.f32.partialorder %v6737_v62, 0.0  ;;  %v6993_v31 = vmul.f32 0.2, %v6737_v62  ;;  %v5700_v48 = vadd.f32 %v5699_v18, %v14849_v20  ;;  %v7113_v3 = vsel %vm6857_vm7, %v6729_v29, %v6985_v44  ;;  %5243 = vmatpush.bf16.msrb.mxu3 %v9401_v60  ;;  %v9592_v2 = vld [vmem:[#allocation4 + $0x318] sm:$0xf] }
 0x61f   :  { %5035 = vmatmul.bf16.gmra.mxu2 %v13589_v33  ;;  %v4881_v41 = vpop.f32.mrf.mxu3  ;;  %v6606_v22 = vmul.f32 %v14827_v57, %v6460_v15  ;;  %v9369_v52 = vor.u32 %v10848_v59, %v9368_v42  ;;  %v15040_v51 = vpack.c.bf16 %v7113_v3, %v7105_v0  ;;  %vm6873_vm9 = vcmp.gt.f32.partialorder %v6745_v7, 0.0  ;;  %v9336_v9 = vld [vmem:[#allocation4 + $0x118] sm:$0xf]  ;;  %v10995_v42 = vld [vmem:[#allocation4 + $0x614] sm:$0xf] }
 0x620   :  { %v4786_v23 = vpop.f32.mrf.mxu1  ;;  %vm6889_vm10 = vcmp.gt.f32.partialorder %v6761_v34, 0.0  ;;  %v5845_v56 = vmul.f32 %v14849_v20, %v14849_v20  ;;  %v10840_v58 = vld [vmem:[#allocation4 + $0x134] sm:$0xf0]  ;;  %v7001_v29 = vmul.f32 0.2, %v6745_v7  ;;  %v7121_v57 = vsel %vm6865_vm8, %v6737_v62, %v6993_v31  ;;  %5293 = vmatpush.bf16.msrb.mxu0 %v9625_v4 }
 0x621   :  { %17513 = vst [vmem:[#allocation30_spill] sm:$0xff] %v15040_v51  ;;  %v4787_v26 = vadd.f32 %v4786_v23, %v14731_v30  ;;  %v5853_v15 = vmul.f32 %v14866_v19, %v14866_v19  ;;  %v15049_v14 = vadd.f32 %v14969_v10, %v4880_v47  ;;  %v6753_v60 = vadd.f32 %v14920_v54, %v6606_v22  ;;  %v9970_v59 = vld [vmem:[#allocation4 + $0x630] sm:$0xf0]  ;;  %v9464_v46 = vld [vmem:[#allocation4 + $0x218] sm:$0xf] }
 0x622   :  { %v7017_v24 = vmul.f32 0.2, %v6761_v34  ;;  %v9593_v18 = vor.u32 %v10904_v61, %v9592_v2  ;;  %v9337_v44 = vor.u32 %v10840_v58, %v9336_v9  ;;  %v7129_v30 = vsel %vm6873_vm9, %v6745_v7, %v7001_v29  ;;  %5244 = vmatpush.bf16.msrb.mxu3 %v9369_v52  ;;  %v9560_v7 = vld [vmem:[#allocation4 + $0x2d8] sm:$0xf]  ;;  %v17516_v9 = vld [vmem:[#allocation31_spill] sm:$0xff] }
 0x623   :  { %4991 = vmatmul.bf16.gmra.mxu1 %v17384_v32  ;;  %v15052_v55 = vadd.f32 %v4835_v25, %v4787_v26  ;;  %v15055_v0 = vpack.c.bf16 %v7129_v30, %v7121_v57  ;;  %vm6881_vm11 = vcmp.gt.f32.partialorder %v6753_v60, 0.0  ;;  %v7009_v62 = vmul.f32 0.2, %v6753_v60  ;;  %v15063_v23 = vpop.f32.mrf.mxu0  ;;  %v10832_v58 = vld [vmem:[#allocation4 + $0xf4] sm:$0xf0] }
 0x624   :  { %v7145_v31 = vsel %vm6889_vm10, %v6761_v34, %v7017_v24  ;;  %v6004_v4 = vadd.f32 %v6003_v45, %v5845_v56  ;;  %v5701_v10 = vadd.f32 %v5700_v48, %v14866_v19  ;;  %v5861_v54 = vmul.f32 %v14922_v6, %v14922_v6  ;;  %5294 = vmatpush.bf16.msrb.mxu0 %v9593_v18  ;;  %v10896_v48 = vld [vmem:[#allocation4 + $0x2f4] sm:$0xf0]  ;;  %v10931_v29 = vld [vmem:[#allocation4 + $0x414] sm:$0xf] }
 0x625   :  { %17514 = vst [vmem:[#allocation83_spill] sm:$0xff] %v15055_v0  ;;  %v4882_v47 = vadd.f32 %v4881_v41, %v14799_v28  ;;  %v7137_v3 = vsel %vm6881_vm11, %v6753_v60, %v7009_v62  ;;  %v4740_v34 = vadd.f32 %v14664_v38, %v14870_v40  ;;  %v9973_v45 = vor.u32 %v10995_v42, %v9970_v59  ;;  %v4837_v61 = vpop.f32.mrf.mxu2  ;;  %v9304_v40 = vld [vmem:[#allocation4 + $0xd8] sm:$0xf]  ;;  %v9714_v24 = vld [vmem:[#allocation4 + $0x430] sm:$0xf0] }
 0x626   :  { %v15068_v25 = vpack.c.bf16 %v7145_v31, %v7137_v3  ;;  %v6005_v41 = vadd.f32 %v6004_v4, %v5853_v15  ;;  %v5702_v52 = vadd.f32 %v5701_v10, %v14922_v6  ;;  %5245 = vmatpush.bf16.msrb.mxu3 %v9337_v44  ;;  %v9561_v56 = vor.u32 %v10896_v48, %v9560_v7  ;;  %v9528_v18 = vld [vmem:[#allocation4 + $0x298] sm:$0xf] }
 0x627   :  { %5128 = vmatmul.bf16.gmra.mxu0 %v13260_v39  ;;  %v4884_v22 = vpop.f32.mrf.mxu3  ;;  %v5869_v26 = vmul.f32 %v14955_v49, %v14955_v49  ;;  %5079 = vmatmul.bf16.gmra.mxu3 %v17516_v9  ;;  %v9305_v15 = vor.u32 %v10832_v58, %v9304_v40  ;;  %v10888_v30 = vld [vmem:[#allocation4 + $0x2b4] sm:$0xf0]  ;;  %v15076_v44 = vadd.f32 %v15002_v50, %v4882_v47 }
 0x628   :  { %17515 = vst [vmem:[#allocation84_spill] sm:$0xff] %v15068_v25  ;;  %v4788_v2 = vpop.f32.mrf.mxu1  ;;  %5200 = vmatpush.bf16.msra.mxu2 %v9973_v45  ;;  %v6006_v57 = vadd.f32 %v6005_v41, %v5861_v54  ;;  %v5703_v60 = vadd.f32 %v5702_v52, %v14955_v49  ;;  %v5877_v62 = vmul.f32 %v14988_v5, %v14988_v5  ;;  %v9272_v42 = vld [vmem:[#allocation4 + $0x98] sm:$0xf]  ;;  %v17533_v25 = vld [vmem:[#allocation35_spill] sm:$0xff] }
 0x629   :  { %v4789_v38 = vadd.f32 %v4788_v2, %v4740_v34  ;;  %5295 = vmatpush.bf16.msrb.mxu0 %v9561_v56  ;;  %v9717_v4 = vor.u32 %v10931_v29, %v9714_v24  ;;  %v9529_v10 = vor.u32 %v10888_v30, %v9528_v18  ;;  %v10824_v59 = vld [vmem:[#allocation4 + $0xb4] sm:$0xf0]  ;;  %v5885_v50 = vmul.f32 %v15028_v21, %v15028_v21  ;;  %v17520_v18 = vld [vmem:[#allocation53_spill] sm:$0xff] }
 0x62a   :  { %5246 = vmatpush.bf16.msrb.mxu3 %v9305_v15  ;;  %v9273_v54 = vor.u32 %v10824_v59, %v9272_v42  ;;  %v9496_v7 = vld [vmem:[#allocation4 + $0x258] sm:$0xf]  ;;  %v6007_v34 = vadd.f32 %v6006_v57, %v5869_v26  ;;  %v5704_v45 = vadd.f32 %v5703_v60, %v14988_v5  ;;  %v4885_v47 = vadd.f32 %v4884_v22, %v14799_v28  ;;  %v17518_v57 = vld [vmem:[#allocation51_spill] sm:$0xff] }
 0x62b   :  { %v15080_v31 = vadd.f32 %v4837_v61, %v4789_v38  ;;  %v10880_v3 = vld [vmem:[#allocation4 + $0x274] sm:$0xf0]  ;;  %5151 = vmatpush.bf16.msrb.mxu1 %v9717_v4  ;;  %v5893_v52 = vmul.f32 %v15052_v55, %v15052_v55  ;;  %v4938_v61 = vpop.f32.mrf.mxu0 }
 0x62c   :  { %v6008_v48 = vadd.f32 %v6007_v34, %v5877_v62  ;;  %v5705_v41 = vadd.f32 %v5704_v45, %v15028_v21  ;;  %v9497_v56 = vor.u32 %v10880_v3, %v9496_v7  ;;  %v17517_v40 = vld [vmem:[#allocation32_spill] sm:$0xff]  ;;  %v15095_v15 = vadd.f32 %v15036_v43, %v4885_v47  ;;  %v17522_v45 = vld [vmem:[#allocation63_spill] sm:$0xff] }
 0x62d   :  { %5296 = vmatpush.bf16.msrb.mxu0 %v9529_v10  ;;  %v4840_v26 = vpop.f32.mrf.mxu2  ;;  %v5901_v22 = vmul.f32 %v15080_v31, %v15080_v31  ;;  %v17519_v24 = vld [vmem:[#allocation28_spill] sm:$0xff] }
 0x62e   :  { %5247 = vmatpush.bf16.msrb.mxu3 %v9273_v54  ;;  %v6009_v58 = vadd.f32 %v6008_v48, %v5885_v50  ;;  %v5706_v29 = vadd.f32 %v5705_v41, %v15052_v55  ;;  %v4696_v30 = vadd.f32 %v17520_v18, %v17519_v24  ;;  %v17521_v3 = vld [vmem:[#allocation48_spill] sm:$0xff]  ;;  %v17525_v18 = vld [vmem:[#allocation25_spill] sm:$0xff] }
 0x62f   :  { %5040 = vmatmul.bf16.gmra.mxu2 %v17390_v53  ;;  %v4886_v2 = vpop.f32.mrf.mxu3  ;;  %v17523_v47 = vld [vmem:[#allocation24_spill] sm:$0xff] }
 0x630   :  { %v4791_v38 = vpop.f32.mrf.mxu1  ;;  %v6010_v62 = vadd.f32 %v6009_v58, %v5893_v52  ;;  %v5707_v4 = vadd.f32 %v5706_v29, %v15080_v31  ;;  %v4887_v7 = vadd.f32 %v4886_v2, %v14799_v28  ;;  %v4745_v50 = vadd.f32 %v17522_v45, %v4696_v30  ;;  %v17524_v52 = vld [vmem:[#allocation49_spill] sm:$0xff] }
 0x631   :  { %v4792_v60 = vadd.f32 %v4791_v38, %v17518_v57  ;;  %5297 = vmatpush.bf16.msrb.mxu0 %v9497_v56 }
 0x632   :  { %v6011_v42 = vadd.f32 %v6010_v62, %v5901_v22  ;;  %v17526_v62 = vld [vmem:[#allocation55_spill] sm:$0xff] }
 0x633   :  { %5152 = vmatmul.bf16.vlgmr.msrb.gmra.mxu1 %v17517_v40  ;;  %v15100_v10 = vadd.f32 %v4840_v26, %v4792_v60  ;;  %v4940_v56 = vpop.f32.mrf.mxu0  ;;  %v15111_v26 = vadd.f32 %v15063_v23, %v4887_v7 }
 0x635   :  { %v5708_v59 = vadd.f32 %v5707_v4, %v15100_v10  ;;  %v5909_v54 = vmul.f32 %v15100_v10, %v15100_v10  ;;  %v4842_v41 = vpop.f32.mrf.mxu2 }
 0x637   :  { %5133 = vmatmul.bf16.gmra.mxu0 %v17521_v3  ;;  %v6012_v43 = vadd.f32 %v6011_v42, %v5909_v54  ;;  %v4889_v34 = vpop.f32.mrf.mxu3  ;;  %5084 = vmatmul.bf16.gmra.mxu3 %v17524_v52  ;;  %v17566_v52 = vld [vmem:[#allocation29_spill] sm:$0xff]  ;;  %v10040_v3 = vld [vmem:[#allocation4 + $0x698] sm:$0xf] }
 0x638   :  { %v4793_v48 = vpop.f32.mrf.mxu1  ;;  %v4890_v22 = vadd.f32 %v4889_v34, %v14799_v28 }
 0x639   :  { %v4794_v38 = vadd.f32 %v4793_v48, %v4745_v50  ;;  %v17529_v50 = vld [vmem:[#allocation34_spill] sm:$0xff] }
 0x63a   :  { %v15121_v42 = vadd.f32 %v4938_v61, %v4890_v22  ;;  %v17531_v61 = vld [vmem:[#allocation62_spill] sm:$0xff] }
 0x63b   :  { %v15113_v58 = vadd.f32 %v4842_v41, %v4794_v38  ;;  %v4943_v23 = vpop.f32.mrf.mxu0  ;;  %v17530_v38 = vld [vmem:[#allocation40_spill] sm:$0xff] }
 0x63c   :  { %17527 = vst [vmem:[#allocation31_spill] sm:$0xff] %v15121_v42  ;;  %v11016_v42 = vld [vmem:[#allocation4 + $0x6b4] sm:$0xf0] }
 0x63d   :  { %v5709_v2 = vadd.f32 %v5708_v59, %v15113_v58  ;;  %v5917_v29 = vmul.f32 %v15113_v58, %v15113_v58  ;;  %v4845_v24 = vpop.f32.mrf.mxu2 }
 0x63f   :  { %5201 = vmatmul.bf16.vlgmr.msra.gmra.mxu2 %v17523_v47  ;;  %v6013_v57 = vadd.f32 %v6012_v43, %v5917_v29  ;;  %v4891_v30 = vpop.f32.mrf.mxu3  ;;  %v17528_v43 = vld [vmem:[#allocation41_spill] sm:$0xff] }
 0x640   :  { %v4796_v60 = vpop.f32.mrf.mxu1  ;;  %v4892_v34 = vadd.f32 %v4891_v30, %v14799_v28 }
 0x641   :  { %v4797_v4 = vadd.f32 %v4796_v60, %v17526_v62 }
 0x642   :  { %v15133_v22 = vadd.f32 %v4940_v56, %v4892_v34  ;;  %v10816_v56 = vld [vmem:[#allocation4 + $0x74] sm:$0xf0] }
 0x643   :  { %5157 = vmatmul.bf16.gmra.mxu1 %v17525_v18  ;;  %v15123_v54 = vadd.f32 %v4845_v24, %v4797_v4  ;;  %v4945_v24 = vpop.f32.mrf.mxu0 }
 0x644   :  { %17532 = vst [vmem:[#allocation32_spill] sm:$0xff] %v15133_v22 }
 0x645   :  { %v5710_v59 = vadd.f32 %v5709_v2, %v15123_v54  ;;  %v5925_v7 = vmul.f32 %v15123_v54, %v15123_v54  ;;  %v4847_v41 = vpop.f32.mrf.mxu2 }
 0x647   :  { %5138 = vmatmul.bf16.gmra.mxu0 %v17528_v43  ;;  %v6014_v45 = vadd.f32 %v6013_v57, %v5925_v7  ;;  %5089 = vmatmul.bf16.gmra.mxu3 %v17530_v38  ;;  %v4894_v60 = vpop.f32.mrf.mxu3  ;;  %v10200_v38 = vld [vmem:[#allocation4 + $0x7d8] sm:$0xf]  ;;  %v17536_v43 = vld [vmem:[#allocation57_spill] sm:$0xff] }
 0x648   :  { %v4798_v48 = vpop.f32.mrf.mxu1  ;;  %v4895_v57 = vadd.f32 %v4894_v60, %v14799_v28  ;;  %v9208_v60 = vld [vmem:[#allocation4 + $0x18] sm:$0xf] }
 0x649   :  { %v4799_v29 = vadd.f32 %v4798_v48, %v17531_v61  ;;  %v9240_v48 = vld [vmem:[#allocation4 + $0x58] sm:$0xf] }
 0x64a   :  { %v15142_v34 = vadd.f32 %v4943_v23, %v4895_v57  ;;  %v11056_v23 = vld [vmem:[#allocation4 + $0x7f4] sm:$0xf0]  ;;  %v17535_v57 = vld [vmem:[#allocation45_spill] sm:$0xff] }
 0x64b   :  { %v15135_v2 = vadd.f32 %v4847_v41, %v4799_v29  ;;  %v9241_v29 = vor.u32 %v10816_v56, %v9240_v48  ;;  %v10201_v48 = vor.u32 %v11056_v23, %v10200_v38  ;;  %v9944_v56 = vld [vmem:[#allocation4 + $0x5d8] sm:$0xf] }
 0x64c   :  { %17534 = vst [vmem:[#allocation51_spill] sm:$0xff] %v15142_v34  ;;  %v10984_v34 = vld [vmem:[#allocation4 + $0x5b4] sm:$0xf0] }
 0x64d   :  { %v5711_v62 = vadd.f32 %v5710_v59, %v15135_v2  ;;  %v5933_v30 = vmul.f32 %v15135_v2, %v15135_v2  ;;  %v10872_v59 = vld [vmem:[#allocation4 + $0x234] sm:$0xf0]  ;;  %5248 = vmatpush.bf16.msrb.mxu3 %v9241_v29  ;;  %5389 = vmatpush.bf16.msrb.mxu2 %v10201_v48 }
 0x64e   :  { %v9465_v35 = vor.u32 %v10872_v59, %v9464_v46  ;;  %v10168_v46 = vld [vmem:[#allocation4 + $0x798] sm:$0xf] }
 0x64f   :  { %5206 = vmatmul.bf16.gmra.mxu2 %v17529_v50  ;;  %v5712_v4 = vrot.slane %v5711_v62, 4  ;;  %v6015_v7 = vadd.f32 %v6014_v45, %v5933_v30 }
 0x650   :  { %5298 = vmatpush.bf16.msrb.mxu0 %v9465_v35  ;;  %v11048_v35 = vld [vmem:[#allocation4 + $0x7b4] sm:$0xf0] }
 0x651   :  { %v5713_v0 = vadd.f32 %v5712_v4, %v5711_v62  ;;  %v6016_v51 = vrot.slane %v6015_v7, 4  ;;  %v9209_v4 = vor.u32 %v10808_v11, %v9208_v60  ;;  %v9912_v11 = vld [vmem:[#allocation4 + $0x598] sm:$0xf]  ;;  %v17537_v60 = vld [vmem:[#allocation43_spill] sm:$0xff] }
 0x653   :  { %5162 = vmatmul.bf16.gmra.mxu1 %v17533_v25  ;;  %v5714_v41 = vrot.slane %v5713_v0, 2  ;;  %v6017_v61 = vadd.f32 %v6016_v51, %v6015_v7  ;;  %v4896_v25 = vpop.f32.mrf.mxu3  ;;  %v4957_v7 = vpop.f32.mrf.mxu1  ;;  %5249 = vmatpush.bf16.msrb.mxu3 %v9209_v4  ;;  %v17539_v4 = vld [vmem:[#allocation42_spill] sm:$0xff] }
 0x654   :  { %v5104_v62 = vpop.f32.mrf.mxu0  ;;  %v4897_v51 = vadd.f32 %v4896_v25, %v14799_v28 }
 0x655   :  { %v5715_v36 = vadd.f32 %v5714_v41, %v5713_v0  ;;  %v6018_v1 = vrot.slane %v6017_v61, 2  ;;  %v5006_v0 = vpop.f32.mrf.mxu2  ;;  %v10992_v41 = vld [vmem:[#allocation4 + $0x5f4] sm:$0xf0] }
 0x656   :  { %v15148_v28 = vadd.f32 %v4945_v24, %v4897_v51 }
 0x657   :  { %v5716_v45 = vrot.slane %v5715_v36, 1  ;;  %v6019_v30 = vadd.f32 %v6018_v1, %v6017_v61  ;;  %v4958_v1 = vadd.f32 %v4957_v7, %v17536_v43  ;;  %v9945_v61 = vor.u32 %v10992_v41, %v9944_v56  ;;  %5299 = vmatmul.bf16.vlgmr.msrb.gmra.mxu0 %v17537_v60  ;;  %v11040_v43 = vld [vmem:[#allocation4 + $0x774] sm:$0xf0]  ;;  %5250 = vmatmul.bf16.vlgmr.msrb.gmra.mxu3 %v17539_v4  ;;  %v17540_v7 = vld [vmem:[#allocation61_spill] sm:$0xff] }
 0x658   :  { %17538 = vst [vmem:[#allocation28_spill] sm:$0xff] %v15148_v28  ;;  %v15156_v56 = vperm.slane %v17540_v7, 5  ;;  %v17542_v7 = vld [vmem:[#allocation64_spill] sm:$0xff] }
 0x659   :  { %v5717_v29 = vadd.f32 %v5716_v45, %v5715_v36  ;;  %v6020_v59 = vrot.slane %v6019_v30, 1  ;;  %v15152_v23 = vadd.f32 %v5006_v0, %v4958_v1  ;;  %5340 = vmatpush.bf16.msra.mxu1 %v9945_v61  ;;  %v9913_v36 = vor.u32 %v10984_v34, %v9912_v11  ;;  %v10136_v45 = vld [vmem:[#allocation4 + $0x758] sm:$0xf] }
 0x65a   :  { %v9880_v34 = vld [vmem:[#allocation4 + $0x558] sm:$0xf] }
 0x65b   :  { %v15150_v25 = vmul.f32 0.0078125, %v5717_v29  ;;  %v6021_v38 = vadd.f32 %v6020_v59, %v6019_v30  ;;  %v10137_v30 = vor.u32 %v11040_v43, %v10136_v45  ;;  %v5055_v0 = vpop.f32.mrf.mxu3  ;;  %v10976_v29 = vld [vmem:[#allocation4 + $0x574] sm:$0xf0]  ;;  %v4959_v1 = vpop.f32.mrf.mxu1  ;;  %v17544_v43 = vld [vmem:[#allocation38_spill] sm:$0xff] }
 0x65c   :  { %v5056_v59 = vadd.f32 %v5055_v0, %v15156_v56  ;;  %v17541_v11 = vld [vmem:[#allocation36_spill] sm:$0xff]  ;;  %v4960_v4 = vadd.f32 %v4959_v1, %v17542_v7  ;;  %v17546_v1 = vld [vmem:[#allocation47_spill] sm:$0xff]  ;;  %v17548_v7 = vld [vmem:[#allocation46_spill] sm:$0xff] }
 0x65d   :  { %v6109_v41 = vmul.f32 0.0078125, %v6021_v38  ;;  %v6117_v48 = vmul.f32 %v15150_v25, %v15150_v25  ;;  %5341 = vmatpush.bf16.msra.mxu1 %v9913_v36  ;;  %v5008_v61 = vpop.f32.mrf.mxu2  ;;  %v9816_v28 = vld [vmem:[#allocation4 + $0x4d8] sm:$0xf] }
 0x65e   :  { %v15165_v24 = vadd.f32 %v5104_v62, %v5056_v59  ;;  %v10104_v62 = vld [vmem:[#allocation4 + $0x718] sm:$0xf] }
 0x65f   :  { %5211 = vmatmul.bf16.gmra.mxu2 %v17535_v57  ;;  %v10169_v57 = vor.u32 %v11048_v35, %v10168_v46  ;;  %v6125_v51 = vsub.f32 %v6109_v41, %v6117_v48  ;;  %v5106_v46 = vpop.f32.mrf.mxu0  ;;  %v9881_v35 = vor.u32 %v10976_v29, %v9880_v34  ;;  %v17545_v29 = vld [vmem:[#allocation65_spill] sm:$0xff] }
 0x660   :  { %17543 = vst [vmem:[#allocation53_spill] sm:$0xff] %v15165_v24 }
 0x661   :  { %5390 = vmatpush.bf16.msrb.mxu2 %v10169_v57  ;;  %v6261_v38 = vadd.f32 0.8, %v6125_v51  ;;  %v15167_v57 = vadd.f32 %v5008_v61, %v4960_v4  ;;  %5342 = vmatpush.bf16.msra.mxu1 %v9881_v35 }
 0x663   :  { %5167 = vmatmul.bf16.gmra.mxu1 %v17541_v11  ;;  %11234 = vrsqrt.f32 %v6261_v38  ;;  %v5057_v36 = vpop.f32.mrf.mxu3  ;;  %v4962_v48 = vpop.f32.mrf.mxu1  ;;  %vm6302_vm13 = vweird.f32 %v6261_v38 }
 0x664   :  { %v5058_v41 = vadd.f32 %v5057_v36, %v15156_v56  ;;  %v4963_v51 = vadd.f32 %v4962_v48, %v17545_v29  ;;  %v17550_v48 = vld [vmem:[#allocation75_spill] sm:$0xff] }
 0x665   :  { %5391 = vmatpush.bf16.msrb.mxu2 %v10137_v30  ;;  %v5011_v0 = vpop.f32.mrf.mxu2  ;;  %v11032_v30 = vld [vmem:[#allocation4 + $0x734] sm:$0xf0] }
 0x666   :  { %v15173_v59 = vadd.f32 %v5106_v46, %v5058_v41  ;;  %v15175_v4 = vadd.f32 %v5011_v0, %v4963_v51  ;;  %v10105_v61 = vor.u32 %v11032_v30, %v10104_v62  ;;  %v9848_v51 = vld [vmem:[#allocation4 + $0x518] sm:$0xf]  ;;  %v17552_v46 = vld [vmem:[#allocation74_spill] sm:$0xff] }
 0x667   :  { %v5109_v45 = vpop.f32.mrf.mxu0  ;;  %5304 = vmatmul.bf16.gmra.mxu0 %v17546_v1  ;;  %5255 = vmatmul.bf16.gmra.mxu3 %v17548_v7  ;;  %v15192_v60 = vperm.slane %v17552_v46, 3 }
 0x668   :  { %17547 = vst [vmem:[#allocation63_spill] sm:$0xff] %v15173_v59 }
 0x669   :  { %v11235_v34 = vpop.eup %11234  ;;  %5392 = vmatpush.bf16.msrb.mxu2 %v10105_v61 }
 0x66a   :  { %v6297_v11 = vmul.f32 %v11235_v34, %v6261_v38  ;;  %vm6303_vm12 = vweird.f32 %v11235_v34 }
 0x66b   :  { %v5060_v41 = vpop.f32.mrf.mxu3  ;;  %v4964_v36 = vpop.f32.mrf.mxu1  ;;  %vm6304_vm14 = vmor %vm6302_vm13, %vm6303_vm12 }
 0x66c   :  { %v6298_v35 = vmul.f32 %v11235_v34, %v6297_v11  ;;  %v10968_v11 = vld [vmem:[#allocation4 + $0x534] sm:$0xf0]  ;;  %v5061_v30 = vadd.f32 %v5060_v41, %v15156_v56  ;;  %v4965_v59 = vadd.f32 %v4964_v36, %v17550_v48  ;;  %v17553_v41 = vsub.f32 %v15135_v2, %v15150_v25 }
 0x66d   :  { %v5013_v61 = vpop.f32.mrf.mxu2  ;;  %v9849_v7 = vor.u32 %v10968_v11, %v9848_v51 }
 0x66e   :  { %v6299_v1 = vmul.f32 0.5, %v6298_v35  ;;  %v15189_v35 = vadd.f32 %v5109_v45, %v5061_v30  ;;  %v17554_v45 = vld [vmem:[#allocation37_spill] sm:$0xff]  ;;  %v11024_v30 = vld [vmem:[#allocation4 + $0x6f4] sm:$0xf0] }
 0x66f   :  { %5216 = vmatmul.bf16.gmra.mxu2 %v17544_v43  ;;  %v5111_v0 = vpop.f32.mrf.mxu0  ;;  %v17549_v43 = vld [vmem:[#allocation22_spill] sm:$0xff]  ;;  %5343 = vmatpush.bf16.msra.mxu1 %v9849_v7 }
 0x670   :  { %v6300_v62 = vsub.f32 1.5, %v6299_v1  ;;  %17551 = vst [vmem:[#allocation55_spill] sm:$0xff] %v15189_v35  ;;  %v15194_v1 = vadd.f32 %v5013_v61, %v4965_v59  ;;  %v17555_v59 = vld [vmem:[#allocation76_spill] sm:$0xff] }
 0x672   :  { %v6301_v29 = vmul.f32 %v11235_v34, %v6300_v62 }
 0x673   :  { %5172 = vmatmul.bf16.gmra.mxu1 %v17549_v43  ;;  %v5062_v38 = vpop.f32.mrf.mxu3  ;;  %v4967_v46 = vpop.f32.mrf.mxu1 }
 0x674   :  { %v15196_v24 = vsel %vm6304_vm14, %v11235_v34, %v6301_v29  ;;  %v5063_v48 = vadd.f32 %v5062_v38, %v15156_v56  ;;  %v4968_v62 = vadd.f32 %v4967_v46, %v17555_v59  ;;  %v17556_v34 = vld [vmem:[#allocation21_spill] sm:$0xff]  ;;  %v10072_v29 = vld [vmem:[#allocation4 + $0x6d8] sm:$0xf]  ;;  %v6149_v46 = vsub.f32 %v14812_v8, %v15150_v25 }
 0x675   :  { %v6469_v51 = vmul.f32 %v15196_v24, %v17553_v41  ;;  %v5016_v11 = vpop.f32.mrf.mxu2  ;;  %v10073_v41 = vor.u32 %v11024_v30, %v10072_v29  ;;  %v17560_v38 = vld [vmem:[#allocation73_spill] sm:$0xff] }
 0x676   :  { %v15209_v2 = vadd.f32 %v5111_v0, %v5063_v48  ;;  %v15211_v61 = vadd.f32 %v5016_v11, %v4968_v62  ;;  %v6141_v35 = vsub.f32 %v17560_v38, %v15150_v25  ;;  %v10960_v0 = vld [vmem:[#allocation4 + $0x4f4] sm:$0xf0]  ;;  %v6157_v48 = vsub.f32 %v14829_v12, %v15150_v25 }
 0x677   :  { %v15203_v36 = vmul.f32 %v15192_v60, %v6469_v51  ;;  %v5114_v7 = vpop.f32.mrf.mxu0  ;;  %5309 = vmatmul.bf16.gmra.mxu0 %v17556_v34  ;;  %v17558_v51 = vld [vmem:[#allocation20_spill] sm:$0xff]  ;;  %5393 = vmatpush.bf16.msrb.mxu2 %v10073_v41  ;;  %v6165_v11 = vsub.f32 %v14849_v20, %v15150_v25  ;;  %v6173_v62 = vsub.f32 %v14866_v19, %v15150_v25 }
 0x678   :  { %17557 = vst [vmem:[#allocation62_spill] sm:$0xff] %v15209_v2  ;;  %5260 = vmatmul.bf16.gmra.mxu3 %v17558_v51  ;;  %v9817_v41 = vor.u32 %v10960_v0, %v9816_v28  ;;  %v17561_v38 = vld [vmem:[#allocation52_spill] sm:$0xff]  ;;  %v6357_v12 = vmul.f32 %v15196_v24, %v6141_v35  ;;  %v6365_v20 = vmul.f32 %v15196_v24, %v6149_v46  ;;  %v17563_v0 = vld [vmem:[#allocation77_spill] sm:$0xff] }
 0x679   :  { %v6373_v19 = vmul.f32 %v15196_v24, %v6157_v48  ;;  %v6381_v50 = vmul.f32 %v15196_v24, %v6165_v11  ;;  %v6389_v46 = vmul.f32 %v15196_v24, %v6173_v62  ;;  %v15250_v48 = vmul.f32 %v15152_v23, %v15152_v23 }
 0x67a   :  { %5344 = vmatpush.bf16.msra.mxu1 %v9817_v41  ;;  %v6503_v28 = vmul.f32 %v15192_v60, %v6357_v12 }
 0x67b   :  { %v5065_v59 = vpop.f32.mrf.mxu3  ;;  %v4969_v30 = vpop.f32.mrf.mxu1  ;;  %v6519_v35 = vmul.f32 %v15192_v60, %v6373_v19  ;;  %v17564_v19 = vld [vmem:[#allocation44_spill] sm:$0xff] }
 0x67c   :  { %v5066_v29 = vadd.f32 %v5065_v59, %v15156_v56  ;;  %v4970_v2 = vadd.f32 %v4969_v30, %v14951_v13  ;;  %v6511_v13 = vmul.f32 %v15192_v60, %v6365_v20  ;;  %v6527_v30 = vmul.f32 %v15192_v60, %v6381_v50 }
 0x67d   :  { %v5018_v8 = vpop.f32.mrf.mxu2 }
 0x67f   :  { %5221 = vmatmul.bf16.gmra.mxu2 %v17554_v45  ;;  %v17559_v45 = vld [vmem:[#allocation59_spill] sm:$0xff]  ;;  %v5116_v34 = vpop.f32.mrf.mxu0 }
 0x680   :  { %v6133_v43 = vsub.f32 %v17559_v45, %v15150_v25  ;;  %v6181_v45 = vsub.f32 %v14922_v6, %v15150_v25  ;;  %v15236_v6 = vadd.f32 %v5114_v7, %v5066_v29 }
 0x682   :  { %v6349_v51 = vmul.f32 %v15196_v24, %v6133_v43  ;;  %17562 = vst [vmem:[#allocation57_spill] sm:$0xff] %v15236_v6  ;;  %v15243_v43 = vadd.f32 %v5018_v8, %v4970_v2  ;;  %v6397_v11 = vmul.f32 %v15196_v24, %v6181_v45  ;;  %v6189_v8 = vsub.f32 %v14955_v49, %v15150_v25 }
 0x683   :  { %5177 = vmatmul.bf16.gmra.mxu1 %v17561_v38  ;;  %v15241_v38 = vperm.slane %v17563_v0, 3  ;;  %v5067_v12 = vpop.f32.mrf.mxu3  ;;  %v4972_v50 = vpop.f32.mrf.mxu1 }
 0x684   :  { %v6495_v59 = vmul.f32 %v15192_v60, %v6349_v51  ;;  %v4973_v6 = vadd.f32 %v4972_v50, %v14985_v16  ;;  %v10041_v16 = vor.u32 %v11016_v42, %v10040_v3  ;;  %v6213_v3 = vsub.f32 %v15052_v55, %v15150_v25  ;;  %v9784_v50 = vld [vmem:[#allocation4 + $0x498] sm:$0xf] }
 0x685   :  { %v6650_v51 = vadd.f32 %v15241_v38, %v6503_v28  ;;  %v6658_v29 = vadd.f32 %v15241_v38, %v6511_v13  ;;  %v6666_v2 = vadd.f32 %v15241_v38, %v6519_v35  ;;  %v5068_v28 = vadd.f32 %v5067_v12, %v15156_v56  ;;  %v5021_v0 = vpop.f32.mrf.mxu2 }
 0x686   :  { %v6642_v7 = vadd.f32 %v15241_v38, %v6495_v59  ;;  %v6197_v59 = vsub.f32 %v14988_v5, %v15150_v25  ;;  %v6674_v12 = vadd.f32 %v15241_v38, %v6527_v30  ;;  %5394 = vmatpush.bf16.msrb.mxu2 %v10041_v16 }
 0x687   :  { %vm6778_vm0 = vcmp.gt.f32.partialorder %v6650_v51, 0.0  ;;  %v6906_v41 = vmul.f32 0.2, %v6650_v51  ;;  %v5119_v20 = vpop.f32.mrf.mxu0  ;;  %vm6786_vm1 = vcmp.gt.f32.partialorder %v6658_v29, 0.0  ;;  %vm6794_vm2 = vcmp.gt.f32.partialorder %v6666_v2, 0.0  ;;  %5314 = vmatmul.bf16.gmra.mxu0 %v17566_v52 }
 0x688   :  { %vm6770_vm15 = vcmp.gt.f32.partialorder %v6642_v7, 0.0  ;;  %v6898_v62 = vmul.f32 0.2, %v6642_v7  ;;  %v6914_v45 = vmul.f32 0.2, %v6658_v29  ;;  %v15269_v47 = vadd.f32 %v5116_v34, %v5068_v28 }
 0x689   :  { %v7034_v49 = vsel %vm6778_vm0, %v6650_v51, %v6906_v41  ;;  %v6922_v35 = vmul.f32 0.2, %v6666_v2  ;;  %v15274_v51 = vadd.f32 %v5021_v0, %v4973_v6  ;;  %vm6802_vm3 = vcmp.gt.f32.partialorder %v6674_v12, 0.0  ;;  %v10952_v0 = vld [vmem:[#allocation4 + $0x4b4] sm:$0xf0] }
 0x68a   :  { %v7026_v13 = vsel %vm6770_vm15, %v6642_v7, %v6898_v62  ;;  %v7042_v22 = vsel %vm6786_vm1, %v6658_v29, %v6914_v45  ;;  %v6405_v7 = vmul.f32 %v15196_v24, %v6189_v8  ;;  %v6930_v41 = vmul.f32 0.2, %v6674_v12 }
 0x68b   :  { %v15265_v18 = vpack.c.bf16 %v7034_v49, %v7026_v13  ;;  %v7050_v5 = vsel %vm6794_vm2, %v6666_v2, %v6922_v35  ;;  %v6543_v34 = vmul.f32 %v15192_v60, %v6397_v11  ;;  %v6205_v6 = vsub.f32 %v15028_v21, %v15150_v25  ;;  %v4974_v35 = vpop.f32.mrf.mxu1 }
 0x68c   :  { %v15276_v62 = vpack.c.bf16 %v7050_v5, %v7042_v22  ;;  %v6551_v45 = vmul.f32 %v15192_v60, %v6405_v7  ;;  %v7058_v42 = vsel %vm6802_vm3, %v6674_v12, %v6930_v41  ;;  %v6413_v8 = vmul.f32 %v15196_v24, %v6197_v59 }
 0x68d   :  { %17565 = vst [vmem:[#allocation61_spill] sm:$0xff] %v15265_v18  ;;  %v6690_v22 = vadd.f32 %v15241_v38, %v6543_v34  ;;  %v5822_v11 = vmul.f32 %v15167_v57, %v15167_v57  ;;  %v6421_v21 = vmul.f32 %v15196_v24, %v6205_v6  ;;  %v6429_v49 = vmul.f32 %v15196_v24, %v6213_v3  ;;  %v5023_v5 = vpop.f32.mrf.mxu2  ;;  %v9210_v18 = vld [vmem:[#allocation4 + $0x38] sm:$0xf0] }
 0x68e   :  { %17567 = vst [vmem:[#allocation64_spill] sm:$0xff] %v15276_v62  ;;  %v6698_v30 = vadd.f32 %v15241_v38, %v6551_v45  ;;  %v9785_v12 = vor.u32 %v10952_v0, %v9784_v50  ;;  %v4975_v7 = vadd.f32 %v4974_v35, %v15020_v17  ;;  %v6559_v34 = vmul.f32 %v15192_v60, %v6413_v8 }
 0x68f   :  { %5226 = vmatmul.bf16.gmra.mxu2 %v17564_v19  ;;  %v6535_v19 = vmul.f32 %v15192_v60, %v6389_v46  ;;  %v17568_v46 = vld [vmem:[#allocation27_spill] sm:$0xff]  ;;  %v5121_v28 = vpop.f32.mrf.mxu0  ;;  %vm6818_vm5 = vcmp.gt.f32.partialorder %v6690_v22, 0.0  ;;  %v6946_v16 = vmul.f32 0.2, %v6690_v22  ;;  %v6567_v45 = vmul.f32 %v15192_v60, %v6421_v21 }
 0x690   :  { %5265 = vmatmul.bf16.gmra.mxu3 %v17568_v46  ;;  %vm6826_vm6 = vcmp.gt.f32.partialorder %v6698_v30, 0.0  ;;  %v6954_v41 = vmul.f32 0.2, %v6698_v30  ;;  %5345 = vmatpush.bf16.msra.mxu1 %v9785_v12  ;;  %v15306_v3 = vadd.f32 %v5023_v5, %v4975_v7  ;;  %v6575_v17 = vmul.f32 %v15192_v60, %v6429_v49 }
 0x691   :  { %v6682_v29 = vadd.f32 %v15241_v38, %v6535_v19  ;;  %v5070_v19 = vpop.f32.mrf.mxu3  ;;  %v6714_v0 = vadd.f32 %v15241_v38, %v6567_v45  ;;  %v5830_v35 = vmul.f32 %v15175_v4, %v15175_v4  ;;  %v17573_v45 = vsub.f32 %v15113_v58, %v15150_v25 }
 0x692   :  { %v5071_v55 = vadd.f32 %v5070_v19, %v15156_v56  ;;  %v7082_v19 = vsel %vm6826_vm6, %v6698_v30, %v6954_v41  ;;  %v6722_v21 = vadd.f32 %v15241_v38, %v6575_v17  ;;  %v10008_v17 = vld [vmem:[#allocation4 + $0x658] sm:$0xf] }
 0x693   :  { %vm6810_vm4 = vcmp.gt.f32.partialorder %v6682_v29, 0.0  ;;  %v6938_v2 = vmul.f32 0.2, %v6682_v29  ;;  %5182 = vmatmul.bf16.gmra.mxu1 %v13655_v27  ;;  %vm6842_vm8 = vcmp.gt.f32.partialorder %v6714_v0, 0.0  ;;  %v4977_v7 = vpop.f32.mrf.mxu1 }
 0x694   :  { %vm6850_vm9 = vcmp.gt.f32.partialorder %v6722_v21, 0.0 }
 0x695   :  { %v7066_v13 = vsel %vm6810_vm4, %v6682_v29, %v6938_v2  ;;  %v15298_v29 = vadd.f32 %v5119_v20, %v5071_v55  ;;  %v17570_v2 = vsub.f32 %v15080_v31, %v15150_v25  ;;  %v6706_v20 = vadd.f32 %v15241_v38, %v6559_v34 }
 0x696   :  { %v15295_v59 = vpack.c.bf16 %v7066_v13, %v7058_v42  ;;  %v7074_v42 = vsel %vm6818_vm5, %v6690_v22, %v6946_v16  ;;  %v5718_v13 = vadd.f32 %v15167_v57, %v15152_v23  ;;  %v6022_v31 = vadd.f32 %v5822_v11, %v15250_v48  ;;  %v5026_v16 = vpop.f32.mrf.mxu2 }
 0x697   :  { %v6437_v6 = vmul.f32 %v15196_v24, %v17570_v2  ;;  %v15309_v50 = vpack.c.bf16 %v7082_v19, %v7074_v42  ;;  %v17572_v22 = vsub.f32 %v15100_v10, %v15150_v25  ;;  %vm6834_vm7 = vcmp.gt.f32.partialorder %v6706_v20, 0.0  ;;  %v15324_v12 = vpop.f32.mrf.mxu0  ;;  %5319 = vmatmul.bf16.gmra.mxu0 %v17445_v63 }
 0x698   :  { %17569 = vst [vmem:[#allocation65_spill] sm:$0xff] %v15295_v59  ;;  %v6962_v49 = vmul.f32 0.2, %v6706_v20  ;;  %v6970_v55 = vmul.f32 0.2, %v6714_v0  ;;  %v6453_v2 = vmul.f32 %v15196_v24, %v17573_v45 }
 0x699   :  { %17571 = vst [vmem:[#allocation75_spill] sm:$0xff] %v15309_v50  ;;  %v6583_v8 = vmul.f32 %v15192_v60, %v6437_v6  ;;  %v6445_v30 = vmul.f32 %v15196_v24, %v17572_v22  ;;  %v5072_v5 = vpop.f32.mrf.mxu3  ;;  %v6978_v11 = vmul.f32 0.2, %v6722_v21  ;;  %v4978_v6 = vadd.f32 %v4977_v7, %v15049_v14  ;;  %v10924_v22 = vld [vmem:[#allocation4 + $0x3dc] sm:$0xf] }
 0x69a   :  { %v5073_v10 = vadd.f32 %v5072_v5, %v15156_v56  ;;  %v7090_v41 = vsel %vm6834_vm7, %v6706_v20, %v6962_v49  ;;  %v7098_v34 = vsel %vm6842_vm8, %v6714_v0, %v6970_v55  ;;  %v6599_v58 = vmul.f32 %v15192_v60, %v6453_v2  ;;  %v9690_v55 = vld [vmem:[#allocation4 + $0x3f8] sm:$0xf0] }
 0x69b   :  { %v6730_v48 = vadd.f32 %v15241_v38, %v6583_v8  ;;  %v15334_v42 = vpack.c.bf16 %v7098_v34, %v7090_v41  ;;  %v11008_v8 = vld [vmem:[#allocation4 + $0x674] sm:$0xf0]  ;;  %v7106_v20 = vsel %vm6850_vm9, %v6722_v21, %v6978_v11  ;;  %v6591_v0 = vmul.f32 %v15192_v60, %v6445_v30  ;;  %v9466_v59 = vld [vmem:[#allocation4 + $0x238] sm:$0xf0] }
 0x69c   :  { %v15337_v5 = vadd.f32 %v5121_v28, %v5073_v10  ;;  %v15342_v49 = vadd.f32 %v5026_v16, %v4978_v6  ;;  %v10009_v14 = vor.u32 %v11008_v8, %v10008_v17  ;;  %v17575_v41 = vsub.f32 %v15123_v54, %v15150_v25  ;;  %v9434_v6 = vld [vmem:[#allocation4 + $0x1f8] sm:$0xf0]  ;;  %v4979_v8 = vpop.f32.mrf.mxu1 }
 0x69d   :  { %17574 = vst [vmem:[#allocation74_spill] sm:$0xff] %v15334_v42  ;;  %vm6858_vm10 = vcmp.gt.f32.partialorder %v6730_v48, 0.0  ;;  %v6986_v19 = vmul.f32 0.2, %v6730_v48  ;;  %v9693_v28 = vor.u32 %v10924_v22, %v9690_v55  ;;  %v6738_v21 = vadd.f32 %v15241_v38, %v6591_v0  ;;  %v10944_v0 = vld [vmem:[#allocation4 + $0x474] sm:$0xf0] }
 0x69e   :  { %v6461_v34 = vmul.f32 %v15196_v24, %v17575_v41  ;;  %v6746_v30 = vadd.f32 %v15241_v38, %v6599_v58  ;;  %v5719_v11 = vadd.f32 %v5718_v13, %v15175_v4  ;;  %v6023_v16 = vadd.f32 %v6022_v31, %v5830_v35  ;;  %5395 = vmatpush.bf16.msrb.mxu2 %v10009_v14  ;;  %v5028_v22 = vpop.f32.mrf.mxu2  ;;  %v10916_v58 = vld [vmem:[#allocation4 + $0x39c] sm:$0xf] }
 0x69f   :  { %5231 = vmatmul.bf16.gmra.mxu2 %v13589_v33  ;;  %v7114_v7 = vsel %vm6858_vm10, %v6730_v48, %v6986_v19  ;;  %v6762_v54 = vadd.f32 %v15241_v38, %v15203_v36  ;;  %5487 = vmatpush.bf16.msra.mxu0 %v9693_v28  ;;  %vm6866_vm11 = vcmp.gt.f32.partialorder %v6738_v21, 0.0  ;;  %v6994_v25 = vmul.f32 0.2, %v6738_v21  ;;  %v15362_v35 = vpop.f32.mrf.mxu0  ;;  %v9752_v19 = vld [vmem:[#allocation4 + $0x458] sm:$0xf] }
 0x6a0   :  { %5270 = vmatmul.bf16.gmra.mxu3 %v17511_v37  ;;  %v15349_v10 = vpack.c.bf16 %v7114_v7, %v7106_v20  ;;  %v6607_v48 = vmul.f32 %v15192_v60, %v6461_v34  ;;  %vm6874_vm12 = vcmp.gt.f32.partialorder %v6746_v30, 0.0  ;;  %v7002_v24 = vmul.f32 0.2, %v6746_v30  ;;  %v10860_v60 = vld [vmem:[#allocation4 + $0x1dc] sm:$0xf] }
 0x6a1   :  { %v5720_v45 = vadd.f32 %v5719_v11, %v15194_v1  ;;  %v5838_v2 = vmul.f32 %v15194_v1, %v15194_v1  ;;  %v5846_v13 = vmul.f32 %v15211_v61, %v15211_v61  ;;  %v5075_v31 = vpop.f32.mrf.mxu3  ;;  %v9437_v20 = vor.u32 %v10860_v60, %v9434_v6  ;;  %v9658_v14 = vld [vmem:[#allocation4 + $0x3b8] sm:$0xf0] }
 0x6a2   :  { %17576 = vst [vmem:[#allocation76_spill] sm:$0xff] %v15349_v10  ;;  %v6754_v36 = vadd.f32 %v15241_v38, %v6607_v48  ;;  %v5076_v17 = vadd.f32 %v5075_v31, %v15156_v56  ;;  %v7122_v55 = vsel %vm6866_vm11, %v6738_v21, %v6994_v25  ;;  %v7130_v7 = vsel %vm6874_vm12, %v6746_v30, %v7002_v24  ;;  %v10852_v11 = vld [vmem:[#allocation4 + $0x19c] sm:$0xf] }
 0x6a3   :  { %5187 = vmatmul.bf16.gmra.mxu1 %v17384_v32  ;;  %v4980_v41 = vadd.f32 %v4979_v8, %v15076_v44  ;;  %v9753_v34 = vor.u32 %v10944_v0, %v9752_v19  ;;  %v9661_v28 = vor.u32 %v10916_v58, %v9658_v14  ;;  %v9402_v38 = vld [vmem:[#allocation4 + $0x1b8] sm:$0xf0]  ;;  %v15370_v31 = vpack.c.bf16 %v7130_v7, %v7122_v55 }
 0x6a4   :  { %v10908_v48 = vld [vmem:[#allocation4 + $0x35c] sm:$0xf]  ;;  %5438 = vmatpush.bf16.msra.mxu3 %v9437_v20  ;;  %v9405_v60 = vor.u32 %v10852_v11, %v9402_v38  ;;  %v15373_v10 = vadd.f32 %v15324_v12, %v5076_v17  ;;  %vm6882_vm13 = vcmp.gt.f32.partialorder %v6754_v36, 0.0  ;;  %vm6890_vm14 = vcmp.gt.f32.partialorder %v6762_v54, 0.0 }
 0x6a5   :  { %17577 = vst [vmem:[#allocation59_spill] sm:$0xff] %v15370_v31  ;;  %v9626_v6 = vld [vmem:[#allocation4 + $0x378] sm:$0xf0]  ;;  %v15375_v21 = vadd.f32 %v5028_v22, %v4980_v41  ;;  %5346 = vmatpush.bf16.msra.mxu1 %v9753_v34  ;;  %5488 = vmatpush.bf16.msra.mxu0 %v9661_v28  ;;  %v7010_v30 = vmul.f32 0.2, %v6754_v36  ;;  %v6024_v24 = vadd.f32 %v6023_v16, %v5838_v2 }
 0x6a6   :  { %v9629_v44 = vor.u32 %v10908_v48, %v9626_v6  ;;  %v7018_v25 = vmul.f32 0.2, %v6762_v54  ;;  %v5721_v19 = vadd.f32 %v5720_v45, %v15211_v61  ;;  %v5854_v8 = vmul.f32 %v15243_v43, %v15243_v43  ;;  %v10844_v55 = vld [vmem:[#allocation4 + $0x15c] sm:$0xf]  ;;  %v5031_v2 = vpop.f32.mrf.mxu2 }
 0x6a7   :  { %v7138_v20 = vsel %vm6882_vm13, %v6754_v36, %v7010_v30  ;;  %v6025_v17 = vadd.f32 %v6024_v24, %v5846_v13  ;;  %v15383_v14 = vpop.f32.mrf.mxu0  ;;  %v9370_v7 = vld [vmem:[#allocation4 + $0x178] sm:$0xf0]  ;;  %v5862_v16 = vmul.f32 %v15274_v51, %v15274_v51  ;;  %v5870_v6 = vmul.f32 %v15306_v3, %v15306_v3  ;;  %5324 = vmatmul.bf16.gmra.mxu0 %v13260_v39  ;;  %v9976_v30 = vld [vmem:[#allocation4 + $0x618] sm:$0xf] }
 0x6a8   :  { %v7146_v0 = vsel %vm6890_vm14, %v6762_v54, %v7018_v25  ;;  %5439 = vmatpush.bf16.msra.mxu3 %v9405_v60  ;;  %v5722_v22 = vadd.f32 %v5721_v19, %v15243_v43  ;;  %v4982_v54 = vpop.f32.mrf.mxu1  ;;  %v9373_v36 = vor.u32 %v10844_v55, %v9370_v7  ;;  %v10900_v41 = vld [vmem:[#allocation4 + $0x31c] sm:$0xf]  ;;  %v11000_v25 = vld [vmem:[#allocation4 + $0x634] sm:$0xf0] }
 0x6a9   :  { %v15380_v12 = vpack.c.bf16 %v7146_v0, %v7138_v20  ;;  %v5077_v58 = vpop.f32.mrf.mxu3  ;;  %5489 = vmatpush.bf16.msra.mxu0 %v9629_v44  ;;  %v9594_v13 = vld [vmem:[#allocation4 + $0x338] sm:$0xf0]  ;;  %v6026_v34 = vadd.f32 %v6025_v17, %v5854_v8  ;;  %v4983_v11 = vadd.f32 %v4982_v54, %v15095_v15  ;;  %v9977_v15 = vor.u32 %v11000_v25, %v9976_v30 }
 0x6aa   :  { %v5078_v45 = vadd.f32 %v5077_v58, %v15156_v56  ;;  %v5723_v28 = vadd.f32 %v5722_v22, %v15274_v51  ;;  %v9597_v38 = vor.u32 %v10900_v41, %v9594_v13  ;;  %v10836_v48 = vld [vmem:[#allocation4 + $0x11c] sm:$0xf]  ;;  %v5878_v22 = vmul.f32 %v15342_v49, %v15342_v49 }
 0x6ab   :  { %17578 = vst [vmem:[#allocation73_spill] sm:$0xff] %v15380_v12  ;;  %v9338_v60 = vld [vmem:[#allocation4 + $0x138] sm:$0xf0]  ;;  %v15397_v8 = vadd.f32 %v5031_v2, %v4983_v11  ;;  %v6027_v0 = vadd.f32 %v6026_v34, %v5862_v16  ;;  %5396 = vmatpush.bf16.msrb.mxu2 %v9977_v15 }
 0x6ac   :  { %5440 = vmatpush.bf16.msra.mxu3 %v9373_v36  ;;  %v9341_v44 = vor.u32 %v10836_v48, %v9338_v60  ;;  %v10892_v24 = vld [vmem:[#allocation4 + $0x2dc] sm:$0xf]  ;;  %v15395_v19 = vadd.f32 %v15362_v35, %v5078_v45  ;;  %v5724_v17 = vadd.f32 %v5723_v28, %v15306_v3  ;;  %v5886_v35 = vmul.f32 %v15375_v21, %v15375_v21  ;;  %v9720_v36 = vld [vmem:[#allocation4 + $0x418] sm:$0xf] }
 0x6ad   :  { %5490 = vmatpush.bf16.msra.mxu0 %v9597_v38  ;;  %v9562_v20 = vld [vmem:[#allocation4 + $0x2f8] sm:$0xf0]  ;;  %v6028_v55 = vadd.f32 %v6027_v0, %v5870_v6  ;;  %v10936_v48 = vld [vmem:[#allocation4 + $0x434] sm:$0xf0] }
 0x6ae   :  { %v9565_v58 = vor.u32 %v10892_v24, %v9562_v20  ;;  %v5725_v7 = vadd.f32 %v5724_v17, %v15342_v49  ;;  %v10828_v16 = vld [vmem:[#allocation4 + $0xdc] sm:$0xf]  ;;  %v5033_v11 = vpop.f32.mrf.mxu2  ;;  %v9721_v25 = vor.u32 %v10936_v48, %v9720_v36 }
 0x6af   :  { %5236 = vmatmul.bf16.gmra.mxu2 %v17390_v53  ;;  %v5131_v54 = vpop.f32.mrf.mxu0  ;;  %v9306_v2 = vld [vmem:[#allocation4 + $0xf8] sm:$0xf0]  ;;  %v6029_v41 = vadd.f32 %v6028_v55, %v5878_v22 }
 0x6b0   :  { %5275 = vmatmul.bf16.gmra.mxu3 %v17516_v9  ;;  %v5726_v13 = vadd.f32 %v5725_v7, %v15375_v21  ;;  %v4984_v28 = vpop.f32.mrf.mxu1  ;;  %v9309_v38 = vor.u32 %v10828_v16, %v9306_v2  ;;  %v10884_v60 = vld [vmem:[#allocation4 + $0x29c] sm:$0xf]  ;;  %5347 = vmatpush.bf16.msra.mxu1 %v9721_v25 }
 0x6b1   :  { %5441 = vmatpush.bf16.msra.mxu3 %v9341_v44  ;;  %v5080_v45 = vpop.f32.mrf.mxu3  ;;  %5491 = vmatpush.bf16.msra.mxu0 %v9565_v58  ;;  %v9530_v6 = vld [vmem:[#allocation4 + $0x2b8] sm:$0xf0]  ;;  %v5894_v44 = vmul.f32 %v15397_v8, %v15397_v8  ;;  %v4985_v30 = vadd.f32 %v4984_v28, %v15111_v26  ;;  %v6030_v17 = vadd.f32 %v6029_v41, %v5886_v35 }
 0x6b2   :  { %v5081_v34 = vadd.f32 %v5080_v45, %v15156_v56  ;;  %v9533_v24 = vor.u32 %v10884_v60, %v9530_v6  ;;  %v10820_v15 = vld [vmem:[#allocation4 + $0x9c] sm:$0xf]  ;;  %v5727_v7 = vadd.f32 %v5726_v13, %v15397_v8 }
 0x6b3   :  { %v9274_v20 = vld [vmem:[#allocation4 + $0xb8] sm:$0xf0]  ;;  %v15415_v45 = vadd.f32 %v5033_v11, %v4985_v30  ;;  %v6031_v26 = vadd.f32 %v6030_v17, %v5894_v44  ;;  %5348 = vmatmul.bf16.vlgmr.msra.gmra.mxu1 %v17517_v40 }
 0x6b4   :  { %v10876_v0 = vld [vmem:[#allocation4 + $0x25c] sm:$0xf]  ;;  %v9277_v22 = vor.u32 %v10820_v15, %v9274_v20  ;;  %v15412_v55 = vadd.f32 %v15383_v14, %v5081_v34 }
 0x6b5   :  { %5442 = vmatpush.bf16.msra.mxu3 %v9309_v38  ;;  %v9498_v58 = vld [vmem:[#allocation4 + $0x278] sm:$0xf0]  ;;  %5492 = vmatpush.bf16.msra.mxu0 %v9533_v24  ;;  %v5728_v2 = vadd.f32 %v5727_v7, %v15415_v45  ;;  %v5902_v36 = vmul.f32 %v15415_v45, %v15415_v45  ;;  %v17580_v38 = vld [vmem:[#allocation31_spill] sm:$0xff] }
 0x6b6   :  { %v9501_v16 = vor.u32 %v10876_v0, %v9498_v58  ;;  %v17579_v34 = vld [vmem:[#allocation24_spill] sm:$0xff]  ;;  %v5036_v11 = vpop.f32.mrf.mxu2  ;;  %v17582_v30 = vld [vmem:[#allocation49_spill] sm:$0xff] }
 0x6b7   :  { %v6032_v35 = vadd.f32 %v6031_v26, %v5902_v36  ;;  %v5134_v14 = vpop.f32.mrf.mxu0  ;;  %v17581_v60 = vld [vmem:[#allocation48_spill] sm:$0xff] }
 0x6b8   :  { %v4987_v28 = vpop.f32.mrf.mxu1  ;;  %5329 = vmatmul.bf16.gmra.mxu0 %v17581_v60  ;;  %v17583_v7 = vld [vmem:[#allocation32_spill] sm:$0xff] }
 0x6b9   :  { %5443 = vmatpush.bf16.msra.mxu3 %v9277_v22  ;;  %v5082_v41 = vpop.f32.mrf.mxu3  ;;  %5493 = vmatpush.bf16.msra.mxu0 %v9501_v16  ;;  %v4988_v48 = vadd.f32 %v4987_v28, %v17580_v38  ;;  %v10138_v60 = vld [vmem:[#allocation4 + $0x778] sm:$0xf0] }
 0x6ba   :  { %v5083_v13 = vadd.f32 %v5082_v41, %v15156_v56  ;;  %v17584_v41 = vld [vmem:[#allocation25_spill] sm:$0xff] }
 0x6bb   :  { %v15427_v44 = vadd.f32 %v5036_v11, %v4988_v48  ;;  %v17585_v11 = vld [vmem:[#allocation34_spill] sm:$0xff] }
 0x6bc   :  { %v15425_v6 = vadd.f32 %v5131_v54, %v5083_v13 }
 0x6bd   :  { %v5729_v25 = vadd.f32 %v5728_v2, %v15427_v44  ;;  %v5910_v24 = vmul.f32 %v15427_v44, %v15427_v44 }
 0x6be   :  { %v5038_v58 = vpop.f32.mrf.mxu2 }
 0x6bf   :  { %5397 = vmatmul.bf16.vlgmr.msrb.gmra.mxu2 %v17579_v34  ;;  %v6033_v15 = vadd.f32 %v6032_v35, %v5910_v24  ;;  %v5136_v0 = vpop.f32.mrf.mxu0 }
 0x6c0   :  { %5280 = vmatmul.bf16.gmra.mxu3 %v17582_v30  ;;  %v4989_v22 = vpop.f32.mrf.mxu1 }
 0x6c1   :  { %v5085_v20 = vpop.f32.mrf.mxu3  ;;  %v4990_v16 = vadd.f32 %v4989_v22, %v17583_v7 }
 0x6c2   :  { %v5086_v17 = vadd.f32 %v5085_v20, %v15156_v56 }
 0x6c3   :  { %v15437_v26 = vadd.f32 %v5038_v58, %v4990_v16  ;;  %5353 = vmatmul.bf16.gmra.mxu1 %v17584_v41  ;;  %v17589_v58 = vld [vmem:[#allocation40_spill] sm:$0xff] }
 0x6c4   :  { %v15435_v54 = vadd.f32 %v5134_v14, %v5086_v17  ;;  %v17586_v14 = vld [vmem:[#allocation51_spill] sm:$0xff]  ;;  %v17587_v17 = vld [vmem:[#allocation41_spill] sm:$0xff] }
 0x6c5   :  { %v5730_v36 = vadd.f32 %v5729_v25, %v15437_v26  ;;  %v5918_v2 = vmul.f32 %v15437_v26, %v15437_v26  ;;  %v10980_v41 = vld [vmem:[#allocation4 + $0x59c] sm:$0xf] }
 0x6c6   :  { %v5041_v24 = vpop.f32.mrf.mxu2 }
 0x6c7   :  { %v6034_v35 = vadd.f32 %v6033_v15, %v5918_v2  ;;  %v5139_v28 = vpop.f32.mrf.mxu0 }
 0x6c8   :  { %v4992_v48 = vpop.f32.mrf.mxu1  ;;  %5334 = vmatmul.bf16.gmra.mxu0 %v17587_v17 }
 0x6c9   :  { %v5087_v13 = vpop.f32.mrf.mxu3  ;;  %v4993_v20 = vadd.f32 %v4992_v48, %v17586_v14  ;;  %v17590_v14 = vld [vmem:[#allocation28_spill] sm:$0xff] }
 0x6ca   :  { %v5088_v38 = vadd.f32 %v5087_v13, %v15156_v56 }
 0x6cb   :  { %v15449_v25 = vadd.f32 %v5041_v24, %v4993_v20 }
 0x6cc   :  { %v15447_v22 = vadd.f32 %v5136_v0, %v5088_v38  ;;  %v10812_v0 = vld [vmem:[#allocation4 + $0x5c] sm:$0xf] }
 0x6cd   :  { %v5731_v15 = vadd.f32 %v5730_v36, %v15449_v25  ;;  %v5926_v7 = vmul.f32 %v15449_v25, %v15449_v25  ;;  %v9242_v38 = vld [vmem:[#allocation4 + $0x78] sm:$0xf0] }
 0x6ce   :  { %17588 = vst [vmem:[#allocation77_spill] sm:$0xff] %v15447_v22  ;;  %v5043_v48 = vpop.f32.mrf.mxu2  ;;  %v9245_v50 = vor.u32 %v10812_v0, %v9242_v38  ;;  %v10868_v36 = vld [vmem:[#allocation4 + $0x21c] sm:$0xf] }
 0x6cf   :  { %5402 = vmatmul.bf16.gmra.mxu2 %v17585_v11  ;;  %v6035_v16 = vadd.f32 %v6034_v35, %v5926_v7  ;;  %v5141_v13 = vpop.f32.mrf.mxu0  ;;  %v9469_v7 = vor.u32 %v10868_v36, %v9466_v59  ;;  %v17595_v36 = vld [vmem:[#allocation43_spill] sm:$0xff] }
 0x6d0   :  { %5285 = vmatmul.bf16.gmra.mxu3 %v17589_v58  ;;  %v4994_v31 = vpop.f32.mrf.mxu1  ;;  %v17592_v58 = vld [vmem:[#allocation35_spill] sm:$0xff] }
 0x6d1   :  { %v5090_v2 = vpop.f32.mrf.mxu3  ;;  %v4995_v42 = vadd.f32 %v4994_v31, %v17590_v14  ;;  %5444 = vmatpush.bf16.msra.mxu3 %v9245_v50  ;;  %5494 = vmatpush.bf16.msra.mxu0 %v9469_v7  ;;  %v17594_v50 = vld [vmem:[#allocation53_spill] sm:$0xff] }
 0x6d2   :  { %v5091_v12 = vadd.f32 %v5090_v2, %v15156_v56  ;;  %v10804_v2 = vld [vmem:[#allocation4 + $0x1c] sm:$0xf] }
 0x6d3   :  { %v15459_v20 = vadd.f32 %v5043_v48, %v4995_v42  ;;  %5358 = vmatmul.bf16.gmra.mxu1 %v17592_v58  ;;  %v9213_v42 = vor.u32 %v10804_v2, %v9210_v18  ;;  %v17593_v48 = vld [vmem:[#allocation45_spill] sm:$0xff] }
 0x6d4   :  { %v15457_v24 = vadd.f32 %v5139_v28, %v5091_v12 }
 0x6d5   :  { %v5732_v62 = vadd.f32 %v5731_v15, %v15459_v20  ;;  %v5934_v35 = vmul.f32 %v15459_v20, %v15459_v20  ;;  %5445 = vmatpush.bf16.msra.mxu3 %v9213_v42 }
 0x6d6   :  { %17591 = vst [vmem:[#allocation29_spill] sm:$0xff] %v15457_v24  ;;  %v5202_v2 = vpop.f32.mrf.mxu2 }
 0x6d7   :  { %v5733_v31 = vrot.slane %v5732_v62, 4  ;;  %v6036_v14 = vadd.f32 %v6035_v16, %v5934_v35  ;;  %v5300_v28 = vpop.f32.mrf.mxu0  ;;  %v17597_v35 = vld [vmem:[#allocation42_spill] sm:$0xff] }
 0x6d8   :  { %v5153_v17 = vpop.f32.mrf.mxu1  ;;  %5495 = vmatmul.bf16.vlgmr.msra.gmra.mxu0 %v17595_v36 }
 0x6d9   :  { %v5092_v12 = vpop.f32.mrf.mxu3  ;;  %v5734_v15 = vadd.f32 %v5733_v31, %v5732_v62  ;;  %v6037_v38 = vrot.slane %v6036_v14, 4  ;;  %v5154_v59 = vadd.f32 %v5153_v17, %v17594_v50  ;;  %v11052_v31 = vld [vmem:[#allocation4 + $0x7dc] sm:$0xf] }
 0x6da   :  { %v5093_v0 = vadd.f32 %v5092_v12, %v15156_v56  ;;  %v15477_v56 = vld [vmem:[%s17032_s8] sm:$0xff]  ;;  %v10202_v12 = vld [vmem:[#allocation4 + $0x7f8] sm:$0xf0] }
 0x6db   :  { %v5735_v58 = vrot.slane %v5734_v15, 2  ;;  %v6038_v16 = vadd.f32 %v6037_v38, %v6036_v14  ;;  %17598 = vst [vmem:[#allocation24_spill] sm:$0xff] %v15477_v56  ;;  %v15480_v62 = vperm.slane %v15477_v56, 6  ;;  %v11044_v50 = vld [vmem:[#allocation4 + $0x79c] sm:$0xf]  ;;  %v17599_v56 = vld [vmem:[#allocation63_spill] sm:$0xff] }
 0x6dc   :  { %v15469_v24 = vadd.f32 %v5141_v13, %v5093_v0  ;;  %v10205_v0 = vor.u32 %v11052_v31, %v10202_v12 }
 0x6dd   :  { %v5736_v7 = vadd.f32 %v5735_v58, %v5734_v15  ;;  %v6039_v18 = vrot.slane %v6038_v16, 2  ;;  %v10988_v58 = vld [vmem:[#allocation4 + $0x5dc] sm:$0xf] }
 0x6de   :  { %17596 = vst [vmem:[#allocation27_spill] sm:$0xff] %v15469_v24  ;;  %v9946_v15 = vld [vmem:[#allocation4 + $0x5f8] sm:$0xf0]  ;;  %5585 = vmatpush.bf16.msra.mxu2 %v10205_v0 }
 0x6df   :  { %5407 = vmatmul.bf16.gmra.mxu2 %v17593_v48  ;;  %v15472_v48 = vadd.f32 %v5202_v2, %v5154_v59  ;;  %v5737_v17 = vrot.slane %v5736_v7, 1  ;;  %v6040_v13 = vadd.f32 %v6039_v18, %v6038_v16  ;;  %v5302_v42 = vpop.f32.mrf.mxu0  ;;  %v10170_v24 = vld [vmem:[#allocation4 + $0x7b8] sm:$0xf0] }
 0x6e0   :  { %5446 = vmatmul.bf16.vlgmr.msra.gmra.mxu3 %v17597_v35  ;;  %v9949_v35 = vor.u32 %v10988_v58, %v9946_v15  ;;  %v5155_v2 = vpop.f32.mrf.mxu1  ;;  %v10173_v16 = vor.u32 %v11044_v50, %v10170_v24  ;;  %v9914_v18 = vld [vmem:[#allocation4 + $0x5b8] sm:$0xf0]  ;;  %v5204_v24 = vpop.f32.mrf.mxu2 }
 0x6e1   :  { %v5251_v14 = vpop.f32.mrf.mxu3  ;;  %v5738_v59 = vadd.f32 %v5737_v17, %v5736_v7  ;;  %v6041_v36 = vrot.slane %v6040_v13, 1  ;;  %v5156_v11 = vadd.f32 %v5155_v2, %v17599_v56  ;;  %v9917_v12 = vor.u32 %v10980_v41, %v9914_v18  ;;  %v10972_v7 = vld [vmem:[#allocation4 + $0x55c] sm:$0xf] }
 0x6e2   :  { %v5252_v38 = vadd.f32 %v5251_v14, %v15480_v62  ;;  %5536 = vmatpush.bf16.msrb.mxu1 %v9949_v35  ;;  %v11036_v14 = vld [vmem:[#allocation4 + $0x75c] sm:$0xf]  ;;  %5586 = vmatpush.bf16.msra.mxu2 %v10173_v16 }
 0x6e3   :  { %v15486_v30 = vmul.f32 0.0078125, %v5738_v59  ;;  %v6042_v31 = vadd.f32 %v6041_v36, %v6040_v13  ;;  %v9882_v17 = vld [vmem:[#allocation4 + $0x578] sm:$0xf0]  ;;  %v15492_v0 = vadd.f32 %v5204_v24, %v5156_v11  ;;  %v17602_v36 = vld [vmem:[#allocation38_spill] sm:$0xff] }
 0x6e4   :  { %v15484_v22 = vadd.f32 %v5300_v28, %v5252_v38  ;;  %v10141_v28 = vor.u32 %v11036_v14, %v10138_v60  ;;  %v17601_v38 = vld [vmem:[#allocation36_spill] sm:$0xff]  ;;  %v9885_v59 = vor.u32 %v10972_v7, %v9882_v17  ;;  %v17608_v24 = vld [vmem:[#allocation22_spill] sm:$0xff] }
 0x6e5   :  { %v6110_v58 = vmul.f32 0.0078125, %v6042_v31  ;;  %v6118_v15 = vmul.f32 %v15486_v30, %v15486_v30  ;;  %5363 = vmatmul.bf16.gmra.mxu1 %v17601_v38  ;;  %v17603_v31 = vld [vmem:[#allocation55_spill] sm:$0xff]  ;;  %v11028_v11 = vld [vmem:[#allocation4 + $0x71c] sm:$0xf] }
 0x6e6   :  { %17600 = vst [vmem:[#allocation31_spill] sm:$0xff] %v15484_v22  ;;  %5537 = vmatpush.bf16.msrb.mxu1 %v9917_v12  ;;  %v17604_v22 = vld [vmem:[#allocation47_spill] sm:$0xff]  ;;  %5587 = vmatpush.bf16.msra.mxu2 %v10141_v28  ;;  %v10106_v60 = vld [vmem:[#allocation4 + $0x738] sm:$0xf0]  ;;  %v17605_v12 = vld [vmem:[#allocation46_spill] sm:$0xff] }
 0x6e7   :  { %v6126_v13 = vsub.f32 %v6110_v58, %v6118_v15  ;;  %v5305_v50 = vpop.f32.mrf.mxu0  ;;  %v10109_v14 = vor.u32 %v11028_v11, %v10106_v60  ;;  %v10964_v60 = vld [vmem:[#allocation4 + $0x51c] sm:$0xf] }
 0x6e8   :  { %v5158_v18 = vpop.f32.mrf.mxu1  ;;  %5500 = vmatmul.bf16.gmra.mxu0 %v17604_v22  ;;  %v5207_v7 = vpop.f32.mrf.mxu2  ;;  %v17609_v38 = vld [vmem:[#allocation37_spill] sm:$0xff] }
 0x6e9   :  { %v5253_v41 = vpop.f32.mrf.mxu3  ;;  %v6262_v2 = vadd.f32 0.8, %v6126_v13  ;;  %v5159_v56 = vadd.f32 %v5158_v18, %v17603_v31  ;;  %v17606_v31 = vld [vmem:[#allocation62_spill] sm:$0xff] }
 0x6ea   :  { %v5254_v35 = vadd.f32 %v5253_v41, %v15480_v62  ;;  %5538 = vmatpush.bf16.msrb.mxu1 %v9885_v59  ;;  %5588 = vmatpush.bf16.msra.mxu2 %v10109_v14 }
 0x6eb   :  { %11236 = vrsqrt.f32 %v6262_v2  ;;  %v15508_v15 = vadd.f32 %v5207_v7, %v5159_v56  ;;  %vm6312_vm0 = vweird.f32 %v6262_v2 }
 0x6ec   :  { %v15499_v16 = vadd.f32 %v5302_v42, %v5254_v35 }
 0x6ef   :  { %5412 = vmatmul.bf16.gmra.mxu2 %v17602_v36  ;;  %v5307_v13 = vpop.f32.mrf.mxu0 }
 0x6f0   :  { %5451 = vmatmul.bf16.gmra.mxu3 %v17605_v12  ;;  %v5160_v35 = vpop.f32.mrf.mxu1  ;;  %v9850_v12 = vld [vmem:[#allocation4 + $0x538] sm:$0xf0]  ;;  %v5209_v22 = vpop.f32.mrf.mxu2 }
 0x6f1   :  { %v5256_v28 = vpop.f32.mrf.mxu3  ;;  %v11237_v59 = vpop.eup %11236  ;;  %v5161_v11 = vadd.f32 %v5160_v35, %v17606_v31  ;;  %v9853_v56 = vor.u32 %v10964_v60, %v9850_v12  ;;  %v11020_v12 = vld [vmem:[#allocation4 + $0x6dc] sm:$0xf] }
 0x6f2   :  { %v5257_v41 = vadd.f32 %v5256_v28, %v15480_v62  ;;  %v6307_v18 = vmul.f32 %v11237_v59, %v6262_v2  ;;  %vm6313_vm15 = vweird.f32 %v11237_v59  ;;  %v17614_v2 = vld [vmem:[#allocation20_spill] sm:$0xff] }
 0x6f3   :  { %5539 = vmatpush.bf16.msrb.mxu1 %v9853_v56  ;;  %v15518_v58 = vadd.f32 %v5209_v22, %v5161_v11  ;;  %v10074_v22 = vld [vmem:[#allocation4 + $0x6f8] sm:$0xf0]  ;;  %vm6314_vm1 = vmor %vm6312_vm0, %vm6313_vm15  ;;  %v15530_v56 = vld [vmem:[%s17036_s12] ss:$2 sm:$0xff] }
 0x6f4   :  { %v15516_v7 = vadd.f32 %v5305_v50, %v5257_v41  ;;  %v6308_v14 = vmul.f32 %v11237_v59, %v6307_v18  ;;  %v17610_v50 = vld [vmem:[#allocation57_spill] sm:$0xff]  ;;  %17613 = vst [vmem:[#allocation28_spill] sm:$0xff] %v15530_v56 }
 0x6f5   :  { %5368 = vmatmul.bf16.gmra.mxu1 %v17608_v24  ;;  %v17611_v18 = vld [vmem:[#allocation21_spill] sm:$0xff] }
 0x6f6   :  { %17607 = vst [vmem:[#allocation32_spill] sm:$0xff] %v15516_v7  ;;  %v6309_v42 = vmul.f32 0.5, %v6308_v14  ;;  %v17615_v14 = vsub.f32 %v15459_v20, %v15486_v30  ;;  %v6150_v20 = vsub.f32 %v15175_v4, %v15486_v30 }
 0x6f7   :  { %v5310_v28 = vpop.f32.mrf.mxu0 }
 0x6f8   :  { %v6310_v36 = vsub.f32 1.5, %v6309_v42  ;;  %v5163_v31 = vpop.f32.mrf.mxu1  ;;  %5505 = vmatmul.bf16.gmra.mxu0 %v17611_v18  ;;  %v15533_v42 = vperm.slane %v15530_v56, 4  ;;  %v6142_v18 = vsub.f32 %v15167_v57, %v15486_v30  ;;  %v6174_v57 = vsub.f32 %v15243_v43, %v15486_v30  ;;  %v9818_v56 = vld [vmem:[#allocation4 + $0x4f8] sm:$0xf0] }
 0x6f9   :  { %v5258_v17 = vpop.f32.mrf.mxu3  ;;  %v5164_v41 = vadd.f32 %v5163_v31, %v17610_v50  ;;  %v6134_v50 = vsub.f32 %v15152_v23, %v15486_v30 }
 0x6fa   :  { %v5259_v35 = vadd.f32 %v5258_v17, %v15480_v62  ;;  %v6311_v60 = vmul.f32 %v11237_v59, %v6310_v36  ;;  %v10077_v17 = vor.u32 %v11020_v12, %v10074_v22  ;;  %v6158_v22 = vsub.f32 %v15194_v1, %v15486_v30 }
 0x6fc   :  { %v15525_v11 = vadd.f32 %v5307_v13, %v5259_v35  ;;  %v15535_v36 = vsel %vm6314_vm1, %v11237_v59, %v6311_v60  ;;  %v5212_v35 = vpop.f32.mrf.mxu2  ;;  %5589 = vmatpush.bf16.msra.mxu2 %v10077_v17 }
 0x6fd   :  { %v6470_v13 = vmul.f32 %v15535_v36, %v17615_v14  ;;  %v15542_v31 = vadd.f32 %v5212_v35, %v5164_v41  ;;  %v6166_v41 = vsub.f32 %v15211_v61, %v15486_v30  ;;  %v6350_v23 = vmul.f32 %v15535_v36, %v6134_v50 }
 0x6fe   :  { %17612 = vst [vmem:[#allocation51_spill] sm:$0xff] %v15525_v11  ;;  %v6366_v4 = vmul.f32 %v15535_v36, %v6150_v20  ;;  %v6374_v1 = vmul.f32 %v15535_v36, %v6158_v22  ;;  %v15577_v20 = vld [vmem:[%s17036_s12 + $0x1] ss:$2 sm:$0xff]  ;;  %v10042_v11 = vld [vmem:[#allocation4 + $0x6b8] sm:$0xf0] }
 0x6ff   :  { %5417 = vmatmul.bf16.gmra.mxu2 %v17609_v38  ;;  %v15549_v59 = vmul.f32 %v15533_v42, %v6470_v13  ;;  %v5312_v12 = vpop.f32.mrf.mxu0  ;;  %v6358_v13 = vmul.f32 %v15535_v36, %v6142_v18  ;;  %v6382_v35 = vmul.f32 %v15535_v36, %v6166_v41  ;;  %v6496_v43 = vmul.f32 %v15533_v42, %v6350_v23  ;;  %v11012_v38 = vld [vmem:[#allocation4 + $0x69c] sm:$0xf] }
 0x700   :  { %5456 = vmatmul.bf16.gmra.mxu3 %v17614_v2  ;;  %v6182_v2 = vsub.f32 %v15274_v51, %v15486_v30  ;;  %v5165_v14 = vpop.f32.mrf.mxu1  ;;  %v6190_v51 = vsub.f32 %v15306_v3, %v15486_v30  ;;  %17617 = vst [vmem:[#allocation43_spill] sm:$0xff] %v15577_v20  ;;  %v15580_v22 = vperm.slane %v15577_v20, 4  ;;  %v6390_v41 = vmul.f32 %v15535_v36, %v6174_v57 }
 0x701   :  { %v5261_v60 = vpop.f32.mrf.mxu3  ;;  %v5166_v61 = vadd.f32 %v5165_v14, %v15269_v47  ;;  %v6504_v18 = vmul.f32 %v15533_v42, %v6358_v13  ;;  %v6512_v47 = vmul.f32 %v15533_v42, %v6366_v4  ;;  %v17618_v4 = vld [vmem:[#allocation52_spill] sm:$0xff] }
 0x702   :  { %v5262_v17 = vadd.f32 %v5261_v60, %v15480_v62  ;;  %v10956_v60 = vld [vmem:[#allocation4 + $0x4dc] sm:$0xf]  ;;  %v6398_v3 = vmul.f32 %v15535_v36, %v6182_v2  ;;  %v6643_v23 = vadd.f32 %v15580_v22, %v6496_v43 }
 0x703   :  { %v9821_v24 = vor.u32 %v10956_v60, %v9818_v56  ;;  %v6651_v14 = vadd.f32 %v15580_v22, %v6504_v18  ;;  %v6659_v13 = vadd.f32 %v15580_v22, %v6512_v47  ;;  %v6406_v60 = vmul.f32 %v15535_v36, %v6190_v51 }
 0x704   :  { %v15568_v50 = vadd.f32 %v5310_v28, %v5262_v17  ;;  %v6520_v28 = vmul.f32 %v15533_v42, %v6374_v1  ;;  %v6528_v17 = vmul.f32 %v15533_v42, %v6382_v35  ;;  %v5214_v56 = vpop.f32.mrf.mxu2  ;;  %v6536_v1 = vmul.f32 %v15533_v42, %v6390_v41 }
 0x705   :  { %5540 = vmatpush.bf16.msrb.mxu1 %v9821_v24  ;;  %v15591_v20 = vadd.f32 %v5214_v56, %v5166_v61  ;;  %vm6771_vm2 = vcmp.gt.f32.partialorder %v6643_v23, 0.0  ;;  %vm6779_vm3 = vcmp.gt.f32.partialorder %v6651_v14, 0.0  ;;  %v6899_v24 = vmul.f32 0.2, %v6643_v23 }
 0x706   :  { %17616 = vst [vmem:[#allocation53_spill] sm:$0xff] %v15568_v50  ;;  %5373 = vmatmul.bf16.gmra.mxu1 %v17618_v4  ;;  %v6667_v57 = vadd.f32 %v15580_v22, %v6520_v28  ;;  %v17619_v50 = vld [vmem:[#allocation44_spill] sm:$0xff]  ;;  %v6907_v43 = vmul.f32 0.2, %v6651_v14  ;;  %vm6787_vm4 = vcmp.gt.f32.partialorder %v6659_v13, 0.0  ;;  %v6675_v61 = vadd.f32 %v15580_v22, %v6528_v17 }
 0x707   :  { %v5315_v2 = vpop.f32.mrf.mxu0  ;;  %v6198_v51 = vsub.f32 %v15342_v49, %v15486_v30  ;;  %v7027_v28 = vsel %vm6771_vm2, %v6643_v23, %v6899_v24  ;;  %v6915_v41 = vmul.f32 0.2, %v6659_v13  ;;  %v6206_v4 = vsub.f32 %v15375_v21, %v15486_v30 }
 0x708   :  { %v5168_v47 = vpop.f32.mrf.mxu1  ;;  %v7035_v56 = vsel %vm6779_vm3, %v6651_v14, %v6907_v43  ;;  %5510 = vmatmul.bf16.gmra.mxu0 %v17566_v52  ;;  %vm6795_vm5 = vcmp.gt.f32.partialorder %v6667_v57, 0.0  ;;  %v10045_v17 = vor.u32 %v11012_v38, %v10042_v11  ;;  %v6923_v49 = vmul.f32 0.2, %v6667_v57 }
 0x709   :  { %v5263_v35 = vpop.f32.mrf.mxu3  ;;  %v15607_v7 = vpack.c.bf16 %v7035_v56, %v7027_v28  ;;  %v7043_v23 = vsel %vm6787_vm4, %v6659_v13, %v6915_v41  ;;  %v6683_v14 = vadd.f32 %v15580_v22, %v6536_v1  ;;  %vm6803_vm6 = vcmp.gt.f32.partialorder %v6675_v61, 0.0 }
 0x70a   :  { %v5264_v18 = vadd.f32 %v5263_v35, %v15480_v62  ;;  %v6931_v21 = vmul.f32 0.2, %v6675_v61  ;;  %v6552_v52 = vmul.f32 %v15533_v42, %v6406_v60  ;;  %5590 = vmatpush.bf16.msra.mxu2 %v10045_v17  ;;  %v6414_v38 = vmul.f32 %v15535_v36, %v6198_v51 }
 0x70b   :  { %17620 = vst [vmem:[#allocation42_spill] sm:$0xff] %v15607_v7  ;;  %vm6811_vm7 = vcmp.gt.f32.partialorder %v6683_v14, 0.0  ;;  %v6939_v43 = vmul.f32 0.2, %v6683_v14  ;;  %v6422_v60 = vmul.f32 %v15535_v36, %v6206_v4 }
 0x70c   :  { %v15605_v35 = vadd.f32 %v5312_v12, %v5264_v18  ;;  %v5217_v24 = vpop.f32.mrf.mxu2  ;;  %v7051_v12 = vsel %vm6795_vm5, %v6667_v57, %v6923_v49  ;;  %v7059_v1 = vsel %vm6803_vm6, %v6675_v61, %v6931_v21  ;;  %v6560_v57 = vmul.f32 %v15533_v42, %v6414_v38  ;;  %v10948_v49 = vld [vmem:[#allocation4 + $0x49c] sm:$0xf] }
 0x70d   :  { %v15617_v13 = vpack.c.bf16 %v7051_v12, %v7043_v23  ;;  %v7067_v28 = vsel %vm6811_vm7, %v6683_v14, %v6939_v43  ;;  %v9786_v23 = vld [vmem:[#allocation4 + $0x4b8] sm:$0xf0]  ;;  %v6568_v21 = vmul.f32 %v15533_v42, %v6422_v60  ;;  %v17624_v38 = vsub.f32 %v15397_v8, %v15486_v30 }
 0x70e   :  { %v15624_v41 = vpack.c.bf16 %v7067_v28, %v7059_v1  ;;  %v9789_v4 = vor.u32 %v10948_v49, %v9786_v23  ;;  %v17626_v28 = vsub.f32 %v15427_v44, %v15486_v30  ;;  %v17627_v60 = vsub.f32 %v15437_v26, %v15486_v30 }
 0x70f   :  { %5422 = vmatmul.bf16.gmra.mxu2 %v17619_v50  ;;  %v5169_v50 = vadd.f32 %v5168_v47, %v15298_v29  ;;  %v6544_v29 = vmul.f32 %v15533_v42, %v6398_v3  ;;  %17621 = vst [vmem:[#allocation63_spill] sm:$0xff] %v15617_v13  ;;  %v5317_v47 = vpop.f32.mrf.mxu0  ;;  %v6699_v3 = vadd.f32 %v15580_v22, %v6552_v52 }
 0x710   :  { %5461 = vmatmul.bf16.gmra.mxu3 %v17568_v46  ;;  %17622 = vst [vmem:[#allocation55_spill] sm:$0xff] %v15624_v41  ;;  %v6715_v43 = vadd.f32 %v15580_v22, %v6568_v21  ;;  %5541 = vmatpush.bf16.msrb.mxu1 %v9789_v4  ;;  %v6454_v8 = vmul.f32 %v15535_v36, %v17627_v60  ;;  %v10441_v41 = vld [vmem:[#allocation6 + $0x1d0] sm:$0xf] }
 0x711   :  { %v15615_v11 = vadd.f32 %v5217_v24, %v5169_v50  ;;  %v6691_v46 = vadd.f32 %v15580_v22, %v6544_v29  ;;  %v5170_v50 = vpop.f32.mrf.mxu1  ;;  %vm6827_vm9 = vcmp.gt.f32.partialorder %v6699_v3, 0.0  ;;  %v6955_v61 = vmul.f32 0.2, %v6699_v3 }
 0x712   :  { %v5171_v17 = vadd.f32 %v5170_v50, %v15337_v5  ;;  %v6707_v24 = vadd.f32 %v15580_v22, %v6560_v57  ;;  %v6430_v5 = vmul.f32 %v15535_v36, %v17624_v38  ;;  %vm6843_vm11 = vcmp.gt.f32.partialorder %v6715_v43, 0.0 }
 0x713   :  { %v5266_v18 = vpop.f32.mrf.mxu3  ;;  %vm6819_vm8 = vcmp.gt.f32.partialorder %v6691_v46, 0.0  ;;  %v6947_v51 = vmul.f32 0.2, %v6691_v46  ;;  %v7083_v52 = vsel %vm6827_vm9, %v6699_v3, %v6955_v61  ;;  %v6446_v3 = vmul.f32 %v15535_v36, %v17626_v28  ;;  %v11088_v28 = vld [vmem:[#allocation6 + $0xf4] sm:$0xf0] }
 0x714   :  { %v5267_v56 = vadd.f32 %v5266_v18, %v15480_v62  ;;  %v5219_v18 = vpop.f32.mrf.mxu2  ;;  %vm6835_vm10 = vcmp.gt.f32.partialorder %v6707_v24, 0.0  ;;  %v6600_v26 = vmul.f32 %v15533_v42, %v6454_v8 }
 0x715   :  { %v7075_v29 = vsel %vm6819_vm8, %v6691_v46, %v6947_v51  ;;  %v6963_v46 = vmul.f32 0.2, %v6707_v24  ;;  %v15650_v57 = vadd.f32 %v5219_v18, %v5171_v17  ;;  %v6592_v49 = vmul.f32 %v15533_v42, %v6446_v3 }
 0x716   :  { %v15627_v14 = vadd.f32 %v5315_v2, %v5267_v56  ;;  %v15631_v12 = vpack.c.bf16 %v7083_v52, %v7075_v29  ;;  %v17625_v2 = vsub.f32 %v15415_v45, %v15486_v30  ;;  %5378 = vmatmul.bf16.gmra.mxu1 %v13655_v27  ;;  %v6971_v45 = vmul.f32 0.2, %v6715_v43 }
 0x717   :  { %v6576_v56 = vmul.f32 %v15533_v42, %v6430_v5  ;;  %v5320_v51 = vpop.f32.mrf.mxu0  ;;  %v7091_v44 = vsel %vm6835_vm10, %v6707_v24, %v6963_v46  ;;  %v6739_v38 = vadd.f32 %v15580_v22, %v6592_v49  ;;  %v11004_v5 = vld [vmem:[#allocation4 + $0x65c] sm:$0xf] }
 0x718   :  { %17623 = vst [vmem:[#allocation47_spill] sm:$0xff] %v15631_v12  ;;  %v6438_v1 = vmul.f32 %v15535_v36, %v17625_v2  ;;  %v7099_v23 = vsel %vm6843_vm11, %v6715_v43, %v6971_v45  ;;  %5515 = vmatmul.bf16.gmra.mxu0 %v17445_v63  ;;  %v10010_v2 = vld [vmem:[#allocation4 + $0x678] sm:$0xf0]  ;;  %v6747_v43 = vadd.f32 %v15580_v22, %v6600_v26 }
 0x719   :  { %v5173_v21 = vpop.f32.mrf.mxu1  ;;  %v15659_v4 = vpack.c.bf16 %v7099_v23, %v7091_v44  ;;  %v6723_v29 = vadd.f32 %v15580_v22, %v6576_v56  ;;  %v10013_v46 = vor.u32 %v11004_v5, %v10010_v2  ;;  %vm6867_vm14 = vcmp.gt.f32.partialorder %v6739_v38, 0.0  ;;  %v10265_v2 = vld [vmem:[#allocation6 + $0x70] sm:$0xf] }
 0x71a   :  { %v6584_v61 = vmul.f32 %v15533_v42, %v6438_v1  ;;  %v5174_v24 = vadd.f32 %v5173_v21, %v15373_v10  ;;  %v10329_v1 = vld [vmem:[#allocation6 + $0xf0] sm:$0xf]  ;;  %vm6875_vm15 = vcmp.gt.f32.partialorder %v6747_v43, 0.0  ;;  %v6995_v45 = vmul.f32 0.2, %v6739_v38 }
 0x71b   :  { %v5268_v50 = vpop.f32.mrf.mxu3  ;;  %17628 = vst [vmem:[#allocation46_spill] sm:$0xff] %v15659_v4  ;;  %vm6851_vm12 = vcmp.gt.f32.partialorder %v6723_v29, 0.0  ;;  %v6979_v3 = vmul.f32 0.2, %v6723_v29  ;;  %v10330_v60 = vor.u32 %v11088_v28, %v10329_v1  ;;  %5591 = vmatpush.bf16.msra.mxu2 %v10013_v46  ;;  %v7003_v56 = vmul.f32 0.2, %v6747_v43 }
 0x71c   :  { %v5269_v17 = vadd.f32 %v5268_v50, %v15480_v62  ;;  %v6731_v52 = vadd.f32 %v15580_v22, %v6584_v61  ;;  %v5222_v10 = vpop.f32.mrf.mxu2  ;;  %v7123_v23 = vsel %vm6867_vm14, %v6739_v38, %v6995_v45  ;;  %v5815_v5 = vmul.f32 %v15472_v48, %v15472_v48  ;;  %v11072_v1 = vld [vmem:[#allocation6 + $0x74] sm:$0xf0]  ;;  %v11118_v4 = vld [vmem:[#allocation6 + $0x1e4] sm:$0xf0] }
 0x71d   :  { %v7107_v63 = vsel %vm6851_vm12, %v6723_v29, %v6979_v3  ;;  %v15674_v44 = vadd.f32 %v5222_v10, %v5174_v24  ;;  %8038 = vmatpush.bf16.msrb.mxu0 %v10330_v60  ;;  %v7131_v21 = vsel %vm6875_vm15, %v6747_v43, %v7003_v56  ;;  %v5831_v38 = vmul.f32 %v15508_v15, %v15508_v15  ;;  %v10940_v43 = vld [vmem:[#allocation4 + $0x45c] sm:$0xf]  ;;  %v10321_v60 = vld [vmem:[#allocation6 + $0xe0] sm:$0xf] }
 0x71e   :  { %v15666_v18 = vadd.f32 %v5317_v47, %v5269_v17  ;;  %vm6859_vm13 = vcmp.gt.f32.partialorder %v6731_v52, 0.0  ;;  %v6987_v8 = vmul.f32 0.2, %v6731_v52  ;;  %v17629_v47 = vsub.f32 %v15449_v25, %v15486_v30 }
 0x71f   :  { %5427 = vmatmul.bf16.gmra.mxu2 %v13589_v33  ;;  %v15678_v26 = vpop.f32.mrf.mxu0  ;;  %v5823_v30 = vmul.f32 %v15492_v0, %v15492_v0  ;;  %v5739_v28 = vadd.f32 %v15492_v0, %v15472_v48  ;;  %v10266_v3 = vor.u32 %v11072_v1, %v10265_v2 }
 0x720   :  { %5466 = vmatmul.bf16.gmra.mxu3 %v17511_v37  ;;  %v6462_v50 = vmul.f32 %v15535_v36, %v17629_v47  ;;  %v7115_v61 = vsel %vm6859_vm13, %v6731_v52, %v6987_v8  ;;  %v6763_v37 = vadd.f32 %v15580_v22, %v15549_v59  ;;  %v15686_v36 = vpack.c.bf16 %v7131_v21, %v7123_v23  ;;  %v11086_v8 = vld [vmem:[#allocation6 + $0xe4] sm:$0xf0]  ;;  %v10257_v47 = vld [vmem:[#allocation6 + $0x60] sm:$0xf] }
 0x721   :  { %v15680_v17 = vpack.c.bf16 %v7115_v61, %v7107_v63  ;;  %v5175_v52 = vpop.f32.mrf.mxu1  ;;  %v6043_v10 = vadd.f32 %v5823_v30, %v5815_v5  ;;  %v5839_v63 = vmul.f32 %v15518_v58, %v15518_v58  ;;  %v10322_v56 = vor.u32 %v11086_v8, %v10321_v60  ;;  %7989 = vmatpush.bf16.msrb.mxu3 %v10266_v3  ;;  %v10249_v8 = vld [vmem:[#allocation6 + $0x50] sm:$0xf] }
 0x722   :  { %v6608_v29 = vmul.f32 %v15533_v42, %v6462_v50  ;;  %17631 = vst [vmem:[#allocation57_spill] sm:$0xff] %v15686_v36  ;;  %vm6891_vm0 = vcmp.gt.f32.partialorder %v6763_v37, 0.0  ;;  %v7019_v59 = vmul.f32 0.2, %v6763_v37  ;;  %v5176_v42 = vadd.f32 %v5175_v52, %v15395_v19  ;;  %v11070_v19 = vld [vmem:[#allocation6 + $0x64] sm:$0xf0] }
 0x723   :  { %v5271_v49 = vpop.f32.mrf.mxu3  ;;  %17630 = vst [vmem:[#allocation62_spill] sm:$0xff] %v15680_v17  ;;  %v10313_v50 = vld [vmem:[#allocation6 + $0xd0] sm:$0xf]  ;;  %8039 = vmatpush.bf16.msrb.mxu0 %v10322_v56  ;;  %v5847_v52 = vmul.f32 %v15542_v31, %v15542_v31 }
 0x724   :  { %v5272_v25 = vadd.f32 %v5271_v49, %v15480_v62  ;;  %v6755_v24 = vadd.f32 %v15580_v22, %v6608_v29  ;;  %v9754_v22 = vld [vmem:[#allocation4 + $0x478] sm:$0xf0]  ;;  %v5224_v61 = vpop.f32.mrf.mxu2  ;;  %v11084_v49 = vld [vmem:[#allocation6 + $0xd4] sm:$0xf0]  ;;  %v7147_v21 = vsel %vm6891_vm0, %v6763_v37, %v7019_v59  ;;  %v5740_v29 = vadd.f32 %v5739_v28, %v15508_v15 }
 0x725   :  { %v9757_v45 = vor.u32 %v10940_v43, %v9754_v22  ;;  %v15702_v30 = vadd.f32 %v5224_v61, %v5176_v42  ;;  %v10314_v1 = vor.u32 %v11084_v49, %v10313_v50  ;;  %v5855_v28 = vmul.f32 %v15591_v20, %v15591_v20  ;;  %v10241_v50 = vld [vmem:[#allocation6 + $0x40] sm:$0xf]  ;;  %v11066_v61 = vld [vmem:[#allocation6 + $0x44] sm:$0xf0]  ;;  %v9978_v49 = vld [vmem:[#allocation4 + $0x638] sm:$0xf0] }
 0x726   :  { %v15694_v46 = vadd.f32 %v5320_v51, %v5272_v25  ;;  %v10258_v51 = vor.u32 %v11070_v19, %v10257_v47  ;;  %vm6883_vm1 = vcmp.gt.f32.partialorder %v6755_v24, 0.0  ;;  %v7011_v23 = vmul.f32 0.2, %v6755_v24  ;;  %5383 = vmatmul.bf16.gmra.mxu1 %v17384_v32  ;;  %v11082_v19 = vld [vmem:[#allocation6 + $0xc4] sm:$0xf0] }
 0x727   :  { %v6044_v25 = vadd.f32 %v6043_v10, %v5831_v38  ;;  %5542 = vmatpush.bf16.msrb.mxu1 %v9757_v45  ;;  %v5325_v2 = vpop.f32.mrf.mxu0  ;;  %v5741_v37 = vadd.f32 %v5740_v29, %v15518_v58  ;;  %v10305_v10 = vld [vmem:[#allocation6 + $0xc0] sm:$0xf]  ;;  %8040 = vmatpush.bf16.msrb.mxu0 %v10314_v1 }
 0x728   :  { %v7139_v43 = vsel %vm6883_vm1, %v6755_v24, %v7011_v23  ;;  %7990 = vmatpush.bf16.msrb.mxu3 %v10258_v51  ;;  %5520 = vmatmul.bf16.gmra.mxu0 %v13260_v39  ;;  %v11068_v24 = vld [vmem:[#allocation6 + $0x54] sm:$0xf0]  ;;  %v10306_v39 = vor.u32 %v11082_v19, %v10305_v10  ;;  %v10297_v23 = vld [vmem:[#allocation6 + $0xb0] sm:$0xf]  ;;  %v10932_v19 = vld [vmem:[#allocation4 + $0x41c] sm:$0xf] }
 0x729   :  { %v15710_v38 = vpack.c.bf16 %v7147_v21, %v7139_v43  ;;  %v6045_v42 = vadd.f32 %v6044_v25, %v5839_v63  ;;  %v5178_v3 = vpop.f32.mrf.mxu1  ;;  %v5742_v22 = vadd.f32 %v5741_v37, %v15542_v31  ;;  %v5863_v63 = vmul.f32 %v15615_v11, %v15615_v11 }
 0x72a   :  { %v5179_v60 = vadd.f32 %v5178_v3, %v15412_v55  ;;  %v10250_v47 = vor.u32 %v11068_v24, %v10249_v8  ;;  %v10996_v55 = vld [vmem:[#allocation4 + $0x61c] sm:$0xf]  ;;  %v10242_v25 = vor.u32 %v11066_v61, %v10241_v50 }
 0x72b   :  { %v5273_v5 = vpop.f32.mrf.mxu3  ;;  %17632 = vst [vmem:[#allocation21_spill] sm:$0xff] %v15710_v38  ;;  %v6046_v56 = vadd.f32 %v6045_v42, %v5847_v52  ;;  %v5743_v51 = vadd.f32 %v5742_v22, %v15591_v20  ;;  %v9981_v52 = vor.u32 %v10996_v55, %v9978_v49  ;;  %8041 = vmatpush.bf16.msrb.mxu0 %v10306_v39  ;;  %v9722_v39 = vld [vmem:[#allocation4 + $0x438] sm:$0xf0]  ;;  %v10289_v55 = vld [vmem:[#allocation6 + $0xa0] sm:$0xf] }
 0x72c   :  { %v5274_v59 = vadd.f32 %v5273_v5, %v15480_v62  ;;  %v5227_v29 = vpop.f32.mrf.mxu2  ;;  %7991 = vmatpush.bf16.msrb.mxu3 %v10250_v47  ;;  %v11080_v5 = vld [vmem:[#allocation6 + $0xb4] sm:$0xf0]  ;;  %v11078_v49 = vld [vmem:[#allocation6 + $0xa4] sm:$0xf0] }
 0x72d   :  { %v6047_v21 = vadd.f32 %v6046_v56, %v5855_v28  ;;  %v5744_v1 = vadd.f32 %v5743_v51, %v15615_v11  ;;  %v15727_v43 = vadd.f32 %v5227_v29, %v5179_v60  ;;  %5592 = vmatpush.bf16.msra.mxu2 %v9981_v52  ;;  %v10298_v28 = vor.u32 %v11080_v5, %v10297_v23  ;;  %v11064_v47 = vld [vmem:[#allocation6 + $0x34] sm:$0xf0]  ;;  %v10281_v52 = vld [vmem:[#allocation6 + $0x90] sm:$0xf] }
 0x72e   :  { %v15718_v45 = vadd.f32 %v15678_v26, %v5274_v59  ;;  %v5871_v26 = vmul.f32 %v15650_v57, %v15650_v57  ;;  %v5887_v60 = vmul.f32 %v15702_v30, %v15702_v30  ;;  %v10290_v29 = vor.u32 %v11078_v49, %v10289_v55 }
 0x72f   :  { %5432 = vmatmul.bf16.gmra.mxu2 %v17390_v53  ;;  %v6048_v37 = vadd.f32 %v6047_v21, %v5863_v63  ;;  %v5327_v42 = vpop.f32.mrf.mxu0  ;;  %v5745_v3 = vadd.f32 %v5744_v1, %v15650_v57  ;;  %v10233_v63 = vld [vmem:[#allocation6 + $0x30] sm:$0xf]  ;;  %8042 = vmatpush.bf16.msrb.mxu0 %v10298_v28  ;;  %v5895_v21 = vmul.f32 %v15727_v43, %v15727_v43  ;;  %v11076_v1 = vld [vmem:[#allocation6 + $0x94] sm:$0xf0] }
 0x730   :  { %5471 = vmatmul.bf16.gmra.mxu3 %v17516_v9  ;;  %v5879_v9 = vmul.f32 %v15674_v44, %v15674_v44  ;;  %v10234_v51 = vor.u32 %v11064_v47, %v10233_v63 }
 0x731   :  { %v6049_v8 = vadd.f32 %v6048_v37, %v5871_v26  ;;  %v5180_v24 = vpop.f32.mrf.mxu1  ;;  %7992 = vmatpush.bf16.msrb.mxu3 %v10242_v25  ;;  %v5746_v10 = vadd.f32 %v5745_v3, %v15674_v44  ;;  %v9725_v26 = vor.u32 %v10932_v19, %v9722_v39  ;;  %v10225_v25 = vld [vmem:[#allocation6 + $0x20] sm:$0xf]  ;;  %v17633_v19 = vld [vmem:[#allocation48_spill] sm:$0xff] }
 0x732   :  { %v5181_v56 = vadd.f32 %v5180_v24, %v15425_v6  ;;  %v11062_v6 = vld [vmem:[#allocation6 + $0x24] sm:$0xf0] }
 0x733   :  { %v5276_v59 = vpop.f32.mrf.mxu3  ;;  %v6050_v61 = vadd.f32 %v6049_v8, %v5879_v9  ;;  %v5747_v23 = vadd.f32 %v5746_v10, %v15702_v30  ;;  %5543 = vmatpush.bf16.msrb.mxu1 %v9725_v26  ;;  %8043 = vmatpush.bf16.msrb.mxu0 %v10290_v29  ;;  %v17635_v29 = vld [vmem:[#allocation77_spill] sm:$0xff] }
 0x734   :  { %v5277_v22 = vadd.f32 %v5276_v59, %v15480_v62  ;;  %v5229_v5 = vpop.f32.mrf.mxu2 }
 0x735   :  { %7993 = vmatpush.bf16.msrb.mxu3 %v10234_v51  ;;  %v6051_v37 = vadd.f32 %v6050_v61, %v5887_v60  ;;  %v5748_v9 = vadd.f32 %v5747_v23, %v15727_v43  ;;  %v15743_v59 = vadd.f32 %v5229_v5, %v5181_v56 }
 0x736   :  { %v15737_v50 = vadd.f32 %v5325_v2, %v5277_v22  ;;  %v10226_v2 = vor.u32 %v11062_v6, %v10225_v25  ;;  %v10282_v22 = vor.u32 %v11076_v1, %v10281_v52  ;;  %5544 = vmatmul.bf16.vlgmr.msrb.gmra.mxu1 %v17517_v40  ;;  %v17636_v1 = vld [vmem:[#allocation34_spill] sm:$0xff] }
 0x737   :  { %v5330_v3 = vpop.f32.mrf.mxu0  ;;  %v6052_v8 = vadd.f32 %v6051_v37, %v5895_v21  ;;  %v5749_v24 = vadd.f32 %v5748_v9, %v15743_v59  ;;  %v5903_v10 = vmul.f32 %v15743_v59, %v15743_v59 }
 0x738   :  { %5525 = vmatmul.bf16.gmra.mxu0 %v17633_v19 }
 0x739   :  { %v5183_v60 = vpop.f32.mrf.mxu1  ;;  %7994 = vmatpush.bf16.msrb.mxu3 %v10226_v2  ;;  %v6053_v56 = vadd.f32 %v6052_v8, %v5903_v10  ;;  %8044 = vmatpush.bf16.msrb.mxu0 %v10282_v22  ;;  %v17637_v8 = vld [vmem:[#allocation25_spill] sm:$0xff] }
 0x73a   :  { %v5184_v47 = vadd.f32 %v5183_v60, %v15435_v54 }
 0x73b   :  { %v5278_v28 = vpop.f32.mrf.mxu3 }
 0x73c   :  { %v5279_v63 = vadd.f32 %v5278_v28, %v15480_v62  ;;  %v5232_v51 = vpop.f32.mrf.mxu2 }
 0x73d   :  { %v15756_v39 = vadd.f32 %v5232_v51, %v5184_v47 }
 0x73e   :  { %v15753_v61 = vadd.f32 %v5327_v42, %v5279_v63  ;;  %v17639_v63 = vld [vmem:[#allocation41_spill] sm:$0xff] }
 0x73f   :  { %5593 = vmatmul.bf16.vlgmr.msra.gmra.mxu2 %v17579_v34  ;;  %v17634_v34 = vld [vmem:[#allocation49_spill] sm:$0xff]  ;;  %v5332_v49 = vpop.f32.mrf.mxu0  ;;  %v5750_v23 = vadd.f32 %v5749_v24, %v15756_v39  ;;  %v5911_v40 = vmul.f32 %v15756_v39, %v15756_v39 }
 0x740   :  { %5476 = vmatmul.bf16.gmra.mxu3 %v17634_v34 }
 0x741   :  { %v5185_v54 = vpop.f32.mrf.mxu1  ;;  %v6054_v26 = vadd.f32 %v6053_v56, %v5911_v40  ;;  %v17640_v56 = vld [vmem:[#allocation40_spill] sm:$0xff] }
 0x742   :  { %v5186_v42 = vadd.f32 %v5185_v54, %v17635_v29 }
 0x743   :  { %v5281_v55 = vpop.f32.mrf.mxu3 }
 0x744   :  { %v5282_v21 = vadd.f32 %v5281_v55, %v15480_v62  ;;  %v5234_v6 = vpop.f32.mrf.mxu2 }
 0x745   :  { %v15765_v52 = vadd.f32 %v5234_v6, %v5186_v42  ;;  %v11060_v42 = vld [vmem:[#allocation6 + $0x14] sm:$0xf0] }
 0x746   :  { %v15763_v25 = vadd.f32 %v5330_v3, %v5282_v21  ;;  %5549 = vmatmul.bf16.gmra.mxu1 %v17637_v8  ;;  %v17638_v3 = vld [vmem:[#allocation29_spill] sm:$0xff] }
 0x747   :  { %v5335_v2 = vpop.f32.mrf.mxu0  ;;  %v5751_v37 = vadd.f32 %v5750_v23, %v15765_v52  ;;  %v5919_v9 = vmul.f32 %v15765_v52, %v15765_v52  ;;  %v10209_v8 = vld [vmem:[#allocation6] sm:$0xf] }
 0x748   :  { %5530 = vmatmul.bf16.gmra.mxu0 %v17639_v63 }
 0x749   :  { %v5188_v22 = vpop.f32.mrf.mxu1  ;;  %v6055_v24 = vadd.f32 %v6054_v26, %v5919_v9  ;;  %v17641_v26 = vld [vmem:[#allocation27_spill] sm:$0xff]  ;;  %v11074_v9 = vld [vmem:[#allocation6 + $0x84] sm:$0xf0] }
 0x74a   :  { %v5189_v10 = vadd.f32 %v5188_v22, %v17638_v3  ;;  %v11058_v3 = vld [vmem:[#allocation6 + $0x4] sm:$0xf0] }
 0x74b   :  { %v5283_v5 = vpop.f32.mrf.mxu3 }
 0x74c   :  { %v5284_v28 = vadd.f32 %v5283_v5, %v15480_v62  ;;  %v5237_v47 = vpop.f32.mrf.mxu2 }
 0x74d   :  { %v15778_v19 = vadd.f32 %v5237_v47, %v5189_v10 }
 0x74e   :  { %v15775_v60 = vadd.f32 %v5332_v49, %v5284_v28  ;;  %v10217_v49 = vld [vmem:[#allocation6 + $0x10] sm:$0xf] }
 0x74f   :  { %5598 = vmatmul.bf16.gmra.mxu2 %v17636_v1  ;;  %v5337_v51 = vpop.f32.mrf.mxu0  ;;  %v5752_v55 = vadd.f32 %v5751_v37, %v15778_v19  ;;  %v5927_v23 = vmul.f32 %v15778_v19, %v15778_v19  ;;  %v10218_v5 = vor.u32 %v11060_v42, %v10217_v49  ;;  %v10273_v1 = vld [vmem:[#allocation6 + $0x80] sm:$0xf]  ;;  %v17645_v42 = vld [vmem:[#allocation54_spill] sm:$0xff] }
 0x750   :  { %5481 = vmatmul.bf16.gmra.mxu3 %v17640_v56  ;;  %v10274_v22 = vor.u32 %v11074_v9, %v10273_v1  ;;  %v17642_v56 = vld [vmem:[#allocation45_spill] sm:$0xff] }
 0x751   :  { %v5190_v21 = vpop.f32.mrf.mxu1  ;;  %v6056_v54 = vadd.f32 %v6055_v24, %v5927_v23  ;;  %7995 = vmatpush.bf16.msrb.mxu3 %v10218_v5  ;;  %v10210_v24 = vor.u32 %v11058_v3, %v10209_v8  ;;  %v17647_v3 = vld [vmem:[#allocation24_spill] sm:$0xff] }
 0x752   :  { %v5191_v29 = vadd.f32 %v5190_v21, %v17641_v26  ;;  %8045 = vmatpush.bf16.msrb.mxu0 %v10274_v22 }
 0x753   :  { %v5286_v34 = vpop.f32.mrf.mxu3 }
 0x754   :  { %v5287_v40 = vadd.f32 %v5286_v34, %v15480_v62  ;;  %v5239_v28 = vpop.f32.mrf.mxu2 }
 0x755   :  { %v15787_v37 = vadd.f32 %v5239_v28, %v5191_v29  ;;  %7996 = vmatpush.bf16.msrb.mxu3 %v10210_v24  ;;  %v17644_v29 = vld [vmem:[#allocation31_spill] sm:$0xff] }
 0x756   :  { %v15785_v6 = vadd.f32 %v5335_v2, %v5287_v40  ;;  %v17643_v40 = vld [vmem:[#allocation35_spill] sm:$0xff] }
 0x757   :  { %v5496_v63 = vpop.f32.mrf.mxu0  ;;  %v5753_v47 = vadd.f32 %v5752_v55, %v15787_v37  ;;  %v5935_v2 = vmul.f32 %v15787_v37, %v15787_v37  ;;  %5554 = vmatmul.bf16.gmra.mxu1 %v17643_v40  ;;  %v17646_v55 = vld [vmem:[#allocation67_spill] sm:$0xff] }
 0x758   :  { %8046 = vmatmul.bf16.vlgmr.msrb.gmra.mxu0 %v17645_v42 }
 0x759   :  { %v5349_v23 = vpop.f32.mrf.mxu1  ;;  %v5754_v21 = vrot.slane %v5753_v47, 4  ;;  %v6057_v26 = vadd.f32 %v6056_v54, %v5935_v2 }
 0x75a   :  { %v5350_v49 = vadd.f32 %v5349_v23, %v17644_v29 }
 0x75b   :  { %v5288_v10 = vpop.f32.mrf.mxu3  ;;  %v5755_v1 = vadd.f32 %v5754_v21, %v5753_v47  ;;  %v6058_v9 = vrot.slane %v6057_v26, 4 }
 0x75c   :  { %v5289_v34 = vadd.f32 %v5288_v10, %v15480_v62  ;;  %v5398_v28 = vpop.f32.mrf.mxu2  ;;  %v15803_v10 = vperm.slane %v17647_v3, 7 }
 0x75d   :  { %v5756_v22 = vrot.slane %v5755_v1, 2  ;;  %v6059_v8 = vadd.f32 %v6058_v9, %v6057_v26  ;;  %v15800_v62 = vadd.f32 %v5398_v28, %v5350_v49 }
 0x75e   :  { %v15797_v5 = vadd.f32 %v5337_v51, %v5289_v34 }
 0x75f   :  { %5603 = vmatmul.bf16.gmra.mxu2 %v17642_v56  ;;  %v5498_v54 = vpop.f32.mrf.mxu0  ;;  %v5757_v56 = vadd.f32 %v5756_v22, %v5755_v1  ;;  %v6060_v2 = vrot.slane %v6059_v8, 2  ;;  %v17648_v22 = vld [vmem:[#allocation38_spill] sm:$0xff] }
 0x760   :  { %7997 = vmatmul.bf16.vlgmr.msrb.gmra.mxu3 %v17646_v55 }
 0x761   :  { %v5351_v51 = vpop.f32.mrf.mxu1  ;;  %v5758_v34 = vrot.slane %v5757_v56, 1  ;;  %v6061_v47 = vadd.f32 %v6060_v2, %v6059_v8  ;;  %v17649_v2 = vld [vmem:[#allocation36_spill] sm:$0xff] }
 0x762   :  { %v5352_v40 = vadd.f32 %v5351_v51, %v15499_v16  ;;  %v17650_v51 = vld [vmem:[#allocation32_spill] sm:$0xff] }
 0x763   :  { %v5447_v24 = vpop.f32.mrf.mxu3  ;;  %v5759_v29 = vadd.f32 %v5758_v34, %v5757_v56  ;;  %v6062_v26 = vrot.slane %v6061_v47, 1 }
 0x764   :  { %v5448_v23 = vadd.f32 %v5447_v24, %v15803_v10  ;;  %v5400_v49 = vpop.f32.mrf.mxu2 }
 0x765   :  { %v15809_v9 = vmul.f32 0.0078125, %v5759_v29  ;;  %v6063_v28 = vadd.f32 %v6062_v26, %v6061_v47  ;;  %v15811_v3 = vadd.f32 %v5400_v49, %v5352_v40  ;;  %v17651_v47 = vld [vmem:[#allocation56_spill] sm:$0xff]  ;;  %v10457_v40 = vld [vmem:[#allocation6 + $0x1f0] sm:$0xf] }
 0x766   :  { %v15807_v21 = vadd.f32 %v5496_v63, %v5448_v23  ;;  %v11120_v29 = vld [vmem:[#allocation6 + $0x1f4] sm:$0xf0] }
 0x767   :  { %v5501_v1 = vpop.f32.mrf.mxu0  ;;  %v6111_v24 = vmul.f32 0.0078125, %v6063_v28  ;;  %v6119_v8 = vmul.f32 %v15809_v9, %v15809_v9  ;;  %5559 = vmatmul.bf16.gmra.mxu1 %v17649_v2  ;;  %v10458_v26 = vor.u32 %v11120_v29, %v10457_v40  ;;  %v17653_v29 = vld [vmem:[#allocation51_spill] sm:$0xff] }
 0x768   :  { %8051 = vmatmul.bf16.gmra.mxu0 %v17651_v47 }
 0x769   :  { %v5354_v56 = vpop.f32.mrf.mxu1  ;;  %v6127_v23 = vsub.f32 %v6111_v24, %v6119_v8  ;;  %8136 = vmatpush.bf16.msrb.mxu2 %v10458_v26  ;;  %v10393_v24 = vld [vmem:[#allocation6 + $0x170] sm:$0xf] }
 0x76a   :  { %v5355_v34 = vadd.f32 %v5354_v56, %v17650_v51 }
 0x76b   :  { %v5449_v55 = vpop.f32.mrf.mxu3  ;;  %v6263_v28 = vadd.f32 0.8, %v6127_v23  ;;  %v17654_v23 = vld [vmem:[#allocation37_spill] sm:$0xff] }
 0x76c   :  { %v5450_v63 = vadd.f32 %v5449_v55, %v15803_v10  ;;  %v5403_v42 = vpop.f32.mrf.mxu2  ;;  %v11104_v55 = vld [vmem:[#allocation6 + $0x174] sm:$0xf0] }
 0x76d   :  { %11238 = vrsqrt.f32 %v6263_v28  ;;  %v15829_v8 = vadd.f32 %v5403_v42, %v5355_v34  ;;  %v10394_v34 = vor.u32 %v11104_v55, %v10393_v24  ;;  %v17657_v55 = vld [vmem:[#allocation58_spill] sm:$0xff]  ;;  %v10449_v24 = vld [vmem:[#allocation6 + $0x1e0] sm:$0xf]  ;;  %vm6322_vm3 = vweird.f32 %v6263_v28 }
 0x76e   :  { %v15822_v49 = vadd.f32 %v5498_v54, %v5450_v63 }
 0x76f   :  { %5608 = vmatmul.bf16.gmra.mxu2 %v17648_v22  ;;  %v17652_v22 = vld [vmem:[#allocation68_spill] sm:$0xff]  ;;  %v5503_v54 = vpop.f32.mrf.mxu0  ;;  %8087 = vmatpush.bf16.msra.mxu1 %v10394_v34 }
 0x770   :  { %8002 = vmatmul.bf16.gmra.mxu3 %v17652_v22 }
 0x771   :  { %v5356_v40 = vpop.f32.mrf.mxu1 }
 0x772   :  { %v5357_v26 = vadd.f32 %v5356_v40, %v17653_v29  ;;  %v17655_v29 = vld [vmem:[#allocation22_spill] sm:$0xff] }
 0x773   :  { %v5452_v2 = vpop.f32.mrf.mxu3  ;;  %v11239_v16 = vpop.eup %11238 }
 0x774   :  { %v5453_v51 = vadd.f32 %v5452_v2, %v15803_v10  ;;  %v6317_v56 = vmul.f32 %v11239_v16, %v6263_v28  ;;  %v5405_v22 = vpop.f32.mrf.mxu2  ;;  %vm6323_vm2 = vweird.f32 %v11239_v16  ;;  %v6151_v28 = vsub.f32 %v15508_v15, %v15809_v9 }
 0x775   :  { %v15841_v47 = vadd.f32 %v5405_v22, %v5357_v26  ;;  %v17659_v26 = vld [vmem:[#allocation69_spill] sm:$0xff]  ;;  %vm6324_vm4 = vmor %vm6322_vm3, %vm6323_vm2 }
 0x776   :  { %v15839_v42 = vadd.f32 %v5501_v1, %v5453_v51  ;;  %v6318_v63 = vmul.f32 %v11239_v16, %v6317_v56  ;;  %v17656_v1 = vld [vmem:[#allocation53_spill] sm:$0xff]  ;;  %v10450_v56 = vor.u32 %v11118_v4, %v10449_v24  ;;  %v6143_v4 = vsub.f32 %v15492_v0, %v15809_v9 }
 0x777   :  { %v5506_v36 = vpop.f32.mrf.mxu0  ;;  %5564 = vmatmul.bf16.gmra.mxu1 %v17655_v29  ;;  %v6159_v24 = vsub.f32 %v15518_v58, %v15809_v9 }
 0x778   :  { %v6319_v17 = vmul.f32 0.5, %v6318_v63  ;;  %8056 = vmatmul.bf16.gmra.mxu0 %v17657_v55  ;;  %8137 = vmatpush.bf16.msrb.mxu2 %v10450_v56  ;;  %v17660_v63 = vld [vmem:[#allocation28_spill] sm:$0xff]  ;;  %v6175_v56 = vsub.f32 %v15591_v20, %v15809_v9  ;;  %v6183_v20 = vsub.f32 %v15615_v11, %v15809_v9 }
 0x779   :  { %v5359_v40 = vpop.f32.mrf.mxu1  ;;  %v15852_v29 = vperm.slane %v17660_v63, 5 }
 0x77a   :  { %v5360_v51 = vadd.f32 %v5359_v40, %v17656_v1  ;;  %v6320_v22 = vsub.f32 1.5, %v6319_v17  ;;  %v6135_v1 = vsub.f32 %v15472_v48, %v15809_v9 }
 0x77b   :  { %v5454_v38 = vpop.f32.mrf.mxu3 }
 0x77c   :  { %v5455_v2 = vadd.f32 %v5454_v38, %v15803_v10  ;;  %v5408_v38 = vpop.f32.mrf.mxu2 }
 0x77d   :  { %v15854_v40 = vadd.f32 %v5408_v38, %v5360_v51  ;;  %v17661_v51 = vsub.f32 %v15787_v37, %v15809_v9 }
 0x77e   :  { %v15848_v34 = vadd.f32 %v5503_v54, %v5455_v2 }
 0x77f   :  { %5613 = vmatmul.bf16.gmra.mxu2 %v17654_v23  ;;  %v6321_v23 = vmul.f32 %v11239_v16, %v6320_v22  ;;  %v15860_v2 = vpop.f32.mrf.mxu0 }
 0x780   :  { %17658 = vst [vmem:[#allocation20_spill] sm:$0xff] %v15848_v34  ;;  %8007 = vmatmul.bf16.gmra.mxu3 %v17659_v26 }
 0x781   :  { %v15858_v54 = vsel %vm6324_vm4, %v11239_v16, %v6321_v23  ;;  %v6167_v16 = vsub.f32 %v15542_v31, %v15809_v9  ;;  %v5361_v0 = vpop.f32.mrf.mxu1  ;;  %v17662_v31 = vld [vmem:[#allocation43_spill] sm:$0xff] }
 0x782   :  { %v6471_v22 = vmul.f32 %v15858_v54, %v17661_v51  ;;  %v6351_v23 = vmul.f32 %v15858_v54, %v6135_v1  ;;  %v6359_v15 = vmul.f32 %v15858_v54, %v6143_v4  ;;  %v6367_v58 = vmul.f32 %v15858_v54, %v6151_v28  ;;  %v11102_v51 = vld [vmem:[#allocation6 + $0x164] sm:$0xf0] }
 0x783   :  { %v5457_v17 = vpop.f32.mrf.mxu3  ;;  %v6375_v38 = vmul.f32 %v15858_v54, %v6159_v24  ;;  %v5362_v63 = vadd.f32 %v5361_v0, %v15605_v35  ;;  %v15886_v26 = vperm.slane %v17662_v31, 5  ;;  %v6383_v35 = vmul.f32 %v15858_v54, %v6167_v16 }
 0x784   :  { %v5458_v48 = vadd.f32 %v5457_v17, %v15803_v10  ;;  %v15882_v37 = vmul.f32 %v15852_v29, %v6471_v22  ;;  %v10385_v17 = vld [vmem:[#allocation6 + $0x160] sm:$0xf]  ;;  %v6497_v4 = vmul.f32 %v15852_v29, %v6351_v23  ;;  %v6505_v28 = vmul.f32 %v15852_v29, %v6359_v15  ;;  %v5410_v31 = vpop.f32.mrf.mxu2 }
 0x785   :  { %v10386_v1 = vor.u32 %v11102_v51, %v10385_v17  ;;  %v6513_v24 = vmul.f32 %v15852_v29, %v6367_v58  ;;  %v6521_v22 = vmul.f32 %v15852_v29, %v6375_v38  ;;  %v6391_v0 = vmul.f32 %v15858_v54, %v6175_v56  ;;  %v17664_v38 = vld [vmem:[#allocation44_spill] sm:$0xff] }
 0x786   :  { %v15894_v55 = vadd.f32 %v5506_v36, %v5458_v48  ;;  %v6644_v12 = vadd.f32 %v15886_v26, %v6497_v4  ;;  %v6652_v11 = vadd.f32 %v15886_v26, %v6505_v28  ;;  %v6399_v15 = vmul.f32 %v15858_v54, %v6183_v20 }
 0x787   :  { %8088 = vmatpush.bf16.msra.mxu1 %v10386_v1  ;;  %v6660_v23 = vadd.f32 %v15886_v26, %v6513_v24  ;;  %v15902_v17 = vadd.f32 %v5410_v31, %v5362_v63  ;;  %v6668_v58 = vadd.f32 %v15886_v26, %v6521_v22  ;;  %v6529_v36 = vmul.f32 %v15852_v29, %v6383_v35  ;;  %v5511_v56 = vpop.f32.mrf.mxu0  ;;  %v17665_v24 = vld [vmem:[#allocation52_spill] sm:$0xff] }
 0x788   :  { %17663 = vst [vmem:[#allocation48_spill] sm:$0xff] %v15894_v55  ;;  %v6537_v48 = vmul.f32 %v15852_v29, %v6391_v0  ;;  %vm6772_vm5 = vcmp.gt.f32.partialorder %v6644_v12, 0.0  ;;  %vm6780_vm6 = vcmp.gt.f32.partialorder %v6652_v11, 0.0  ;;  %v6900_v51 = vmul.f32 0.2, %v6644_v12  ;;  %5569 = vmatmul.bf16.gmra.mxu1 %v17665_v24 }
 0x789   :  { %v6908_v1 = vmul.f32 0.2, %v6652_v11  ;;  %vm6788_vm7 = vcmp.gt.f32.partialorder %v6660_v23, 0.0  ;;  %v6191_v63 = vsub.f32 %v15650_v57, %v15809_v9  ;;  %v6199_v20 = vsub.f32 %v15674_v44, %v15809_v9  ;;  %v5364_v28 = vpop.f32.mrf.mxu1 }
 0x78a   :  { %v7028_v22 = vsel %vm6772_vm5, %v6644_v12, %v6900_v51  ;;  %vm6796_vm8 = vcmp.gt.f32.partialorder %v6668_v58, 0.0  ;;  %v6916_v0 = vmul.f32 0.2, %v6660_v23  ;;  %v5365_v31 = vadd.f32 %v5364_v28, %v15627_v14  ;;  %v17668_v51 = vld [vmem:[#allocation70_spill] sm:$0xff] }
 0x78b   :  { %v5459_v16 = vpop.f32.mrf.mxu3  ;;  %v7036_v35 = vsel %vm6780_vm6, %v6652_v11, %v6908_v1  ;;  %v6924_v34 = vmul.f32 0.2, %v6668_v58  ;;  %v6207_v57 = vsub.f32 %v15702_v30, %v15809_v9  ;;  %v6676_v12 = vadd.f32 %v15886_v26, %v6529_v36 }
 0x78c   :  { %v5460_v4 = vadd.f32 %v5459_v16, %v15803_v10  ;;  %v11116_v16 = vld [vmem:[#allocation6 + $0x1d4] sm:$0xf0]  ;;  %v15916_v55 = vpack.c.bf16 %v7036_v35, %v7028_v22  ;;  %v7044_v13 = vsel %vm6788_vm7, %v6660_v23, %v6916_v0  ;;  %v6684_v11 = vadd.f32 %v15886_v26, %v6537_v48  ;;  %v5413_v22 = vpop.f32.mrf.mxu2 }
 0x78d   :  { %v10442_v44 = vor.u32 %v11116_v16, %v10441_v41  ;;  %v7052_v14 = vsel %vm6796_vm8, %v6668_v58, %v6924_v34  ;;  %v6407_v28 = vmul.f32 %v15858_v54, %v6191_v63  ;;  %v6545_v24 = vmul.f32 %v15852_v29, %v6399_v15 }
 0x78e   :  { %17667 = vst [vmem:[#allocation49_spill] sm:$0xff] %v15916_v55  ;;  %v15925_v1 = vadd.f32 %v15860_v2, %v5460_v4  ;;  %v15929_v30 = vpack.c.bf16 %v7052_v14, %v7044_v13  ;;  %vm6804_vm9 = vcmp.gt.f32.partialorder %v6676_v12, 0.0  ;;  %vm6812_vm10 = vcmp.gt.f32.partialorder %v6684_v11, 0.0 }
 0x78f   :  { %5618 = vmatmul.bf16.gmra.mxu2 %v17664_v38  ;;  %v17666_v38 = vld [vmem:[#allocation60_spill] sm:$0xff]  ;;  %v6932_v41 = vmul.f32 0.2, %v6676_v12  ;;  %v15931_v23 = vadd.f32 %v5413_v22, %v5365_v31  ;;  %v6940_v36 = vmul.f32 0.2, %v6684_v11  ;;  %v6553_v48 = vmul.f32 %v15852_v29, %v6407_v28  ;;  %v5513_v58 = vpop.f32.mrf.mxu0 }
 0x790   :  { %8061 = vmatmul.bf16.gmra.mxu0 %v17666_v38  ;;  %8012 = vmatmul.bf16.gmra.mxu3 %v17668_v51  ;;  %17669 = vst [vmem:[#allocation77_spill] sm:$0xff] %v15929_v30  ;;  %v6692_v34 = vadd.f32 %v15886_v26, %v6545_v24  ;;  %v6415_v63 = vmul.f32 %v15858_v54, %v6199_v20  ;;  %v10377_v20 = vld [vmem:[#allocation6 + $0x150] sm:$0xf]  ;;  %v11100_v24 = vld [vmem:[#allocation6 + $0x154] sm:$0xf0] }
 0x791   :  { %8138 = vmatpush.bf16.msrb.mxu2 %v10442_v44  ;;  %v7060_v4 = vsel %vm6804_vm9, %v6676_v12, %v6932_v41  ;;  %v6423_v15 = vmul.f32 %v15858_v54, %v6207_v57  ;;  %v17670_v13 = vsub.f32 %v15727_v43, %v15809_v9  ;;  %v7068_v31 = vsel %vm6812_vm10, %v6684_v11, %v6940_v36  ;;  %v5366_v16 = vpop.f32.mrf.mxu1 }
 0x792   :  { %v15942_v44 = vpack.c.bf16 %v7068_v31, %v7060_v4  ;;  %v6700_v14 = vadd.f32 %v15886_v26, %v6553_v48  ;;  %vm6820_vm11 = vcmp.gt.f32.partialorder %v6692_v34, 0.0  ;;  %v6948_v28 = vmul.f32 0.2, %v6692_v34 }
 0x793   :  { %v5462_v2 = vpop.f32.mrf.mxu3  ;;  %v6431_v35 = vmul.f32 %v15858_v54, %v17670_v13  ;;  %v5367_v12 = vadd.f32 %v5366_v16, %v15666_v18  ;;  %v6561_v43 = vmul.f32 %v15852_v29, %v6415_v63  ;;  %v10378_v22 = vor.u32 %v11100_v24, %v10377_v20 }
 0x794   :  { %v5463_v0 = vadd.f32 %v5462_v2, %v15803_v10  ;;  %17671 = vst [vmem:[#allocation34_spill] sm:$0xff] %v15942_v44  ;;  %vm6828_vm12 = vcmp.gt.f32.partialorder %v6700_v14, 0.0  ;;  %v6956_v41 = vmul.f32 0.2, %v6700_v14  ;;  %v7076_v2 = vsel %vm6820_vm11, %v6692_v34, %v6948_v28  ;;  %v5415_v13 = vpop.f32.mrf.mxu2 }
 0x795   :  { %v6569_v11 = vmul.f32 %v15852_v29, %v6423_v15  ;;  %v6708_v36 = vadd.f32 %v15886_v26, %v6561_v43  ;;  %v17672_v48 = vsub.f32 %v15743_v59, %v15809_v9  ;;  %v6577_v18 = vmul.f32 %v15852_v29, %v6431_v35  ;;  %8089 = vmatpush.bf16.msra.mxu1 %v10378_v22 }
 0x796   :  { %v15946_v57 = vadd.f32 %v5511_v56, %v5463_v0  ;;  %v7084_v56 = vsel %vm6828_vm12, %v6700_v14, %v6956_v41  ;;  %v17673_v63 = vsub.f32 %v15756_v39, %v15809_v9  ;;  %v17674_v34 = vsub.f32 %v15765_v52, %v15809_v9  ;;  %v17677_v41 = vld [vmem:[#allocation26_spill] sm:$0xff] }
 0x797   :  { %v6439_v4 = vmul.f32 %v15858_v54, %v17672_v48  ;;  %v17675_v59 = vsub.f32 %v15778_v19, %v15809_v9  ;;  %v15968_v16 = vadd.f32 %v5415_v13, %v5367_v12  ;;  %v15970_v35 = vpack.c.bf16 %v7084_v56, %v7076_v2  ;;  %v5516_v28 = vpop.f32.mrf.mxu0  ;;  %v10433_v2 = vld [vmem:[#allocation6 + $0x1c0] sm:$0xf]  ;;  %v10585_v48 = vld [vmem:[#allocation6 + $0x2f0] sm:$0xf]  ;;  %v11152_v56 = vld [vmem:[#allocation6 + $0x2f4] sm:$0xf0] }
 0x798   :  { %v6447_v0 = vmul.f32 %v15858_v54, %v17673_v63  ;;  %v6455_v15 = vmul.f32 %v15858_v54, %v17674_v34  ;;  %v6716_v14 = vadd.f32 %v15886_v26, %v6569_v11  ;;  %vm6836_vm13 = vcmp.gt.f32.partialorder %v6708_v36, 0.0  ;;  %5574 = vmatmul.bf16.gmra.mxu1 %v13655_v27  ;;  %v11114_v11 = vld [vmem:[#allocation6 + $0x1c4] sm:$0xf0] }
 0x799   :  { %v6463_v31 = vmul.f32 %v15858_v54, %v17675_v59  ;;  %17676 = vst [vmem:[#allocation25_spill] sm:$0xff] %v15970_v35  ;;  %v6964_v20 = vmul.f32 0.2, %v6708_v36  ;;  %v6585_v52 = vmul.f32 %v15852_v29, %v6439_v4  ;;  %v6724_v24 = vadd.f32 %v15886_v26, %v6577_v18  ;;  %v5369_v54 = vpop.f32.mrf.mxu1  ;;  %v17678_v63 = vld [vmem:[#allocation50_spill] sm:$0xff] }
 0x79a   :  { %v6593_v19 = vmul.f32 %v15852_v29, %v6447_v0  ;;  %vm6844_vm14 = vcmp.gt.f32.partialorder %v6716_v14, 0.0  ;;  %v6972_v12 = vmul.f32 0.2, %v6716_v14  ;;  %v6601_v18 = vmul.f32 %v15852_v29, %v6455_v15 }
 0x79b   :  { %v5464_v39 = vpop.f32.mrf.mxu3  ;;  %v7092_v43 = vsel %vm6836_vm13, %v6708_v36, %v6964_v20  ;;  %v6732_v22 = vadd.f32 %v15886_v26, %v6585_v52  ;;  %vm6852_vm15 = vcmp.gt.f32.partialorder %v6724_v24, 0.0  ;;  %v10434_v13 = vor.u32 %v11114_v11, %v10433_v2 }
 0x79c   :  { %v5465_v9 = vadd.f32 %v5464_v39, %v15803_v10  ;;  %v7100_v27 = vsel %vm6844_vm14, %v6716_v14, %v6972_v12  ;;  %v6980_v36 = vmul.f32 0.2, %v6724_v24  ;;  %v10586_v0 = vor.u32 %v11152_v56, %v10585_v48  ;;  %v5418_v39 = vpop.f32.mrf.mxu2  ;;  %v11136_v56 = vld [vmem:[#allocation6 + $0x274] sm:$0xf0] }
 0x79d   :  { %vm6860_vm0 = vcmp.gt.f32.partialorder %v6732_v22, 0.0  ;;  %v15987_v34 = vpack.c.bf16 %v7100_v27, %v7092_v43  ;;  %v6740_v59 = vadd.f32 %v15886_v26, %v6593_v19  ;;  %8139 = vmatpush.bf16.msrb.mxu2 %v10434_v13  ;;  %v6748_v15 = vadd.f32 %v15886_v26, %v6601_v18  ;;  %v10369_v27 = vld [vmem:[#allocation6 + $0x140] sm:$0xf] }
 0x79e   :  { %v15982_v4 = vadd.f32 %v5513_v58, %v5465_v9  ;;  %v7108_v58 = vsel %vm6852_vm15, %v6724_v24, %v6980_v36  ;;  %v6609_v20 = vmul.f32 %v15852_v29, %v6463_v31  ;;  %v6764_v14 = vadd.f32 %v15886_v26, %v15882_v37  ;;  %8234 = vmatpush.bf16.msra.mxu0 %v10586_v0 }
 0x79f   :  { %5623 = vmatmul.bf16.gmra.mxu2 %v13589_v33  ;;  %v5370_v33 = vadd.f32 %v5369_v54, %v15694_v46  ;;  %17679 = vst [vmem:[#allocation29_spill] sm:$0xff] %v15987_v34  ;;  %v6988_v46 = vmul.f32 0.2, %v6732_v22  ;;  %vm6868_vm1 = vcmp.gt.f32.partialorder %v6740_v59, 0.0  ;;  %v6996_v54 = vmul.f32 0.2, %v6740_v59  ;;  %v15997_v43 = vpop.f32.mrf.mxu0 }
 0x7a0   :  { %8066 = vmatmul.bf16.gmra.mxu0 %v17677_v41  ;;  %8017 = vmatmul.bf16.gmra.mxu3 %v17678_v63  ;;  %vm6876_vm2 = vcmp.gt.f32.partialorder %v6748_v15, 0.0  ;;  %v7004_v24 = vmul.f32 0.2, %v6748_v15  ;;  %v6756_v2 = vadd.f32 %v15886_v26, %v6609_v20  ;;  %v5816_v29 = vmul.f32 %v15800_v62, %v15800_v62  ;;  %v10521_v26 = vld [vmem:[#allocation6 + $0x270] sm:$0xf] }
 0x7a1   :  { %v15995_v52 = vadd.f32 %v5418_v39, %v5370_v33  ;;  %v7116_v9 = vsel %vm6860_vm0, %v6732_v22, %v6988_v46  ;;  %v5824_v37 = vmul.f32 %v15811_v3, %v15811_v3  ;;  %v7124_v22 = vsel %vm6868_vm1, %v6740_v59, %v6996_v54  ;;  %v5371_v33 = vpop.f32.mrf.mxu1  ;;  %v11098_v39 = vld [vmem:[#allocation6 + $0x144] sm:$0xf0] }
 0x7a2   :  { %v15999_v19 = vpack.c.bf16 %v7116_v9, %v7108_v58  ;;  %v7132_v11 = vsel %vm6876_vm2, %v6748_v15, %v7004_v24  ;;  %vm6884_vm3 = vcmp.gt.f32.partialorder %v6756_v2, 0.0  ;;  %vm6892_vm4 = vcmp.gt.f32.partialorder %v6764_v14, 0.0  ;;  %v10577_v58 = vld [vmem:[#allocation6 + $0x2e0] sm:$0xf]  ;;  %v11150_v15 = vld [vmem:[#allocation6 + $0x2e4] sm:$0xf0] }
 0x7a3   :  { %v5467_v12 = vpop.f32.mrf.mxu3  ;;  %v7012_v48 = vmul.f32 0.2, %v6756_v2  ;;  %v5832_v18 = vmul.f32 %v15829_v8, %v15829_v8  ;;  %v5372_v13 = vadd.f32 %v5371_v33, %v15718_v45  ;;  %v16012_v0 = vpack.c.bf16 %v7132_v11, %v7124_v22  ;;  %v11134_v24 = vld [vmem:[#allocation6 + $0x264] sm:$0xf0]  ;;  %v10569_v33 = vld [vmem:[#allocation6 + $0x2d0] sm:$0xf] }
 0x7a4   :  { %v5468_v31 = vadd.f32 %v5467_v12, %v15803_v10  ;;  %v5760_v46 = vadd.f32 %v15811_v3, %v15800_v62  ;;  %v10522_v59 = vor.u32 %v11136_v56, %v10521_v26  ;;  %v6064_v20 = vadd.f32 %v5824_v37, %v5816_v29  ;;  %v10513_v12 = vld [vmem:[#allocation6 + $0x260] sm:$0xf]  ;;  %v11148_v11 = vld [vmem:[#allocation6 + $0x2d4] sm:$0xf0] }
 0x7a5   :  { %v5840_v9 = vmul.f32 %v15841_v47, %v15841_v47  ;;  %v10370_v54 = vor.u32 %v11098_v39, %v10369_v27  ;;  %v10578_v45 = vor.u32 %v11150_v15, %v10577_v58  ;;  %v10514_v22 = vor.u32 %v11134_v24, %v10513_v12  ;;  %v10561_v12 = vld [vmem:[#allocation6 + $0x2c0] sm:$0xf] }
 0x7a6   :  { %v16010_v36 = vadd.f32 %v5516_v28, %v5468_v31  ;;  %v5761_v28 = vadd.f32 %v5760_v46, %v15829_v8  ;;  %v5420_v31 = vpop.f32.mrf.mxu2  ;;  %8185 = vmatpush.bf16.msra.mxu3 %v10522_v59  ;;  %v7020_v63 = vmul.f32 0.2, %v6764_v14  ;;  %v7140_v26 = vsel %vm6884_vm3, %v6756_v2, %v7012_v48 }
 0x7a7   :  { %v6065_v56 = vadd.f32 %v6064_v20, %v5832_v18  ;;  %v5848_v29 = vmul.f32 %v15854_v40, %v15854_v40  ;;  %v16022_v37 = vadd.f32 %v5420_v31, %v5372_v13  ;;  %8090 = vmatpush.bf16.msra.mxu1 %v10370_v54  ;;  %8235 = vmatpush.bf16.msra.mxu0 %v10578_v45  ;;  %v5521_v58 = vpop.f32.mrf.mxu0  ;;  %v11132_v45 = vld [vmem:[#allocation6 + $0x254] sm:$0xf0]  ;;  %v11146_v31 = vld [vmem:[#allocation6 + $0x2c4] sm:$0xf0] }
 0x7a8   :  { %v5762_v27 = vadd.f32 %v5761_v28, %v15841_v47  ;;  %v10570_v46 = vor.u32 %v11148_v11, %v10569_v33  ;;  %v7148_v59 = vsel %vm6892_vm4, %v6764_v14, %v7020_v63  ;;  %v5856_v2 = vmul.f32 %v15902_v17, %v15902_v17  ;;  %5579 = vmatmul.bf16.gmra.mxu1 %v17384_v32  ;;  %v17680_v14 = vld [vmem:[#allocation66_spill] sm:$0xff]  ;;  %v10497_v32 = vld [vmem:[#allocation6 + $0x240] sm:$0xf] }
 0x7a9   :  { %v6066_v15 = vadd.f32 %v6065_v56, %v5840_v9  ;;  %v16030_v18 = vpack.c.bf16 %v7148_v59, %v7140_v26  ;;  %v5374_v20 = vpop.f32.mrf.mxu1  ;;  %v10505_v9 = vld [vmem:[#allocation6 + $0x250] sm:$0xf]  ;;  %v10562_v56 = vor.u32 %v11146_v31, %v10561_v12 }
 0x7aa   :  { %v5763_v13 = vadd.f32 %v5762_v27, %v15854_v40  ;;  %8186 = vmatpush.bf16.msra.mxu3 %v10514_v22  ;;  %v5375_v63 = vadd.f32 %v5374_v20, %v15737_v50  ;;  %v10506_v28 = vor.u32 %v11132_v45, %v10505_v9  ;;  %v11130_v22 = vld [vmem:[#allocation6 + $0x244] sm:$0xf0]  ;;  %v17681_v26 = vld [vmem:[#allocation39_spill] sm:$0xff] }
 0x7ab   :  { %v5469_v39 = vpop.f32.mrf.mxu3  ;;  %v6067_v54 = vadd.f32 %v6066_v15, %v5848_v29  ;;  %8236 = vmatpush.bf16.msra.mxu0 %v10570_v46  ;;  %v10425_v50 = vld [vmem:[#allocation6 + $0x1b0] sm:$0xf]  ;;  %v11112_v29 = vld [vmem:[#allocation6 + $0x1b4] sm:$0xf0]  ;;  %v10498_v15 = vor.u32 %v11130_v22, %v10497_v32 }
 0x7ac   :  { %v5470_v48 = vadd.f32 %v5469_v39, %v15803_v10  ;;  %v5764_v33 = vadd.f32 %v5763_v13, %v15902_v17  ;;  %v10553_v27 = vld [vmem:[#allocation6 + $0x2b0] sm:$0xf]  ;;  %v10426_v46 = vor.u32 %v11112_v29, %v10425_v50 }
 0x7ad   :  { %v6068_v11 = vadd.f32 %v6067_v54, %v5856_v2  ;;  %v5880_v54 = vmul.f32 %v15995_v52, %v15995_v52  ;;  %v10361_v22 = vld [vmem:[#allocation6 + $0x130] sm:$0xf] }
 0x7ae   :  { %v16039_v24 = vadd.f32 %v15997_v43, %v5470_v48  ;;  %v5765_v39 = vadd.f32 %v5764_v33, %v15931_v23  ;;  %v5872_v43 = vmul.f32 %v15968_v16, %v15968_v16  ;;  %v5423_v59 = vpop.f32.mrf.mxu2  ;;  %8187 = vmatpush.bf16.msra.mxu3 %v10506_v28  ;;  %v11144_v48 = vld [vmem:[#allocation6 + $0x2b4] sm:$0xf0]  ;;  %8140 = vmatpush.bf16.msrb.mxu2 %v10426_v46  ;;  %v10489_v50 = vld [vmem:[#allocation6 + $0x230] sm:$0xf]  ;;  %v10417_v46 = vld [vmem:[#allocation6 + $0x1a0] sm:$0xf] }
 0x7af   :  { %5628 = vmatmul.bf16.gmra.mxu2 %v17390_v53  ;;  %v5864_v53 = vmul.f32 %v15931_v23, %v15931_v23  ;;  %v16046_v20 = vadd.f32 %v5423_v59, %v5375_v63  ;;  %v5523_v45 = vpop.f32.mrf.mxu0  ;;  %8237 = vmatpush.bf16.msra.mxu0 %v10562_v56  ;;  %v10554_v12 = vor.u32 %v11144_v48, %v10553_v27  ;;  %v11128_v59 = vld [vmem:[#allocation6 + $0x234] sm:$0xf0]  ;;  %v11110_v48 = vld [vmem:[#allocation6 + $0x1a4] sm:$0xf0] }
 0x7b0   :  { %8071 = vmatmul.bf16.gmra.mxu0 %v17680_v14  ;;  %8022 = vmatmul.bf16.gmra.mxu3 %v17681_v26  ;;  %v5766_v2 = vadd.f32 %v5765_v39, %v15968_v16  ;;  %v11126_v26 = vld [vmem:[#allocation6 + $0x224] sm:$0xf0] }
 0x7b1   :  { %v6069_v13 = vadd.f32 %v6068_v11, %v5864_v53  ;;  %v5888_v53 = vmul.f32 %v16022_v37, %v16022_v37  ;;  %v5376_v63 = vpop.f32.mrf.mxu1  ;;  %v11096_v11 = vld [vmem:[#allocation6 + $0x134] sm:$0xf0]  ;;  %v5896_v39 = vmul.f32 %v16046_v20, %v16046_v20 }
 0x7b2   :  { %v5767_v28 = vadd.f32 %v5766_v2, %v15995_v52  ;;  %8188 = vmatpush.bf16.msra.mxu3 %v10498_v15  ;;  %v5377_v32 = vadd.f32 %v5376_v63, %v15753_v61  ;;  %v10418_v15 = vor.u32 %v11110_v48, %v10417_v46  ;;  %v10545_v2 = vld [vmem:[#allocation6 + $0x2a0] sm:$0xf]  ;;  %v11142_v61 = vld [vmem:[#allocation6 + $0x2a4] sm:$0xf0] }
 0x7b3   :  { %v5472_v9 = vpop.f32.mrf.mxu3  ;;  %v6070_v31 = vadd.f32 %v6069_v13, %v5872_v43  ;;  %8238 = vmatpush.bf16.msra.mxu0 %v10554_v12  ;;  %v10362_v43 = vor.u32 %v11096_v11, %v10361_v22  ;;  %v10490_v13 = vor.u32 %v11128_v59, %v10489_v50  ;;  %v10409_v11 = vld [vmem:[#allocation6 + $0x190] sm:$0xf]  ;;  %v11108_v50 = vld [vmem:[#allocation6 + $0x194] sm:$0xf0] }
 0x7b4   :  { %v5473_v33 = vadd.f32 %v5472_v9, %v15803_v10  ;;  %v5768_v27 = vadd.f32 %v5767_v28, %v16022_v37  ;;  %v10353_v9 = vld [vmem:[#allocation6 + $0x120] sm:$0xf]  ;;  %8141 = vmatpush.bf16.msrb.mxu2 %v10418_v15  ;;  %v10537_v59 = vld [vmem:[#allocation6 + $0x290] sm:$0xf] }
 0x7b5   :  { %v6071_v56 = vadd.f32 %v6070_v31, %v5880_v54  ;;  %8091 = vmatpush.bf16.msra.mxu1 %v10362_v43  ;;  %v10546_v54 = vor.u32 %v11142_v61, %v10545_v2  ;;  %v11094_v31 = vld [vmem:[#allocation6 + $0x124] sm:$0xf0]  ;;  %v10481_v28 = vld [vmem:[#allocation6 + $0x220] sm:$0xf] }
 0x7b6   :  { %v16056_v29 = vadd.f32 %v5521_v58, %v5473_v33  ;;  %v5769_v58 = vadd.f32 %v5768_v27, %v16046_v20  ;;  %v5425_v33 = vpop.f32.mrf.mxu2  ;;  %8189 = vmatpush.bf16.msra.mxu3 %v10490_v13  ;;  %v10354_v12 = vor.u32 %v11094_v31, %v10353_v9  ;;  %v10482_v22 = vor.u32 %v11126_v26, %v10481_v28  ;;  %v11140_v27 = vld [vmem:[#allocation6 + $0x294] sm:$0xf0]  ;;  %v17682_v9 = vld [vmem:[#allocation23_spill] sm:$0xff] }
 0x7b7   :  { %v6072_v63 = vadd.f32 %v6071_v56, %v5888_v53  ;;  %v16062_v14 = vadd.f32 %v5425_v33, %v5377_v32  ;;  %v5526_v53 = vpop.f32.mrf.mxu0  ;;  %8239 = vmatpush.bf16.msra.mxu0 %v10546_v54  ;;  %v10410_v56 = vor.u32 %v11108_v50, %v10409_v11  ;;  %v10538_v13 = vor.u32 %v11140_v27, %v10537_v59 }
 0x7b9   :  { %v6073_v46 = vadd.f32 %v6072_v63, %v5896_v39  ;;  %v5770_v43 = vadd.f32 %v5769_v58, %v16062_v14  ;;  %v5904_v2 = vmul.f32 %v16062_v14, %v16062_v14  ;;  %v5379_v15 = vpop.f32.mrf.mxu1  ;;  %8092 = vmatpush.bf16.msra.mxu1 %v10354_v12  ;;  %8142 = vmatpush.bf16.msrb.mxu2 %v10410_v56  ;;  %v17683_v63 = vld [vmem:[#allocation71_spill] sm:$0xff] }
 0x7ba   :  { %v5380_v61 = vadd.f32 %v5379_v15, %v15763_v25  ;;  %8190 = vmatpush.bf16.msra.mxu3 %v10482_v22 }
 0x7bb   :  { %v5474_v48 = vpop.f32.mrf.mxu3  ;;  %v6074_v26 = vadd.f32 %v6073_v46, %v5904_v2  ;;  %8240 = vmatpush.bf16.msra.mxu0 %v10538_v13 }
 0x7bc   :  { %v5475_v32 = vadd.f32 %v5474_v48, %v15803_v10 }
 0x7be   :  { %v16070_v39 = vadd.f32 %v5523_v45, %v5475_v32  ;;  %v5428_v58 = vpop.f32.mrf.mxu2 }
 0x7bf   :  { %v16073_v33 = vadd.f32 %v5428_v58, %v5380_v61  ;;  %v5528_v31 = vpop.f32.mrf.mxu0 }
 0x7c0   :  { %8076 = vmatmul.bf16.gmra.mxu0 %v17682_v9  ;;  %8027 = vmatmul.bf16.gmra.mxu3 %v17683_v63  ;;  %v11138_v9 = vld [vmem:[#allocation6 + $0x284] sm:$0xf0] }
 0x7c1   :  { %v5771_v28 = vadd.f32 %v5770_v43, %v16073_v33  ;;  %v5912_v12 = vmul.f32 %v16073_v33, %v16073_v33  ;;  %v5381_v11 = vpop.f32.mrf.mxu1 }
 0x7c2   :  { %v5382_v45 = vadd.f32 %v5381_v11, %v15775_v60 }
 0x7c3   :  { %v5477_v54 = vpop.f32.mrf.mxu3  ;;  %v6075_v22 = vadd.f32 %v6074_v26, %v5912_v12  ;;  %v17684_v26 = vld [vmem:[#allocation72_spill] sm:$0xff] }
 0x7c4   :  { %v5478_v25 = vadd.f32 %v5477_v54, %v15803_v10 }
 0x7c6   :  { %v16080_v50 = vadd.f32 %v5526_v53, %v5478_v25  ;;  %v5430_v59 = vpop.f32.mrf.mxu2  ;;  %v17685_v53 = vld [vmem:[#allocation33_spill] sm:$0xff] }
 0x7c7   :  { %v16082_v46 = vadd.f32 %v5430_v59, %v5382_v45  ;;  %v5531_v56 = vpop.f32.mrf.mxu0  ;;  %v11092_v59 = vld [vmem:[#allocation6 + $0x114] sm:$0xf0] }
 0x7c9   :  { %v5772_v27 = vadd.f32 %v5771_v28, %v16082_v46  ;;  %v5920_v43 = vmul.f32 %v16082_v46, %v16082_v46  ;;  %v5384_v32 = vpop.f32.mrf.mxu1 }
 0x7ca   :  { %v5385_v15 = vadd.f32 %v5384_v32, %v15785_v6  ;;  %v11124_v32 = vld [vmem:[#allocation6 + $0x214] sm:$0xf0] }
 0x7cb   :  { %v5479_v48 = vpop.f32.mrf.mxu3  ;;  %v6076_v13 = vadd.f32 %v6075_v22, %v5920_v43 }
 0x7cc   :  { %v5480_v2 = vadd.f32 %v5479_v48, %v15803_v10  ;;  %v10473_v48 = vld [vmem:[#allocation6 + $0x210] sm:$0xf] }
 0x7ce   :  { %v16090_v60 = vadd.f32 %v5528_v31, %v5480_v2  ;;  %v5433_v61 = vpop.f32.mrf.mxu2  ;;  %v10345_v31 = vld [vmem:[#allocation6 + $0x110] sm:$0xf] }
 0x7cf   :  { %v16093_v58 = vadd.f32 %v5433_v61, %v5385_v15  ;;  %v5533_v28 = vpop.f32.mrf.mxu0  ;;  %v10346_v2 = vor.u32 %v11092_v59, %v10345_v31  ;;  %v10474_v15 = vor.u32 %v11124_v32, %v10473_v48  ;;  %v10401_v61 = vld [vmem:[#allocation6 + $0x180] sm:$0xf]  ;;  %v11122_v31 = vld [vmem:[#allocation6 + $0x204] sm:$0xf0] }
 0x7d0   :  { %8081 = vmatmul.bf16.gmra.mxu0 %v17684_v26  ;;  %8032 = vmatmul.bf16.gmra.mxu3 %v17685_v53  ;;  %v11106_v53 = vld [vmem:[#allocation6 + $0x184] sm:$0xf0] }
 0x7d1   :  { %v5773_v12 = vadd.f32 %v5772_v27, %v16093_v58  ;;  %v5928_v25 = vmul.f32 %v16093_v58, %v16093_v58  ;;  %v5386_v22 = vpop.f32.mrf.mxu1  ;;  %v10529_v27 = vld [vmem:[#allocation6 + $0x280] sm:$0xf]  ;;  %8093 = vmatpush.bf16.msra.mxu1 %v10346_v2  ;;  %v10402_v63 = vor.u32 %v11106_v53, %v10401_v61  ;;  %8191 = vmatpush.bf16.msra.mxu3 %v10474_v15 }
 0x7d2   :  { %v5387_v45 = vadd.f32 %v5386_v22, %v15797_v5  ;;  %v10337_v5 = vld [vmem:[#allocation6 + $0x100] sm:$0xf] }
 0x7d3   :  { %v5482_v54 = vpop.f32.mrf.mxu3  ;;  %v6077_v6 = vadd.f32 %v6076_v13, %v5928_v25  ;;  %v10530_v13 = vor.u32 %v11138_v9, %v10529_v27  ;;  %v11090_v25 = vld [vmem:[#allocation6 + $0x104] sm:$0xf0]  ;;  %v10465_v22 = vld [vmem:[#allocation6 + $0x200] sm:$0xf]  ;;  %8143 = vmatpush.bf16.msrb.mxu2 %v10402_v63 }
 0x7d4   :  { %v5483_v11 = vadd.f32 %v5482_v54, %v15803_v10  ;;  %v17686_v15 = vld [vmem:[#allocation61_spill] sm:$0xff]  ;;  %v17687_v27 = vld [vmem:[#allocation78_spill] sm:$0xff] }
 0x7d5   :  { %8241 = vmatpush.bf16.msra.mxu0 %v10530_v13 }
 0x7d6   :  { %v16100_v43 = vadd.f32 %v5531_v56, %v5483_v11  ;;  %v5435_v26 = vpop.f32.mrf.mxu2  ;;  %v10338_v11 = vor.u32 %v11090_v25, %v10337_v5  ;;  %8144 = vmatmul.bf16.vlgmr.msrb.gmra.mxu2 %v17686_v15 }
 0x7d7   :  { %v16102_v54 = vadd.f32 %v5435_v26, %v5387_v45  ;;  %v8047_v56 = vpop.f32.mrf.mxu0  ;;  %v10466_v26 = vor.u32 %v11122_v31, %v10465_v22 }
 0x7d8   :  { %8094 = vmatpush.bf16.msra.mxu1 %v10338_v11 }
 0x7d9   :  { %v5774_v59 = vadd.f32 %v5773_v12, %v16102_v54  ;;  %v5936_v48 = vmul.f32 %v16102_v54, %v16102_v54  ;;  %v5545_v45 = vpop.f32.mrf.mxu1  ;;  %8192 = vmatpush.bf16.msra.mxu3 %v10466_v26 }
 0x7da   :  { %v5546_v32 = vadd.f32 %v5545_v45, %v15807_v21 }
 0x7db   :  { %v5484_v41 = vpop.f32.mrf.mxu3  ;;  %v5775_v9 = vrot.slane %v5774_v59, 4  ;;  %v6078_v2 = vadd.f32 %v6077_v6, %v5936_v48  ;;  %8095 = vmatmul.bf16.vlgmr.msra.gmra.mxu1 %v17687_v27 }
 0x7dc   :  { %v5485_v53 = vadd.f32 %v5484_v41, %v15803_v10  ;;  %v7343_v41 = vld [vmem:[#allocation10] sm:$0x3] }
 0x7dd   :  { %v5776_v12 = vadd.f32 %v5775_v9, %v5774_v59  ;;  %v6079_v61 = vrot.slane %v6078_v2, 4  ;;  %v16117_v21 = vperm.slane %v7343_v41, 0 }
 0x7de   :  { %v16110_v63 = vadd.f32 %v5533_v28, %v5485_v53  ;;  %v5594_v10 = vpop.f32.mrf.mxu2 }
 0x7df   :  { %v5777_v13 = vrot.slane %v5776_v12, 2  ;;  %v6080_v5 = vadd.f32 %v6079_v61, %v6078_v2  ;;  %v16115_v6 = vadd.f32 %v5594_v10, %v5546_v32  ;;  %v8049_v22 = vpop.f32.mrf.mxu0 }
 0x7e0   :  { %8242 = vmatmul.bf16.vlgmr.msra.gmra.mxu0 %v15916_v55  ;;  %8193 = vmatmul.bf16.vlgmr.msra.gmra.mxu3 %v15607_v7  ;;  %v17692_v55 = vld [vmem:[#allocation48_spill] sm:$0xff] }
 0x7e1   :  { %v5778_v28 = vadd.f32 %v5777_v13, %v5776_v12  ;;  %v6081_v11 = vrot.slane %v6080_v5, 2  ;;  %v5547_v59 = vpop.f32.mrf.mxu1 }
 0x7e2   :  { %v5548_v26 = vadd.f32 %v5547_v59, %v15822_v49  ;;  %v11184_v59 = vld [vmem:[#allocation6 + $0x3f4] sm:$0xf0] }
 0x7e3   :  { %v7998_v25 = vpop.f32.mrf.mxu3  ;;  %v5779_v48 = vrot.slane %v5778_v28, 1  ;;  %v6082_v53 = vadd.f32 %v6081_v11, %v6080_v5  ;;  %v10649_v5 = vld [vmem:[#allocation6 + $0x370] sm:$0xf] }
 0x7e4   :  { %v7999_v31 = vadd.f32 %v7998_v25, %v16117_v21 }
 0x7e5   :  { %v5780_v9 = vadd.f32 %v5779_v48, %v5778_v28  ;;  %v6083_v15 = vrot.slane %v6082_v53, 1 }
 0x7e6   :  { %v16121_v45 = vadd.f32 %v8047_v56, %v7999_v31  ;;  %v5596_v2 = vpop.f32.mrf.mxu2  ;;  %v17688_v31 = vld [vmem:[#allocation64_spill] sm:$0xff] }
 0x7e7   :  { %v16123_v32 = vmul.f32 0.0078125, %v5780_v9  ;;  %v6084_v61 = vadd.f32 %v6083_v15, %v6082_v53  ;;  %v16125_v10 = vadd.f32 %v5596_v2, %v5548_v26  ;;  %v8052_v12 = vpop.f32.mrf.mxu0  ;;  %8149 = vmatmul.bf16.gmra.mxu2 %v17688_v31  ;;  %v10713_v15 = vld [vmem:[#allocation6 + $0x3f0] sm:$0xf] }
 0x7e8   :  { %v17689_v26 = vld [vmem:[#allocation79_spill] sm:$0xff]  ;;  %v10714_v9 = vor.u32 %v11184_v59, %v10713_v15 }
 0x7e9   :  { %v6112_v13 = vmul.f32 0.0078125, %v6084_v61  ;;  %v6120_v25 = vmul.f32 %v16123_v32, %v16123_v32  ;;  %v5550_v56 = vpop.f32.mrf.mxu1  ;;  %v17690_v2 = vld [vmem:[#allocation63_spill] sm:$0xff] }
 0x7ea   :  { %v5551_v11 = vadd.f32 %v5550_v56, %v15839_v42  ;;  %8332 = vmatpush.bf16.msra.mxu2 %v10714_v9 }
 0x7eb   :  { %v8000_v41 = vpop.f32.mrf.mxu3  ;;  %v6128_v28 = vsub.f32 %v6112_v13, %v6120_v25  ;;  %8100 = vmatmul.bf16.gmra.mxu1 %v17689_v26 }
 0x7ec   :  { %v8001_v49 = vadd.f32 %v8000_v41, %v16117_v21  ;;  %v17691_v41 = vld [vmem:[#allocation20_spill] sm:$0xff] }
 0x7ed   :  { %v6264_v53 = vadd.f32 0.8, %v6128_v28 }
 0x7ee   :  { %v16135_v48 = vadd.f32 %v8049_v22, %v8001_v49  ;;  %v5599_v61 = vpop.f32.mrf.mxu2 }
 0x7ef   :  { %11240 = vrsqrt.f32 %v6264_v53  ;;  %v16143_v13 = vadd.f32 %v5599_v61, %v5551_v11  ;;  %v8054_v49 = vpop.f32.mrf.mxu0  ;;  %v11168_v11 = vld [vmem:[#allocation6 + $0x374] sm:$0xf0]  ;;  %vm6332_vm6 = vweird.f32 %v6264_v53 }
 0x7f0   :  { %8247 = vmatmul.bf16.gmra.mxu0 %v15929_v30  ;;  %8198 = vmatmul.bf16.gmra.mxu3 %v17690_v2  ;;  %v10650_v9 = vor.u32 %v11168_v11, %v10649_v5 }
 0x7f1   :  { %v5552_v59 = vpop.f32.mrf.mxu1 }
 0x7f2   :  { %v5553_v42 = vadd.f32 %v5552_v59, %v17691_v41  ;;  %8283 = vmatpush.bf16.msrb.mxu1 %v10650_v9  ;;  %v17693_v59 = vld [vmem:[#allocation65_spill] sm:$0xff] }
 0x7f3   :  { %v8003_v25 = vpop.f32.mrf.mxu3 }
 0x7f4   :  { %v8004_v15 = vadd.f32 %v8003_v25, %v16117_v21 }
 0x7f5   :  { %v11241_v31 = vpop.eup %11240 }
 0x7f6   :  { %v16153_v61 = vadd.f32 %v8052_v12, %v8004_v15  ;;  %v6327_v22 = vmul.f32 %v11241_v31, %v6264_v53  ;;  %v5601_v2 = vpop.f32.mrf.mxu2  ;;  %vm6333_vm5 = vweird.f32 %v11241_v31  ;;  %v10705_v15 = vld [vmem:[#allocation6 + $0x3e0] sm:$0xf] }
 0x7f7   :  { %v16155_v26 = vadd.f32 %v5601_v2, %v5553_v42  ;;  %v8057_v7 = vpop.f32.mrf.mxu0  ;;  %8154 = vmatmul.bf16.gmra.mxu2 %v17693_v59  ;;  %v11182_v2 = vld [vmem:[#allocation6 + $0x3e4] sm:$0xf0]  ;;  %v17695_v42 = vld [vmem:[#allocation80_spill] sm:$0xff]  ;;  %vm6334_vm7 = vmor %vm6332_vm6, %vm6333_vm5 }
 0x7f8   :  { %v6328_v56 = vmul.f32 %v11241_v31, %v6327_v22  ;;  %v10706_v22 = vor.u32 %v11182_v2, %v10705_v15  ;;  %v6152_v15 = vsub.f32 %v15829_v8, %v16123_v32  ;;  %v6160_v2 = vsub.f32 %v15841_v47, %v16123_v32 }
 0x7f9   :  { %v5555_v27 = vpop.f32.mrf.mxu1 }
 0x7fa   :  { %v6329_v25 = vmul.f32 0.5, %v6328_v56  ;;  %v5556_v41 = vadd.f32 %v5555_v27, %v17692_v55  ;;  %v16168_v55 = vld [vmem:[%s17036_s12] ss:$2 sm:$0xff]  ;;  %8333 = vmatpush.bf16.msra.mxu2 %v10706_v22 }
 0x7fb   :  { %v8005_v30 = vpop.f32.mrf.mxu3  ;;  %8105 = vmatmul.bf16.gmra.mxu1 %v17695_v42  ;;  %17697 = vst [vmem:[#allocation40_spill] sm:$0xff] %v16168_v55  ;;  %v16171_v27 = vperm.slane %v16168_v55, 6  ;;  %v6200_v55 = vsub.f32 %v15995_v52, %v16123_v32 }
 0x7fc   :  { %v8006_v28 = vadd.f32 %v8005_v30, %v16117_v21  ;;  %v6330_v5 = vsub.f32 1.5, %v6329_v25  ;;  %v17696_v30 = vld [vmem:[#allocation55_spill] sm:$0xff] }
 0x7fe   :  { %v16160_v12 = vadd.f32 %v8054_v49, %v8006_v28  ;;  %v6331_v11 = vmul.f32 %v11241_v31, %v6330_v5  ;;  %v5604_v56 = vpop.f32.mrf.mxu2  ;;  %v6136_v28 = vsub.f32 %v15800_v62, %v16123_v32  ;;  %v6144_v5 = vsub.f32 %v15811_v3, %v16123_v32 }
 0x7ff   :  { %v16173_v49 = vadd.f32 %v5604_v56, %v5556_v41  ;;  %v8059_v25 = vpop.f32.mrf.mxu0  ;;  %v17698_v41 = vsub.f32 %v16102_v54, %v16123_v32  ;;  %v10641_v54 = vld [vmem:[#allocation6 + $0x360] sm:$0xf] }
 0x800   :  { %17694 = vst [vmem:[#allocation41_spill] sm:$0xff] %v16160_v12  ;;  %8252 = vmatmul.bf16.gmra.mxu0 %v15942_v44  ;;  %8203 = vmatmul.bf16.gmra.mxu3 %v17696_v30  ;;  %v16177_v9 = vsel %vm6334_vm7, %v11241_v31, %v6331_v11  ;;  %v6168_v31 = vsub.f32 %v15854_v40, %v16123_v32 }
 0x801   :  { %v6472_v22 = vmul.f32 %v16177_v9, %v17698_v41  ;;  %v16192_v11 = vpop.f32.mrf.mxu1  ;;  %v6352_v3 = vmul.f32 %v16177_v9, %v6136_v28  ;;  %v6360_v56 = vmul.f32 %v16177_v9, %v6144_v5  ;;  %v6368_v8 = vmul.f32 %v16177_v9, %v6152_v15  ;;  %v11166_v41 = vld [vmem:[#allocation6 + $0x364] sm:$0xf0] }
 0x802   :  { %v6376_v47 = vmul.f32 %v16177_v9, %v6160_v2  ;;  %v6176_v28 = vsub.f32 %v15902_v17, %v16123_v32  ;;  %v6184_v5 = vsub.f32 %v15931_v23, %v16123_v32  ;;  %v10642_v15 = vor.u32 %v11166_v41, %v10641_v54 }
 0x803   :  { %v8008_v53 = vpop.f32.mrf.mxu3  ;;  %v16199_v59 = vmul.f32 %v16171_v27, %v6472_v22  ;;  %v6498_v2 = vmul.f32 %v16171_v27, %v6352_v3  ;;  %v6506_v22 = vmul.f32 %v16171_v27, %v6360_v56  ;;  %v6514_v30 = vmul.f32 %v16171_v27, %v6368_v8 }
 0x804   :  { %v8009_v62 = vadd.f32 %v8008_v53, %v16117_v21  ;;  %v16204_v53 = vld [vmem:[%s17036_s12 + $0x1] ss:$2 sm:$0xff]  ;;  %v6522_v42 = vmul.f32 %v16171_v27, %v6376_v47  ;;  %v6384_v51 = vmul.f32 %v16177_v9, %v6168_v31  ;;  %v6392_v38 = vmul.f32 %v16177_v9, %v6176_v28  ;;  %8284 = vmatpush.bf16.msrb.mxu1 %v10642_v15 }
 0x805   :  { %17699 = vst [vmem:[#allocation27_spill] sm:$0xff] %v16204_v53  ;;  %v16207_v40 = vperm.slane %v16204_v53, 6  ;;  %v6400_v56 = vmul.f32 %v16177_v9, %v6184_v5 }
 0x806   :  { %v16217_v44 = vadd.f32 %v8057_v7, %v8009_v62  ;;  %v16221_v53 = vpop.f32.mrf.mxu2  ;;  %v6530_v7 = vmul.f32 %v16171_v27, %v6384_v51  ;;  %v6538_v62 = vmul.f32 %v16171_v27, %v6392_v38 }
 0x807   :  { %v6645_v17 = vadd.f32 %v16207_v40, %v6498_v2  ;;  %v6653_v23 = vadd.f32 %v16207_v40, %v6506_v22  ;;  %v6661_v3 = vadd.f32 %v16207_v40, %v6514_v30  ;;  %v6669_v8 = vadd.f32 %v16207_v40, %v6522_v42  ;;  %v17701_v2 = vld [vmem:[#allocation75_spill] sm:$0xff] }
 0x808   :  { %17700 = vst [vmem:[#allocation45_spill] sm:$0xff] %v16217_v44  ;;  %v6192_v30 = vsub.f32 %v15968_v16, %v16123_v32  ;;  %8159 = vmatmul.bf16.gmra.mxu2 %v17701_v2  ;;  %v10697_v16 = vld [vmem:[#allocation6 + $0x3d0] sm:$0xf]  ;;  %v11180_v44 = vld [vmem:[#allocation6 + $0x3d4] sm:$0xf0] }
 0x809   :  { %vm6773_vm8 = vcmp.gt.f32.partialorder %v6645_v17, 0.0  ;;  %vm6781_vm9 = vcmp.gt.f32.partialorder %v6653_v23, 0.0  ;;  %v6901_v54 = vmul.f32 0.2, %v6645_v17  ;;  %v6909_v41 = vmul.f32 0.2, %v6653_v23  ;;  %v16233_v15 = vpop.f32.mrf.mxu1 }
 0x80a   :  { %vm6789_vm10 = vcmp.gt.f32.partialorder %v6661_v3, 0.0  ;;  %vm6797_vm11 = vcmp.gt.f32.partialorder %v6669_v8, 0.0  ;;  %v6917_v51 = vmul.f32 0.2, %v6661_v3  ;;  %v6925_v22 = vmul.f32 0.2, %v6669_v8 }
 0x80b   :  { %v8010_v31 = vpop.f32.mrf.mxu3  ;;  %v7029_v5 = vsel %vm6773_vm8, %v6645_v17, %v6901_v54  ;;  %v7037_v42 = vsel %vm6781_vm9, %v6653_v23, %v6909_v41  ;;  %v6677_v17 = vadd.f32 %v16207_v40, %v6530_v7  ;;  %v6685_v23 = vadd.f32 %v16207_v40, %v6538_v62  ;;  %v17703_v41 = vld [vmem:[#allocation81_spill] sm:$0xff]  ;;  %v17704_v2 = vld [vmem:[#allocation47_spill] sm:$0xff] }
 0x80c   :  { %v8011_v28 = vadd.f32 %v8010_v31, %v16117_v21  ;;  %v16236_v38 = vpack.c.bf16 %v7037_v42, %v7029_v5  ;;  %v6208_v31 = vsub.f32 %v16022_v37, %v16123_v32  ;;  %v7045_v12 = vsel %vm6789_vm10, %v6661_v3, %v6917_v51  ;;  %8110 = vmatmul.bf16.gmra.mxu1 %v17703_v41 }
 0x80d   :  { %v8062_v47 = vpop.f32.mrf.mxu0  ;;  %v10698_v5 = vor.u32 %v11180_v44, %v10697_v16  ;;  %v7053_v42 = vsel %vm6797_vm11, %v6669_v8, %v6925_v22  ;;  %v6408_v52 = vmul.f32 %v16177_v9, %v6192_v30  ;;  %v6546_v37 = vmul.f32 %v16171_v27, %v6400_v56 }
 0x80e   :  { %17702 = vst [vmem:[#allocation35_spill] sm:$0xff] %v16236_v38  ;;  %v16245_v54 = vadd.f32 %v8059_v25, %v8011_v28  ;;  %v16254_v3 = vpack.c.bf16 %v7053_v42, %v7045_v12  ;;  %vm6805_vm12 = vcmp.gt.f32.partialorder %v6677_v17, 0.0  ;;  %vm6813_vm13 = vcmp.gt.f32.partialorder %v6685_v23, 0.0 }
 0x80f   :  { %v6933_v7 = vmul.f32 0.2, %v6677_v17  ;;  %8334 = vmatpush.bf16.msra.mxu2 %v10698_v5  ;;  %v6941_v25 = vmul.f32 0.2, %v6685_v23  ;;  %v6554_v62 = vmul.f32 %v16171_v27, %v6408_v52  ;;  %v6693_v44 = vadd.f32 %v16207_v40, %v6546_v37 }
 0x810   :  { %8257 = vmatmul.bf16.gmra.mxu0 %v15970_v35  ;;  %8208 = vmatmul.bf16.gmra.mxu3 %v17704_v2  ;;  %v16252_v35 = vpop.f32.mrf.mxu2  ;;  %17705 = vst [vmem:[#allocation31_spill] sm:$0xff] %v16254_v3  ;;  %v6416_v56 = vmul.f32 %v16177_v9, %v6200_v55  ;;  %v6424_v51 = vmul.f32 %v16177_v9, %v6208_v31  ;;  %v11164_v55 = vld [vmem:[#allocation6 + $0x354] sm:$0xf0] }
 0x811   :  { %v7061_v30 = vsel %vm6805_vm12, %v6677_v17, %v6933_v7  ;;  %v17706_v12 = vsub.f32 %v16046_v20, %v16123_v32  ;;  %v7069_v5 = vsel %vm6813_vm13, %v6685_v23, %v6941_v25  ;;  %v16265_v42 = vpop.f32.mrf.mxu1  ;;  %v6701_v37 = vadd.f32 %v16207_v40, %v6554_v62  ;;  %v10633_v7 = vld [vmem:[#allocation6 + $0x350] sm:$0xf] }
 0x812   :  { %v16267_v52 = vpack.c.bf16 %v7069_v5, %v7061_v30  ;;  %vm6821_vm14 = vcmp.gt.f32.partialorder %v6693_v44, 0.0  ;;  %v6949_v17 = vmul.f32 0.2, %v6693_v44  ;;  %v6562_v31 = vmul.f32 %v16171_v27, %v6416_v56 }
 0x813   :  { %v8013_v8 = vpop.f32.mrf.mxu3  ;;  %v6432_v22 = vmul.f32 %v16177_v9, %v17706_v12  ;;  %v10634_v20 = vor.u32 %v11164_v55, %v10633_v7  ;;  %vm6829_vm15 = vcmp.gt.f32.partialorder %v6701_v37, 0.0  ;;  %v6957_v12 = vmul.f32 0.2, %v6701_v37 }
 0x814   :  { %v8014_v16 = vadd.f32 %v8013_v8, %v16117_v21  ;;  %17707 = vst [vmem:[#allocation24_spill] sm:$0xff] %v16267_v52  ;;  %v7077_v41 = vsel %vm6821_vm14, %v6693_v44, %v6949_v17  ;;  %v6570_v23 = vmul.f32 %v16171_v27, %v6424_v51  ;;  %v6709_v25 = vadd.f32 %v16207_v40, %v6562_v31 }
 0x815   :  { %v8064_v28 = vpop.f32.mrf.mxu0  ;;  %v17708_v8 = vsub.f32 %v16062_v14, %v16123_v32  ;;  %v6578_v30 = vmul.f32 %v16171_v27, %v6432_v22  ;;  %8285 = vmatpush.bf16.msrb.mxu1 %v10634_v20  ;;  %v17709_v56 = vsub.f32 %v16073_v33, %v16123_v32  ;;  %v17710_v51 = vsub.f32 %v16082_v46, %v16123_v32 }
 0x816   :  { %v16270_v2 = vadd.f32 %v8062_v47, %v8014_v16  ;;  %v7085_v47 = vsel %vm6829_vm15, %v6701_v37, %v6957_v12  ;;  %v17711_v14 = vsub.f32 %v16093_v58, %v16123_v32  ;;  %v6717_v7 = vadd.f32 %v16207_v40, %v6570_v23  ;;  %v17713_v23 = vld [vmem:[#allocation74_spill] sm:$0xff] }
 0x817   :  { %v6440_v62 = vmul.f32 %v16177_v9, %v17708_v8  ;;  %v6448_v44 = vmul.f32 %v16177_v9, %v17709_v56  ;;  %v6456_v16 = vmul.f32 %v16177_v9, %v17710_v51  ;;  %v16294_v22 = vpack.c.bf16 %v7085_v47, %v7077_v41  ;;  %v11087_v56 = vld [vmem:[#allocation6 + $0xf4] sm:$0xf] }
 0x818   :  { %v16280_v5 = vpop.f32.mrf.mxu2  ;;  %v6464_v17 = vmul.f32 %v16177_v9, %v17711_v14  ;;  %vm6837_vm0 = vcmp.gt.f32.partialorder %v6709_v25, 0.0  ;;  %v6965_v33 = vmul.f32 0.2, %v6709_v25  ;;  %v6725_v20 = vadd.f32 %v16207_v40, %v6578_v30  ;;  %8164 = vmatmul.bf16.gmra.mxu2 %v17713_v23  ;;  %v11178_v30 = vld [vmem:[#allocation6 + $0x3c4] sm:$0xf0] }
 0x819   :  { %17712 = vst [vmem:[#allocation38_spill] sm:$0xff] %v16294_v22  ;;  %v6586_v31 = vmul.f32 %v16171_v27, %v6440_v62  ;;  %v6594_v46 = vmul.f32 %v16171_v27, %v6448_v44  ;;  %vm6845_vm1 = vcmp.gt.f32.partialorder %v6717_v7, 0.0  ;;  %v16301_v58 = vpop.f32.mrf.mxu1  ;;  %v6973_v32 = vmul.f32 0.2, %v6717_v7  ;;  %v10689_v62 = vld [vmem:[#allocation6 + $0x3c0] sm:$0xf] }
 0x81a   :  { %v7093_v9 = vsel %vm6837_vm0, %v6709_v25, %v6965_v33  ;;  %vm6853_vm2 = vcmp.gt.f32.partialorder %v6725_v20, 0.0  ;;  %v6981_v47 = vmul.f32 0.2, %v6725_v20  ;;  %v6602_v51 = vmul.f32 %v16171_v27, %v6456_v16  ;;  %v17717_v23 = vld [vmem:[#allocation46_spill] sm:$0xff] }
 0x81b   :  { %v8015_v37 = vpop.f32.mrf.mxu3  ;;  %v6733_v41 = vadd.f32 %v16207_v40, %v6586_v31  ;;  %v7101_v44 = vsel %vm6845_vm1, %v6717_v7, %v6973_v32  ;;  %v6741_v14 = vadd.f32 %v16207_v40, %v6594_v46  ;;  %v6610_v25 = vmul.f32 %v16171_v27, %v6464_v17  ;;  %v10331_v31 = vld [vmem:[#allocation6 + $0xf8] sm:$0xf0]  ;;  %v11069_v22 = vld [vmem:[#allocation6 + $0x64] sm:$0xf] }
 0x81c   :  { %v8016_v12 = vadd.f32 %v8015_v37, %v16117_v21  ;;  %v17715_v37 = vld [vmem:[#allocation82_spill] sm:$0xff]  ;;  %v10690_v33 = vor.u32 %v11178_v30, %v10689_v62  ;;  %v7109_v7 = vsel %vm6853_vm2, %v6725_v20, %v6981_v47  ;;  %v6749_v16 = vadd.f32 %v16207_v40, %v6602_v51 }
 0x81d   :  { %v8067_v55 = vpop.f32.mrf.mxu0  ;;  %8115 = vmatmul.bf16.gmra.mxu1 %v17715_v37  ;;  %vm6861_vm3 = vcmp.gt.f32.partialorder %v6733_v41, 0.0  ;;  %vm6869_vm4 = vcmp.gt.f32.partialorder %v6741_v14, 0.0  ;;  %v5825_v27 = vmul.f32 %v16125_v10, %v16125_v10  ;;  %v6997_v46 = vmul.f32 0.2, %v6741_v14  ;;  %v10323_v37 = vld [vmem:[#allocation6 + $0xe8] sm:$0xf0] }
 0x81e   :  { %v16305_v8 = vadd.f32 %v8064_v28, %v8016_v12  ;;  %v16312_v28 = vpack.c.bf16 %v7101_v44, %v7093_v9  ;;  %v6989_v12 = vmul.f32 0.2, %v6733_v41  ;;  %8335 = vmatpush.bf16.msra.mxu2 %v10690_v33  ;;  %v6757_v32 = vadd.f32 %v16207_v40, %v6610_v25 }
 0x81f   :  { %vm6877_vm5 = vcmp.gt.f32.partialorder %v6749_v16, 0.0  ;;  %v6765_v20 = vadd.f32 %v16207_v40, %v16199_v59  ;;  %v5817_v47 = vmul.f32 %v16115_v6, %v16115_v6  ;;  %v7125_v51 = vsel %vm6869_vm4, %v6741_v14, %v6997_v46  ;;  %v11071_v40 = vld [vmem:[#allocation6 + $0x74] sm:$0xf]  ;;  %v11162_v46 = vld [vmem:[#allocation6 + $0x344] sm:$0xf0] }
 0x820   :  { %17714 = vst [vmem:[#allocation36_spill] sm:$0xff] %v16305_v8  ;;  %8262 = vmatmul.bf16.gmra.mxu0 %v15987_v34  ;;  %8213 = vmatmul.bf16.gmra.mxu3 %v17717_v23  ;;  %v16315_v34 = vpop.f32.mrf.mxu2  ;;  %v10334_v8 = vor.u32 %v11087_v56, %v10331_v31  ;;  %v7117_v17 = vsel %vm6861_vm3, %v6733_v41, %v6989_v12  ;;  %v7005_v56 = vmul.f32 0.2, %v6749_v16  ;;  %vm6885_vm6 = vcmp.gt.f32.partialorder %v6757_v32, 0.0  ;;  %v10267_v12 = vld [vmem:[#allocation6 + $0x78] sm:$0xf0] }
 0x821   :  { %17716 = vst [vmem:[#allocation32_spill] sm:$0xff] %v16312_v28  ;;  %v16324_v30 = vpack.c.bf16 %v7117_v17, %v7109_v7  ;;  %v5781_v41 = vadd.f32 %v16125_v10, %v16115_v6  ;;  %v5567_v25 = vpop.f32.mrf.mxu1  ;;  %vm6893_vm7 = vcmp.gt.f32.partialorder %v6765_v20, 0.0  ;;  %v5833_v31 = vmul.f32 %v16143_v13, %v16143_v13  ;;  %v10625_v7 = vld [vmem:[#allocation6 + $0x340] sm:$0xf] }
 0x822   :  { %8430 = vmatpush.bf16.msrb.mxu0 %v10334_v8  ;;  %v7133_v33 = vsel %vm6877_vm5, %v6749_v16, %v7005_v56  ;;  %v7013_v8 = vmul.f32 0.2, %v6757_v32  ;;  %v5558_v59 = vadd.f32 %v16192_v11, %v15925_v1  ;;  %v10270_v16 = vor.u32 %v11071_v40, %v10267_v12  ;;  %v11085_v56 = vld [vmem:[#allocation6 + $0xe4] sm:$0xf] }
 0x823   :  { %v8018_v9 = vpop.f32.mrf.mxu3  ;;  %17718 = vst [vmem:[#allocation51_spill] sm:$0xff] %v16324_v30  ;;  %v16340_v23 = vpack.c.bf16 %v7133_v33, %v7125_v51  ;;  %v5782_v14 = vadd.f32 %v5781_v41, %v16143_v13  ;;  %v5841_v30 = vmul.f32 %v16155_v26, %v16155_v26  ;;  %v10626_v1 = vor.u32 %v11162_v46, %v10625_v7  ;;  %v10315_v51 = vld [vmem:[#allocation6 + $0xd8] sm:$0xf0] }
 0x824   :  { %v8019_v44 = vadd.f32 %v8018_v9, %v16117_v21  ;;  %v6085_v9 = vadd.f32 %v5825_v27, %v5817_v47  ;;  %v16346_v28 = vadd.f32 %v16221_v53, %v5558_v59  ;;  %v10326_v11 = vor.u32 %v11085_v56, %v10323_v37  ;;  %8381 = vmatpush.bf16.msrb.mxu3 %v10270_v16  ;;  %v10251_v56 = vld [vmem:[#allocation6 + $0x58] sm:$0xf0] }
 0x825   :  { %v16322_v62 = vpop.f32.mrf.mxu0  ;;  %v5561_v27 = vadd.f32 %v16233_v15, %v15946_v57  ;;  %v7021_v33 = vmul.f32 0.2, %v6765_v20  ;;  %v7141_v40 = vsel %vm6885_vm6, %v6757_v32, %v7013_v8  ;;  %v5849_v53 = vmul.f32 %v16173_v49, %v16173_v49  ;;  %8286 = vmatpush.bf16.msrb.mxu1 %v10626_v1  ;;  %v11081_v1 = vld [vmem:[#allocation6 + $0xc4] sm:$0xf] }
 0x826   :  { %v16338_v17 = vadd.f32 %v8067_v55, %v8019_v44  ;;  %v10259_v55 = vld [vmem:[#allocation6 + $0x68] sm:$0xf0]  ;;  %v11083_v44 = vld [vmem:[#allocation6 + $0xd4] sm:$0xf]  ;;  %v6086_v12 = vadd.f32 %v6085_v9, %v5833_v31  ;;  %8431 = vmatpush.bf16.msrb.mxu0 %v10326_v11  ;;  %v5783_v59 = vadd.f32 %v5782_v14, %v16155_v26  ;;  %v5563_v57 = vadd.f32 %v16265_v42, %v15982_v4 }
 0x827   :  { %v10262_v41 = vor.u32 %v11069_v22, %v10259_v55  ;;  %v10318_v37 = vor.u32 %v11083_v44, %v10315_v51  ;;  %v16355_v7 = vadd.f32 %v16252_v35, %v5561_v27  ;;  %v7149_v16 = vsel %vm6893_vm7, %v6765_v20, %v7021_v33  ;;  %v17719_v20 = vld [vmem:[#allocation76_spill] sm:$0xff]  ;;  %v10307_v44 = vld [vmem:[#allocation6 + $0xc8] sm:$0xf0]  ;;  %v11065_v27 = vld [vmem:[#allocation6 + $0x44] sm:$0xf] }
 0x828   :  { %v5616_v47 = vpop.f32.mrf.mxu2  ;;  %v6087_v32 = vadd.f32 %v6086_v12, %v5841_v30  ;;  %v5857_v8 = vmul.f32 %v16346_v28, %v16346_v28  ;;  %v16363_v9 = vpack.c.bf16 %v7149_v16, %v7141_v40  ;;  %v16366_v14 = vadd.f32 %v16280_v5, %v5563_v57  ;;  %8169 = vmatmul.bf16.gmra.mxu2 %v17719_v20  ;;  %v11067_v30 = vld [vmem:[#allocation6 + $0x54] sm:$0xf]  ;;  %v17720_v40 = vld [vmem:[#allocation30_spill] sm:$0xff]  ;;  %v10681_v12 = vld [vmem:[#allocation6 + $0x3b0] sm:$0xf] }
 0x829   :  { %v5566_v35 = vadd.f32 %v16301_v58, %v16010_v36  ;;  %v5570_v46 = vpop.f32.mrf.mxu1  ;;  %8382 = vmatpush.bf16.msrb.mxu3 %v10262_v41  ;;  %v5784_v4 = vadd.f32 %v5783_v59, %v16173_v49  ;;  %v5865_v5 = vmul.f32 %v16355_v7, %v16355_v7  ;;  %v5568_v36 = vadd.f32 %v5567_v25, %v16039_v24  ;;  %v10243_v41 = vld [vmem:[#allocation6 + $0x48] sm:$0xf0]  ;;  %v10299_v16 = vld [vmem:[#allocation6 + $0xb8] sm:$0xf0] }
 0x82a   :  { %v6088_v42 = vadd.f32 %v6087_v32, %v5849_v53  ;;  %8432 = vmatpush.bf16.msrb.mxu0 %v10318_v37  ;;  %v10254_v58 = vor.u32 %v11067_v30, %v10251_v56  ;;  %v11176_v53 = vld [vmem:[#allocation6 + $0x3b4] sm:$0xf0]  ;;  %v11079_v37 = vld [vmem:[#allocation6 + $0xb4] sm:$0xf]  ;;  %v5571_v24 = vadd.f32 %v5570_v46, %v16056_v29  ;;  %v17721_v25 = vld [vmem:[#allocation62_spill] sm:$0xff] }
 0x82b   :  { %v8020_v15 = vpop.f32.mrf.mxu3  ;;  %v16378_v55 = vadd.f32 %v16315_v34, %v5566_v35  ;;  %v5785_v51 = vadd.f32 %v5784_v4, %v16346_v28  ;;  %v5873_v34 = vmul.f32 %v16366_v14, %v16366_v14  ;;  %v16386_v59 = vadd.f32 %v5616_v47, %v5568_v36 }
 0x82c   :  { %v8021_v31 = vadd.f32 %v8020_v15, %v16117_v21  ;;  %v6089_v33 = vadd.f32 %v6088_v42, %v5857_v8  ;;  %v10682_v15 = vor.u32 %v11176_v53, %v10681_v12  ;;  %v10246_v8 = vor.u32 %v11065_v27, %v10243_v41  ;;  %v11063_v27 = vld [vmem:[#allocation6 + $0x34] sm:$0xf]  ;;  %v10235_v12 = vld [vmem:[#allocation6 + $0x38] sm:$0xf0]  ;;  %v11077_v53 = vld [vmem:[#allocation6 + $0xa4] sm:$0xf] }
 0x82d   :  { %v8072_v22 = vpop.f32.mrf.mxu0  ;;  %8120 = vmatmul.bf16.gmra.mxu1 %v17720_v40  ;;  %v5786_v32 = vadd.f32 %v5785_v51, %v16355_v7  ;;  %8383 = vmatpush.bf16.msrb.mxu3 %v10254_v58  ;;  %v5881_v4 = vmul.f32 %v16378_v55, %v16378_v55 }
 0x82e   :  { %v16373_v11 = vadd.f32 %v16322_v62, %v8021_v31  ;;  %v10310_v62 = vor.u32 %v11081_v1, %v10307_v44  ;;  %v10302_v31 = vor.u32 %v11079_v37, %v10299_v16  ;;  %v6090_v35 = vadd.f32 %v6089_v33, %v5865_v5  ;;  %8336 = vmatpush.bf16.msra.mxu2 %v10682_v15  ;;  %v10617_v5 = vld [vmem:[#allocation6 + $0x330] sm:$0xf]  ;;  %v11160_v44 = vld [vmem:[#allocation6 + $0x334] sm:$0xf0]  ;;  %v10291_v37 = vld [vmem:[#allocation6 + $0xa8] sm:$0xf0] }
 0x82f   :  { %v5787_v29 = vadd.f32 %v5786_v32, %v16366_v14  ;;  %v5889_v1 = vmul.f32 %v16386_v59, %v16386_v59  ;;  %v10294_v15 = vor.u32 %v11077_v53, %v10291_v37  ;;  %v10609_v16 = vld [vmem:[#allocation6 + $0x320] sm:$0xf]  ;;  %v11158_v32 = vld [vmem:[#allocation6 + $0x324] sm:$0xf0]  ;;  %v17722_v53 = vld [vmem:[#allocation59_spill] sm:$0xff] }
 0x830   :  { %8267 = vmatmul.bf16.gmra.mxu0 %v15999_v19  ;;  %8218 = vmatmul.bf16.gmra.mxu3 %v17721_v25  ;;  %v5619_v57 = vpop.f32.mrf.mxu2  ;;  %v6091_v56 = vadd.f32 %v6090_v35, %v5873_v34  ;;  %v10610_v35 = vor.u32 %v11158_v32, %v10609_v16 }
 0x831   :  { %8433 = vmatpush.bf16.msrb.mxu0 %v10310_v62  ;;  %v16393_v42 = vadd.f32 %v5619_v57, %v5571_v24  ;;  %v5572_v36 = vpop.f32.mrf.mxu1  ;;  %v5788_v58 = vadd.f32 %v5787_v29, %v16378_v55  ;;  %8384 = vmatpush.bf16.msrb.mxu3 %v10246_v8  ;;  %v10618_v62 = vor.u32 %v11160_v44, %v10617_v5  ;;  %v11061_v8 = vld [vmem:[#allocation6 + $0x24] sm:$0xf]  ;;  %v10283_v29 = vld [vmem:[#allocation6 + $0x98] sm:$0xf0] }
 0x832   :  { %v6092_v51 = vadd.f32 %v6091_v56, %v5881_v4  ;;  %v5573_v24 = vadd.f32 %v5572_v36, %v16070_v39  ;;  %v10238_v57 = vor.u32 %v11063_v27, %v10235_v12  ;;  %v10227_v4 = vld [vmem:[#allocation6 + $0x28] sm:$0xf0] }
 0x833   :  { %v8023_v47 = vpop.f32.mrf.mxu3  ;;  %v5897_v33 = vmul.f32 %v16393_v42, %v16393_v42  ;;  %v5789_v34 = vadd.f32 %v5788_v58, %v16386_v59  ;;  %8287 = vmatpush.bf16.msrb.mxu1 %v10618_v62  ;;  %v10230_v58 = vor.u32 %v11061_v8, %v10227_v4 }
 0x834   :  { %v8024_v46 = vadd.f32 %v8023_v47, %v16117_v21  ;;  %v11075_v47 = vld [vmem:[#allocation6 + $0x94] sm:$0xf] }
 0x835   :  { %v8074_v30 = vpop.f32.mrf.mxu0  ;;  %8434 = vmatpush.bf16.msrb.mxu0 %v10302_v31  ;;  %v6093_v31 = vadd.f32 %v6092_v51, %v5889_v1  ;;  %8385 = vmatpush.bf16.msrb.mxu3 %v10238_v57  ;;  %v10286_v51 = vor.u32 %v11075_v47, %v10283_v29 }
 0x836   :  { %v16400_v41 = vadd.f32 %v8072_v22, %v8024_v46  ;;  %v5790_v46 = vadd.f32 %v5789_v34, %v16393_v42  ;;  %v17723_v34 = vld [vmem:[#allocation83_spill] sm:$0xff] }
 0x837   :  { %v6094_v39 = vadd.f32 %v6093_v31, %v5897_v33  ;;  %8288 = vmatpush.bf16.msrb.mxu1 %v10610_v35 }
 0x838   :  { %v5621_v22 = vpop.f32.mrf.mxu2  ;;  %8174 = vmatmul.bf16.gmra.mxu2 %v17722_v53 }
 0x839   :  { %v16407_v56 = vadd.f32 %v5621_v22, %v5573_v24  ;;  %8435 = vmatpush.bf16.msrb.mxu0 %v10294_v15  ;;  %v5575_v62 = vpop.f32.mrf.mxu1  ;;  %8386 = vmatpush.bf16.msrb.mxu3 %v10230_v58  ;;  %v17724_v24 = vld [vmem:[#allocation57_spill] sm:$0xff] }
 0x83a   :  { %v5576_v33 = vadd.f32 %v5575_v62, %v16080_v50  ;;  %v17726_v62 = vld [vmem:[#allocation84_spill] sm:$0xff] }
 0x83b   :  { %v8025_v36 = vpop.f32.mrf.mxu3  ;;  %v5791_v44 = vadd.f32 %v5790_v46, %v16407_v56  ;;  %v5905_v1 = vmul.f32 %v16407_v56, %v16407_v56 }
 0x83c   :  { %v8026_v27 = vadd.f32 %v8025_v36, %v16117_v21 }
 0x83d   :  { %v8077_v5 = vpop.f32.mrf.mxu0  ;;  %v6095_v12 = vadd.f32 %v6094_v39, %v5905_v1  ;;  %8125 = vmatmul.bf16.gmra.mxu1 %v17723_v34  ;;  %8436 = vmatpush.bf16.msrb.mxu0 %v10286_v51  ;;  %v17725_v51 = vld [vmem:[#allocation73_spill] sm:$0xff] }
 0x83e   :  { %v16414_v37 = vadd.f32 %v8074_v30, %v8026_v27 }
 0x840   :  { %8272 = vmatmul.bf16.gmra.mxu0 %v16012_v0  ;;  %8223 = vmatmul.bf16.gmra.mxu3 %v17724_v24  ;;  %v5624_v57 = vpop.f32.mrf.mxu2 }
 0x841   :  { %v16420_v15 = vadd.f32 %v5624_v57, %v5576_v33  ;;  %v5577_v22 = vpop.f32.mrf.mxu1 }
 0x842   :  { %v5578_v4 = vadd.f32 %v5577_v22, %v16090_v60 }
 0x843   :  { %v8028_v16 = vpop.f32.mrf.mxu3  ;;  %v5792_v8 = vadd.f32 %v5791_v44, %v16420_v15  ;;  %v5913_v30 = vmul.f32 %v16420_v15, %v16420_v15 }
 0x844   :  { %v8029_v31 = vadd.f32 %v8028_v16, %v16117_v21 }
 0x845   :  { %v8079_v32 = vpop.f32.mrf.mxu0  ;;  %v6096_v35 = vadd.f32 %v6095_v12, %v5913_v30  ;;  %v17727_v12 = vld [vmem:[#allocation21_spill] sm:$0xff] }
 0x846   :  { %v16426_v50 = vadd.f32 %v8077_v5, %v8029_v31 }
 0x848   :  { %v5626_v47 = vpop.f32.mrf.mxu2  ;;  %8179 = vmatmul.bf16.gmra.mxu2 %v17725_v51  ;;  %v10275_v51 = vld [vmem:[#allocation6 + $0x88] sm:$0xf0] }
 0x849   :  { %v16429_v29 = vadd.f32 %v5626_v47, %v5578_v4  ;;  %v5580_v1 = vpop.f32.mrf.mxu1  ;;  %v10601_v4 = vld [vmem:[#allocation6 + $0x310] sm:$0xf]  ;;  %v11059_v47 = vld [vmem:[#allocation6 + $0x14] sm:$0xf] }
 0x84a   :  { %v5581_v60 = vadd.f32 %v5580_v1, %v16100_v43  ;;  %v11156_v43 = vld [vmem:[#allocation6 + $0x314] sm:$0xf0] }
 0x84b   :  { %v8030_v46 = vpop.f32.mrf.mxu3  ;;  %v5793_v39 = vadd.f32 %v5792_v8, %v16429_v29  ;;  %v5921_v36 = vmul.f32 %v16429_v29, %v16429_v29 }
 0x84c   :  { %v8031_v44 = vadd.f32 %v8030_v46, %v16117_v21 }
 0x84d   :  { %v8082_v58 = vpop.f32.mrf.mxu0  ;;  %v6097_v27 = vadd.f32 %v6096_v35, %v5921_v36  ;;  %8130 = vmatmul.bf16.gmra.mxu1 %v17726_v62  ;;  %v10602_v36 = vor.u32 %v11156_v43, %v10601_v4 }
 0x84e   :  { %v16436_v5 = vadd.f32 %v8079_v32, %v8031_v44  ;;  %v10219_v44 = vld [vmem:[#allocation6 + $0x18] sm:$0xf0] }
 0x84f   :  { %8289 = vmatpush.bf16.msrb.mxu1 %v10602_v36 }
 0x850   :  { %8277 = vmatmul.bf16.gmra.mxu0 %v16030_v18  ;;  %8228 = vmatmul.bf16.gmra.mxu3 %v17727_v12  ;;  %v5629_v33 = vpop.f32.mrf.mxu2 }
 0x851   :  { %v16442_v57 = vadd.f32 %v5629_v33, %v5581_v60  ;;  %v5582_v22 = vpop.f32.mrf.mxu1  ;;  %v10222_v60 = vor.u32 %v11059_v47, %v10219_v44  ;;  %v11073_v33 = vld [vmem:[#allocation6 + $0x84] sm:$0xf] }
 0x852   :  { %v5583_v1 = vadd.f32 %v5582_v22, %v16110_v63  ;;  %v10278_v53 = vor.u32 %v11073_v33, %v10275_v51 }
 0x853   :  { %v8033_v16 = vpop.f32.mrf.mxu3  ;;  %v5794_v30 = vadd.f32 %v5793_v39, %v16442_v57  ;;  %v5929_v31 = vmul.f32 %v16442_v57, %v16442_v57  ;;  %8387 = vmatpush.bf16.msrb.mxu3 %v10222_v60 }
 0x854   :  { %v8034_v32 = vadd.f32 %v8033_v16, %v16117_v21  ;;  %v10593_v16 = vld [vmem:[#allocation6 + $0x300] sm:$0xf]  ;;  %8437 = vmatpush.bf16.msrb.mxu0 %v10278_v53  ;;  %v17728_v53 = vld [vmem:[#allocation54_spill] sm:$0xff] }
 0x855   :  { %v8084_v8 = vpop.f32.mrf.mxu0  ;;  %v6098_v35 = vadd.f32 %v6097_v27, %v5929_v31  ;;  %v11154_v27 = vld [vmem:[#allocation6 + $0x304] sm:$0xf0]  ;;  %v11057_v31 = vld [vmem:[#allocation6 + $0x4] sm:$0xf] }
 0x856   :  { %v16448_v46 = vadd.f32 %v8082_v58, %v8034_v32  ;;  %v10594_v58 = vor.u32 %v11154_v27, %v10593_v16  ;;  %v10211_v32 = vld [vmem:[#allocation6 + $0x8] sm:$0xf0] }
 0x857   :  { %v10214_v47 = vor.u32 %v11057_v31, %v10211_v32 }
 0x858   :  { %v5631_v39 = vpop.f32.mrf.mxu2  ;;  %8290 = vmatpush.bf16.msrb.mxu1 %v10594_v58 }
 0x859   :  { %v16451_v20 = vadd.f32 %v5631_v39, %v5583_v1  ;;  %v8096_v51 = vpop.f32.mrf.mxu1  ;;  %8388 = vmatpush.bf16.msrb.mxu3 %v10214_v47  ;;  %v17729_v39 = vld [vmem:[#allocation67_spill] sm:$0xff]  ;;  %v10673_v47 = vld [vmem:[#allocation6 + $0x3a0] sm:$0xf] }
 0x85a   :  { %v8097_v1 = vadd.f32 %v8096_v51, %v16121_v45  ;;  %v11174_v51 = vld [vmem:[#allocation6 + $0x3a4] sm:$0xf0] }
 0x85b   :  { %v8035_v12 = vpop.f32.mrf.mxu3  ;;  %v5795_v4 = vadd.f32 %v5794_v30, %v16451_v20  ;;  %v5937_v63 = vmul.f32 %v16451_v20, %v16451_v20 }
 0x85c   :  { %v8036_v22 = vadd.f32 %v8035_v12, %v16117_v21 }
 0x85d   :  { %v8243_v43 = vpop.f32.mrf.mxu0  ;;  %v5796_v36 = vrot.slane %v5795_v4, 4  ;;  %v6099_v44 = vadd.f32 %v6098_v35, %v5937_v63  ;;  %8291 = vmatmul.bf16.vlgmr.msrb.gmra.mxu1 %v16236_v38  ;;  %v11172_v38 = vld [vmem:[#allocation6 + $0x394] sm:$0xf0] }
 0x85e   :  { %v16458_v60 = vadd.f32 %v8084_v8, %v8036_v22 }
 0x85f   :  { %v5797_v33 = vadd.f32 %v5796_v36, %v5795_v4  ;;  %v6100_v30 = vrot.slane %v6099_v44, 4  ;;  %v10674_v36 = vor.u32 %v11174_v51, %v10673_v47  ;;  %v11119_v51 = vld [vmem:[#allocation6 + $0x1f4] sm:$0xf] }
 0x860   :  { %8438 = vmatmul.bf16.vlgmr.msrb.gmra.mxu0 %v17728_v53  ;;  %8389 = vmatmul.bf16.vlgmr.msrb.gmra.mxu3 %v17729_v39  ;;  %v8145_v21 = vpop.f32.mrf.mxu2  ;;  %v10665_v53 = vld [vmem:[#allocation6 + $0x390] sm:$0xf] }
 0x861   :  { %v5798_v12 = vrot.slane %v5797_v33, 2  ;;  %v6101_v16 = vadd.f32 %v6100_v30, %v6099_v44  ;;  %v8146_v27 = vadd.f32 %v8145_v21, %v8097_v1  ;;  %v8098_v63 = vpop.f32.mrf.mxu1  ;;  %8337 = vmatpush.bf16.msra.mxu2 %v10674_v36 }
 0x862   :  { %v8099_v4 = vadd.f32 %v8098_v63, %v16135_v48 }
 0x863   :  { %v5799_v31 = vadd.f32 %v5798_v12, %v5797_v33  ;;  %v6102_v58 = vrot.slane %v6101_v16, 2  ;;  %v8194_v35 = vpop.f32.mrf.mxu3  ;;  %v10666_v33 = vor.u32 %v11172_v38, %v10665_v53 }
 0x864   :  { %v8195_v45 = vadd.f32 %v8194_v35, %v8146_v27  ;;  %v10657_v27 = vld [vmem:[#allocation6 + $0x380] sm:$0xf] }
 0x865   :  { %v8245_v32 = vpop.f32.mrf.mxu0  ;;  %v5800_v8 = vrot.slane %v5799_v31, 1  ;;  %v6103_v22 = vadd.f32 %v6102_v58, %v6101_v16  ;;  %v11170_v16 = vld [vmem:[#allocation6 + $0x384] sm:$0xf0]  ;;  %8338 = vmatpush.bf16.msra.mxu2 %v10666_v33 }
 0x866   :  { %v16464_v39 = vadd.f32 %v8243_v43, %v8195_v45 }
 0x867   :  { %v5801_v62 = vadd.f32 %v5800_v8, %v5799_v31  ;;  %v6104_v44 = vrot.slane %v6103_v22, 1  ;;  %v10658_v8 = vor.u32 %v11170_v16, %v10657_v27 }
 0x868   :  { %v8147_v1 = vpop.f32.mrf.mxu2 }
 0x869   :  { %v16466_v30 = vmul.f32 0.0078125, %v5801_v62  ;;  %v6105_v21 = vadd.f32 %v6104_v44, %v6103_v22  ;;  %v8148_v12 = vadd.f32 %v8147_v1, %v8099_v4  ;;  %v8101_v63 = vpop.f32.mrf.mxu1  ;;  %v17730_v22 = vld [vmem:[#allocation56_spill] sm:$0xff]  ;;  %8339 = vmatpush.bf16.msra.mxu2 %v10658_v8 }
 0x86a   :  { %v8102_v62 = vadd.f32 %v8101_v63, %v16153_v61  ;;  %v10459_v4 = vld [vmem:[#allocation6 + $0x1f8] sm:$0xf0]  ;;  %v11103_v8 = vld [vmem:[#allocation6 + $0x174] sm:$0xf] }
 0x86b   :  { %v6113_v58 = vmul.f32 0.0078125, %v6105_v21  ;;  %v6121_v48 = vmul.f32 %v16466_v30, %v16466_v30  ;;  %v8196_v43 = vpop.f32.mrf.mxu3  ;;  %v17731_v44 = vld [vmem:[#allocation68_spill] sm:$0xff]  ;;  %v10462_v33 = vor.u32 %v11119_v51, %v10459_v4 }
 0x86c   :  { %v8197_v31 = vadd.f32 %v8196_v43, %v8148_v12 }
 0x86d   :  { %v8248_v45 = vpop.f32.mrf.mxu0  ;;  %v6129_v38 = vsub.f32 %v6113_v58, %v6121_v48  ;;  %8296 = vmatmul.bf16.gmra.mxu1 %v16254_v3  ;;  %8528 = vmatpush.bf16.msrb.mxu2 %v10462_v33 }
 0x86e   :  { %v16480_v21 = vadd.f32 %v8245_v32, %v8197_v31  ;;  %v17732_v32 = vld [vmem:[#allocation41_spill] sm:$0xff] }
 0x86f   :  { %v6265_v47 = vadd.f32 0.8, %v6129_v38  ;;  %v10395_v38 = vld [vmem:[#allocation6 + $0x178] sm:$0xf0] }
 0x870   :  { %8443 = vmatmul.bf16.gmra.mxu0 %v17730_v22  ;;  %8394 = vmatmul.bf16.gmra.mxu3 %v17731_v44  ;;  %v8150_v1 = vpop.f32.mrf.mxu2  ;;  %v10398_v22 = vor.u32 %v11103_v8, %v10395_v38  ;;  %v6137_v38 = vsub.f32 %v16115_v6, %v16466_v30  ;;  %v6169_v6 = vsub.f32 %v16173_v49, %v16466_v30 }
 0x871   :  { %11242 = vrsqrt.f32 %v6265_v47  ;;  %v8151_v12 = vadd.f32 %v8150_v1, %v8102_v62  ;;  %v8103_v63 = vpop.f32.mrf.mxu1  ;;  %vm6342_vm9 = vweird.f32 %v6265_v47 }
 0x872   :  { %v8104_v31 = vadd.f32 %v8103_v63, %v17732_v32  ;;  %8479 = vmatpush.bf16.msra.mxu1 %v10398_v22  ;;  %v17734_v63 = vld [vmem:[#allocation40_spill] sm:$0xff]  ;;  %v6153_v32 = vsub.f32 %v16143_v13, %v16466_v30  ;;  %v10451_v22 = vld [vmem:[#allocation6 + $0x1e8] sm:$0xf0]  ;;  %v6185_v13 = vsub.f32 %v16355_v7, %v16466_v30 }
 0x873   :  { %v8199_v58 = vpop.f32.mrf.mxu3  ;;  %v16495_v8 = vperm.slane %v17734_v63, 7 }
 0x874   :  { %v8200_v43 = vadd.f32 %v8199_v58, %v8151_v12  ;;  %v17733_v58 = vld [vmem:[#allocation45_spill] sm:$0xff] }
 0x875   :  { %v8250_v48 = vpop.f32.mrf.mxu0 }
 0x876   :  { %v16489_v51 = vadd.f32 %v8248_v45, %v8200_v43  ;;  %v17735_v45 = vld [vmem:[#allocation58_spill] sm:$0xff] }
 0x877   :  { %v11243_v4 = vpop.eup %11242 }
 0x878   :  { %v6337_v62 = vmul.f32 %v11243_v4, %v6265_v47  ;;  %v8152_v44 = vpop.f32.mrf.mxu2  ;;  %vm6343_vm8 = vweird.f32 %v11243_v4  ;;  %v6193_v47 = vsub.f32 %v16366_v14, %v16466_v30 }
 0x879   :  { %v8153_v1 = vadd.f32 %v8152_v44, %v8104_v31  ;;  %v8106_v12 = vpop.f32.mrf.mxu1  ;;  %v11117_v31 = vld [vmem:[#allocation6 + $0x1e4] sm:$0xf]  ;;  %vm6344_vm10 = vmor %vm6342_vm9, %vm6343_vm8 }
 0x87a   :  { %v6338_v33 = vmul.f32 %v11243_v4, %v6337_v62  ;;  %v8107_v36 = vadd.f32 %v8106_v12, %v17733_v58  ;;  %v10454_v44 = vor.u32 %v11117_v31, %v10451_v22  ;;  %v17738_v12 = vsub.f32 %v16451_v20, %v16466_v30 }
 0x87b   :  { %v8201_v27 = vpop.f32.mrf.mxu3 }
 0x87c   :  { %v6339_v16 = vmul.f32 0.5, %v6338_v33  ;;  %v8202_v53 = vadd.f32 %v8201_v27, %v8153_v1  ;;  %v6145_v27 = vsub.f32 %v16125_v10, %v16466_v30  ;;  %v17737_v1 = vld [vmem:[#allocation27_spill] sm:$0xff]  ;;  %8529 = vmatpush.bf16.msrb.mxu2 %v10454_v44 }
 0x87d   :  { %v16491_v61 = vpop.f32.mrf.mxu0  ;;  %8301 = vmatmul.bf16.gmra.mxu1 %v16267_v52  ;;  %v16514_v33 = vperm.slane %v17737_v1, 7  ;;  %v17739_v52 = vld [vmem:[#allocation60_spill] sm:$0xff] }
 0x87e   :  { %v6340_v35 = vsub.f32 1.5, %v6339_v16  ;;  %v16498_v43 = vadd.f32 %v8250_v48, %v8202_v53  ;;  %v6161_v16 = vsub.f32 %v16155_v26, %v16466_v30  ;;  %v17736_v53 = vld [vmem:[#allocation69_spill] sm:$0xff]  ;;  %v6177_v26 = vsub.f32 %v16346_v28, %v16466_v30 }
 0x880   :  { %8448 = vmatmul.bf16.gmra.mxu0 %v17735_v45  ;;  %v6341_v62 = vmul.f32 %v11243_v4, %v6340_v35  ;;  %8399 = vmatmul.bf16.gmra.mxu3 %v17736_v53  ;;  %v8155_v48 = vpop.f32.mrf.mxu2  ;;  %v10387_v53 = vld [vmem:[#allocation6 + $0x168] sm:$0xf0] }
 0x881   :  { %v8156_v10 = vadd.f32 %v8155_v48, %v8107_v36  ;;  %v8108_v31 = vpop.f32.mrf.mxu1 }
 0x882   :  { %v16520_v35 = vsel %vm6344_vm10, %v11243_v4, %v6341_v62  ;;  %v11101_v62 = vld [vmem:[#allocation6 + $0x164] sm:$0xf] }
 0x883   :  { %v6473_v28 = vmul.f32 %v16520_v35, %v17738_v12  ;;  %v8204_v58 = vpop.f32.mrf.mxu3  ;;  %v6353_v7 = vmul.f32 %v16520_v35, %v6137_v38  ;;  %v6361_v4 = vmul.f32 %v16520_v35, %v6145_v27  ;;  %v6369_v14 = vmul.f32 %v16520_v35, %v6153_v32 }
 0x884   :  { %v16537_v45 = vadd.f32 %v8204_v58, %v8156_v10  ;;  %v6377_v22 = vmul.f32 %v16520_v35, %v6161_v16  ;;  %v6385_v20 = vmul.f32 %v16520_v35, %v6169_v6  ;;  %v6393_v48 = vmul.f32 %v16520_v35, %v6177_v26 }
 0x885   :  { %v16532_v63 = vpop.f32.mrf.mxu0  ;;  %v16543_v44 = vmul.f32 %v16495_v8, %v6473_v28  ;;  %v8109_v38 = vadd.f32 %v8108_v31, %v16245_v54  ;;  %v6499_v27 = vmul.f32 %v16495_v8, %v6353_v7  ;;  %v6507_v32 = vmul.f32 %v16495_v8, %v6361_v4 }
 0x886   :  { %v6515_v10 = vmul.f32 %v16495_v8, %v6369_v14  ;;  %v6523_v1 = vmul.f32 %v16495_v8, %v6377_v22  ;;  %v10390_v16 = vor.u32 %v11101_v62, %v10387_v53  ;;  %v6531_v12 = vmul.f32 %v16495_v8, %v6385_v20 }
 0x887   :  { %v6646_v6 = vadd.f32 %v16514_v33, %v6499_v27  ;;  %v6654_v26 = vadd.f32 %v16514_v33, %v6507_v32  ;;  %v6539_v28 = vmul.f32 %v16495_v8, %v6393_v48  ;;  %v6401_v58 = vmul.f32 %v16520_v35, %v6185_v13 }
 0x888   :  { %v8157_v54 = vpop.f32.mrf.mxu2  ;;  %v6662_v7 = vadd.f32 %v16514_v33, %v6515_v10  ;;  %v6670_v4 = vadd.f32 %v16514_v33, %v6523_v1  ;;  %8480 = vmatpush.bf16.msra.mxu1 %v10390_v16  ;;  %v6678_v14 = vadd.f32 %v16514_v33, %v6531_v12  ;;  %v6409_v31 = vmul.f32 %v16520_v35, %v6193_v47 }
 0x889   :  { %v8158_v22 = vadd.f32 %v8157_v54, %v8109_v38  ;;  %vm6774_vm11 = vcmp.gt.f32.partialorder %v6646_v6, 0.0  ;;  %vm6782_vm12 = vcmp.gt.f32.partialorder %v6654_v26, 0.0  ;;  %v6902_v62 = vmul.f32 0.2, %v6646_v6  ;;  %v8111_v16 = vpop.f32.mrf.mxu1 }
 0x88a   :  { %v6910_v53 = vmul.f32 0.2, %v6654_v26  ;;  %vm6790_vm13 = vcmp.gt.f32.partialorder %v6662_v7, 0.0  ;;  %vm6798_vm14 = vcmp.gt.f32.partialorder %v6670_v4, 0.0  ;;  %v6918_v20 = vmul.f32 0.2, %v6662_v7 }
 0x88b   :  { %v8206_v48 = vpop.f32.mrf.mxu3  ;;  %v7030_v27 = vsel %vm6774_vm11, %v6646_v6, %v6902_v62  ;;  %v6926_v32 = vmul.f32 0.2, %v6670_v4  ;;  %v6686_v10 = vadd.f32 %v16514_v33, %v6539_v28  ;;  %vm6806_vm15 = vcmp.gt.f32.partialorder %v6678_v14, 0.0 }
 0x88c   :  { %v16562_v1 = vadd.f32 %v8206_v48, %v8158_v22  ;;  %v7038_v47 = vsel %vm6782_vm12, %v6654_v26, %v6910_v53  ;;  %v7046_v38 = vsel %vm6790_vm13, %v6662_v7, %v6918_v20  ;;  %v6934_v12 = vmul.f32 0.2, %v6678_v14  ;;  %v17740_v22 = vld [vmem:[#allocation38_spill] sm:$0xff]  ;;  %v11115_v26 = vld [vmem:[#allocation6 + $0x1d4] sm:$0xf] }
 0x88d   :  { %v16559_v13 = vpop.f32.mrf.mxu0  ;;  %v8112_v54 = vadd.f32 %v8111_v16, %v16270_v2  ;;  %v16565_v36 = vpack.c.bf16 %v7038_v47, %v7030_v27  ;;  %v7054_v49 = vsel %vm6798_vm14, %v6670_v4, %v6926_v32  ;;  %vm6814_vm0 = vcmp.gt.f32.partialorder %v6686_v10, 0.0  ;;  %8306 = vmatmul.bf16.gmra.mxu1 %v17740_v22  ;;  %v10443_v7 = vld [vmem:[#allocation6 + $0x1d8] sm:$0xf0] }
 0x88e   :  { %v16568_v3 = vpack.c.bf16 %v7054_v49, %v7046_v38  ;;  %v6942_v6 = vmul.f32 0.2, %v6686_v10  ;;  %v7062_v62 = vsel %vm6806_vm15, %v6678_v14, %v6934_v12  ;;  %v6547_v28 = vmul.f32 %v16495_v8, %v6401_v58  ;;  %v17743_v14 = vld [vmem:[#allocation70_spill] sm:$0xff] }
 0x88f   :  { %8340 = vmatmul.bf16.vlgmr.msra.gmra.mxu2 %v16565_v36  ;;  %v6555_v2 = vmul.f32 %v16495_v8, %v6409_v31  ;;  %v17741_v4 = vsub.f32 %v16378_v55, %v16466_v30  ;;  %v10446_v48 = vor.u32 %v11115_v26, %v10443_v7  ;;  %v17744_v31 = vsub.f32 %v16393_v42, %v16466_v30 }
 0x890   :  { %8453 = vmatmul.bf16.gmra.mxu0 %v17739_v52  ;;  %v17742_v52 = vsub.f32 %v16386_v59, %v16466_v30  ;;  %8404 = vmatmul.bf16.gmra.mxu3 %v17743_v14  ;;  %v8160_v58 = vpop.f32.mrf.mxu2  ;;  %v7070_v20 = vsel %vm6814_vm0, %v6686_v10, %v6942_v6  ;;  %v6694_v27 = vadd.f32 %v16514_v33, %v6547_v28  ;;  %v17746_v14 = vld [vmem:[#allocation36_spill] sm:$0xff] }
 0x891   :  { %v6417_v53 = vmul.f32 %v16520_v35, %v17741_v4  ;;  %v6433_v32 = vmul.f32 %v16520_v35, %v17744_v31  ;;  %v8161_v55 = vadd.f32 %v8160_v58, %v8112_v54  ;;  %v16588_v16 = vpack.c.bf16 %v7070_v20, %v7062_v62  ;;  %8530 = vmatpush.bf16.msrb.mxu2 %v10446_v48  ;;  %v11099_v4 = vld [vmem:[#allocation6 + $0x154] sm:$0xf] }
 0x892   :  { %v6425_v49 = vmul.f32 %v16520_v35, %v17742_v52  ;;  %v6702_v47 = vadd.f32 %v16514_v33, %v6555_v2  ;;  %vm6822_vm1 = vcmp.gt.f32.partialorder %v6694_v27, 0.0  ;;  %v6950_v38 = vmul.f32 0.2, %v6694_v27  ;;  %v8113_v2 = vpop.f32.mrf.mxu1 }
 0x893   :  { %v6563_v59 = vmul.f32 %v16495_v8, %v6417_v53  ;;  %v17745_v12 = vsub.f32 %v16407_v56, %v16466_v30  ;;  %v8209_v42 = vpop.f32.mrf.mxu3  ;;  %v6579_v26 = vmul.f32 %v16495_v8, %v6433_v32  ;;  %v10379_v53 = vld [vmem:[#allocation6 + $0x158] sm:$0xf0]  ;;  %v8114_v58 = vadd.f32 %v8113_v2, %v17746_v14 }
 0x894   :  { %v6571_v10 = vmul.f32 %v16495_v8, %v6425_v49  ;;  %vm6830_vm2 = vcmp.gt.f32.partialorder %v6702_v47, 0.0  ;;  %v6958_v54 = vmul.f32 0.2, %v6702_v47  ;;  %v8210_v7 = vadd.f32 %v8209_v42, %v8161_v55 }
 0x895   :  { %v6441_v6 = vmul.f32 %v16520_v35, %v17745_v12  ;;  %v16597_v28 = vpop.f32.mrf.mxu0  ;;  %v6710_v62 = vadd.f32 %v16514_v33, %v6563_v59  ;;  %v7078_v52 = vsel %vm6822_vm1, %v6694_v27, %v6950_v38  ;;  %v10382_v20 = vor.u32 %v11099_v4, %v10379_v53 }
 0x896   :  { %v6718_v49 = vadd.f32 %v16514_v33, %v6571_v10  ;;  %v7086_v48 = vsel %vm6830_vm2, %v6702_v47, %v6958_v54  ;;  %v6726_v32 = vadd.f32 %v16514_v33, %v6579_v26  ;;  %v17747_v27 = vsub.f32 %v16420_v15, %v16466_v30 }
 0x897   :  { %v6587_v56 = vmul.f32 %v16495_v8, %v6441_v6  ;;  %vm6838_vm3 = vcmp.gt.f32.partialorder %v6710_v62, 0.0  ;;  %v16604_v31 = vpack.c.bf16 %v7086_v48, %v7078_v52  ;;  %v6966_v59 = vmul.f32 0.2, %v6710_v62  ;;  %8481 = vmatpush.bf16.msra.mxu1 %v10382_v20 }
 0x898   :  { %vm6846_vm4 = vcmp.gt.f32.partialorder %v6718_v49, 0.0  ;;  %v6974_v12 = vmul.f32 0.2, %v6718_v49  ;;  %v6449_v38 = vmul.f32 %v16520_v35, %v17747_v27  ;;  %v17748_v10 = vsub.f32 %v16429_v29, %v16466_v30  ;;  %v8162_v6 = vpop.f32.mrf.mxu2 }
 0x899   :  { %v6734_v55 = vadd.f32 %v16514_v33, %v6587_v56  ;;  %v7094_v42 = vsel %vm6838_vm3, %v6710_v62, %v6966_v59  ;;  %v16618_v2 = vadd.f32 %v16491_v61, %v16537_v45  ;;  %v17749_v26 = vsub.f32 %v16442_v57, %v16466_v30 }
 0x89a   :  { %v6457_v47 = vmul.f32 %v16520_v35, %v17748_v10  ;;  %v7102_v54 = vsel %vm6846_vm4, %v6718_v49, %v6974_v12  ;;  %v8163_v15 = vadd.f32 %v8162_v6, %v8114_v58  ;;  %vm6854_vm5 = vcmp.gt.f32.partialorder %v6726_v32, 0.0  ;;  %v8116_v58 = vpop.f32.mrf.mxu1  ;;  %v17752_v10 = vld [vmem:[#allocation50_spill] sm:$0xff]  ;;  %v10587_v6 = vld [vmem:[#allocation6 + $0x2f8] sm:$0xf0] }
 0x89b   :  { %v6465_v4 = vmul.f32 %v16520_v35, %v17749_v26  ;;  %v16624_v53 = vpack.c.bf16 %v7102_v54, %v7094_v42  ;;  %vm6862_vm6 = vcmp.gt.f32.partialorder %v6734_v55, 0.0  ;;  %v6982_v29 = vmul.f32 0.2, %v6726_v32  ;;  %v8211_v49 = vpop.f32.mrf.mxu3 }
 0x89c   :  { %v6990_v52 = vmul.f32 0.2, %v6734_v55  ;;  %v6595_v56 = vmul.f32 %v16495_v8, %v6449_v38  ;;  %v6603_v62 = vmul.f32 %v16495_v8, %v6457_v47  ;;  %v6766_v57 = vadd.f32 %v16514_v33, %v16543_v44  ;;  %v17750_v38 = vld [vmem:[#allocation26_spill] sm:$0xff] }
 0x89d   :  { %v16628_v14 = vpop.f32.mrf.mxu0  ;;  %v6611_v61 = vmul.f32 %v16495_v8, %v6465_v4  ;;  %v16635_v30 = vadd.f32 %v16532_v63, %v16562_v1  ;;  %v16638_v35 = vadd.f32 %v16559_v13, %v8210_v7  ;;  %v8212_v45 = vadd.f32 %v8211_v49, %v8163_v15  ;;  %v17751_v1 = vld [vmem:[#allocation32_spill] sm:$0xff]  ;;  %v11113_v7 = vld [vmem:[#allocation6 + $0x1c4] sm:$0xf] }
 0x89e   :  { %v7110_v20 = vsel %vm6854_vm5, %v6726_v32, %v6982_v29  ;;  %v7118_v48 = vsel %vm6862_vm6, %v6734_v55, %v6990_v52  ;;  %v6742_v59 = vadd.f32 %v16514_v33, %v6595_v56  ;;  %v8117_v12 = vadd.f32 %v8116_v58, %v16338_v17  ;;  %8311 = vmatmul.bf16.gmra.mxu1 %v17751_v1  ;;  %v10435_v32 = vld [vmem:[#allocation6 + $0x1c8] sm:$0xf0]  ;;  %v11151_v55 = vld [vmem:[#allocation6 + $0x2f4] sm:$0xf]  ;;  %v10523_v29 = vld [vmem:[#allocation6 + $0x278] sm:$0xf0] }
 0x89f   :  { %v16642_v27 = vpack.c.bf16 %v7118_v48, %v7110_v20  ;;  %v6750_v8 = vadd.f32 %v16514_v33, %v6603_v62  ;;  %v6758_v44 = vadd.f32 %v16514_v33, %v6611_v61  ;;  %vm6894_vm8 = vcmp.gt.f32.partialorder %v6766_v57, 0.0  ;;  %8345 = vmatmul.bf16.gmra.mxu2 %v16568_v3  ;;  %v11135_v15 = vld [vmem:[#allocation6 + $0x274] sm:$0xf]  ;;  %v11097_v48 = vld [vmem:[#allocation6 + $0x144] sm:$0xf] }
 0x8a0   :  { %8458 = vmatmul.bf16.gmra.mxu0 %v17750_v38  ;;  %vm6870_vm7 = vcmp.gt.f32.partialorder %v6742_v59, 0.0  ;;  %v6998_v63 = vmul.f32 0.2, %v6742_v59  ;;  %v7022_v13 = vmul.f32 0.2, %v6766_v57  ;;  %v16650_v17 = vadd.f32 %v16597_v28, %v8212_v45  ;;  %8409 = vmatmul.bf16.gmra.mxu3 %v17752_v10  ;;  %v8165_v47 = vpop.f32.mrf.mxu2 }
 0x8a1   :  { %v10438_v33 = vor.u32 %v11113_v7, %v10435_v32  ;;  %vm6878_vm9 = vcmp.gt.f32.partialorder %v6750_v8, 0.0  ;;  %v7006_v42 = vmul.f32 0.2, %v6750_v8  ;;  %v8166_v26 = vadd.f32 %v8165_v47, %v8117_v12  ;;  %v11149_v12 = vld [vmem:[#allocation6 + $0x2e4] sm:$0xf] }
 0x8a2   :  { %v7126_v54 = vsel %vm6870_vm7, %v6742_v59, %v6998_v63  ;;  %v10590_v4 = vor.u32 %v11151_v55, %v10587_v6  ;;  %vm6886_vm10 = vcmp.gt.f32.partialorder %v6758_v44, 0.0  ;;  %v10526_v52 = vor.u32 %v11135_v15, %v10523_v29  ;;  %v8118_v20 = vpop.f32.mrf.mxu1  ;;  %v10371_v59 = vld [vmem:[#allocation6 + $0x148] sm:$0xf0]  ;;  %v11133_v32 = vld [vmem:[#allocation6 + $0x264] sm:$0xf] }
 0x8a3   :  { %8531 = vmatpush.bf16.msrb.mxu2 %v10438_v33  ;;  %v7134_v56 = vsel %vm6878_vm9, %v6750_v8, %v7006_v42  ;;  %v7014_v62 = vmul.f32 0.2, %v6758_v44  ;;  %v7150_v28 = vsel %vm6894_vm8, %v6766_v57, %v7022_v13  ;;  %v8214_v49 = vpop.f32.mrf.mxu3  ;;  %v8119_v63 = vadd.f32 %v8118_v20, %v16373_v11  ;;  %v10579_v8 = vld [vmem:[#allocation6 + $0x2e8] sm:$0xf0]  ;;  %v11147_v47 = vld [vmem:[#allocation6 + $0x2d4] sm:$0xf] }
 0x8a4   :  { %8626 = vmatpush.bf16.msra.mxu0 %v10590_v4  ;;  %v16655_v45 = vpack.c.bf16 %v7134_v56, %v7126_v54  ;;  %v8215_v58 = vadd.f32 %v8214_v49, %v8166_v26  ;;  %8577 = vmatpush.bf16.msra.mxu3 %v10526_v52  ;;  %v10374_v7 = vor.u32 %v11097_v48, %v10371_v59  ;;  %v10515_v55 = vld [vmem:[#allocation6 + $0x268] sm:$0xf0]  ;;  %v10571_v33 = vld [vmem:[#allocation6 + $0x2d8] sm:$0xf0]  ;;  %v11131_v11 = vld [vmem:[#allocation6 + $0x254] sm:$0xf] }
 0x8a5   :  { %v8265_v61 = vpop.f32.mrf.mxu0  ;;  %v7142_v38 = vsel %vm6886_vm10, %v6758_v44, %v7014_v62  ;;  %v10582_v13 = vor.u32 %v11149_v12, %v10579_v8  ;;  %v10518_v10 = vor.u32 %v11133_v32, %v10515_v55  ;;  %v10574_v44 = vor.u32 %v11147_v47, %v10571_v33  ;;  %v10507_v26 = vld [vmem:[#allocation6 + $0x258] sm:$0xf0]  ;;  %v11145_v62 = vld [vmem:[#allocation6 + $0x2c4] sm:$0xf]  ;;  %v10499_v20 = vld [vmem:[#allocation6 + $0x248] sm:$0xf0] }
 0x8a6   :  { %17753 = vst [vmem:[#allocation37_spill] sm:$0xff] %v16655_v45  ;;  %v16659_v57 = vpack.c.bf16 %v7150_v28, %v7142_v38  ;;  %v16662_v6 = vadd.f32 %v16628_v14, %v8215_v58  ;;  %8482 = vmatpush.bf16.msra.mxu1 %v10374_v7  ;;  %v10510_v4 = vor.u32 %v11131_v11, %v10507_v26  ;;  %v10563_v28 = vld [vmem:[#allocation6 + $0x2c8] sm:$0xf0]  ;;  %v11129_v58 = vld [vmem:[#allocation6 + $0x244] sm:$0xf] }
 0x8a7   :  { %v10566_v49 = vor.u32 %v11145_v62, %v10563_v28  ;;  %v17755_v48 = vld [vmem:[#allocation66_spill] sm:$0xff]  ;;  %v10502_v59 = vor.u32 %v11129_v58, %v10499_v20  ;;  %v17756_v38 = vld [vmem:[#allocation51_spill] sm:$0xff]  ;;  %v10427_v7 = vld [vmem:[#allocation6 + $0x1b8] sm:$0xf0] }
 0x8a8   :  { %17754 = vst [vmem:[#allocation22_spill] sm:$0xff] %v16659_v57  ;;  %v8167_v42 = vpop.f32.mrf.mxu2  ;;  %8627 = vmatpush.bf16.msra.mxu0 %v10582_v13  ;;  %8578 = vmatpush.bf16.msra.mxu3 %v10518_v10  ;;  %v11143_v8 = vld [vmem:[#allocation6 + $0x2b4] sm:$0xf]  ;;  %v10555_v13 = vld [vmem:[#allocation6 + $0x2b8] sm:$0xf0] }
 0x8a9   :  { %v8168_v54 = vadd.f32 %v8167_v42, %v8119_v63  ;;  %v11111_v63 = vld [vmem:[#allocation6 + $0x1b4] sm:$0xf]  ;;  %v10558_v47 = vor.u32 %v11143_v8, %v10555_v13  ;;  %v10363_v42 = vld [vmem:[#allocation6 + $0x138] sm:$0xf0]  ;;  %v10547_v62 = vld [vmem:[#allocation6 + $0x2a8] sm:$0xf0] }
 0x8aa   :  { %v8121_v56 = vpop.f32.mrf.mxu1  ;;  %v17757_v32 = vld [vmem:[#allocation39_spill] sm:$0xff]  ;;  %v11125_v20 = vld [vmem:[#allocation6 + $0x224] sm:$0xf] }
 0x8ab   :  { %v8216_v15 = vpop.f32.mrf.mxu3  ;;  %v8122_v14 = vadd.f32 %v8121_v56, %v16400_v41  ;;  %v10430_v41 = vor.u32 %v11111_v63, %v10427_v7  ;;  %v11095_v33 = vld [vmem:[#allocation6 + $0x134] sm:$0xf]  ;;  %v11141_v56 = vld [vmem:[#allocation6 + $0x2a4] sm:$0xf]  ;;  %v10355_v58 = vld [vmem:[#allocation6 + $0x128] sm:$0xf0] }
 0x8ac   :  { %v8217_v52 = vadd.f32 %v8216_v15, %v8168_v54  ;;  %8628 = vmatpush.bf16.msra.mxu0 %v10574_v44  ;;  %8579 = vmatpush.bf16.msra.mxu3 %v10510_v4  ;;  %v10366_v44 = vor.u32 %v11095_v33, %v10363_v42  ;;  %v10491_v54 = vld [vmem:[#allocation6 + $0x238] sm:$0xf0]  ;;  %v11139_v63 = vld [vmem:[#allocation6 + $0x294] sm:$0xf] }
 0x8ad   :  { %v8268_v29 = vpop.f32.mrf.mxu0  ;;  %8532 = vmatpush.bf16.msrb.mxu2 %v10430_v41  ;;  %v10539_v7 = vld [vmem:[#allocation6 + $0x298] sm:$0xf0] }
 0x8ae   :  { %v16666_v12 = vadd.f32 %v8265_v61, %v8217_v52  ;;  %8316 = vmatmul.bf16.gmra.mxu1 %v17756_v38  ;;  %v11127_v61 = vld [vmem:[#allocation6 + $0x234] sm:$0xf]  ;;  %v10542_v41 = vor.u32 %v11139_v63, %v10539_v7  ;;  %v10475_v42 = vld [vmem:[#allocation6 + $0x218] sm:$0xf0]  ;;  %v11109_v63 = vld [vmem:[#allocation6 + $0x1a4] sm:$0xf] }
 0x8af   :  { %8350 = vmatmul.bf16.gmra.mxu2 %v16588_v16  ;;  %v10494_v4 = vor.u32 %v11127_v61, %v10491_v54  ;;  %8483 = vmatpush.bf16.msra.mxu1 %v10366_v44  ;;  %v10419_v7 = vld [vmem:[#allocation6 + $0x1a8] sm:$0xf0] }
 0x8b0   :  { %8463 = vmatmul.bf16.gmra.mxu0 %v17755_v48  ;;  %8414 = vmatmul.bf16.gmra.mxu3 %v17757_v32  ;;  %v8170_v55 = vpop.f32.mrf.mxu2 }
 0x8b1   :  { %8629 = vmatpush.bf16.msra.mxu0 %v10566_v49  ;;  %v8171_v10 = vadd.f32 %v8170_v55, %v8122_v14  ;;  %8580 = vmatpush.bf16.msra.mxu3 %v10502_v59  ;;  %v10550_v14 = vor.u32 %v11141_v56, %v10547_v62  ;;  %v11093_v49 = vld [vmem:[#allocation6 + $0x124] sm:$0xf]  ;;  %v10483_v59 = vld [vmem:[#allocation6 + $0x228] sm:$0xf0] }
 0x8b2   :  { %v8123_v52 = vpop.f32.mrf.mxu1  ;;  %v10358_v48 = vor.u32 %v11093_v49, %v10355_v58  ;;  %v10486_v32 = vor.u32 %v11125_v20, %v10483_v59  ;;  %v11089_v62 = vld [vmem:[#allocation6 + $0x104] sm:$0xf]  ;;  %v17758_v49 = vld [vmem:[#allocation23_spill] sm:$0xff] }
 0x8b3   :  { %v8219_v11 = vpop.f32.mrf.mxu3  ;;  %v8124_v28 = vadd.f32 %v8123_v52, %v16414_v37  ;;  %v10347_v37 = vld [vmem:[#allocation6 + $0x118] sm:$0xf0]  ;;  %v10467_v20 = vld [vmem:[#allocation6 + $0x208] sm:$0xf0] }
 0x8b4   :  { %v8220_v15 = vadd.f32 %v8219_v11, %v8171_v10  ;;  %8484 = vmatpush.bf16.msra.mxu1 %v10358_v48  ;;  %v11091_v10 = vld [vmem:[#allocation6 + $0x114] sm:$0xf] }
 0x8b5   :  { %v8270_v26 = vpop.f32.mrf.mxu0  ;;  %8630 = vmatpush.bf16.msra.mxu0 %v10558_v47  ;;  %8581 = vmatpush.bf16.msra.mxu3 %v10494_v4  ;;  %v11123_v47 = vld [vmem:[#allocation6 + $0x214] sm:$0xf]  ;;  %v10350_v33 = vor.u32 %v11091_v10, %v10347_v37 }
 0x8b6   :  { %v16672_v8 = vadd.f32 %v8268_v29, %v8220_v15  ;;  %v10478_v54 = vor.u32 %v11123_v47, %v10475_v42  ;;  %v11137_v29 = vld [vmem:[#allocation6 + $0x284] sm:$0xf]  ;;  %v10531_v15 = vld [vmem:[#allocation6 + $0x288] sm:$0xf0] }
 0x8b7   :  { %v10534_v56 = vor.u32 %v11137_v29, %v10531_v15 }
 0x8b8   :  { %v8172_v55 = vpop.f32.mrf.mxu2  ;;  %8485 = vmatpush.bf16.msra.mxu1 %v10350_v33 }
 0x8b9   :  { %8631 = vmatpush.bf16.msra.mxu0 %v10550_v14  ;;  %v8173_v13 = vadd.f32 %v8172_v55, %v8124_v28  ;;  %8582 = vmatpush.bf16.msra.mxu3 %v10486_v32  ;;  %v10339_v28 = vld [vmem:[#allocation6 + $0x108] sm:$0xf0]  ;;  %v11121_v14 = vld [vmem:[#allocation6 + $0x204] sm:$0xf]  ;;  %v10422_v55 = vor.u32 %v11109_v63, %v10419_v7 }
 0x8ba   :  { %v8126_v4 = vpop.f32.mrf.mxu1  ;;  %v10342_v58 = vor.u32 %v11089_v62, %v10339_v28  ;;  %v10470_v59 = vor.u32 %v11121_v14, %v10467_v20  ;;  %v17759_v32 = vld [vmem:[#allocation71_spill] sm:$0xff] }
 0x8bb   :  { %v8221_v61 = vpop.f32.mrf.mxu3  ;;  %v8127_v52 = vadd.f32 %v8126_v4, %v16426_v50  ;;  %8533 = vmatpush.bf16.msrb.mxu2 %v10422_v55  ;;  %v11107_v62 = vld [vmem:[#allocation6 + $0x194] sm:$0xf] }
 0x8bc   :  { %v8222_v11 = vadd.f32 %v8221_v61, %v8173_v13  ;;  %8486 = vmatpush.bf16.msra.mxu1 %v10342_v58 }
 0x8bd   :  { %v8273_v44 = vpop.f32.mrf.mxu0  ;;  %8632 = vmatpush.bf16.msra.mxu0 %v10542_v41  ;;  %8583 = vmatpush.bf16.msra.mxu3 %v10478_v54 }
 0x8be   :  { %v16676_v48 = vadd.f32 %v8270_v26, %v8222_v11  ;;  %8321 = vmatmul.bf16.gmra.mxu1 %v16340_v23 }
 0x8bf   :  { %8355 = vmatmul.bf16.gmra.mxu2 %v16604_v31 }
 0x8c0   :  { %8468 = vmatmul.bf16.gmra.mxu0 %v17758_v49  ;;  %8419 = vmatmul.bf16.gmra.mxu3 %v17759_v32  ;;  %v8175_v50 = vpop.f32.mrf.mxu2 }
 0x8c1   :  { %8633 = vmatpush.bf16.msra.mxu0 %v10534_v56  ;;  %v8176_v41 = vadd.f32 %v8175_v50, %v8127_v52  ;;  %8584 = vmatpush.bf16.msra.mxu3 %v10470_v59  ;;  %v17760_v52 = vld [vmem:[#allocation72_spill] sm:$0xff] }
 0x8c2   :  { %v8128_v37 = vpop.f32.mrf.mxu1 }
 0x8c3   :  { %v8224_v13 = vpop.f32.mrf.mxu3  ;;  %v8129_v47 = vadd.f32 %v8128_v37, %v16436_v5  ;;  %v10411_v5 = vld [vmem:[#allocation6 + $0x198] sm:$0xf0] }
 0x8c4   :  { %v8225_v26 = vadd.f32 %v8224_v13, %v8176_v41  ;;  %v10414_v14 = vor.u32 %v11107_v62, %v10411_v5 }
 0x8c5   :  { %v8275_v10 = vpop.f32.mrf.mxu0 }
 0x8c6   :  { %v16682_v33 = vadd.f32 %v8273_v44, %v8225_v26  ;;  %v17761_v44 = vld [vmem:[#allocation33_spill] sm:$0xff]  ;;  %8534 = vmatpush.bf16.msrb.mxu2 %v10414_v14 }
 0x8c7   :  { %v17762_v26 = vld [vmem:[#allocation49_spill] sm:$0xff] }
 0x8c8   :  { %v8177_v42 = vpop.f32.mrf.mxu2 }
 0x8c9   :  { %v8178_v61 = vadd.f32 %v8177_v42, %v8129_v47  ;;  %v17763_v47 = vld [vmem:[#allocation78_spill] sm:$0xff] }
 0x8ca   :  { %v8131_v29 = vpop.f32.mrf.mxu1  ;;  %v11105_v42 = vld [vmem:[#allocation6 + $0x184] sm:$0xf] }
 0x8cb   :  { %v8226_v54 = vpop.f32.mrf.mxu3  ;;  %v8132_v15 = vadd.f32 %v8131_v29, %v16448_v46 }
 0x8cc   :  { %v8227_v4 = vadd.f32 %v8226_v54, %v8178_v61  ;;  %v10403_v61 = vld [vmem:[#allocation6 + $0x188] sm:$0xf0]  ;;  %v11319_v54 = vld [vmem:[#allocation10] sm:$0x3] }
 0x8cd   :  { %v8278_v11 = vpop.f32.mrf.mxu0 }
 0x8ce   :  { %v16686_v56 = vadd.f32 %v8275_v10, %v8227_v4  ;;  %8326 = vmatmul.bf16.gmra.mxu1 %v16363_v9  ;;  %v10406_v4 = vor.u32 %v11105_v42, %v10403_v61 }
 0x8cf   :  { %8360 = vmatmul.bf16.gmra.mxu2 %v16624_v53 }
 0x8d0   :  { %8473 = vmatmul.bf16.gmra.mxu0 %v17760_v52  ;;  %8424 = vmatmul.bf16.gmra.mxu3 %v17761_v44  ;;  %v8180_v28 = vpop.f32.mrf.mxu2 }
 0x8d1   :  { %v8181_v49 = vadd.f32 %v8180_v28, %v8132_v15  ;;  %8535 = vmatpush.bf16.msrb.mxu2 %v10406_v4  ;;  %v11167_v4 = vld [vmem:[#allocation6 + $0x374] sm:$0xf] }
 0x8d2   :  { %v8133_v46 = vpop.f32.mrf.mxu1 }
 0x8d3   :  { %v8229_v58 = vpop.f32.mrf.mxu3  ;;  %v8134_v63 = vadd.f32 %v8133_v46, %v16458_v60  ;;  %v17764_v60 = vld [vmem:[#allocation42_spill] sm:$0xff]  ;;  %v11183_v46 = vld [vmem:[#allocation6 + $0x3f4] sm:$0xf] }
 0x8d4   :  { %v8230_v59 = vadd.f32 %v8229_v58, %v8181_v49  ;;  %v17765_v58 = vld [vmem:[#allocation77_spill] sm:$0xff] }
 0x8d5   :  { %v8280_v20 = vpop.f32.mrf.mxu0 }
 0x8d6   :  { %v16692_v7 = vadd.f32 %v8278_v11, %v8230_v59  ;;  %v16702_v11 = vperm.slane %v11319_v54, 1  ;;  %v17766_v59 = vld [vmem:[#allocation79_spill] sm:$0xff] }
 0x8d8   :  { %v8182_v32 = vpop.f32.mrf.mxu2 }
 0x8d9   :  { %v8183_v50 = vadd.f32 %v8182_v32, %v8134_v63  ;;  %v10715_v63 = vld [vmem:[#allocation6 + $0x3f8] sm:$0xf0]  ;;  %v17767_v32 = vld [vmem:[#allocation63_spill] sm:$0xff] }
 0x8da   :  { %v16694_v10 = vpop.f32.mrf.mxu1 }
 0x8db   :  { %v8231_v55 = vpop.f32.mrf.mxu3 }
 0x8dc   :  { %v8232_v13 = vadd.f32 %v8231_v55, %v8183_v50  ;;  %v10718_v50 = vor.u32 %v11183_v46, %v10715_v63 }
 0x8dd   :  { %v8439_v41 = vpop.f32.mrf.mxu0 }
 0x8de   :  { %v16697_v37 = vadd.f32 %v8280_v20, %v8232_v13  ;;  %8487 = vmatmul.bf16.vlgmr.msra.gmra.mxu1 %v17763_v47  ;;  %8724 = vmatpush.bf16.msra.mxu2 %v10718_v50  ;;  %v10707_v50 = vld [vmem:[#allocation6 + $0x3e8] sm:$0xf0] }
 0x8df   :  { %8365 = vmatmul.bf16.gmra.mxu2 %v16642_v27 }
 0x8e0   :  { %8634 = vmatmul.bf16.vlgmr.msra.gmra.mxu0 %v17762_v26  ;;  %8585 = vmatmul.bf16.vlgmr.msra.gmra.mxu3 %v17764_v60 }
 0x8e2   :  { %v16705_v62 = vpop.f32.mrf.mxu1 }
 0x8e3   :  { %v8390_v29 = vpop.f32.mrf.mxu3 }
 0x8e4   :  { %v8391_v52 = vadd.f32 %v8390_v29, %v16702_v11  ;;  %v10651_v29 = vld [vmem:[#allocation6 + $0x378] sm:$0xf0] }
 0x8e5   :  { %v8441_v15 = vpop.f32.mrf.mxu0 }
 0x8e6   :  { %v16707_v5 = vadd.f32 %v8439_v41, %v8391_v52  ;;  %v17768_v52 = vld [vmem:[#allocation34_spill] sm:$0xff] }
 0x8ea   :  { %v16710_v49 = vpop.f32.mrf.mxu1 }
 0x8eb   :  { %v8392_v44 = vpop.f32.mrf.mxu3 }
 0x8ec   :  { %v8393_v14 = vadd.f32 %v8392_v44, %v16702_v11 }
 0x8ed   :  { %v8444_v28 = vpop.f32.mrf.mxu0 }
 0x8ee   :  { %v16713_v20 = vadd.f32 %v8441_v15, %v8393_v14  ;;  %8492 = vmatmul.bf16.gmra.mxu1 %v17766_v59  ;;  %v10654_v15 = vor.u32 %v11167_v4, %v10651_v29  ;;  %v17769_v14 = vld [vmem:[#allocation80_spill] sm:$0xff]  ;;  %v11165_v29 = vld [vmem:[#allocation6 + $0x364] sm:$0xf] }
 0x8ef   :  { %8370 = vmatmul.bf16.gmra.mxu2 %v16655_v45 }
 0x8f0   :  { %8639 = vmatmul.bf16.gmra.mxu0 %v17765_v58  ;;  %8590 = vmatmul.bf16.gmra.mxu3 %v17767_v32  ;;  %v17770_v58 = vld [vmem:[#allocation55_spill] sm:$0xff]  ;;  %v11181_v32 = vld [vmem:[#allocation6 + $0x3e4] sm:$0xf] }
 0x8f1   :  { %8675 = vmatpush.bf16.msrb.mxu1 %v10654_v15  ;;  %v10643_v15 = vld [vmem:[#allocation6 + $0x368] sm:$0xf0] }
 0x8f2   :  { %v16719_v26 = vpop.f32.mrf.mxu1 }
 0x8f3   :  { %v8395_v55 = vpop.f32.mrf.mxu3 }
 0x8f4   :  { %v8396_v13 = vadd.f32 %v8395_v55, %v16702_v11  ;;  %v10710_v55 = vor.u32 %v11181_v32, %v10707_v50 }
 0x8f5   :  { %v8446_v41 = vpop.f32.mrf.mxu0 }
 0x8f6   :  { %v16721_v47 = vadd.f32 %v8444_v28, %v8396_v13  ;;  %8725 = vmatpush.bf16.msra.mxu2 %v10710_v55 }
 0x8fa   :  { %v16724_v54 = vpop.f32.mrf.mxu1 }
 0x8fb   :  { %v8397_v42 = vpop.f32.mrf.mxu3 }
 0x8fc   :  { %v8398_v60 = vadd.f32 %v8397_v42, %v16702_v11 }
 0x8fd   :  { %v8449_v61 = vpop.f32.mrf.mxu0 }
 0x8fe   :  { %v16727_v44 = vadd.f32 %v8446_v41, %v8398_v60  ;;  %8497 = vmatmul.bf16.gmra.mxu1 %v17769_v14  ;;  %v17771_v14 = vld [vmem:[#allocation25_spill] sm:$0xff] }
 0x8ff   :  { %8375 = vmatmul.bf16.gmra.mxu2 %v16659_v57  ;;  %v17773_v57 = vld [vmem:[#allocation81_spill] sm:$0xff] }
 0x900   :  { %8644 = vmatmul.bf16.gmra.mxu0 %v17768_v52  ;;  %8595 = vmatmul.bf16.gmra.mxu3 %v17770_v58  ;;  %v10646_v52 = vor.u32 %v11165_v29, %v10643_v15 }
 0x902   :  { %v16733_v63 = vpop.f32.mrf.mxu1  ;;  %8676 = vmatpush.bf16.msrb.mxu1 %v10646_v52 }
 0x903   :  { %v8400_v28 = vpop.f32.mrf.mxu3 }
 0x904   :  { %v8401_v46 = vadd.f32 %v8400_v28, %v16702_v11  ;;  %v17772_v28 = vld [vmem:[#allocation61_spill] sm:$0xff] }
 0x905   :  { %v8451_v59 = vpop.f32.mrf.mxu0 }
 0x906   :  { %v16735_v13 = vadd.f32 %v8449_v61, %v8401_v46  ;;  %v17774_v61 = vld [vmem:[#allocation47_spill] sm:$0xff]  ;;  %v8293_v46 = vadd.f32 %v16694_v10, %v16464_v39 }
 0x90a   :  { %v16738_v4 = vpop.f32.mrf.mxu1 }
 0x90b   :  { %v8402_v41 = vpop.f32.mrf.mxu3 }
 0x90c   :  { %v8403_v60 = vadd.f32 %v8402_v41, %v16702_v11 }
 0x90d   :  { %v8454_v42 = vpop.f32.mrf.mxu0 }
 0x90e   :  { %v16741_v58 = vadd.f32 %v8451_v59, %v8403_v60  ;;  %8502 = vmatmul.bf16.gmra.mxu1 %v17773_v57  ;;  %v11179_v59 = vld [vmem:[#allocation6 + $0x3d4] sm:$0xf]  ;;  %v10699_v60 = vld [vmem:[#allocation6 + $0x3d8] sm:$0xf0]  ;;  %v8295_v57 = vadd.f32 %v16705_v62, %v16480_v21 }
 0x90f   :  { %8536 = vmatmul.bf16.vlgmr.msrb.gmra.mxu2 %v17772_v28  ;;  %v17776_v62 = vld [vmem:[#allocation64_spill] sm:$0xff] }
 0x910   :  { %8649 = vmatmul.bf16.gmra.mxu0 %v17771_v14  ;;  %8600 = vmatmul.bf16.gmra.mxu3 %v17774_v61  ;;  %v10702_v14 = vor.u32 %v11179_v59, %v10699_v60  ;;  %v17775_v59 = vld [vmem:[#allocation29_spill] sm:$0xff]  ;;  %v17777_v60 = vld [vmem:[#allocation82_spill] sm:$0xff] }
 0x912   :  { %v8341_v32 = vpop.f32.mrf.mxu2  ;;  %v16749_v15 = vpop.f32.mrf.mxu1  ;;  %8726 = vmatpush.bf16.msra.mxu2 %v10702_v14  ;;  %v17778_v14 = vld [vmem:[#allocation46_spill] sm:$0xff] }
 0x913   :  { %v8342_v50 = vadd.f32 %v8341_v32, %v8293_v46  ;;  %v8405_v55 = vpop.f32.mrf.mxu3 }
 0x914   :  { %v8406_v29 = vadd.f32 %v8405_v55, %v16702_v11 }
 0x915   :  { %v8456_v41 = vpop.f32.mrf.mxu0  ;;  %11244 = vtanh.f32 %v8342_v50  ;;  %v11163_v50 = vld [vmem:[#allocation6 + $0x354] sm:$0xf] }
 0x916   :  { %v16751_v28 = vadd.f32 %v8454_v42, %v8406_v29  ;;  %v10635_v42 = vld [vmem:[#allocation6 + $0x358] sm:$0xf0] }
 0x917   :  { %v10638_v29 = vor.u32 %v11163_v50, %v10635_v42  ;;  %v11177_v50 = vld [vmem:[#allocation6 + $0x3c4] sm:$0xf]  ;;  %v10691_v42 = vld [vmem:[#allocation6 + $0x3c8] sm:$0xf0] }
 0x919   :  { %8677 = vmatpush.bf16.msrb.mxu1 %v10638_v29  ;;  %v10694_v29 = vor.u32 %v11177_v50, %v10691_v42 }
 0x91a   :  { %v8343_v52 = vpop.f32.mrf.mxu2 }
 0x91b   :  { %v11245_v39 = vpop.eup %11244  ;;  %v8344_v10 = vadd.f32 %v8343_v52, %v8295_v57  ;;  %v8407_v61 = vpop.f32.mrf.mxu3  ;;  %v8298_v57 = vadd.f32 %v16710_v49, %v16489_v51  ;;  %8727 = vmatpush.bf16.msra.mxu2 %v10694_v29  ;;  %v8300_v51 = vadd.f32 %v16719_v26, %v16498_v43  ;;  %v17779_v26 = vld [vmem:[#allocation65_spill] sm:$0xff] }
 0x91c   :  { %8805 = vst [vmem:[%s17037_s13] sm:$0xff] %v11245_v39  ;;  %v8408_v32 = vadd.f32 %v8407_v61, %v16702_v11  ;;  %v16759_v55 = vpop.f32.mrf.mxu1 }
 0x91d   :  { %v8459_v46 = vpop.f32.mrf.mxu0  ;;  %11246 = vtanh.f32 %v8344_v10 }
 0x91e   :  { %v16762_v21 = vadd.f32 %v8456_v41, %v8408_v32  ;;  %8507 = vmatmul.bf16.gmra.mxu1 %v17777_v60 }
 0x91f   :  { %8541 = vmatmul.bf16.gmra.mxu2 %v17776_v62 }
 0x920   :  { %8654 = vmatmul.bf16.gmra.mxu0 %v17775_v59  ;;  %8605 = vmatmul.bf16.gmra.mxu3 %v17778_v14 }
 0x922   :  { %v8346_v52 = vpop.f32.mrf.mxu2 }
 0x923   :  { %v11247_v39 = vpop.eup %11246  ;;  %v8347_v61 = vadd.f32 %v8346_v52, %v8298_v57  ;;  %v8410_v45 = vpop.f32.mrf.mxu3 }
 0x924   :  { %8807 = vst [vmem:[%s17037_s13 + $0x10] sm:$0xff] %v11247_v39  ;;  %v8411_v41 = vadd.f32 %v8410_v45, %v16702_v11  ;;  %v16773_v32 = vpop.f32.mrf.mxu1  ;;  %v11161_v39 = vld [vmem:[#allocation6 + $0x344] sm:$0xf] }
 0x925   :  { %v8461_v10 = vpop.f32.mrf.mxu0  ;;  %11248 = vtanh.f32 %v8347_v61 }
 0x926   :  { %v16775_v59 = vadd.f32 %v8459_v46, %v8411_v41  ;;  %v10627_v46 = vld [vmem:[#allocation6 + $0x348] sm:$0xf0]  ;;  %v8303_v41 = vadd.f32 %v16724_v54, %v16618_v2 }
 0x927   :  { %v10630_v61 = vor.u32 %v11161_v39, %v10627_v46 }
 0x929   :  { %8678 = vmatpush.bf16.msrb.mxu1 %v10630_v61 }
 0x92a   :  { %v8348_v49 = vpop.f32.mrf.mxu2 }
 0x92b   :  { %v11249_v62 = vpop.eup %11248  ;;  %v8349_v60 = vadd.f32 %v8348_v49, %v8300_v51  ;;  %v8412_v14 = vpop.f32.mrf.mxu3  ;;  %v11175_v49 = vld [vmem:[#allocation6 + $0x3b4] sm:$0xf] }
 0x92c   :  { %8809 = vst [vmem:[%s17037_s13 + $0x20] sm:$0xff] %v11249_v62  ;;  %v8413_v45 = vadd.f32 %v8412_v14, %v16702_v11  ;;  %v16783_v52 = vpop.f32.mrf.mxu1  ;;  %v10619_v14 = vld [vmem:[#allocation6 + $0x338] sm:$0xf0] }
 0x92d   :  { %v8464_v57 = vpop.f32.mrf.mxu0  ;;  %11250 = vtanh.f32 %v8349_v60  ;;  %v11159_v60 = vld [vmem:[#allocation6 + $0x334] sm:$0xf] }
 0x92e   :  { %v16786_v43 = vadd.f32 %v8461_v10, %v8413_v45  ;;  %8512 = vmatmul.bf16.gmra.mxu1 %v17720_v40  ;;  %v10683_v40 = vld [vmem:[#allocation6 + $0x3b8] sm:$0xf0]  ;;  %v10622_v2 = vor.u32 %v11159_v60, %v10619_v14  ;;  %v8305_v45 = vadd.f32 %v16733_v63, %v16635_v30 }
 0x92f   :  { %8546 = vmatmul.bf16.gmra.mxu2 %v17779_v26  ;;  %v10686_v62 = vor.u32 %v11175_v49, %v10683_v40  ;;  %v17780_v49 = vld [vmem:[#allocation75_spill] sm:$0xff] }
 0x930   :  { %8659 = vmatmul.bf16.gmra.mxu0 %v15999_v19  ;;  %8610 = vmatmul.bf16.gmra.mxu3 %v17721_v25 }
 0x931   :  { %8728 = vmatpush.bf16.msra.mxu2 %v10686_v62  ;;  %8679 = vmatpush.bf16.msrb.mxu1 %v10622_v2  ;;  %v8308_v62 = vadd.f32 %v16738_v4, %v16638_v35 }
 0x932   :  { %v8351_v50 = vpop.f32.mrf.mxu2 }
 0x933   :  { %v11251_v42 = vpop.eup %11250  ;;  %v8352_v29 = vadd.f32 %v8351_v50, %v8303_v41  ;;  %v8415_v51 = vpop.f32.mrf.mxu3 }
 0x934   :  { %8811 = vst [vmem:[%s17037_s13 + $0x30] sm:$0xff] %v11251_v42  ;;  %v8416_v19 = vadd.f32 %v8415_v51, %v16702_v11  ;;  %v16797_v10 = vpop.f32.mrf.mxu1  ;;  %v11157_v42 = vld [vmem:[#allocation6 + $0x324] sm:$0xf]  ;;  %v11155_v51 = vld [vmem:[#allocation6 + $0x314] sm:$0xf] }
 0x935   :  { %11252 = vtanh.f32 %v8352_v29  ;;  %v8466_v25 = vpop.f32.mrf.mxu0 }
 0x936   :  { %v16799_v54 = vadd.f32 %v8464_v57, %v8416_v19  ;;  %v10611_v57 = vld [vmem:[#allocation6 + $0x328] sm:$0xf0]  ;;  %v10603_v19 = vld [vmem:[#allocation6 + $0x318] sm:$0xf0] }
 0x937   :  { %v10614_v29 = vor.u32 %v11157_v42, %v10611_v57  ;;  %v10606_v40 = vor.u32 %v11155_v51, %v10603_v19 }
 0x939   :  { %8680 = vmatpush.bf16.msrb.mxu1 %v10614_v29 }
 0x93a   :  { %v8353_v39 = vpop.f32.mrf.mxu2 }
 0x93b   :  { %v11253_v46 = vpop.eup %11252  ;;  %v8354_v61 = vadd.f32 %v8353_v39, %v8305_v45  ;;  %v8417_v26 = vpop.f32.mrf.mxu3 }
 0x93c   :  { %8813 = vst [vmem:[%s17037_s13 + $0x40] sm:$0xff] %v11253_v46  ;;  %v8418_v41 = vadd.f32 %v8417_v26, %v16702_v11  ;;  %v16807_v50 = vpop.f32.mrf.mxu1  ;;  %v11173_v46 = vld [vmem:[#allocation6 + $0x3a4] sm:$0xf]  ;;  %v8310_v26 = vadd.f32 %v16749_v15, %v16650_v17  ;;  %v17782_v17 = vld [vmem:[#allocation84_spill] sm:$0xff] }
 0x93d   :  { %11254 = vtanh.f32 %v8354_v61  ;;  %v8469_v63 = vpop.f32.mrf.mxu0  ;;  %8681 = vmatpush.bf16.msrb.mxu1 %v10606_v40  ;;  %v10675_v61 = vld [vmem:[#allocation6 + $0x3a8] sm:$0xf0]  ;;  %v17783_v15 = vld [vmem:[#allocation21_spill] sm:$0xff] }
 0x93e   :  { %v16810_v30 = vadd.f32 %v8466_v25, %v8418_v41  ;;  %8517 = vmatmul.bf16.gmra.mxu1 %v17723_v34  ;;  %v11153_v34 = vld [vmem:[#allocation6 + $0x304] sm:$0xf]  ;;  %v10678_v35 = vor.u32 %v11173_v46, %v10675_v61 }
 0x93f   :  { %8551 = vmatmul.bf16.gmra.mxu2 %v17780_v49  ;;  %v17781_v40 = vld [vmem:[#allocation74_spill] sm:$0xff] }
 0x940   :  { %8664 = vmatmul.bf16.gmra.mxu0 %v16012_v0  ;;  %8615 = vmatmul.bf16.gmra.mxu3 %v17724_v24  ;;  %v10595_v24 = vld [vmem:[#allocation6 + $0x308] sm:$0xf0] }
 0x941   :  { %v10598_v39 = vor.u32 %v11153_v34, %v10595_v24  ;;  %8729 = vmatpush.bf16.msra.mxu2 %v10678_v35  ;;  %v11171_v24 = vld [vmem:[#allocation6 + $0x394] sm:$0xf] }
 0x942   :  { %v8356_v60 = vpop.f32.mrf.mxu2 }
 0x943   :  { %v11255_v14 = vpop.eup %11254  ;;  %v8357_v2 = vadd.f32 %v8356_v60, %v8308_v62  ;;  %v8420_v45 = vpop.f32.mrf.mxu3  ;;  %8682 = vmatpush.bf16.msrb.mxu1 %v10598_v39  ;;  %v8313_v62 = vadd.f32 %v16759_v55, %v16662_v6  ;;  %v10667_v39 = vld [vmem:[#allocation6 + $0x398] sm:$0xf0]  ;;  %v8315_v6 = vadd.f32 %v16773_v32, %v16666_v12  ;;  %v17785_v12 = vld [vmem:[#allocation35_spill] sm:$0xff]  ;;  %v8318_v32 = vadd.f32 %v16783_v52, %v16672_v8 }
 0x944   :  { %8815 = vst [vmem:[%s17037_s13 + $0x50] sm:$0xff] %v11255_v14  ;;  %v8421_v0 = vadd.f32 %v8420_v45, %v16702_v11  ;;  %v16821_v25 = vpop.f32.mrf.mxu1  ;;  %v10670_v46 = vor.u32 %v11171_v24, %v10667_v39  ;;  %v17786_v39 = vld [vmem:[#allocation59_spill] sm:$0xff] }
 0x945   :  { %11256 = vtanh.f32 %v8357_v2  ;;  %v8471_v41 = vpop.f32.mrf.mxu0 }
 0x946   :  { %v16823_v4 = vadd.f32 %v8469_v63, %v8421_v0  ;;  %8730 = vmatpush.bf16.msra.mxu2 %v10670_v46  ;;  %v17787_v46 = vld [vmem:[#allocation31_spill] sm:$0xff] }
 0x94a   :  { %v8358_v42 = vpop.f32.mrf.mxu2 }
 0x94b   :  { %v11257_v57 = vpop.eup %11256  ;;  %v8359_v29 = vadd.f32 %v8358_v42, %v8310_v26  ;;  %v8422_v51 = vpop.f32.mrf.mxu3 }
 0x94c   :  { %8817 = vst [vmem:[%s17037_s13 + $0x60] sm:$0xff] %v11257_v57  ;;  %v8423_v19 = vadd.f32 %v8422_v51, %v16702_v11  ;;  %v16831_v49 = vpop.f32.mrf.mxu1 }
 0x94d   :  { %11258 = vtanh.f32 %v8359_v29  ;;  %v8474_v2 = vpop.f32.mrf.mxu0 }
 0x94e   :  { %v16834_v63 = vadd.f32 %v8471_v41, %v8423_v19  ;;  %8522 = vmatmul.bf16.gmra.mxu1 %v17782_v17 }
 0x94f   :  { %8556 = vmatmul.bf16.gmra.mxu2 %v17781_v40  ;;  %v17784_v40 = vld [vmem:[#allocation76_spill] sm:$0xff] }
 0x950   :  { %8669 = vmatmul.bf16.gmra.mxu0 %v16030_v18  ;;  %8620 = vmatmul.bf16.gmra.mxu3 %v17783_v15 }
 0x952   :  { %v8361_v60 = vpop.f32.mrf.mxu2 }
 0x953   :  { %v11259_v14 = vpop.eup %11258  ;;  %v8362_v45 = vadd.f32 %v8361_v60, %v8313_v62  ;;  %v8425_v0 = vpop.f32.mrf.mxu3  ;;  %v11169_v60 = vld [vmem:[#allocation6 + $0x384] sm:$0xf] }
 0x954   :  { %8819 = vst [vmem:[%s17037_s13 + $0x70] sm:$0xff] %v11259_v14  ;;  %v8426_v18 = vadd.f32 %v8425_v0, %v16702_v11  ;;  %v16845_v34 = vpop.f32.mrf.mxu1 }
 0x955   :  { %11260 = vtanh.f32 %v8362_v45  ;;  %v8476_v29 = vpop.f32.mrf.mxu0  ;;  %v8320_v45 = vadd.f32 %v16797_v10, %v16676_v48 }
 0x956   :  { %v16847_v61 = vadd.f32 %v8474_v2, %v8426_v18 }
 0x95a   :  { %v8363_v55 = vpop.f32.mrf.mxu2 }
 0x95b   :  { %v11261_v35 = vpop.eup %11260  ;;  %v8364_v26 = vadd.f32 %v8363_v55, %v8315_v6  ;;  %v8427_v41 = vpop.f32.mrf.mxu3 }
 0x95c   :  { %8821 = vst [vmem:[%s17037_s13 + $0x80] sm:$0xff] %v11261_v35  ;;  %v8428_v42 = vadd.f32 %v8427_v41, %v16702_v11  ;;  %v8488_v57 = vpop.f32.mrf.mxu1 }
 0x95d   :  { %11262 = vtanh.f32 %v8364_v26  ;;  %v16856_v51 = vadd.f32 %v8488_v57, %v16707_v5  ;;  %v10659_v5 = vld [vmem:[#allocation6 + $0x388] sm:$0xf0]  ;;  %v17788_v57 = vld [vmem:[#allocation73_spill] sm:$0xff] }
 0x95e   :  { %v16858_v19 = vadd.f32 %v8476_v29, %v8428_v42  ;;  %8683 = vmatmul.bf16.vlgmr.msrb.gmra.mxu1 %v17785_v12  ;;  %v10662_v2 = vor.u32 %v11169_v60, %v10659_v5  ;;  %v17789_v29 = vld [vmem:[#allocation24_spill] sm:$0xff] }
 0x95f   :  { %8561 = vmatmul.bf16.gmra.mxu2 %v17784_v40 }
 0x960   :  { %8731 = vmatpush.bf16.msra.mxu2 %v10662_v2 }
 0x962   :  { %v8366_v17 = vpop.f32.mrf.mxu2 }
 0x963   :  { %v11263_v15 = vpop.eup %11262  ;;  %v8367_v62 = vadd.f32 %v8366_v17, %v8318_v32 }
 0x964   :  { %8823 = vst [vmem:[%s17037_s13 + $0x90] sm:$0xff] %v11263_v15  ;;  %v8490_v11 = vpop.f32.mrf.mxu1 }
 0x965   :  { %11264 = vtanh.f32 %v8367_v62  ;;  %v8491_v14 = vadd.f32 %v8490_v11, %v16713_v20  ;;  %v8323_v20 = vadd.f32 %v16807_v50, %v16682_v33 }
 0x96a   :  { %v8368_v0 = vpop.f32.mrf.mxu2 }
 0x96b   :  { %v11265_v8 = vpop.eup %11264  ;;  %v8369_v52 = vadd.f32 %v8368_v0, %v8320_v45 }
 0x96c   :  { %8825 = vst [vmem:[%s17037_s13 + $0xa0] sm:$0xff] %v11265_v8  ;;  %v8493_v18 = vpop.f32.mrf.mxu1 }
 0x96d   :  { %11266 = vtanh.f32 %v8369_v52  ;;  %v8494_v24 = vadd.f32 %v8493_v18, %v16721_v47  ;;  %v8325_v47 = vadd.f32 %v16821_v25, %v16686_v56 }
 0x96e   :  { %8688 = vmatmul.bf16.gmra.mxu1 %v17787_v46 }
 0x96f   :  { %8566 = vmatmul.bf16.gmra.mxu2 %v17786_v39 }
 0x972   :  { %v8371_v6 = vpop.f32.mrf.mxu2 }
 0x973   :  { %v11267_v48 = vpop.eup %11266  ;;  %v8372_v10 = vadd.f32 %v8371_v6, %v8323_v20 }
 0x974   :  { %8827 = vst [vmem:[%s17037_s13 + $0xb0] sm:$0xff] %v11267_v48  ;;  %v8495_v55 = vpop.f32.mrf.mxu1 }
 0x975   :  { %11268 = vtanh.f32 %v8372_v10  ;;  %v8496_v35 = vadd.f32 %v8495_v55, %v16727_v44  ;;  %v8328_v44 = vadd.f32 %v16831_v49, %v16692_v7 }
 0x97a   :  { %v8373_v26 = vpop.f32.mrf.mxu2 }
 0x97b   :  { %v11269_v41 = vpop.eup %11268  ;;  %v8374_v42 = vadd.f32 %v8373_v26, %v8325_v47 }
 0x97c   :  { %8829 = vst [vmem:[%s17037_s13 + $0xc0] sm:$0xff] %v11269_v41  ;;  %v8498_v33 = vpop.f32.mrf.mxu1 }
 0x97d   :  { %11270 = vtanh.f32 %v8374_v42  ;;  %v8499_v50 = vadd.f32 %v8498_v33, %v16735_v13  ;;  %v8330_v13 = vadd.f32 %v16845_v34, %v16697_v37  ;;  %v8635_v42 = vpop.f32.mrf.mxu0 }
 0x97e   :  { %8693 = vmatmul.bf16.gmra.mxu1 %v17789_v29 }
 0x97f   :  { %8571 = vmatmul.bf16.gmra.mxu2 %v17788_v57 }
 0x982   :  { %v8376_v40 = vpop.f32.mrf.mxu2 }
 0x983   :  { %v11271_v56 = vpop.eup %11270  ;;  %v8377_v25 = vadd.f32 %v8376_v40, %v8328_v44 }
 0x984   :  { %8831 = vst [vmem:[%s17037_s13 + $0xd0] sm:$0xff] %v11271_v56  ;;  %v8500_v12 = vpop.f32.mrf.mxu1 }
 0x985   :  { %11272 = vtanh.f32 %v8377_v25  ;;  %v8501_v32 = vadd.f32 %v8500_v12, %v16741_v58  ;;  %v8637_v29 = vpop.f32.mrf.mxu0 }
 0x98a   :  { %v8378_v17 = vpop.f32.mrf.mxu2 }
 0x98b   :  { %v11273_v15 = vpop.eup %11272  ;;  %v8379_v62 = vadd.f32 %v8378_v17, %v8330_v13 }
 0x98c   :  { %8833 = vst [vmem:[%s17037_s13 + $0xe0] sm:$0xff] %v11273_v15  ;;  %v8503_v7 = vpop.f32.mrf.mxu1 }
 0x98d   :  { %11274 = vtanh.f32 %v8379_v62  ;;  %v8504_v49 = vadd.f32 %v8503_v7, %v16751_v28 }
 0x98e   :  { %8698 = vmatmul.bf16.gmra.mxu1 %v17740_v22 }
 0x98f   :  { %8732 = vmatmul.bf16.vlgmr.msra.gmra.mxu2 %v16565_v36 }
 0x992   :  { %v8537_v11 = vpop.f32.mrf.mxu2 }
 0x993   :  { %v11275_v58 = vpop.eup %11274  ;;  %v16905_v60 = vadd.f32 %v8537_v11, %v16856_v51 }
 0x994   :  { %8835 = vst [vmem:[%s17037_s13 + $0xf0] sm:$0xff] %v11275_v58  ;;  %v8505_v37 = vpop.f32.mrf.mxu1 }
 0x995   :  { %v8506_v34 = vadd.f32 %v8505_v37, %v16762_v21 }
 0x99a   :  { %v8539_v5 = vpop.f32.mrf.mxu2 }
 0x99b   :  { %v16911_v2 = vadd.f32 %v8539_v5, %v8491_v14 }
 0x99c   :  { %v8508_v28 = vpop.f32.mrf.mxu1 }
 0x99d   :  { %v8509_v36 = vadd.f32 %v8508_v28, %v16775_v59 }
 0x99e   :  { %8703 = vmatmul.bf16.gmra.mxu1 %v17751_v1 }
 0x99f   :  { %8737 = vmatmul.bf16.gmra.mxu2 %v16568_v3 }
 0x9a2   :  { %v8542_v22 = vpop.f32.mrf.mxu2 }
 0x9a3   :  { %v16916_v51 = vadd.f32 %v8542_v22, %v8494_v24 }
 0x9a4   :  { %v8510_v45 = vpop.f32.mrf.mxu1 }
 0x9a5   :  { %v8511_v0 = vadd.f32 %v8510_v45, %v16786_v43 }
 0x9aa   :  { %v8544_v8 = vpop.f32.mrf.mxu2 }
 0x9ab   :  { %v16919_v52 = vadd.f32 %v8544_v8, %v8496_v35 }
 0x9ac   :  { %v8513_v21 = vpop.f32.mrf.mxu1 }
 0x9ad   :  { %v8514_v14 = vadd.f32 %v8513_v21, %v16799_v54 }
 0x9ae   :  { %8708 = vmatmul.bf16.gmra.mxu1 %v17756_v38 }
 0x9af   :  { %8742 = vmatmul.bf16.gmra.mxu2 %v16588_v16 }
 0x9b2   :  { %v8547_v59 = vpop.f32.mrf.mxu2 }
 0x9b3   :  { %v16924_v3 = vadd.f32 %v8547_v59, %v8499_v50 }
 0x9b4   :  { %v8515_v1 = vpop.f32.mrf.mxu1 }
 0x9b5   :  { %v8516_v18 = vadd.f32 %v8515_v1, %v16810_v30 }
 0x9ba   :  { %v8549_v24 = vpop.f32.mrf.mxu2 }
 0x9bb   :  { %v16927_v39 = vadd.f32 %v8549_v24, %v8501_v32  ;;  %v8640_v32 = vpop.f32.mrf.mxu0 }
 0x9bc   :  { %v8518_v43 = vpop.f32.mrf.mxu1 }
 0x9bd   :  { %v8519_v46 = vadd.f32 %v8518_v43, %v16823_v4 }
 0x9be   :  { %8713 = vmatmul.bf16.gmra.mxu1 %v16340_v23 }
 0x9bf   :  { %8747 = vmatmul.bf16.gmra.mxu2 %v16604_v31 }
 0x9c2   :  { %v8552_v54 = vpop.f32.mrf.mxu2 }
 0x9c3   :  { %v16932_v16 = vadd.f32 %v8552_v54, %v8504_v49  ;;  %v8642_v11 = vpop.f32.mrf.mxu0 }
 0x9c4   :  { %v8520_v38 = vpop.f32.mrf.mxu1 }
 0x9c5   :  { %v8521_v20 = vadd.f32 %v8520_v38, %v16834_v63 }
 0x9ca   :  { %v8554_v6 = vpop.f32.mrf.mxu2 }
 0x9cb   :  { %v16935_v48 = vadd.f32 %v8554_v6, %v8506_v34  ;;  %v8645_v45 = vpop.f32.mrf.mxu0 }
 0x9cc   :  { %v8523_v30 = vpop.f32.mrf.mxu1 }
 0x9cd   :  { %v8524_v10 = vadd.f32 %v8523_v30, %v16847_v61 }
 0x9ce   :  { %8718 = vmatmul.bf16.gmra.mxu1 %v16363_v9  ;;  %v17790_v9 = vld [vmem:[#allocation37_spill] sm:$0xff] }
 0x9cf   :  { %8752 = vmatmul.bf16.gmra.mxu2 %v16624_v53  ;;  %v8586_v53 = vpop.f32.mrf.mxu3 }
 0x9d0   :  { %v8587_v7 = vadd.f32 %v8586_v53, %v16905_v60 }
 0x9d2   :  { %v8557_v4 = vpop.f32.mrf.mxu2  ;;  %v8636_v37 = vadd.f32 %v8635_v42, %v8587_v7 }
 0x9d3   :  { %v16940_v31 = vadd.f32 %v8557_v4, %v8509_v36 }
 0x9d4   :  { %v8525_v23 = vpop.f32.mrf.mxu1 }
 0x9d5   :  { %v8526_v55 = vadd.f32 %v8525_v23, %v16858_v19 }
 0x9d7   :  { %v8588_v19 = vpop.f32.mrf.mxu3 }
 0x9d8   :  { %v8589_v28 = vadd.f32 %v8588_v19, %v16911_v2  ;;  %v8647_v2 = vpop.f32.mrf.mxu0 }
 0x9da   :  { %v8559_v35 = vpop.f32.mrf.mxu2 }
 0x9db   :  { %v16943_v47 = vadd.f32 %v8559_v35, %v8511_v0  ;;  %v8638_v0 = vadd.f32 %v8637_v29, %v8589_v28 }
 0x9dc   :  { %v8684_v33 = vpop.f32.mrf.mxu1 }
 0x9dd   :  { %v8685_v34 = vadd.f32 %v8684_v33, %v8636_v37 }
 0x9df   :  { %8757 = vmatmul.bf16.gmra.mxu2 %v16642_v27  ;;  %v17791_v27 = vld [vmem:[#allocation22_spill] sm:$0xff]  ;;  %v8591_v25 = vpop.f32.mrf.mxu3 }
 0x9e0   :  { %v8592_v60 = vadd.f32 %v8591_v25, %v16916_v51 }
 0x9e2   :  { %v8562_v63 = vpop.f32.mrf.mxu2  ;;  %v8641_v24 = vadd.f32 %v8640_v32, %v8592_v60 }
 0x9e3   :  { %v16946_v26 = vadd.f32 %v8562_v63, %v8514_v14 }
 0x9e4   :  { %v8686_v44 = vpop.f32.mrf.mxu1 }
 0x9e5   :  { %v8687_v21 = vadd.f32 %v8686_v44, %v8638_v0 }
 0x9e7   :  { %v8593_v15 = vpop.f32.mrf.mxu3 }
 0x9ea   :  { %v8564_v41 = vpop.f32.mrf.mxu2 }
 0x9eb   :  { %v16948_v61 = vadd.f32 %v8564_v41, %v8516_v18 }
 0x9ec   :  { %v8689_v17 = vpop.f32.mrf.mxu1 }
 0x9ed   :  { %v8690_v43 = vadd.f32 %v8689_v17, %v8641_v24 }
 0x9ef   :  { %8762 = vmatmul.bf16.gmra.mxu2 %v17790_v9  ;;  %v8596_v22 = vpop.f32.mrf.mxu3 }
 0x9f0   :  { %v8597_v35 = vadd.f32 %v8596_v22, %v16924_v3 }
 0x9f2   :  { %v8567_v50 = vpop.f32.mrf.mxu2 }
 0x9f3   :  { %v16951_v57 = vadd.f32 %v8567_v50, %v8519_v46 }
 0x9f4   :  { %v8691_v58 = vpop.f32.mrf.mxu1 }
 0x9f7   :  { %v8598_v18 = vpop.f32.mrf.mxu3 }
 0x9f8   :  { %v8599_v50 = vadd.f32 %v8598_v18, %v16927_v39 }
 0x9fa   :  { %v8569_v40 = vpop.f32.mrf.mxu2  ;;  %v8648_v44 = vadd.f32 %v8647_v2, %v8599_v50 }
 0x9fb   :  { %v16953_v56 = vadd.f32 %v8569_v40, %v8521_v20  ;;  %v8594_v20 = vadd.f32 %v8593_v15, %v16919_v52  ;;  %v8646_v52 = vadd.f32 %v8645_v45, %v8597_v35 }
 0x9fc   :  { %v8694_v8 = vpop.f32.mrf.mxu1 }
 0x9fd   :  { %v8643_v51 = vadd.f32 %v8642_v11, %v8594_v20  ;;  %v8695_v53 = vadd.f32 %v8694_v8, %v8646_v52 }
 0x9ff   :  { %8767 = vmatmul.bf16.gmra.mxu2 %v17791_v27  ;;  %v8601_v30 = vpop.f32.mrf.mxu3 }
 0xa02   :  { %v8572_v12 = vpop.f32.mrf.mxu2 }
 0xa03   :  { %v16956_v13 = vadd.f32 %v8572_v12, %v8524_v10  ;;  %v8692_v10 = vadd.f32 %v8691_v58, %v8643_v51  ;;  %v8602_v12 = vadd.f32 %v8601_v30, %v16932_v16 }
 0xa04   :  { %v8696_v46 = vpop.f32.mrf.mxu1 }
 0xa05   :  { %v8697_v40 = vadd.f32 %v8696_v46, %v8648_v44 }
 0xa07   :  { %v8603_v42 = vpop.f32.mrf.mxu3 }
 0xa08   :  { %v8604_v37 = vadd.f32 %v8603_v42, %v16935_v48 }
 0xa0a   :  { %v8574_v62 = vpop.f32.mrf.mxu2 }
 0xa0b   :  { %v16959_v49 = vadd.f32 %v8574_v62, %v8526_v55  ;;  %v8650_v55 = vpop.f32.mrf.mxu0 }
 0xa0c   :  { %v8699_v41 = vpop.f32.mrf.mxu1  ;;  %v8651_v15 = vadd.f32 %v8650_v55, %v8602_v12 }
 0xa0e   :  { %v8700_v7 = vadd.f32 %v8699_v41, %v8651_v15 }
 0xa0f   :  { %v8606_v17 = vpop.f32.mrf.mxu3 }
 0xa10   :  { %v8607_v8 = vadd.f32 %v8606_v17, %v16940_v31 }
 0xa12   :  { %v8733_v5 = vpop.f32.mrf.mxu2 }
 0xa13   :  { %v8734_v36 = vadd.f32 %v8733_v5, %v8685_v34  ;;  %v8652_v3 = vpop.f32.mrf.mxu0 }
 0xa14   :  { %v8701_v29 = vpop.f32.mrf.mxu1  ;;  %v8653_v5 = vadd.f32 %v8652_v3, %v8604_v37 }
 0xa15   :  { %11276 = vtanh.f32 %v8734_v36 }
 0xa16   :  { %v8702_v36 = vadd.f32 %v8701_v29, %v8653_v5 }
 0xa17   :  { %v8608_v16 = vpop.f32.mrf.mxu3 }
 0xa18   :  { %v8609_v24 = vadd.f32 %v8608_v16, %v16943_v47 }
 0xa1a   :  { %v8735_v14 = vpop.f32.mrf.mxu2 }
 0xa1b   :  { %v11277_v59 = vpop.eup %11276  ;;  %v8736_v1 = vadd.f32 %v8735_v14, %v8687_v21  ;;  %v8655_v39 = vpop.f32.mrf.mxu0 }
 0xa1c   :  { %8806 = vst [vmem:[%s17037_s13 + $0x8] sm:$0xff] %v11277_v59  ;;  %v8704_v62 = vpop.f32.mrf.mxu1  ;;  %v8656_v48 = vadd.f32 %v8655_v39, %v8607_v8 }
 0xa1d   :  { %11278 = vtanh.f32 %v8736_v1 }
 0xa1e   :  { %v8705_v59 = vadd.f32 %v8704_v62, %v8656_v48 }
 0xa1f   :  { %v8611_v14 = vpop.f32.mrf.mxu3 }
 0xa22   :  { %v8738_v54 = vpop.f32.mrf.mxu2 }
 0xa23   :  { %v11279_v38 = vpop.eup %11278  ;;  %v8739_v6 = vadd.f32 %v8738_v54, %v8690_v43  ;;  %v8657_v28 = vpop.f32.mrf.mxu0 }
 0xa24   :  { %8808 = vst [vmem:[%s17037_s13 + $0x18] sm:$0xff] %v11279_v38  ;;  %v8706_v22 = vpop.f32.mrf.mxu1  ;;  %v8658_v31 = vadd.f32 %v8657_v28, %v8609_v24 }
 0xa25   :  { %11280 = vtanh.f32 %v8739_v6  ;;  %v8612_v6 = vadd.f32 %v8611_v14, %v16946_v26 }
 0xa26   :  { %v8707_v46 = vadd.f32 %v8706_v22, %v8658_v31 }
 0xa27   :  { %v8613_v54 = vpop.f32.mrf.mxu3 }
 0xa28   :  { %v8614_v35 = vadd.f32 %v8613_v54, %v16948_v61 }
 0xa2a   :  { %v8740_v4 = vpop.f32.mrf.mxu2 }
 0xa2b   :  { %v11281_v23 = vpop.eup %11280  ;;  %v8741_v63 = vadd.f32 %v8740_v4, %v8692_v10  ;;  %v8660_v18 = vpop.f32.mrf.mxu0 }
 0xa2c   :  { %8810 = vst [vmem:[%s17037_s13 + $0x28] sm:$0xff] %v11281_v23  ;;  %v8709_v43 = vpop.f32.mrf.mxu1  ;;  %v8661_v10 = vadd.f32 %v8660_v18, %v8612_v6 }
 0xa2d   :  { %11282 = vtanh.f32 %v8741_v63 }
 0xa2e   :  { %v8710_v4 = vadd.f32 %v8709_v43, %v8661_v10 }
 0xa2f   :  { %v8616_v41 = vpop.f32.mrf.mxu3 }
 0xa30   :  { %v8617_v50 = vadd.f32 %v8616_v41, %v16951_v57 }
 0xa32   :  { %v8743_v9 = vpop.f32.mrf.mxu2 }
 0xa33   :  { %v11283_v33 = vpop.eup %11282  ;;  %v8744_v19 = vadd.f32 %v8743_v9, %v8695_v53  ;;  %v8662_v47 = vpop.f32.mrf.mxu0 }
 0xa34   :  { %8812 = vst [vmem:[%s17037_s13 + $0x38] sm:$0xff] %v11283_v33  ;;  %v8711_v30 = vpop.f32.mrf.mxu1  ;;  %v8663_v52 = vadd.f32 %v8662_v47, %v8614_v35 }
 0xa35   :  { %11284 = vtanh.f32 %v8744_v19 }
 0xa36   :  { %v8712_v42 = vadd.f32 %v8711_v30, %v8663_v52 }
 0xa37   :  { %v8618_v61 = vpop.f32.mrf.mxu3 }
 0xa38   :  { %v8619_v12 = vadd.f32 %v8618_v61, %v16953_v56 }
 0xa3a   :  { %v8745_v27 = vpop.f32.mrf.mxu2 }
 0xa3b   :  { %v11285_v25 = vpop.eup %11284  ;;  %v8746_v32 = vadd.f32 %v8745_v27, %v8697_v40  ;;  %v8665_v26 = vpop.f32.mrf.mxu0 }
 0xa3c   :  { %8814 = vst [vmem:[%s17037_s13 + $0x48] sm:$0xff] %v11285_v25  ;;  %v8714_v53 = vpop.f32.mrf.mxu1  ;;  %v8666_v3 = vadd.f32 %v8665_v26, %v8617_v50 }
 0xa3d   :  { %11286 = vtanh.f32 %v8746_v32 }
 0xa3e   :  { %v8715_v44 = vadd.f32 %v8714_v53, %v8666_v3 }
 0xa3f   :  { %v8621_v17 = vpop.f32.mrf.mxu3 }
 0xa42   :  { %v8748_v11 = vpop.f32.mrf.mxu2 }
 0xa43   :  { %v11287_v58 = vpop.eup %11286  ;;  %v8749_v34 = vadd.f32 %v8748_v11, %v8700_v7  ;;  %v8667_v29 = vpop.f32.mrf.mxu0  ;;  %v8622_v7 = vadd.f32 %v8621_v17, %v16956_v13 }
 0xa44   :  { %8816 = vst [vmem:[%s17037_s13 + $0x58] sm:$0xff] %v11287_v58  ;;  %v8716_v40 = vpop.f32.mrf.mxu1  ;;  %v8668_v57 = vadd.f32 %v8667_v29, %v8619_v12 }
 0xa45   :  { %11288 = vtanh.f32 %v8749_v34 }
 0xa46   :  { %v8717_v39 = vadd.f32 %v8716_v40, %v8668_v57 }
 0xa47   :  { %v8623_v16 = vpop.f32.mrf.mxu3 }
 0xa4a   :  { %v8750_v45 = vpop.f32.mrf.mxu2 }
 0xa4b   :  { %v11289_v0 = vpop.eup %11288  ;;  %v8751_v21 = vadd.f32 %v8750_v45, %v8702_v36  ;;  %v8670_v58 = vpop.f32.mrf.mxu0  ;;  %v8624_v36 = vadd.f32 %v8623_v16, %v16959_v49 }
 0xa4c   :  { %8818 = vst [vmem:[%s17037_s13 + $0x68] sm:$0xff] %v11289_v0  ;;  %v8719_v37 = vpop.f32.mrf.mxu1  ;;  %v8671_v56 = vadd.f32 %v8670_v58, %v8622_v7 }
 0xa4d   :  { %11290 = vtanh.f32 %v8751_v21 }
 0xa4e   :  { %v8720_v34 = vadd.f32 %v8719_v37, %v8671_v56 }
 0xa52   :  { %v8753_v60 = vpop.f32.mrf.mxu2 }
 0xa53   :  { %v11291_v1 = vpop.eup %11290  ;;  %v8754_v2 = vadd.f32 %v8753_v60, %v8705_v59  ;;  %v8672_v13 = vpop.f32.mrf.mxu0 }
 0xa54   :  { %8820 = vst [vmem:[%s17037_s13 + $0x78] sm:$0xff] %v11291_v1  ;;  %v8721_v45 = vpop.f32.mrf.mxu1  ;;  %v8673_v0 = vadd.f32 %v8672_v13, %v8624_v36 }
 0xa55   :  { %11292 = vtanh.f32 %v8754_v2 }
 0xa56   :  { %v8722_v8 = vadd.f32 %v8721_v45, %v8673_v0 }
 0xa5a   :  { %v8755_v38 = vpop.f32.mrf.mxu2 }
 0xa5b   :  { %v11293_v20 = vpop.eup %11292  ;;  %v8756_v51 = vadd.f32 %v8755_v38, %v8707_v46 }
 0xa5c   :  { %8822 = vst [vmem:[%s17037_s13 + $0x88] sm:$0xff] %v11293_v20 }
 0xa5d   :  { %11294 = vtanh.f32 %v8756_v51 }
 0xa62   :  { %v8758_v23 = vpop.f32.mrf.mxu2 }
 0xa63   :  { %v11295_v55 = vpop.eup %11294  ;;  %v8759_v63 = vadd.f32 %v8758_v23, %v8710_v4 }
 0xa64   :  { %8824 = vst [vmem:[%s17037_s13 + $0x98] sm:$0xff] %v11295_v55 }
 0xa65   :  { %11296 = vtanh.f32 %v8759_v63 }
 0xa6a   :  { %v8760_v9 = vpop.f32.mrf.mxu2 }
 0xa6b   :  { %v11297_v33 = vpop.eup %11296  ;;  %v8761_v19 = vadd.f32 %v8760_v9, %v8712_v42 }
 0xa6c   :  { %8826 = vst [vmem:[%s17037_s13 + $0xa8] sm:$0xff] %v11297_v33 }
 0xa6d   :  { %11298 = vtanh.f32 %v8761_v19 }
 0xa72   :  { %v8763_v27 = vpop.f32.mrf.mxu2 }
 0xa73   :  { %v11299_v25 = vpop.eup %11298  ;;  %v8764_v32 = vadd.f32 %v8763_v27, %v8715_v44 }
 0xa74   :  { %8828 = vst [vmem:[%s17037_s13 + $0xb8] sm:$0xff] %v11299_v25 }
 0xa75   :  { %11300 = vtanh.f32 %v8764_v32 }
 0xa7a   :  { %v8765_v15 = vpop.f32.mrf.mxu2 }
 0xa7b   :  { %v11301_v62 = vpop.eup %11300  ;;  %v8766_v11 = vadd.f32 %v8765_v15, %v8717_v39 }
 0xa7c   :  { %8830 = vst [vmem:[%s17037_s13 + $0xc8] sm:$0xff] %v11301_v62 }
 0xa7d   :  { %11302 = vtanh.f32 %v8766_v11 }
 0xa82   :  { %v8768_v5 = vpop.f32.mrf.mxu2 }
 0xa83   :  { %v11303_v28 = vpop.eup %11302  ;;  %v8769_v22 = vadd.f32 %v8768_v5, %v8720_v34 }
 0xa84   :  { %8832 = vst [vmem:[%s17037_s13 + $0xd8] sm:$0xff] %v11303_v28 }
 0xa85   :  { %11304 = vtanh.f32 %v8769_v22 }
 0xa8a   :  { %v8770_v21 = vpop.f32.mrf.mxu2 }
 0xa8b   :  { %v11305_v48 = vpop.eup %11304  ;;  %v8771_v14 = vadd.f32 %v8770_v21, %v8722_v8 }
 0xa8c   :  { %8834 = vst [vmem:[%s17037_s13 + $0xe8] sm:$0xff] %v11305_v48 }
 0xa8d   :  { %11306 = vtanh.f32 %v8771_v14 }
 0xa93   :  { %v11307_v59 = vpop.eup %11306 }
 0xa94   :  { %8836 = vst [vmem:[%s17037_s13 + $0xf8] sm:$0xff] %v11307_v59 }
 0xa95   :  { %8841 = vsyncpa [#allocation3], 1 }
 0xa96   :  { %8842 = vsyncpa [#allocation5], 1 }
 0xa97   :  { %8843 = vsyncpa [#allocation8], 1 }
 0xa98   :  { %8844 = vsyncpa [#allocation11], 1 }
 0xa99   :  { %8845 = vsyncpa [#allocation14], 1 }

</bundles_post_ra>
